<compile_context>
chip_gen: v7x
topology: tpu7x:2x2x1
jax: 0.10.0
libtpu: 0.0.40
codegen_flags: <defaults>
</compile_context>

<pallas_src>
import functools

import jax
import jax.numpy as jnp
import numpy as np
from jax.experimental import pallas as pl
from jax.experimental.pallas import tpu as pltpu

Z_DIM = 32
BN_EPS = 1e-5
LRELU_SLOPE = 0.1


# ----------------------------------------------------------------------------
# Single fused Pallas kernel.
# ----------------------------------------------------------------------------
def encoder_fused_kernel(a_ref, wc_ref, g2_ref, b2_ref, w3_ref, g3_ref, b3_ref,
                         w4mu_ref, w4ls_ref, b4mu_ref, b4ls_ref, eps_ref,
                         out_ref, h2_ref, acc3_ref, *, batch):
    nb = batch
    m2 = a_ref.shape[0]       # 144 * nb : conv2 output positions x batch
    m3 = acc3_ref.shape[0]    # 25 * nb  : conv3 output positions x batch

    # ---- conv1 o conv2 folded into one composite 5x5 / stride-2 conv, done as
    #      a single GEMM.  bf16 operands, f32 accumulation (MXU-native).
    y2 = jnp.dot(a_ref[...], wc_ref[...], preferred_element_type=jnp.float32)

    # ---- BatchNorm2d(64), training-mode batch statistics (over N,H,W == over
    #      GEMM rows), two-pass (centered) variance, then leaky_relu(0.1).
    mean2 = jnp.sum(y2, axis=0, keepdims=True) * (1.0 / m2)
    y2c = y2 - mean2
    var2 = jnp.sum(y2c * y2c, axis=0, keepdims=True) * (1.0 / m2)
    h2 = y2c * jax.lax.rsqrt(var2 + BN_EPS) * g2_ref[...] + b2_ref[...]
    h2 = jnp.where(h2 >= 0.0, h2, LRELU_SLOPE * h2)
    # Keep the activation resident in VMEM.  Rows are ordered
    # (row_parity, col_parity, u, v, b) with conv2-output spatial position
    # (r, w) = (2u + row_parity, 2v + col_parity), so every conv3 tap below is
    # a contiguous row range of this buffer.
    h2_ref[...] = h2

    # ---- conv3 (3x3, stride 2) as 9 shifted GEMMs straight out of VMEM,
    #      accumulated in f32.  Output rows ordered (p*5 + q, b).
    for p in range(5):
        acc = jnp.zeros((5 * nb, 128), jnp.float32)
        for di in range(3):
            u = p + di // 2
            for dj in range(3):
                par_blk = (di % 2) * 2 + (dj % 2)
                start = (par_blk * 36 + u * 6 + dj // 2) * nb
                slab = h2_ref[start:start + 5 * nb, :]        # [(q, b), 64]
                acc = acc + jnp.dot(slab, w3_ref[di * 3 + dj],
                                    preferred_element_type=jnp.float32)
        acc3_ref[p * 5 * nb:(p + 1) * 5 * nb, :] = acc

    # ---- BatchNorm2d(128) + leaky_relu(0.1), f32 epilogue.
    y3 = acc3_ref[...]
    mean3 = jnp.sum(y3, axis=0, keepdims=True) * (1.0 / m3)
    y3c = y3 - mean3
    var3 = jnp.sum(y3c * y3c, axis=0, keepdims=True) * (1.0 / m3)
    h3 = y3c * jax.lax.rsqrt(var3 + BN_EPS) * g3_ref[...] + b3_ref[...]
    h3 = jnp.where(h3 >= 0.0, h3, LRELU_SLOPE * h3)
    acc3_ref[...] = h3        # reuse the scratch so the fc slices a ref

    # ---- nn4 (Linear 3200 -> 64) fused with the reparameterization.
    #      h3 rows are (s = p*5 + q, b); the fc weight was pre-permuted to
    #      [s, cin, out] and split into mu / log_sigma halves (no lane slicing).
    zmu = jnp.zeros((nb, Z_DIM), jnp.float32)
    zls = jnp.zeros((nb, Z_DIM), jnp.float32)
    for s in range(25):
        rows = acc3_ref[s * nb:(s + 1) * nb, :]               # [nb, 128]
        zmu = zmu + jnp.dot(rows, w4mu_ref[s], preferred_element_type=jnp.float32)
        zls = zls + jnp.dot(rows, w4ls_ref[s], preferred_element_type=jnp.float32)
    zmu = zmu + b4mu_ref[...]
    zls = zls + b4ls_ref[...]
    # reparameterize: mu + eps * exp(log_sigma)   (exp runs on the EUP slot)
    out_ref[...] = zmu + eps_ref[...] * jnp.exp(zls)


# ----------------------------------------------------------------------------
# One-time parameter preparation (weight folding / reordering -- hoisted out of
# the forward, as recommended).
# ----------------------------------------------------------------------------
def prepare_params(params):
    dn = ("NCHW", "OIHW", "NCHW")
    # Fold conv1 into conv2: both are bias-free and there is no nonlinearity in
    # between, so conv2(conv1(x)) == conv_{5x5, stride 2}(x) with a composite
    # weight.  Derive the composite taps by probing with 5x5 delta images
    # (exact, no manual index algebra).
    deltas = jnp.eye(25, dtype=jnp.float32).reshape(25, 1, 5, 5)
    probe = jax.lax.conv_general_dilated(deltas, params["w1"], (1, 1), "VALID",
                                         dimension_numbers=dn)
    probe = jax.lax.conv_general_dilated(probe, params["w2"], (2, 2), "VALID",
                                         dimension_numbers=dn)
    wc = probe.reshape(25, 64)                        # [u*5+v, cout]

    # conv3 weight -> per-tap GEMM weights [tap, cin, cout].
    w3t = params["w3"].transpose(2, 3, 1, 0).reshape(9, 64, 128)

    # nn4 weight: torch flattens NCHW (index = c*25 + p*5 + q); our conv3
    # output rows are (p*5 + q, b) with channels in lanes, so permute the fc
    # weight to [spatial, cin, out] once and split mu / log_sigma halves.
    w4p = params["w4"].reshape(2 * Z_DIM, 128, 5, 5).transpose(2, 3, 1, 0)
    w4p = w4p.reshape(25, 128, 2 * Z_DIM)
    b4 = params["b4"]

    return {
        "wc": wc.astype(jnp.bfloat16),
        "g2": params["g2"].reshape(1, 64).astype(jnp.float32),
        "b2": params["b2"].reshape(1, 64).astype(jnp.float32),
        "w3t": w3t.astype(jnp.float32),
        "g3": params["g3"].reshape(1, 128).astype(jnp.float32),
        "b3": params["b3"].reshape(1, 128).astype(jnp.float32),
        "w4mu": w4p[:, :, :Z_DIM].astype(jnp.float32),
        "w4ls": w4p[:, :, Z_DIM:].astype(jnp.float32),
        "b4mu": b4[:Z_DIM].reshape(1, Z_DIM).astype(jnp.float32),
        "b4ls": b4[Z_DIM:].reshape(1, Z_DIM).astype(jnp.float32),
    }


# ----------------------------------------------------------------------------
# Forward wrapper: builds the composite-conv patch matrix (input prep only) and
# calls the single fused kernel.
# ----------------------------------------------------------------------------
@jax.jit
def encoder_forward(x, prep, eps_noise):
    b = x.shape[0]
    x2d = x.reshape(b, 28, 28)                    # Cin == 1

    # 5x5 / stride-2 patches of the raw input (receptive field of the folded
    # conv1 o conv2), channels-last, rows ordered
    # (row_parity, col_parity, u, v, batch) so the in-kernel conv3 taps are
    # contiguous slices.  Feature index k = u*5 + v.
    cols = []
    for u in range(5):
        for v in range(5):
            cols.append(x2d[:, u:u + 24:2, v:v + 24:2])       # [b, 12, 12]
    a = jnp.stack(cols, axis=-1)                              # [b, 12, 12, 25]
    a = a.reshape(b, 6, 2, 6, 2, 25)                          # r=(u6,kr), w=(v6,kc)
    a = a.transpose(2, 4, 1, 3, 0, 5).reshape(144 * b, 25)
    a = a.astype(jnp.bfloat16)

    kernel = functools.partial(encoder_fused_kernel, batch=b)
    vspec = pl.BlockSpec(memory_space=pltpu.MemorySpace.VMEM)
    out = pl.pallas_call(
        kernel,
        out_shape=jax.ShapeDtypeStruct((b, Z_DIM), jnp.float32),
        in_specs=[vspec] * 12,
        out_specs=vspec,
        scratch_shapes=[
            pltpu.VMEM((144 * b, 64), jnp.float32),   # conv2 output (parity blocked)
            pltpu.VMEM((25 * b, 128), jnp.float32),   # conv3 accumulator / h3
        ],
        compiler_params=pltpu.CompilerParams(vmem_limit_bytes=32 * 1024 * 1024),
    )(a, prep["wc"], prep["g2"], prep["b2"], prep["w3t"], prep["g3"],
      prep["b3"], prep["w4mu"], prep["w4ls"], prep["b4mu"], prep["b4ls"],
      eps_noise.astype(jnp.float32))
    return out.reshape(b, Z_DIM, 1, 1)


# ----------------------------------------------------------------------------
# Pure-JAX reference (numerical sanity check, mirrors the PyTorch module in
# training mode).
# ----------------------------------------------------------------------------
def encoder_reference(x, params, eps_noise):
    dn = ("NCHW", "OIHW", "NCHW")

    def bn(y, g, bb):
        mean = y.mean(axis=(0, 2, 3), keepdims=True)
        var = y.var(axis=(0, 2, 3), keepdims=True)  # biased, like torch train BN
        return (y - mean) / jnp.sqrt(var + BN_EPS) * g.reshape(1, -1, 1, 1) \
            + bb.reshape(1, -1, 1, 1)

    def lrelu(y):
        return jnp.where(y >= 0, y, LRELU_SLOPE * y)

    y = jax.lax.conv_general_dilated(x, params["w1"], (1, 1), "VALID",
                                     dimension_numbers=dn,
                                     precision=jax.lax.Precision.HIGHEST)
    y = jax.lax.conv_general_dilated(y, params["w2"], (2, 2), "VALID",
                                     dimension_numbers=dn,
                                     precision=jax.lax.Precision.HIGHEST)
    y = lrelu(bn(y, params["g2"], params["b2"]))
    y = jax.lax.conv_general_dilated(y, params["w3"], (2, 2), "VALID",
                                     dimension_numbers=dn,
                                     precision=jax.lax.Precision.HIGHEST)
    y = lrelu(bn(y, params["g3"], params["b3"]))
    flat = y.reshape(x.shape[0], -1)
    z = jnp.dot(flat, params["w4"].T, precision=jax.lax.Precision.HIGHEST) \
        + params["b4"]
    mu, log_sigma = z[:, :Z_DIM], z[:, Z_DIM:]
    out = mu + eps_noise * jnp.exp(log_sigma)
    return out.reshape(x.shape[0], Z_DIM, 1, 1)


if __name__ == "__main__":
    key = jax.random.PRNGKey(0)
    (kx, k1, k2, k3, k4, k5, kg2, kb2, kg3, kb3, keps) = jax.random.split(key, 11)

    B = 2
    x = jax.random.normal(kx, (B, 1, 28, 28), jnp.float32)

    params = {
        "w1": jax.random.normal(k1, (32, 1, 3, 3), jnp.float32) * 0.1,
        "w2": jax.random.normal(k2, (64, 32, 3, 3), jnp.float32) * 0.05,
        "w3": jax.random.normal(k3, (128, 64, 3, 3), jnp.float32) * 0.05,
        "g2": 1.0 + 0.1 * jax.random.normal(kg2, (64,), jnp.float32),
        "b2": 0.1 * jax.random.normal(kb2, (64,), jnp.float32),
        "g3": 1.0 + 0.1 * jax.random.normal(kg3, (128,), jnp.float32),
        "b3": 0.1 * jax.random.normal(kb3, (128,), jnp.float32),
        "w4": jax.random.normal(k4, (2 * Z_DIM, 128 * 5 * 5), jnp.float32) * 0.02,
        "b4": jax.random.normal(k5, (2 * Z_DIM,), jnp.float32) * 0.01,
    }

    # torch.randn_like(std) has no deterministic Pallas equivalent -> a fixed
    # JAX normal draw is passed in as the reparameterization noise so the
    # kernel can be checked against the reference.
    eps_noise = jax.random.normal(keps, (B, Z_DIM), jnp.float32)

    prep = prepare_params(params)   # one-time weight folding / reordering

    out = encoder_forward(x, prep, eps_noise)
    out = jax.block_until_ready(out)
    assert out.shape == (B, Z_DIM, 1, 1)

    ref = jax.block_until_ready(encoder_reference(x, params, eps_noise))
    np.testing.assert_allclose(np.asarray(out), np.asarray(ref),
                               rtol=5e-2, atol=5e-2)

    print("KERNEL_OK")
</pallas_src>

<mosaic_0001>
module attributes {stable_mosaic.version = 11 : i64} {
  func.func @encoder_fused_kernel(%arg0: memref<288x25xbf16, #tpu.memory_space<vmem>>, %arg1: memref<25x64xbf16, #tpu.memory_space<vmem>>, %arg2: memref<1x64xf32, #tpu.memory_space<vmem>>, %arg3: memref<1x64xf32, #tpu.memory_space<vmem>>, %arg4: memref<9x64x128xf32, #tpu.memory_space<vmem>>, %arg5: memref<1x128xf32, #tpu.memory_space<vmem>>, %arg6: memref<1x128xf32, #tpu.memory_space<vmem>>, %arg7: memref<25x128x32xf32, #tpu.memory_space<vmem>>, %arg8: memref<25x128x32xf32, #tpu.memory_space<vmem>>, %arg9: memref<1x32xf32, #tpu.memory_space<vmem>>, %arg10: memref<1x32xf32, #tpu.memory_space<vmem>>, %arg11: memref<2x32xf32, #tpu.memory_space<vmem>>, %arg12: memref<2x32xf32, #tpu.memory_space<vmem>>, %arg13: memref<288x64xf32, #tpu.memory_space<vmem>>, %arg14: memref<50x128xf32, #tpu.memory_space<vmem>>) attributes {dimension_semantics = [], scalar_prefetch = 0 : i64, scratch_operands = 2 : i64, tpu.core_type = #tpu.core_type<tc>} {
    %c0 = arith.constant 0 : index
    %c0_0 = arith.constant 0 : index
    %0 = vector.load %arg0[%c0, %c0_0] : memref<288x25xbf16, #tpu.memory_space<vmem>>, vector<288x25xbf16>
    %c0_1 = arith.constant 0 : index
    %c0_2 = arith.constant 0 : index
    %1 = vector.load %arg1[%c0_1, %c0_2] : memref<25x64xbf16, #tpu.memory_space<vmem>>, vector<25x64xbf16>
    %cst = arith.constant dense<0.000000e+00> : vector<288x64xf32>
    %2 = tpu.matmul %0, %1, %cst {dimension_numbers = #tpu.dot_dimension_numbers<[1], [0], [0], [1], [0, 0, 1, 1], [], []>} : vector<288x25xbf16>, vector<25x64xbf16>, vector<288x64xf32> -> vector<288x64xf32>
    %cst_3 = arith.constant dense<0.000000e+00> : vector<64xf32>
    %3 = vector.multi_reduction <add>, %2, %cst_3 [0] : vector<288x64xf32> to vector<64xf32>
    %4 = vector.shape_cast %3 : vector<64xf32> to vector<1x64xf32>
    %cst_4 = arith.constant 0.00347222225 : f32
    %5 = vector.broadcast %cst_4 : f32 to vector<1x64xf32>
    %6 = arith.mulf %4, %5 : vector<1x64xf32>
    %7 = vector.broadcast %6 : vector<1x64xf32> to vector<288x64xf32>
    %8 = arith.subf %2, %7 : vector<288x64xf32>
    %9 = arith.mulf %8, %8 : vector<288x64xf32>
    %cst_5 = arith.constant dense<0.000000e+00> : vector<64xf32>
    %10 = vector.multi_reduction <add>, %9, %cst_5 [0] : vector<288x64xf32> to vector<64xf32>
    %11 = vector.shape_cast %10 : vector<64xf32> to vector<1x64xf32>
    %cst_6 = arith.constant 0.00347222225 : f32
    %12 = vector.broadcast %cst_6 : f32 to vector<1x64xf32>
    %13 = arith.mulf %11, %12 : vector<1x64xf32>
    %cst_7 = arith.constant 9.99999974E-6 : f32
    %14 = vector.broadcast %cst_7 : f32 to vector<1x64xf32>
    %15 = arith.addf %13, %14 : vector<1x64xf32>
    %16 = math.rsqrt %15 : vector<1x64xf32>
    %17 = vector.broadcast %16 : vector<1x64xf32> to vector<288x64xf32>
    %18 = arith.mulf %8, %17 : vector<288x64xf32>
    %c0_8 = arith.constant 0 : index
    %c0_9 = arith.constant 0 : index
    %19 = vector.load %arg2[%c0_8, %c0_9] : memref<1x64xf32, #tpu.memory_space<vmem>>, vector<1x64xf32>
    %20 = vector.broadcast %19 : vector<1x64xf32> to vector<288x64xf32>
    %21 = arith.mulf %18, %20 : vector<288x64xf32>
    %c0_10 = arith.constant 0 : index
    %c0_11 = arith.constant 0 : index
    %22 = vector.load %arg3[%c0_10, %c0_11] : memref<1x64xf32, #tpu.memory_space<vmem>>, vector<1x64xf32>
    %23 = vector.broadcast %22 : vector<1x64xf32> to vector<288x64xf32>
    %24 = arith.addf %21, %23 : vector<288x64xf32>
    %cst_12 = arith.constant 0.000000e+00 : f32
    %25 = vector.broadcast %cst_12 : f32 to vector<288x64xf32>
    %26 = arith.cmpf oge, %24, %25 : vector<288x64xf32>
    %cst_13 = arith.constant 1.000000e-01 : f32
    %27 = vector.broadcast %cst_13 : f32 to vector<288x64xf32>
    %28 = arith.mulf %27, %24 : vector<288x64xf32>
    %29 = arith.select %26, %24, %28 : vector<288x64xi1>, vector<288x64xf32>
    %c0_14 = arith.constant 0 : index
    %c0_15 = arith.constant 0 : index
    %30 = vector.load %arg13[%c0_14, %c0_15] : memref<288x64xf32, #tpu.memory_space<vmem>>, vector<288x64xf32>
    tpu.vector_store %arg13[%c0_14, %c0_15], %29 {strides = array<i32>} : memref<288x64xf32, #tpu.memory_space<vmem>>, vector<288x64xf32>,
    %cst_16 = arith.constant 0.000000e+00 : f32
    %31 = vector.broadcast %cst_16 : f32 to vector<10x128xf32>
    %c0_17 = arith.constant 0 : index
    %c0_18 = arith.constant 0 : index
    %32 = vector.load %arg13[%c0_17, %c0_18] : memref<288x64xf32, #tpu.memory_space<vmem>>, vector<10x64xf32>
    %c0_19 = arith.constant 0 : index
    %c0_20 = arith.constant 0 : index
    %c0_21 = arith.constant 0 : index
    %33 = vector.load %arg4[%c0_19, %c0_20, %c0_21] : memref<9x64x128xf32, #tpu.memory_space<vmem>>, vector<1x64x128xf32>
    %34 = vector.shape_cast %33 : vector<1x64x128xf32> to vector<64x128xf32>
    %cst_22 = arith.constant dense<0.000000e+00> : vector<10x128xf32>
    %35 = tpu.matmul %32, %34, %cst_22 {dimension_numbers = #tpu.dot_dimension_numbers<[1], [0], [0], [1], [0, 0, 1, 1], [], []>} : vector<10x64xf32>, vector<64x128xf32>, vector<10x128xf32> -> vector<10x128xf32>
    %36 = arith.addf %31, %35 : vector<10x128xf32>
    %c72 = arith.constant 72 : index
    %c0_23 = arith.constant 0 : index
    %37 = vector.load %arg13[%c72, %c0_23] : memref<288x64xf32, #tpu.memory_space<vmem>>, vector<10x64xf32>
    %c1 = arith.constant 1 : index
    %c0_24 = arith.constant 0 : index
    %c0_25 = arith.constant 0 : index
    %38 = vector.load %arg4[%c1, %c0_24, %c0_25] : memref<9x64x128xf32, #tpu.memory_space<vmem>>, vector<1x64x128xf32>
    %39 = vector.shape_cast %38 : vector<1x64x128xf32> to vector<64x128xf32>
    %cst_26 = arith.constant dense<0.000000e+00> : vector<10x128xf32>
    %40 = tpu.matmul %37, %39, %cst_26 {dimension_numbers = #tpu.dot_dimension_numbers<[1], [0], [0], [1], [0, 0, 1, 1], [], []>} : vector<10x64xf32>, vector<64x128xf32>, vector<10x128xf32> -> vector<10x128xf32>
    %41 = arith.addf %36, %40 : vector<10x128xf32>
    %c2 = arith.constant 2 : index
    %c0_27 = arith.constant 0 : index
    %42 = vector.load %arg13[%c2, %c0_27] : memref<288x64xf32, #tpu.memory_space<vmem>>, vector<10x64xf32>
    %c2_28 = arith.constant 2 : index
    %c0_29 = arith.constant 0 : index
    %c0_30 = arith.constant 0 : index
    %43 = vector.load %arg4[%c2_28, %c0_29, %c0_30] : memref<9x64x128xf32, #tpu.memory_space<vmem>>, vector<1x64x128xf32>
    %44 = vector.shape_cast %43 : vector<1x64x128xf32> to vector<64x128xf32>
    %cst_31 = arith.constant dense<0.000000e+00> : vector<10x128xf32>
    %45 = tpu.matmul %42, %44, %cst_31 {dimension_numbers = #tpu.dot_dimension_numbers<[1], [0], [0], [1], [0, 0, 1, 1], [], []>} : vector<10x64xf32>, vector<64x128xf32>, vector<10x128xf32> -> vector<10x128xf32>
    %46 = arith.addf %41, %45 : vector<10x128xf32>
    %c144 = arith.constant 144 : index
    %c0_32 = arith.constant 0 : index
    %47 = vector.load %arg13[%c144, %c0_32] : memref<288x64xf32, #tpu.memory_space<vmem>>, vector<10x64xf32>
    %c3 = arith.constant 3 : index
    %c0_33 = arith.constant 0 : index
    %c0_34 = arith.constant 0 : index
    %48 = vector.load %arg4[%c3, %c0_33, %c0_34] : memref<9x64x128xf32, #tpu.memory_space<vmem>>, vector<1x64x128xf32>
    %49 = vector.shape_cast %48 : vector<1x64x128xf32> to vector<64x128xf32>
    %cst_35 = arith.constant dense<0.000000e+00> : vector<10x128xf32>
    %50 = tpu.matmul %47, %49, %cst_35 {dimension_numbers = #tpu.dot_dimension_numbers<[1], [0], [0], [1], [0, 0, 1, 1], [], []>} : vector<10x64xf32>, vector<64x128xf32>, vector<10x128xf32> -> vector<10x128xf32>
    %51 = arith.addf %46, %50 : vector<10x128xf32>
    %c216 = arith.constant 216 : index
    %c0_36 = arith.constant 0 : index
    %52 = vector.load %arg13[%c216, %c0_36] : memref<288x64xf32, #tpu.memory_space<vmem>>, vector<10x64xf32>
    %c4 = arith.constant 4 : index
    %c0_37 = arith.constant 0 : index
    %c0_38 = arith.constant 0 : index
    %53 = vector.load %arg4[%c4, %c0_37, %c0_38] : memref<9x64x128xf32, #tpu.memory_space<vmem>>, vector<1x64x128xf32>
    %54 = vector.shape_cast %53 : vector<1x64x128xf32> to vector<64x128xf32>
    %cst_39 = arith.constant dense<0.000000e+00> : vector<10x128xf32>
    %55 = tpu.matmul %52, %54, %cst_39 {dimension_numbers = #tpu.dot_dimension_numbers<[1], [0], [0], [1], [0, 0, 1, 1], [], []>} : vector<10x64xf32>, vector<64x128xf32>, vector<10x128xf32> -> vector<10x128xf32>
    %56 = arith.addf %51, %55 : vector<10x128xf32>
    %c146 = arith.constant 146 : index
    %c0_40 = arith.constant 0 : index
    %57 = vector.load %arg13[%c146, %c0_40] : memref<288x64xf32, #tpu.memory_space<vmem>>, vector<10x64xf32>
    %c5 = arith.constant 5 : index
    %c0_41 = arith.constant 0 : index
    %c0_42 = arith.constant 0 : index
    %58 = vector.load %arg4[%c5, %c0_41, %c0_42] : memref<9x64x128xf32, #tpu.memory_space<vmem>>, vector<1x64x128xf32>
    %59 = vector.shape_cast %58 : vector<1x64x128xf32> to vector<64x128xf32>
    %cst_43 = arith.constant dense<0.000000e+00> : vector<10x128xf32>
    %60 = tpu.matmul %57, %59, %cst_43 {dimension_numbers = #tpu.dot_dimension_numbers<[1], [0], [0], [1], [0, 0, 1, 1], [], []>} : vector<10x64xf32>, vector<64x128xf32>, vector<10x128xf32> -> vector<10x128xf32>
    %61 = arith.addf %56, %60 : vector<10x128xf32>
    %c12 = arith.constant 12 : index
    %c0_44 = arith.constant 0 : index
    %62 = vector.load %arg13[%c12, %c0_44] : memref<288x64xf32, #tpu.memory_space<vmem>>, vector<10x64xf32>
    %c6 = arith.constant 6 : index
    %c0_45 = arith.constant 0 : index
    %c0_46 = arith.constant 0 : index
    %63 = vector.load %arg4[%c6, %c0_45, %c0_46] : memref<9x64x128xf32, #tpu.memory_space<vmem>>, vector<1x64x128xf32>
    %64 = vector.shape_cast %63 : vector<1x64x128xf32> to vector<64x128xf32>
    %cst_47 = arith.constant dense<0.000000e+00> : vector<10x128xf32>
    %65 = tpu.matmul %62, %64, %cst_47 {dimension_numbers = #tpu.dot_dimension_numbers<[1], [0], [0], [1], [0, 0, 1, 1], [], []>} : vector<10x64xf32>, vector<64x128xf32>, vector<10x128xf32> -> vector<10x128xf32>
    %66 = arith.addf %61, %65 : vector<10x128xf32>
    %c84 = arith.constant 84 : index
    %c0_48 = arith.constant 0 : index
    %67 = vector.load %arg13[%c84, %c0_48] : memref<288x64xf32, #tpu.memory_space<vmem>>, vector<10x64xf32>
    %c7 = arith.constant 7 : index
    %c0_49 = arith.constant 0 : index
    %c0_50 = arith.constant 0 : index
    %68 = vector.load %arg4[%c7, %c0_49, %c0_50] : memref<9x64x128xf32, #tpu.memory_space<vmem>>, vector<1x64x128xf32>
    %69 = vector.shape_cast %68 : vector<1x64x128xf32> to vector<64x128xf32>
    %cst_51 = arith.constant dense<0.000000e+00> : vector<10x128xf32>
    %70 = tpu.matmul %67, %69, %cst_51 {dimension_numbers = #tpu.dot_dimension_numbers<[1], [0], [0], [1], [0, 0, 1, 1], [], []>} : vector<10x64xf32>, vector<64x128xf32>, vector<10x128xf32> -> vector<10x128xf32>
    %71 = arith.addf %66, %70 : vector<10x128xf32>
    %c14 = arith.constant 14 : index
    %c0_52 = arith.constant 0 : index
    %72 = vector.load %arg13[%c14, %c0_52] : memref<288x64xf32, #tpu.memory_space<vmem>>, vector<10x64xf32>
    %c8 = arith.constant 8 : index
    %c0_53 = arith.constant 0 : index
    %c0_54 = arith.constant 0 : index
    %73 = vector.load %arg4[%c8, %c0_53, %c0_54] : memref<9x64x128xf32, #tpu.memory_space<vmem>>, vector<1x64x128xf32>
    %74 = vector.shape_cast %73 : vector<1x64x128xf32> to vector<64x128xf32>
    %cst_55 = arith.constant dense<0.000000e+00> : vector<10x128xf32>
    %75 = tpu.matmul %72, %74, %cst_55 {dimension_numbers = #tpu.dot_dimension_numbers<[1], [0], [0], [1], [0, 0, 1, 1], [], []>} : vector<10x64xf32>, vector<64x128xf32>, vector<10x128xf32> -> vector<10x128xf32>
    %76 = arith.addf %71, %75 : vector<10x128xf32>
    %c0_56 = arith.constant 0 : index
    %c0_57 = arith.constant 0 : index
    %77 = vector.load %arg14[%c0_56, %c0_57] : memref<50x128xf32, #tpu.memory_space<vmem>>, vector<10x128xf32>
    tpu.vector_store %arg14[%c0_56, %c0_57], %76 {strides = array<i32>} : memref<50x128xf32, #tpu.memory_space<vmem>>, vector<10x128xf32>,
    %cst_58 = arith.constant 0.000000e+00 : f32
    %78 = vector.broadcast %cst_58 : f32 to vector<10x128xf32>
    %c12_59 = arith.constant 12 : index
    %c0_60 = arith.constant 0 : index
    %79 = vector.load %arg13[%c12_59, %c0_60] : memref<288x64xf32, #tpu.memory_space<vmem>>, vector<10x64xf32>
    %c0_61 = arith.constant 0 : index
    %c0_62 = arith.constant 0 : index
    %c0_63 = arith.constant 0 : index
    %80 = vector.load %arg4[%c0_61, %c0_62, %c0_63] : memref<9x64x128xf32, #tpu.memory_space<vmem>>, vector<1x64x128xf32>
    %81 = vector.shape_cast %80 : vector<1x64x128xf32> to vector<64x128xf32>
    %cst_64 = arith.constant dense<0.000000e+00> : vector<10x128xf32>
    %82 = tpu.matmul %79, %81, %cst_64 {dimension_numbers = #tpu.dot_dimension_numbers<[1], [0], [0], [1], [0, 0, 1, 1], [], []>} : vector<10x64xf32>, vector<64x128xf32>, vector<10x128xf32> -> vector<10x128xf32>
    %83 = arith.addf %78, %82 : vector<10x128xf32>
    %c84_65 = arith.constant 84 : index
    %c0_66 = arith.constant 0 : index
    %84 = vector.load %arg13[%c84_65, %c0_66] : memref<288x64xf32, #tpu.memory_space<vmem>>, vector<10x64xf32>
    %c1_67 = arith.constant 1 : index
    %c0_68 = arith.constant 0 : index
    %c0_69 = arith.constant 0 : index
    %85 = vector.load %arg4[%c1_67, %c0_68, %c0_69] : memref<9x64x128xf32, #tpu.memory_space<vmem>>, vector<1x64x128xf32>
    %86 = vector.shape_cast %85 : vector<1x64x128xf32> to vector<64x128xf32>
    %cst_70 = arith.constant dense<0.000000e+00> : vector<10x128xf32>
    %87 = tpu.matmul %84, %86, %cst_70 {dimension_numbers = #tpu.dot_dimension_numbers<[1], [0], [0], [1], [0, 0, 1, 1], [], []>} : vector<10x64xf32>, vector<64x128xf32>, vector<10x128xf32> -> vector<10x128xf32>
    %88 = arith.addf %83, %87 : vector<10x128xf32>
    %c14_71 = arith.constant 14 : index
    %c0_72 = arith.constant 0 : index
    %89 = vector.load %arg13[%c14_71, %c0_72] : memref<288x64xf32, #tpu.memory_space<vmem>>, vector<10x64xf32>
    %c2_73 = arith.constant 2 : index
    %c0_74 = arith.constant 0 : index
    %c0_75 = arith.constant 0 : index
    %90 = vector.load %arg4[%c2_73, %c0_74, %c0_75] : memref<9x64x128xf32, #tpu.memory_space<vmem>>, vector<1x64x128xf32>
    %91 = vector.shape_cast %90 : vector<1x64x128xf32> to vector<64x128xf32>
    %cst_76 = arith.constant dense<0.000000e+00> : vector<10x128xf32>
    %92 = tpu.matmul %89, %91, %cst_76 {dimension_numbers = #tpu.dot_dimension_numbers<[1], [0], [0], [1], [0, 0, 1, 1], [], []>} : vector<10x64xf32>, vector<64x128xf32>, vector<10x128xf32> -> vector<10x128xf32>
    %93 = arith.addf %88, %92 : vector<10x128xf32>
    %c156 = arith.constant 156 : index
    %c0_77 = arith.constant 0 : index
    %94 = vector.load %arg13[%c156, %c0_77] : memref<288x64xf32, #tpu.memory_space<vmem>>, vector<10x64xf32>
    %c3_78 = arith.constant 3 : index
    %c0_79 = arith.constant 0 : index
    %c0_80 = arith.constant 0 : index
    %95 = vector.load %arg4[%c3_78, %c0_79, %c0_80] : memref<9x64x128xf32, #tpu.memory_space<vmem>>, vector<1x64x128xf32>
    %96 = vector.shape_cast %95 : vector<1x64x128xf32> to vector<64x128xf32>
    %cst_81 = arith.constant dense<0.000000e+00> : vector<10x128xf32>
    %97 = tpu.matmul %94, %96, %cst_81 {dimension_numbers = #tpu.dot_dimension_numbers<[1], [0], [0], [1], [0, 0, 1, 1], [], []>} : vector<10x64xf32>, vector<64x128xf32>, vector<10x128xf32> -> vector<10x128xf32>
    %98 = arith.addf %93, %97 : vector<10x128xf32>
    %c228 = arith.constant 228 : index
    %c0_82 = arith.constant 0 : index
    %99 = vector.load %arg13[%c228, %c0_82] : memref<288x64xf32, #tpu.memory_space<vmem>>, vector<10x64xf32>
    %c4_83 = arith.constant 4 : index
    %c0_84 = arith.constant 0 : index
    %c0_85 = arith.constant 0 : index
    %100 = vector.load %arg4[%c4_83, %c0_84, %c0_85] : memref<9x64x128xf32, #tpu.memory_space<vmem>>, vector<1x64x128xf32>
    %101 = vector.shape_cast %100 : vector<1x64x128xf32> to vector<64x128xf32>
    %cst_86 = arith.constant dense<0.000000e+00> : vector<10x128xf32>
    %102 = tpu.matmul %99, %101, %cst_86 {dimension_numbers = #tpu.dot_dimension_numbers<[1], [0], [0], [1], [0, 0, 1, 1], [], []>} : vector<10x64xf32>, vector<64x128xf32>, vector<10x128xf32> -> vector<10x128xf32>
    %103 = arith.addf %98, %102 : vector<10x128xf32>
    %c158 = arith.constant 158 : index
    %c0_87 = arith.constant 0 : index
    %104 = vector.load %arg13[%c158, %c0_87] : memref<288x64xf32, #tpu.memory_space<vmem>>, vector<10x64xf32>
    %c5_88 = arith.constant 5 : index
    %c0_89 = arith.constant 0 : index
    %c0_90 = arith.constant 0 : index
    %105 = vector.load %arg4[%c5_88, %c0_89, %c0_90] : memref<9x64x128xf32, #tpu.memory_space<vmem>>, vector<1x64x128xf32>
    %106 = vector.shape_cast %105 : vector<1x64x128xf32> to vector<64x128xf32>
    %cst_91 = arith.constant dense<0.000000e+00> : vector<10x128xf32>
    %107 = tpu.matmul %104, %106, %cst_91 {dimension_numbers = #tpu.dot_dimension_numbers<[1], [0], [0], [1], [0, 0, 1, 1], [], []>} : vector<10x64xf32>, vector<64x128xf32>, vector<10x128xf32> -> vector<10x128xf32>
    %108 = arith.addf %103, %107 : vector<10x128xf32>
    %c24 = arith.constant 24 : index
    %c0_92 = arith.constant 0 : index
    %109 = vector.load %arg13[%c24, %c0_92] : memref<288x64xf32, #tpu.memory_space<vmem>>, vector<10x64xf32>
    %c6_93 = arith.constant 6 : index
    %c0_94 = arith.constant 0 : index
    %c0_95 = arith.constant 0 : index
    %110 = vector.load %arg4[%c6_93, %c0_94, %c0_95] : memref<9x64x128xf32, #tpu.memory_space<vmem>>, vector<1x64x128xf32>
    %111 = vector.shape_cast %110 : vector<1x64x128xf32> to vector<64x128xf32>
    %cst_96 = arith.constant dense<0.000000e+00> : vector<10x128xf32>
    %112 = tpu.matmul %109, %111, %cst_96 {dimension_numbers = #tpu.dot_dimension_numbers<[1], [0], [0], [1], [0, 0, 1, 1], [], []>} : vector<10x64xf32>, vector<64x128xf32>, vector<10x128xf32> -> vector<10x128xf32>
    %113 = arith.addf %108, %112 : vector<10x128xf32>
    %c96 = arith.constant 96 : index
    %c0_97 = arith.constant 0 : index
    %114 = vector.load %arg13[%c96, %c0_97] : memref<288x64xf32, #tpu.memory_space<vmem>>, vector<10x64xf32>
    %c7_98 = arith.constant 7 : index
    %c0_99 = arith.constant 0 : index
    %c0_100 = arith.constant 0 : index
    %115 = vector.load %arg4[%c7_98, %c0_99, %c0_100] : memref<9x64x128xf32, #tpu.memory_space<vmem>>, vector<1x64x128xf32>
    %116 = vector.shape_cast %115 : vector<1x64x128xf32> to vector<64x128xf32>
    %cst_101 = arith.constant dense<0.000000e+00> : vector<10x128xf32>
    %117 = tpu.matmul %114, %116, %cst_101 {dimension_numbers = #tpu.dot_dimension_numbers<[1], [0], [0], [1], [0, 0, 1, 1], [], []>} : vector<10x64xf32>, vector<64x128xf32>, vector<10x128xf32> -> vector<10x128xf32>
    %118 = arith.addf %113, %117 : vector<10x128xf32>
    %c26 = arith.constant 26 : index
    %c0_102 = arith.constant 0 : index
    %119 = vector.load %arg13[%c26, %c0_102] : memref<288x64xf32, #tpu.memory_space<vmem>>, vector<10x64xf32>
    %c8_103 = arith.constant 8 : index
    %c0_104 = arith.constant 0 : index
    %c0_105 = arith.constant 0 : index
    %120 = vector.load %arg4[%c8_103, %c0_104, %c0_105] : memref<9x64x128xf32, #tpu.memory_space<vmem>>, vector<1x64x128xf32>
    %121 = vector.shape_cast %120 : vector<1x64x128xf32> to vector<64x128xf32>
    %cst_106 = arith.constant dense<0.000000e+00> : vector<10x128xf32>
    %122 = tpu.matmul %119, %121, %cst_106 {dimension_numbers = #tpu.dot_dimension_numbers<[1], [0], [0], [1], [0, 0, 1, 1], [], []>} : vector<10x64xf32>, vector<64x128xf32>, vector<10x128xf32> -> vector<10x128xf32>
    %123 = arith.addf %118, %122 : vector<10x128xf32>
    %c10 = arith.constant 10 : index
    %c0_107 = arith.constant 0 : index
    %124 = vector.load %arg14[%c10, %c0_107] : memref<50x128xf32, #tpu.memory_space<vmem>>, vector<10x128xf32>
    tpu.vector_store %arg14[%c10, %c0_107], %123 {strides = array<i32>} : memref<50x128xf32, #tpu.memory_space<vmem>>, vector<10x128xf32>,
    %cst_108 = arith.constant 0.000000e+00 : f32
    %125 = vector.broadcast %cst_108 : f32 to vector<10x128xf32>
    %c24_109 = arith.constant 24 : index
    %c0_110 = arith.constant 0 : index
    %126 = vector.load %arg13[%c24_109, %c0_110] : memref<288x64xf32, #tpu.memory_space<vmem>>, vector<10x64xf32>
    %c0_111 = arith.constant 0 : index
    %c0_112 = arith.constant 0 : index
    %c0_113 = arith.constant 0 : index
    %127 = vector.load %arg4[%c0_111, %c0_112, %c0_113] : memref<9x64x128xf32, #tpu.memory_space<vmem>>, vector<1x64x128xf32>
    %128 = vector.shape_cast %127 : vector<1x64x128xf32> to vector<64x128xf32>
    %cst_114 = arith.constant dense<0.000000e+00> : vector<10x128xf32>
    %129 = tpu.matmul %126, %128, %cst_114 {dimension_numbers = #tpu.dot_dimension_numbers<[1], [0], [0], [1], [0, 0, 1, 1], [], []>} : vector<10x64xf32>, vector<64x128xf32>, vector<10x128xf32> -> vector<10x128xf32>
    %130 = arith.addf %125, %129 : vector<10x128xf32>
    %c96_115 = arith.constant 96 : index
    %c0_116 = arith.constant 0 : index
    %131 = vector.load %arg13[%c96_115, %c0_116] : memref<288x64xf32, #tpu.memory_space<vmem>>, vector<10x64xf32>
    %c1_117 = arith.constant 1 : index
    %c0_118 = arith.constant 0 : index
    %c0_119 = arith.constant 0 : index
    %132 = vector.load %arg4[%c1_117, %c0_118, %c0_119] : memref<9x64x128xf32, #tpu.memory_space<vmem>>, vector<1x64x128xf32>
    %133 = vector.shape_cast %132 : vector<1x64x128xf32> to vector<64x128xf32>
    %cst_120 = arith.constant dense<0.000000e+00> : vector<10x128xf32>
    %134 = tpu.matmul %131, %133, %cst_120 {dimension_numbers = #tpu.dot_dimension_numbers<[1], [0], [0], [1], [0, 0, 1, 1], [], []>} : vector<10x64xf32>, vector<64x128xf32>, vector<10x128xf32> -> vector<10x128xf32>
    %135 = arith.addf %130, %134 : vector<10x128xf32>
    %c26_121 = arith.constant 26 : index
    %c0_122 = arith.constant 0 : index
    %136 = vector.load %arg13[%c26_121, %c0_122] : memref<288x64xf32, #tpu.memory_space<vmem>>, vector<10x64xf32>
    %c2_123 = arith.constant 2 : index
    %c0_124 = arith.constant 0 : index
    %c0_125 = arith.constant 0 : index
    %137 = vector.load %arg4[%c2_123, %c0_124, %c0_125] : memref<9x64x128xf32, #tpu.memory_space<vmem>>, vector<1x64x128xf32>
    %138 = vector.shape_cast %137 : vector<1x64x128xf32> to vector<64x128xf32>
    %cst_126 = arith.constant dense<0.000000e+00> : vector<10x128xf32>
    %139 = tpu.matmul %136, %138, %cst_126 {dimension_numbers = #tpu.dot_dimension_numbers<[1], [0], [0], [1], [0, 0, 1, 1], [], []>} : vector<10x64xf32>, vector<64x128xf32>, vector<10x128xf32> -> vector<10x128xf32>
    %140 = arith.addf %135, %139 : vector<10x128xf32>
    %c168 = arith.constant 168 : index
    %c0_127 = arith.constant 0 : index
    %141 = vector.load %arg13[%c168, %c0_127] : memref<288x64xf32, #tpu.memory_space<vmem>>, vector<10x64xf32>
    %c3_128 = arith.constant 3 : index
    %c0_129 = arith.constant 0 : index
    %c0_130 = arith.constant 0 : index
    %142 = vector.load %arg4[%c3_128, %c0_129, %c0_130] : memref<9x64x128xf32, #tpu.memory_space<vmem>>, vector<1x64x128xf32>
    %143 = vector.shape_cast %142 : vector<1x64x128xf32> to vector<64x128xf32>
    %cst_131 = arith.constant dense<0.000000e+00> : vector<10x128xf32>
    %144 = tpu.matmul %141, %143, %cst_131 {dimension_numbers = #tpu.dot_dimension_numbers<[1], [0], [0], [1], [0, 0, 1, 1], [], []>} : vector<10x64xf32>, vector<64x128xf32>, vector<10x128xf32> -> vector<10x128xf32>
    %145 = arith.addf %140, %144 : vector<10x128xf32>
    %c240 = arith.constant 240 : index
    %c0_132 = arith.constant 0 : index
    %146 = vector.load %arg13[%c240, %c0_132] : memref<288x64xf32, #tpu.memory_space<vmem>>, vector<10x64xf32>
    %c4_133 = arith.constant 4 : index
    %c0_134 = arith.constant 0 : index
    %c0_135 = arith.constant 0 : index
    %147 = vector.load %arg4[%c4_133, %c0_134, %c0_135] : memref<9x64x128xf32, #tpu.memory_space<vmem>>, vector<1x64x128xf32>
    %148 = vector.shape_cast %147 : vector<1x64x128xf32> to vector<64x128xf32>
    %cst_136 = arith.constant dense<0.000000e+00> : vector<10x128xf32>
    %149 = tpu.matmul %146, %148, %cst_136 {dimension_numbers = #tpu.dot_dimension_numbers<[1], [0], [0], [1], [0, 0, 1, 1], [], []>} : vector<10x64xf32>, vector<64x128xf32>, vector<10x128xf32> -> vector<10x128xf32>
    %150 = arith.addf %145, %149 : vector<10x128xf32>
    %c170 = arith.constant 170 : index
    %c0_137 = arith.constant 0 : index
    %151 = vector.load %arg13[%c170, %c0_137] : memref<288x64xf32, #tpu.memory_space<vmem>>, vector<10x64xf32>
    %c5_138 = arith.constant 5 : index
    %c0_139 = arith.constant 0 : index
    %c0_140 = arith.constant 0 : index
    %152 = vector.load %arg4[%c5_138, %c0_139, %c0_140] : memref<9x64x128xf32, #tpu.memory_space<vmem>>, vector<1x64x128xf32>
    %153 = vector.shape_cast %152 : vector<1x64x128xf32> to vector<64x128xf32>
    %cst_141 = arith.constant dense<0.000000e+00> : vector<10x128xf32>
    %154 = tpu.matmul %151, %153, %cst_141 {dimension_numbers = #tpu.dot_dimension_numbers<[1], [0], [0], [1], [0, 0, 1, 1], [], []>} : vector<10x64xf32>, vector<64x128xf32>, vector<10x128xf32> -> vector<10x128xf32>
    %155 = arith.addf %150, %154 : vector<10x128xf32>
    %c36 = arith.constant 36 : index
    %c0_142 = arith.constant 0 : index
    %156 = vector.load %arg13[%c36, %c0_142] : memref<288x64xf32, #tpu.memory_space<vmem>>, vector<10x64xf32>
    %c6_143 = arith.constant 6 : index
    %c0_144 = arith.constant 0 : index
    %c0_145 = arith.constant 0 : index
    %157 = vector.load %arg4[%c6_143, %c0_144, %c0_145] : memref<9x64x128xf32, #tpu.memory_space<vmem>>, vector<1x64x128xf32>
    %158 = vector.shape_cast %157 : vector<1x64x128xf32> to vector<64x128xf32>
    %cst_146 = arith.constant dense<0.000000e+00> : vector<10x128xf32>
    %159 = tpu.matmul %156, %158, %cst_146 {dimension_numbers = #tpu.dot_dimension_numbers<[1], [0], [0], [1], [0, 0, 1, 1], [], []>} : vector<10x64xf32>, vector<64x128xf32>, vector<10x128xf32> -> vector<10x128xf32>
    %160 = arith.addf %155, %159 : vector<10x128xf32>
    %c108 = arith.constant 108 : index
    %c0_147 = arith.constant 0 : index
    %161 = vector.load %arg13[%c108, %c0_147] : memref<288x64xf32, #tpu.memory_space<vmem>>, vector<10x64xf32>
    %c7_148 = arith.constant 7 : index
    %c0_149 = arith.constant 0 : index
    %c0_150 = arith.constant 0 : index
    %162 = vector.load %arg4[%c7_148, %c0_149, %c0_150] : memref<9x64x128xf32, #tpu.memory_space<vmem>>, vector<1x64x128xf32>
    %163 = vector.shape_cast %162 : vector<1x64x128xf32> to vector<64x128xf32>
    %cst_151 = arith.constant dense<0.000000e+00> : vector<10x128xf32>
    %164 = tpu.matmul %161, %163, %cst_151 {dimension_numbers = #tpu.dot_dimension_numbers<[1], [0], [0], [1], [0, 0, 1, 1], [], []>} : vector<10x64xf32>, vector<64x128xf32>, vector<10x128xf32> -> vector<10x128xf32>
    %165 = arith.addf %160, %164 : vector<10x128xf32>
    %c38 = arith.constant 38 : index
    %c0_152 = arith.constant 0 : index
    %166 = vector.load %arg13[%c38, %c0_152] : memref<288x64xf32, #tpu.memory_space<vmem>>, vector<10x64xf32>
    %c8_153 = arith.constant 8 : index
    %c0_154 = arith.constant 0 : index
    %c0_155 = arith.constant 0 : index
    %167 = vector.load %arg4[%c8_153, %c0_154, %c0_155] : memref<9x64x128xf32, #tpu.memory_space<vmem>>, vector<1x64x128xf32>
    %168 = vector.shape_cast %167 : vector<1x64x128xf32> to vector<64x128xf32>
    %cst_156 = arith.constant dense<0.000000e+00> : vector<10x128xf32>
    %169 = tpu.matmul %166, %168, %cst_156 {dimension_numbers = #tpu.dot_dimension_numbers<[1], [0], [0], [1], [0, 0, 1, 1], [], []>} : vector<10x64xf32>, vector<64x128xf32>, vector<10x128xf32> -> vector<10x128xf32>
    %170 = arith.addf %165, %169 : vector<10x128xf32>
    %c20 = arith.constant 20 : index
    %c0_157 = arith.constant 0 : index
    %171 = vector.load %arg14[%c20, %c0_157] : memref<50x128xf32, #tpu.memory_space<vmem>>, vector<10x128xf32>
    tpu.vector_store %arg14[%c20, %c0_157], %170 {strides = array<i32>} : memref<50x128xf32, #tpu.memory_space<vmem>>, vector<10x128xf32>,
    %cst_158 = arith.constant 0.000000e+00 : f32
    %172 = vector.broadcast %cst_158 : f32 to vector<10x128xf32>
    %c36_159 = arith.constant 36 : index
    %c0_160 = arith.constant 0 : index
    %173 = vector.load %arg13[%c36_159, %c0_160] : memref<288x64xf32, #tpu.memory_space<vmem>>, vector<10x64xf32>
    %c0_161 = arith.constant 0 : index
    %c0_162 = arith.constant 0 : index
    %c0_163 = arith.constant 0 : index
    %174 = vector.load %arg4[%c0_161, %c0_162, %c0_163] : memref<9x64x128xf32, #tpu.memory_space<vmem>>, vector<1x64x128xf32>
    %175 = vector.shape_cast %174 : vector<1x64x128xf32> to vector<64x128xf32>
    %cst_164 = arith.constant dense<0.000000e+00> : vector<10x128xf32>
    %176 = tpu.matmul %173, %175, %cst_164 {dimension_numbers = #tpu.dot_dimension_numbers<[1], [0], [0], [1], [0, 0, 1, 1], [], []>} : vector<10x64xf32>, vector<64x128xf32>, vector<10x128xf32> -> vector<10x128xf32>
    %177 = arith.addf %172, %176 : vector<10x128xf32>
    %c108_165 = arith.constant 108 : index
    %c0_166 = arith.constant 0 : index
    %178 = vector.load %arg13[%c108_165, %c0_166] : memref<288x64xf32, #tpu.memory_space<vmem>>, vector<10x64xf32>
    %c1_167 = arith.constant 1 : index
    %c0_168 = arith.constant 0 : index
    %c0_169 = arith.constant 0 : index
    %179 = vector.load %arg4[%c1_167, %c0_168, %c0_169] : memref<9x64x128xf32, #tpu.memory_space<vmem>>, vector<1x64x128xf32>
    %180 = vector.shape_cast %179 : vector<1x64x128xf32> to vector<64x128xf32>
    %cst_170 = arith.constant dense<0.000000e+00> : vector<10x128xf32>
    %181 = tpu.matmul %178, %180, %cst_170 {dimension_numbers = #tpu.dot_dimension_numbers<[1], [0], [0], [1], [0, 0, 1, 1], [], []>} : vector<10x64xf32>, vector<64x128xf32>, vector<10x128xf32> -> vector<10x128xf32>
    %182 = arith.addf %177, %181 : vector<10x128xf32>
    %c38_171 = arith.constant 38 : index
    %c0_172 = arith.constant 0 : index
    %183 = vector.load %arg13[%c38_171, %c0_172] : memref<288x64xf32, #tpu.memory_space<vmem>>, vector<10x64xf32>
    %c2_173 = arith.constant 2 : index
    %c0_174 = arith.constant 0 : index
    %c0_175 = arith.constant 0 : index
    %184 = vector.load %arg4[%c2_173, %c0_174, %c0_175] : memref<9x64x128xf32, #tpu.memory_space<vmem>>, vector<1x64x128xf32>
    %185 = vector.shape_cast %184 : vector<1x64x128xf32> to vector<64x128xf32>
    %cst_176 = arith.constant dense<0.000000e+00> : vector<10x128xf32>
    %186 = tpu.matmul %183, %185, %cst_176 {dimension_numbers = #tpu.dot_dimension_numbers<[1], [0], [0], [1], [0, 0, 1, 1], [], []>} : vector<10x64xf32>, vector<64x128xf32>, vector<10x128xf32> -> vector<10x128xf32>
    %187 = arith.addf %182, %186 : vector<10x128xf32>
    %c180 = arith.constant 180 : index
    %c0_177 = arith.constant 0 : index
    %188 = vector.load %arg13[%c180, %c0_177] : memref<288x64xf32, #tpu.memory_space<vmem>>, vector<10x64xf32>
    %c3_178 = arith.constant 3 : index
    %c0_179 = arith.constant 0 : index
    %c0_180 = arith.constant 0 : index
    %189 = vector.load %arg4[%c3_178, %c0_179, %c0_180] : memref<9x64x128xf32, #tpu.memory_space<vmem>>, vector<1x64x128xf32>
    %190 = vector.shape_cast %189 : vector<1x64x128xf32> to vector<64x128xf32>
    %cst_181 = arith.constant dense<0.000000e+00> : vector<10x128xf32>
    %191 = tpu.matmul %188, %190, %cst_181 {dimension_numbers = #tpu.dot_dimension_numbers<[1], [0], [0], [1], [0, 0, 1, 1], [], []>} : vector<10x64xf32>, vector<64x128xf32>, vector<10x128xf32> -> vector<10x128xf32>
    %192 = arith.addf %187, %191 : vector<10x128xf32>
    %c252 = arith.constant 252 : index
    %c0_182 = arith.constant 0 : index
    %193 = vector.load %arg13[%c252, %c0_182] : memref<288x64xf32, #tpu.memory_space<vmem>>, vector<10x64xf32>
    %c4_183 = arith.constant 4 : index
    %c0_184 = arith.constant 0 : index
    %c0_185 = arith.constant 0 : index
    %194 = vector.load %arg4[%c4_183, %c0_184, %c0_185] : memref<9x64x128xf32, #tpu.memory_space<vmem>>, vector<1x64x128xf32>
    %195 = vector.shape_cast %194 : vector<1x64x128xf32> to vector<64x128xf32>
    %cst_186 = arith.constant dense<0.000000e+00> : vector<10x128xf32>
    %196 = tpu.matmul %193, %195, %cst_186 {dimension_numbers = #tpu.dot_dimension_numbers<[1], [0], [0], [1], [0, 0, 1, 1], [], []>} : vector<10x64xf32>, vector<64x128xf32>, vector<10x128xf32> -> vector<10x128xf32>
    %197 = arith.addf %192, %196 : vector<10x128xf32>
    %c182 = arith.constant 182 : index
    %c0_187 = arith.constant 0 : index
    %198 = vector.load %arg13[%c182, %c0_187] : memref<288x64xf32, #tpu.memory_space<vmem>>, vector<10x64xf32>
    %c5_188 = arith.constant 5 : index
    %c0_189 = arith.constant 0 : index
    %c0_190 = arith.constant 0 : index
    %199 = vector.load %arg4[%c5_188, %c0_189, %c0_190] : memref<9x64x128xf32, #tpu.memory_space<vmem>>, vector<1x64x128xf32>
    %200 = vector.shape_cast %199 : vector<1x64x128xf32> to vector<64x128xf32>
    %cst_191 = arith.constant dense<0.000000e+00> : vector<10x128xf32>
    %201 = tpu.matmul %198, %200, %cst_191 {dimension_numbers = #tpu.dot_dimension_numbers<[1], [0], [0], [1], [0, 0, 1, 1], [], []>} : vector<10x64xf32>, vector<64x128xf32>, vector<10x128xf32> -> vector<10x128xf32>
    %202 = arith.addf %197, %201 : vector<10x128xf32>
    %c48 = arith.constant 48 : index
    %c0_192 = arith.constant 0 : index
    %203 = vector.load %arg13[%c48, %c0_192] : memref<288x64xf32, #tpu.memory_space<vmem>>, vector<10x64xf32>
    %c6_193 = arith.constant 6 : index
    %c0_194 = arith.constant 0 : index
    %c0_195 = arith.constant 0 : index
    %204 = vector.load %arg4[%c6_193, %c0_194, %c0_195] : memref<9x64x128xf32, #tpu.memory_space<vmem>>, vector<1x64x128xf32>
    %205 = vector.shape_cast %204 : vector<1x64x128xf32> to vector<64x128xf32>
    %cst_196 = arith.constant dense<0.000000e+00> : vector<10x128xf32>
    %206 = tpu.matmul %203, %205, %cst_196 {dimension_numbers = #tpu.dot_dimension_numbers<[1], [0], [0], [1], [0, 0, 1, 1], [], []>} : vector<10x64xf32>, vector<64x128xf32>, vector<10x128xf32> -> vector<10x128xf32>
    %207 = arith.addf %202, %206 : vector<10x128xf32>
    %c120 = arith.constant 120 : index
    %c0_197 = arith.constant 0 : index
    %208 = vector.load %arg13[%c120, %c0_197] : memref<288x64xf32, #tpu.memory_space<vmem>>, vector<10x64xf32>
    %c7_198 = arith.constant 7 : index
    %c0_199 = arith.constant 0 : index
    %c0_200 = arith.constant 0 : index
    %209 = vector.load %arg4[%c7_198, %c0_199, %c0_200] : memref<9x64x128xf32, #tpu.memory_space<vmem>>, vector<1x64x128xf32>
    %210 = vector.shape_cast %209 : vector<1x64x128xf32> to vector<64x128xf32>
    %cst_201 = arith.constant dense<0.000000e+00> : vector<10x128xf32>
    %211 = tpu.matmul %208, %210, %cst_201 {dimension_numbers = #tpu.dot_dimension_numbers<[1], [0], [0], [1], [0, 0, 1, 1], [], []>} : vector<10x64xf32>, vector<64x128xf32>, vector<10x128xf32> -> vector<10x128xf32>
    %212 = arith.addf %207, %211 : vector<10x128xf32>
    %c50 = arith.constant 50 : index
    %c0_202 = arith.constant 0 : index
    %213 = vector.load %arg13[%c50, %c0_202] : memref<288x64xf32, #tpu.memory_space<vmem>>, vector<10x64xf32>
    %c8_203 = arith.constant 8 : index
    %c0_204 = arith.constant 0 : index
    %c0_205 = arith.constant 0 : index
    %214 = vector.load %arg4[%c8_203, %c0_204, %c0_205] : memref<9x64x128xf32, #tpu.memory_space<vmem>>, vector<1x64x128xf32>
    %215 = vector.shape_cast %214 : vector<1x64x128xf32> to vector<64x128xf32>
    %cst_206 = arith.constant dense<0.000000e+00> : vector<10x128xf32>
    %216 = tpu.matmul %213, %215, %cst_206 {dimension_numbers = #tpu.dot_dimension_numbers<[1], [0], [0], [1], [0, 0, 1, 1], [], []>} : vector<10x64xf32>, vector<64x128xf32>, vector<10x128xf32> -> vector<10x128xf32>
    %217 = arith.addf %212, %216 : vector<10x128xf32>
    %c30 = arith.constant 30 : index
    %c0_207 = arith.constant 0 : index
    %218 = vector.load %arg14[%c30, %c0_207] : memref<50x128xf32, #tpu.memory_space<vmem>>, vector<10x128xf32>
    tpu.vector_store %arg14[%c30, %c0_207], %217 {strides = array<i32>} : memref<50x128xf32, #tpu.memory_space<vmem>>, vector<10x128xf32>,
    %cst_208 = arith.constant 0.000000e+00 : f32
    %219 = vector.broadcast %cst_208 : f32 to vector<10x128xf32>
    %c48_209 = arith.constant 48 : index
    %c0_210 = arith.constant 0 : index
    %220 = vector.load %arg13[%c48_209, %c0_210] : memref<288x64xf32, #tpu.memory_space<vmem>>, vector<10x64xf32>
    %c0_211 = arith.constant 0 : index
    %c0_212 = arith.constant 0 : index
    %c0_213 = arith.constant 0 : index
    %221 = vector.load %arg4[%c0_211, %c0_212, %c0_213] : memref<9x64x128xf32, #tpu.memory_space<vmem>>, vector<1x64x128xf32>
    %222 = vector.shape_cast %221 : vector<1x64x128xf32> to vector<64x128xf32>
    %cst_214 = arith.constant dense<0.000000e+00> : vector<10x128xf32>
    %223 = tpu.matmul %220, %222, %cst_214 {dimension_numbers = #tpu.dot_dimension_numbers<[1], [0], [0], [1], [0, 0, 1, 1], [], []>} : vector<10x64xf32>, vector<64x128xf32>, vector<10x128xf32> -> vector<10x128xf32>
    %224 = arith.addf %219, %223 : vector<10x128xf32>
    %c120_215 = arith.constant 120 : index
    %c0_216 = arith.constant 0 : index
    %225 = vector.load %arg13[%c120_215, %c0_216] : memref<288x64xf32, #tpu.memory_space<vmem>>, vector<10x64xf32>
    %c1_217 = arith.constant 1 : index
    %c0_218 = arith.constant 0 : index
    %c0_219 = arith.constant 0 : index
    %226 = vector.load %arg4[%c1_217, %c0_218, %c0_219] : memref<9x64x128xf32, #tpu.memory_space<vmem>>, vector<1x64x128xf32>
    %227 = vector.shape_cast %226 : vector<1x64x128xf32> to vector<64x128xf32>
    %cst_220 = arith.constant dense<0.000000e+00> : vector<10x128xf32>
    %228 = tpu.matmul %225, %227, %cst_220 {dimension_numbers = #tpu.dot_dimension_numbers<[1], [0], [0], [1], [0, 0, 1, 1], [], []>} : vector<10x64xf32>, vector<64x128xf32>, vector<10x128xf32> -> vector<10x128xf32>
    %229 = arith.addf %224, %228 : vector<10x128xf32>
    %c50_221 = arith.constant 50 : index
    %c0_222 = arith.constant 0 : index
    %230 = vector.load %arg13[%c50_221, %c0_222] : memref<288x64xf32, #tpu.memory_space<vmem>>, vector<10x64xf32>
    %c2_223 = arith.constant 2 : index
    %c0_224 = arith.constant 0 : index
    %c0_225 = arith.constant 0 : index
    %231 = vector.load %arg4[%c2_223, %c0_224, %c0_225] : memref<9x64x128xf32, #tpu.memory_space<vmem>>, vector<1x64x128xf32>
    %232 = vector.shape_cast %231 : vector<1x64x128xf32> to vector<64x128xf32>
    %cst_226 = arith.constant dense<0.000000e+00> : vector<10x128xf32>
    %233 = tpu.matmul %230, %232, %cst_226 {dimension_numbers = #tpu.dot_dimension_numbers<[1], [0], [0], [1], [0, 0, 1, 1], [], []>} : vector<10x64xf32>, vector<64x128xf32>, vector<10x128xf32> -> vector<10x128xf32>
    %234 = arith.addf %229, %233 : vector<10x128xf32>
    %c192 = arith.constant 192 : index
    %c0_227 = arith.constant 0 : index
    %235 = vector.load %arg13[%c192, %c0_227] : memref<288x64xf32, #tpu.memory_space<vmem>>, vector<10x64xf32>
    %c3_228 = arith.constant 3 : index
    %c0_229 = arith.constant 0 : index
    %c0_230 = arith.constant 0 : index
    %236 = vector.load %arg4[%c3_228, %c0_229, %c0_230] : memref<9x64x128xf32, #tpu.memory_space<vmem>>, vector<1x64x128xf32>
    %237 = vector.shape_cast %236 : vector<1x64x128xf32> to vector<64x128xf32>
    %cst_231 = arith.constant dense<0.000000e+00> : vector<10x128xf32>
    %238 = tpu.matmul %235, %237, %cst_231 {dimension_numbers = #tpu.dot_dimension_numbers<[1], [0], [0], [1], [0, 0, 1, 1], [], []>} : vector<10x64xf32>, vector<64x128xf32>, vector<10x128xf32> -> vector<10x128xf32>
    %239 = arith.addf %234, %238 : vector<10x128xf32>
    %c264 = arith.constant 264 : index
    %c0_232 = arith.constant 0 : index
    %240 = vector.load %arg13[%c264, %c0_232] : memref<288x64xf32, #tpu.memory_space<vmem>>, vector<10x64xf32>
    %c4_233 = arith.constant 4 : index
    %c0_234 = arith.constant 0 : index
    %c0_235 = arith.constant 0 : index
    %241 = vector.load %arg4[%c4_233, %c0_234, %c0_235] : memref<9x64x128xf32, #tpu.memory_space<vmem>>, vector<1x64x128xf32>
    %242 = vector.shape_cast %241 : vector<1x64x128xf32> to vector<64x128xf32>
    %cst_236 = arith.constant dense<0.000000e+00> : vector<10x128xf32>
    %243 = tpu.matmul %240, %242, %cst_236 {dimension_numbers = #tpu.dot_dimension_numbers<[1], [0], [0], [1], [0, 0, 1, 1], [], []>} : vector<10x64xf32>, vector<64x128xf32>, vector<10x128xf32> -> vector<10x128xf32>
    %244 = arith.addf %239, %243 : vector<10x128xf32>
    %c194 = arith.constant 194 : index
    %c0_237 = arith.constant 0 : index
    %245 = vector.load %arg13[%c194, %c0_237] : memref<288x64xf32, #tpu.memory_space<vmem>>, vector<10x64xf32>
    %c5_238 = arith.constant 5 : index
    %c0_239 = arith.constant 0 : index
    %c0_240 = arith.constant 0 : index
    %246 = vector.load %arg4[%c5_238, %c0_239, %c0_240] : memref<9x64x128xf32, #tpu.memory_space<vmem>>, vector<1x64x128xf32>
    %247 = vector.shape_cast %246 : vector<1x64x128xf32> to vector<64x128xf32>
    %cst_241 = arith.constant dense<0.000000e+00> : vector<10x128xf32>
    %248 = tpu.matmul %245, %247, %cst_241 {dimension_numbers = #tpu.dot_dimension_numbers<[1], [0], [0], [1], [0, 0, 1, 1], [], []>} : vector<10x64xf32>, vector<64x128xf32>, vector<10x128xf32> -> vector<10x128xf32>
    %249 = arith.addf %244, %248 : vector<10x128xf32>
    %c60 = arith.constant 60 : index
    %c0_242 = arith.constant 0 : index
    %250 = vector.load %arg13[%c60, %c0_242] : memref<288x64xf32, #tpu.memory_space<vmem>>, vector<10x64xf32>
    %c6_243 = arith.constant 6 : index
    %c0_244 = arith.constant 0 : index
    %c0_245 = arith.constant 0 : index
    %251 = vector.load %arg4[%c6_243, %c0_244, %c0_245] : memref<9x64x128xf32, #tpu.memory_space<vmem>>, vector<1x64x128xf32>
    %252 = vector.shape_cast %251 : vector<1x64x128xf32> to vector<64x128xf32>
    %cst_246 = arith.constant dense<0.000000e+00> : vector<10x128xf32>
    %253 = tpu.matmul %250, %252, %cst_246 {dimension_numbers = #tpu.dot_dimension_numbers<[1], [0], [0], [1], [0, 0, 1, 1], [], []>} : vector<10x64xf32>, vector<64x128xf32>, vector<10x128xf32> -> vector<10x128xf32>
    %254 = arith.addf %249, %253 : vector<10x128xf32>
    %c132 = arith.constant 132 : index
    %c0_247 = arith.constant 0 : index
    %255 = vector.load %arg13[%c132, %c0_247] : memref<288x64xf32, #tpu.memory_space<vmem>>, vector<10x64xf32>
    %c7_248 = arith.constant 7 : index
    %c0_249 = arith.constant 0 : index
    %c0_250 = arith.constant 0 : index
    %256 = vector.load %arg4[%c7_248, %c0_249, %c0_250] : memref<9x64x128xf32, #tpu.memory_space<vmem>>, vector<1x64x128xf32>
    %257 = vector.shape_cast %256 : vector<1x64x128xf32> to vector<64x128xf32>
    %cst_251 = arith.constant dense<0.000000e+00> : vector<10x128xf32>
    %258 = tpu.matmul %255, %257, %cst_251 {dimension_numbers = #tpu.dot_dimension_numbers<[1], [0], [0], [1], [0, 0, 1, 1], [], []>} : vector<10x64xf32>, vector<64x128xf32>, vector<10x128xf32> -> vector<10x128xf32>
    %259 = arith.addf %254, %258 : vector<10x128xf32>
    %c62 = arith.constant 62 : index
    %c0_252 = arith.constant 0 : index
    %260 = vector.load %arg13[%c62, %c0_252] : memref<288x64xf32, #tpu.memory_space<vmem>>, vector<10x64xf32>
    %c8_253 = arith.constant 8 : index
    %c0_254 = arith.constant 0 : index
    %c0_255 = arith.constant 0 : index
    %261 = vector.load %arg4[%c8_253, %c0_254, %c0_255] : memref<9x64x128xf32, #tpu.memory_space<vmem>>, vector<1x64x128xf32>
    %262 = vector.shape_cast %261 : vector<1x64x128xf32> to vector<64x128xf32>
    %cst_256 = arith.constant dense<0.000000e+00> : vector<10x128xf32>
    %263 = tpu.matmul %260, %262, %cst_256 {dimension_numbers = #tpu.dot_dimension_numbers<[1], [0], [0], [1], [0, 0, 1, 1], [], []>} : vector<10x64xf32>, vector<64x128xf32>, vector<10x128xf32> -> vector<10x128xf32>
    %264 = arith.addf %259, %263 : vector<10x128xf32>
    %c40 = arith.constant 40 : index
    %c0_257 = arith.constant 0 : index
    %265 = vector.load %arg14[%c40, %c0_257] : memref<50x128xf32, #tpu.memory_space<vmem>>, vector<10x128xf32>
    tpu.vector_store %arg14[%c40, %c0_257], %264 {strides = array<i32>} : memref<50x128xf32, #tpu.memory_space<vmem>>, vector<10x128xf32>,
    %c0_258 = arith.constant 0 : index
    %c0_259 = arith.constant 0 : index
    %266 = vector.load %arg14[%c0_258, %c0_259] : memref<50x128xf32, #tpu.memory_space<vmem>>, vector<50x128xf32>
    %cst_260 = arith.constant dense<0.000000e+00> : vector<128xf32>
    %267 = vector.multi_reduction <add>, %266, %cst_260 [0] : vector<50x128xf32> to vector<128xf32>
    %268 = vector.shape_cast %267 : vector<128xf32> to vector<1x128xf32>
    %cst_261 = arith.constant 2.000000e-02 : f32
    %269 = vector.broadcast %cst_261 : f32 to vector<1x128xf32>
    %270 = arith.mulf %268, %269 : vector<1x128xf32>
    %271 = vector.broadcast %270 : vector<1x128xf32> to vector<50x128xf32>
    %272 = arith.subf %266, %271 : vector<50x128xf32>
    %273 = arith.mulf %272, %272 : vector<50x128xf32>
    %cst_262 = arith.constant dense<0.000000e+00> : vector<128xf32>
    %274 = vector.multi_reduction <add>, %273, %cst_262 [0] : vector<50x128xf32> to vector<128xf32>
    %275 = vector.shape_cast %274 : vector<128xf32> to vector<1x128xf32>
    %cst_263 = arith.constant 2.000000e-02 : f32
    %276 = vector.broadcast %cst_263 : f32 to vector<1x128xf32>
    %277 = arith.mulf %275, %276 : vector<1x128xf32>
    %cst_264 = arith.constant 9.99999974E-6 : f32
    %278 = vector.broadcast %cst_264 : f32 to vector<1x128xf32>
    %279 = arith.addf %277, %278 : vector<1x128xf32>
    %280 = math.rsqrt %279 : vector<1x128xf32>
    %281 = vector.broadcast %280 : vector<1x128xf32> to vector<50x128xf32>
    %282 = arith.mulf %272, %281 : vector<50x128xf32>
    %c0_265 = arith.constant 0 : index
    %c0_266 = arith.constant 0 : index
    %283 = vector.load %arg5[%c0_265, %c0_266] : memref<1x128xf32, #tpu.memory_space<vmem>>, vector<1x128xf32>
    %284 = vector.broadcast %283 : vector<1x128xf32> to vector<50x128xf32>
    %285 = arith.mulf %282, %284 : vector<50x128xf32>
    %c0_267 = arith.constant 0 : index
    %c0_268 = arith.constant 0 : index
    %286 = vector.load %arg6[%c0_267, %c0_268] : memref<1x128xf32, #tpu.memory_space<vmem>>, vector<1x128xf32>
    %287 = vector.broadcast %286 : vector<1x128xf32> to vector<50x128xf32>
    %288 = arith.addf %285, %287 : vector<50x128xf32>
    %cst_269 = arith.constant 0.000000e+00 : f32
    %289 = vector.broadcast %cst_269 : f32 to vector<50x128xf32>
    %290 = arith.cmpf oge, %288, %289 : vector<50x128xf32>
    %cst_270 = arith.constant 1.000000e-01 : f32
    %291 = vector.broadcast %cst_270 : f32 to vector<50x128xf32>
    %292 = arith.mulf %291, %288 : vector<50x128xf32>
    %293 = arith.select %290, %288, %292 : vector<50x128xi1>, vector<50x128xf32>
    %c0_271 = arith.constant 0 : index
    %c0_272 = arith.constant 0 : index
    %294 = vector.load %arg14[%c0_271, %c0_272] : memref<50x128xf32, #tpu.memory_space<vmem>>, vector<50x128xf32>
    tpu.vector_store %arg14[%c0_271, %c0_272], %293 {strides = array<i32>} : memref<50x128xf32, #tpu.memory_space<vmem>>, vector<50x128xf32>,
    %cst_273 = arith.constant 0.000000e+00 : f32
    %295 = vector.broadcast %cst_273 : f32 to vector<2x32xf32>
    %cst_274 = arith.constant 0.000000e+00 : f32
    %296 = vector.broadcast %cst_274 : f32 to vector<2x32xf32>
    %c0_275 = arith.constant 0 : index
    %c0_276 = arith.constant 0 : index
    %297 = vector.load %arg14[%c0_275, %c0_276] : memref<50x128xf32, #tpu.memory_space<vmem>>, vector<2x128xf32>
    %c0_277 = arith.constant 0 : index
    %c0_278 = arith.constant 0 : index
    %c0_279 = arith.constant 0 : index
    %298 = vector.load %arg7[%c0_277, %c0_278, %c0_279] : memref<25x128x32xf32, #tpu.memory_space<vmem>>, vector<1x128x32xf32>
    %299 = vector.shape_cast %298 : vector<1x128x32xf32> to vector<128x32xf32>
    %cst_280 = arith.constant dense<0.000000e+00> : vector<2x32xf32>
    %300 = tpu.matmul %297, %299, %cst_280 {dimension_numbers = #tpu.dot_dimension_numbers<[1], [0], [0], [1], [0, 0, 1, 1], [], []>} : vector<2x128xf32>, vector<128x32xf32>, vector<2x32xf32> -> vector<2x32xf32>
    %301 = arith.addf %295, %300 : vector<2x32xf32>
    %c0_281 = arith.constant 0 : index
    %c0_282 = arith.constant 0 : index
    %c0_283 = arith.constant 0 : index
    %302 = vector.load %arg8[%c0_281, %c0_282, %c0_283] : memref<25x128x32xf32, #tpu.memory_space<vmem>>, vector<1x128x32xf32>
    %303 = vector.shape_cast %302 : vector<1x128x32xf32> to vector<128x32xf32>
    %cst_284 = arith.constant dense<0.000000e+00> : vector<2x32xf32>
    %304 = tpu.matmul %297, %303, %cst_284 {dimension_numbers = #tpu.dot_dimension_numbers<[1], [0], [0], [1], [0, 0, 1, 1], [], []>} : vector<2x128xf32>, vector<128x32xf32>, vector<2x32xf32> -> vector<2x32xf32>
    %305 = arith.addf %296, %304 : vector<2x32xf32>
    %c2_285 = arith.constant 2 : index
    %c0_286 = arith.constant 0 : index
    %306 = vector.load %arg14[%c2_285, %c0_286] : memref<50x128xf32, #tpu.memory_space<vmem>>, vector<2x128xf32>
    %c1_287 = arith.constant 1 : index
    %c0_288 = arith.constant 0 : index
    %c0_289 = arith.constant 0 : index
    %307 = vector.load %arg7[%c1_287, %c0_288, %c0_289] : memref<25x128x32xf32, #tpu.memory_space<vmem>>, vector<1x128x32xf32>
    %308 = vector.shape_cast %307 : vector<1x128x32xf32> to vector<128x32xf32>
    %cst_290 = arith.constant dense<0.000000e+00> : vector<2x32xf32>
    %309 = tpu.matmul %306, %308, %cst_290 {dimension_numbers = #tpu.dot_dimension_numbers<[1], [0], [0], [1], [0, 0, 1, 1], [], []>} : vector<2x128xf32>, vector<128x32xf32>, vector<2x32xf32> -> vector<2x32xf32>
    %310 = arith.addf %301, %309 : vector<2x32xf32>
    %c1_291 = arith.constant 1 : index
    %c0_292 = arith.constant 0 : index
    %c0_293 = arith.constant 0 : index
    %311 = vector.load %arg8[%c1_291, %c0_292, %c0_293] : memref<25x128x32xf32, #tpu.memory_space<vmem>>, vector<1x128x32xf32>
    %312 = vector.shape_cast %311 : vector<1x128x32xf32> to vector<128x32xf32>
    %cst_294 = arith.constant dense<0.000000e+00> : vector<2x32xf32>
    %313 = tpu.matmul %306, %312, %cst_294 {dimension_numbers = #tpu.dot_dimension_numbers<[1], [0], [0], [1], [0, 0, 1, 1], [], []>} : vector<2x128xf32>, vector<128x32xf32>, vector<2x32xf32> -> vector<2x32xf32>
    %314 = arith.addf %305, %313 : vector<2x32xf32>
    %c4_295 = arith.constant 4 : index
    %c0_296 = arith.constant 0 : index
    %315 = vector.load %arg14[%c4_295, %c0_296] : memref<50x128xf32, #tpu.memory_space<vmem>>, vector<2x128xf32>
    %c2_297 = arith.constant 2 : index
    %c0_298 = arith.constant 0 : index
    %c0_299 = arith.constant 0 : index
    %316 = vector.load %arg7[%c2_297, %c0_298, %c0_299] : memref<25x128x32xf32, #tpu.memory_space<vmem>>, vector<1x128x32xf32>
    %317 = vector.shape_cast %316 : vector<1x128x32xf32> to vector<128x32xf32>
    %cst_300 = arith.constant dense<0.000000e+00> : vector<2x32xf32>
    %318 = tpu.matmul %315, %317, %cst_300 {dimension_numbers = #tpu.dot_dimension_numbers<[1], [0], [0], [1], [0, 0, 1, 1], [], []>} : vector<2x128xf32>, vector<128x32xf32>, vector<2x32xf32> -> vector<2x32xf32>
    %319 = arith.addf %310, %318 : vector<2x32xf32>
    %c2_301 = arith.constant 2 : index
    %c0_302 = arith.constant 0 : index
    %c0_303 = arith.constant 0 : index
    %320 = vector.load %arg8[%c2_301, %c0_302, %c0_303] : memref<25x128x32xf32, #tpu.memory_space<vmem>>, vector<1x128x32xf32>
    %321 = vector.shape_cast %320 : vector<1x128x32xf32> to vector<128x32xf32>
    %cst_304 = arith.constant dense<0.000000e+00> : vector<2x32xf32>
    %322 = tpu.matmul %315, %321, %cst_304 {dimension_numbers = #tpu.dot_dimension_numbers<[1], [0], [0], [1], [0, 0, 1, 1], [], []>} : vector<2x128xf32>, vector<128x32xf32>, vector<2x32xf32> -> vector<2x32xf32>
    %323 = arith.addf %314, %322 : vector<2x32xf32>
    %c6_305 = arith.constant 6 : index
    %c0_306 = arith.constant 0 : index
    %324 = vector.load %arg14[%c6_305, %c0_306] : memref<50x128xf32, #tpu.memory_space<vmem>>, vector<2x128xf32>
    %c3_307 = arith.constant 3 : index
    %c0_308 = arith.constant 0 : index
    %c0_309 = arith.constant 0 : index
    %325 = vector.load %arg7[%c3_307, %c0_308, %c0_309] : memref<25x128x32xf32, #tpu.memory_space<vmem>>, vector<1x128x32xf32>
    %326 = vector.shape_cast %325 : vector<1x128x32xf32> to vector<128x32xf32>
    %cst_310 = arith.constant dense<0.000000e+00> : vector<2x32xf32>
    %327 = tpu.matmul %324, %326, %cst_310 {dimension_numbers = #tpu.dot_dimension_numbers<[1], [0], [0], [1], [0, 0, 1, 1], [], []>} : vector<2x128xf32>, vector<128x32xf32>, vector<2x32xf32> -> vector<2x32xf32>
    %328 = arith.addf %319, %327 : vector<2x32xf32>
    %c3_311 = arith.constant 3 : index
    %c0_312 = arith.constant 0 : index
    %c0_313 = arith.constant 0 : index
    %329 = vector.load %arg8[%c3_311, %c0_312, %c0_313] : memref<25x128x32xf32, #tpu.memory_space<vmem>>, vector<1x128x32xf32>
    %330 = vector.shape_cast %329 : vector<1x128x32xf32> to vector<128x32xf32>
    %cst_314 = arith.constant dense<0.000000e+00> : vector<2x32xf32>
    %331 = tpu.matmul %324, %330, %cst_314 {dimension_numbers = #tpu.dot_dimension_numbers<[1], [0], [0], [1], [0, 0, 1, 1], [], []>} : vector<2x128xf32>, vector<128x32xf32>, vector<2x32xf32> -> vector<2x32xf32>
    %332 = arith.addf %323, %331 : vector<2x32xf32>
    %c8_315 = arith.constant 8 : index
    %c0_316 = arith.constant 0 : index
    %333 = vector.load %arg14[%c8_315, %c0_316] : memref<50x128xf32, #tpu.memory_space<vmem>>, vector<2x128xf32>
    %c4_317 = arith.constant 4 : index
    %c0_318 = arith.constant 0 : index
    %c0_319 = arith.constant 0 : index
    %334 = vector.load %arg7[%c4_317, %c0_318, %c0_319] : memref<25x128x32xf32, #tpu.memory_space<vmem>>, vector<1x128x32xf32>
    %335 = vector.shape_cast %334 : vector<1x128x32xf32> to vector<128x32xf32>
    %cst_320 = arith.constant dense<0.000000e+00> : vector<2x32xf32>
    %336 = tpu.matmul %333, %335, %cst_320 {dimension_numbers = #tpu.dot_dimension_numbers<[1], [0], [0], [1], [0, 0, 1, 1], [], []>} : vector<2x128xf32>, vector<128x32xf32>, vector<2x32xf32> -> vector<2x32xf32>
    %337 = arith.addf %328, %336 : vector<2x32xf32>
    %c4_321 = arith.constant 4 : index
    %c0_322 = arith.constant 0 : index
    %c0_323 = arith.constant 0 : index
    %338 = vector.load %arg8[%c4_321, %c0_322, %c0_323] : memref<25x128x32xf32, #tpu.memory_space<vmem>>, vector<1x128x32xf32>
    %339 = vector.shape_cast %338 : vector<1x128x32xf32> to vector<128x32xf32>
    %cst_324 = arith.constant dense<0.000000e+00> : vector<2x32xf32>
    %340 = tpu.matmul %333, %339, %cst_324 {dimension_numbers = #tpu.dot_dimension_numbers<[1], [0], [0], [1], [0, 0, 1, 1], [], []>} : vector<2x128xf32>, vector<128x32xf32>, vector<2x32xf32> -> vector<2x32xf32>
    %341 = arith.addf %332, %340 : vector<2x32xf32>
    %c10_325 = arith.constant 10 : index
    %c0_326 = arith.constant 0 : index
    %342 = vector.load %arg14[%c10_325, %c0_326] : memref<50x128xf32, #tpu.memory_space<vmem>>, vector<2x128xf32>
    %c5_327 = arith.constant 5 : index
    %c0_328 = arith.constant 0 : index
    %c0_329 = arith.constant 0 : index
    %343 = vector.load %arg7[%c5_327, %c0_328, %c0_329] : memref<25x128x32xf32, #tpu.memory_space<vmem>>, vector<1x128x32xf32>
    %344 = vector.shape_cast %343 : vector<1x128x32xf32> to vector<128x32xf32>
    %cst_330 = arith.constant dense<0.000000e+00> : vector<2x32xf32>
    %345 = tpu.matmul %342, %344, %cst_330 {dimension_numbers = #tpu.dot_dimension_numbers<[1], [0], [0], [1], [0, 0, 1, 1], [], []>} : vector<2x128xf32>, vector<128x32xf32>, vector<2x32xf32> -> vector<2x32xf32>
    %346 = arith.addf %337, %345 : vector<2x32xf32>
    %c5_331 = arith.constant 5 : index
    %c0_332 = arith.constant 0 : index
    %c0_333 = arith.constant 0 : index
    %347 = vector.load %arg8[%c5_331, %c0_332, %c0_333] : memref<25x128x32xf32, #tpu.memory_space<vmem>>, vector<1x128x32xf32>
    %348 = vector.shape_cast %347 : vector<1x128x32xf32> to vector<128x32xf32>
    %cst_334 = arith.constant dense<0.000000e+00> : vector<2x32xf32>
    %349 = tpu.matmul %342, %348, %cst_334 {dimension_numbers = #tpu.dot_dimension_numbers<[1], [0], [0], [1], [0, 0, 1, 1], [], []>} : vector<2x128xf32>, vector<128x32xf32>, vector<2x32xf32> -> vector<2x32xf32>
    %350 = arith.addf %341, %349 : vector<2x32xf32>
    %c12_335 = arith.constant 12 : index
    %c0_336 = arith.constant 0 : index
    %351 = vector.load %arg14[%c12_335, %c0_336] : memref<50x128xf32, #tpu.memory_space<vmem>>, vector<2x128xf32>
    %c6_337 = arith.constant 6 : index
    %c0_338 = arith.constant 0 : index
    %c0_339 = arith.constant 0 : index
    %352 = vector.load %arg7[%c6_337, %c0_338, %c0_339] : memref<25x128x32xf32, #tpu.memory_space<vmem>>, vector<1x128x32xf32>
    %353 = vector.shape_cast %352 : vector<1x128x32xf32> to vector<128x32xf32>
    %cst_340 = arith.constant dense<0.000000e+00> : vector<2x32xf32>
    %354 = tpu.matmul %351, %353, %cst_340 {dimension_numbers = #tpu.dot_dimension_numbers<[1], [0], [0], [1], [0, 0, 1, 1], [], []>} : vector<2x128xf32>, vector<128x32xf32>, vector<2x32xf32> -> vector<2x32xf32>
    %355 = arith.addf %346, %354 : vector<2x32xf32>
    %c6_341 = arith.constant 6 : index
    %c0_342 = arith.constant 0 : index
    %c0_343 = arith.constant 0 : index
    %356 = vector.load %arg8[%c6_341, %c0_342, %c0_343] : memref<25x128x32xf32, #tpu.memory_space<vmem>>, vector<1x128x32xf32>
    %357 = vector.shape_cast %356 : vector<1x128x32xf32> to vector<128x32xf32>
    %cst_344 = arith.constant dense<0.000000e+00> : vector<2x32xf32>
    %358 = tpu.matmul %351, %357, %cst_344 {dimension_numbers = #tpu.dot_dimension_numbers<[1], [0], [0], [1], [0, 0, 1, 1], [], []>} : vector<2x128xf32>, vector<128x32xf32>, vector<2x32xf32> -> vector<2x32xf32>
    %359 = arith.addf %350, %358 : vector<2x32xf32>
    %c14_345 = arith.constant 14 : index
    %c0_346 = arith.constant 0 : index
    %360 = vector.load %arg14[%c14_345, %c0_346] : memref<50x128xf32, #tpu.memory_space<vmem>>, vector<2x128xf32>
    %c7_347 = arith.constant 7 : index
    %c0_348 = arith.constant 0 : index
    %c0_349 = arith.constant 0 : index
    %361 = vector.load %arg7[%c7_347, %c0_348, %c0_349] : memref<25x128x32xf32, #tpu.memory_space<vmem>>, vector<1x128x32xf32>
    %362 = vector.shape_cast %361 : vector<1x128x32xf32> to vector<128x32xf32>
    %cst_350 = arith.constant dense<0.000000e+00> : vector<2x32xf32>
    %363 = tpu.matmul %360, %362, %cst_350 {dimension_numbers = #tpu.dot_dimension_numbers<[1], [0], [0], [1], [0, 0, 1, 1], [], []>} : vector<2x128xf32>, vector<128x32xf32>, vector<2x32xf32> -> vector<2x32xf32>
    %364 = arith.addf %355, %363 : vector<2x32xf32>
    %c7_351 = arith.constant 7 : index
    %c0_352 = arith.constant 0 : index
    %c0_353 = arith.constant 0 : index
    %365 = vector.load %arg8[%c7_351, %c0_352, %c0_353] : memref<25x128x32xf32, #tpu.memory_space<vmem>>, vector<1x128x32xf32>
    %366 = vector.shape_cast %365 : vector<1x128x32xf32> to vector<128x32xf32>
    %cst_354 = arith.constant dense<0.000000e+00> : vector<2x32xf32>
    %367 = tpu.matmul %360, %366, %cst_354 {dimension_numbers = #tpu.dot_dimension_numbers<[1], [0], [0], [1], [0, 0, 1, 1], [], []>} : vector<2x128xf32>, vector<128x32xf32>, vector<2x32xf32> -> vector<2x32xf32>
    %368 = arith.addf %359, %367 : vector<2x32xf32>
    %c16 = arith.constant 16 : index
    %c0_355 = arith.constant 0 : index
    %369 = vector.load %arg14[%c16, %c0_355] : memref<50x128xf32, #tpu.memory_space<vmem>>, vector<2x128xf32>
    %c8_356 = arith.constant 8 : index
    %c0_357 = arith.constant 0 : index
    %c0_358 = arith.constant 0 : index
    %370 = vector.load %arg7[%c8_356, %c0_357, %c0_358] : memref<25x128x32xf32, #tpu.memory_space<vmem>>, vector<1x128x32xf32>
    %371 = vector.shape_cast %370 : vector<1x128x32xf32> to vector<128x32xf32>
    %cst_359 = arith.constant dense<0.000000e+00> : vector<2x32xf32>
    %372 = tpu.matmul %369, %371, %cst_359 {dimension_numbers = #tpu.dot_dimension_numbers<[1], [0], [0], [1], [0, 0, 1, 1], [], []>} : vector<2x128xf32>, vector<128x32xf32>, vector<2x32xf32> -> vector<2x32xf32>
    %373 = arith.addf %364, %372 : vector<2x32xf32>
    %c8_360 = arith.constant 8 : index
    %c0_361 = arith.constant 0 : index
    %c0_362 = arith.constant 0 : index
    %374 = vector.load %arg8[%c8_360, %c0_361, %c0_362] : memref<25x128x32xf32, #tpu.memory_space<vmem>>, vector<1x128x32xf32>
    %375 = vector.shape_cast %374 : vector<1x128x32xf32> to vector<128x32xf32>
    %cst_363 = arith.constant dense<0.000000e+00> : vector<2x32xf32>
    %376 = tpu.matmul %369, %375, %cst_363 {dimension_numbers = #tpu.dot_dimension_numbers<[1], [0], [0], [1], [0, 0, 1, 1], [], []>} : vector<2x128xf32>, vector<128x32xf32>, vector<2x32xf32> -> vector<2x32xf32>
    %377 = arith.addf %368, %376 : vector<2x32xf32>
    %c18 = arith.constant 18 : index
    %c0_364 = arith.constant 0 : index
    %378 = vector.load %arg14[%c18, %c0_364] : memref<50x128xf32, #tpu.memory_space<vmem>>, vector<2x128xf32>
    %c9 = arith.constant 9 : index
    %c0_365 = arith.constant 0 : index
    %c0_366 = arith.constant 0 : index
    %379 = vector.load %arg7[%c9, %c0_365, %c0_366] : memref<25x128x32xf32, #tpu.memory_space<vmem>>, vector<1x128x32xf32>
    %380 = vector.shape_cast %379 : vector<1x128x32xf32> to vector<128x32xf32>
    %cst_367 = arith.constant dense<0.000000e+00> : vector<2x32xf32>
    %381 = tpu.matmul %378, %380, %cst_367 {dimension_numbers = #tpu.dot_dimension_numbers<[1], [0], [0], [1], [0, 0, 1, 1], [], []>} : vector<2x128xf32>, vector<128x32xf32>, vector<2x32xf32> -> vector<2x32xf32>
    %382 = arith.addf %373, %381 : vector<2x32xf32>
    %c9_368 = arith.constant 9 : index
    %c0_369 = arith.constant 0 : index
    %c0_370 = arith.constant 0 : index
    %383 = vector.load %arg8[%c9_368, %c0_369, %c0_370] : memref<25x128x32xf32, #tpu.memory_space<vmem>>, vector<1x128x32xf32>
    %384 = vector.shape_cast %383 : vector<1x128x32xf32> to vector<128x32xf32>
    %cst_371 = arith.constant dense<0.000000e+00> : vector<2x32xf32>
    %385 = tpu.matmul %378, %384, %cst_371 {dimension_numbers = #tpu.dot_dimension_numbers<[1], [0], [0], [1], [0, 0, 1, 1], [], []>} : vector<2x128xf32>, vector<128x32xf32>, vector<2x32xf32> -> vector<2x32xf32>
    %386 = arith.addf %377, %385 : vector<2x32xf32>
    %c20_372 = arith.constant 20 : index
    %c0_373 = arith.constant 0 : index
    %387 = vector.load %arg14[%c20_372, %c0_373] : memref<50x128xf32, #tpu.memory_space<vmem>>, vector<2x128xf32>
    %c10_374 = arith.constant 10 : index
    %c0_375 = arith.constant 0 : index
    %c0_376 = arith.constant 0 : index
    %388 = vector.load %arg7[%c10_374, %c0_375, %c0_376] : memref<25x128x32xf32, #tpu.memory_space<vmem>>, vector<1x128x32xf32>
    %389 = vector.shape_cast %388 : vector<1x128x32xf32> to vector<128x32xf32>
    %cst_377 = arith.constant dense<0.000000e+00> : vector<2x32xf32>
    %390 = tpu.matmul %387, %389, %cst_377 {dimension_numbers = #tpu.dot_dimension_numbers<[1], [0], [0], [1], [0, 0, 1, 1], [], []>} : vector<2x128xf32>, vector<128x32xf32>, vector<2x32xf32> -> vector<2x32xf32>
    %391 = arith.addf %382, %390 : vector<2x32xf32>
    %c10_378 = arith.constant 10 : index
    %c0_379 = arith.constant 0 : index
    %c0_380 = arith.constant 0 : index
    %392 = vector.load %arg8[%c10_378, %c0_379, %c0_380] : memref<25x128x32xf32, #tpu.memory_space<vmem>>, vector<1x128x32xf32>
    %393 = vector.shape_cast %392 : vector<1x128x32xf32> to vector<128x32xf32>
    %cst_381 = arith.constant dense<0.000000e+00> : vector<2x32xf32>
    %394 = tpu.matmul %387, %393, %cst_381 {dimension_numbers = #tpu.dot_dimension_numbers<[1], [0], [0], [1], [0, 0, 1, 1], [], []>} : vector<2x128xf32>, vector<128x32xf32>, vector<2x32xf32> -> vector<2x32xf32>
    %395 = arith.addf %386, %394 : vector<2x32xf32>
    %c22 = arith.constant 22 : index
    %c0_382 = arith.constant 0 : index
    %396 = vector.load %arg14[%c22, %c0_382] : memref<50x128xf32, #tpu.memory_space<vmem>>, vector<2x128xf32>
    %c11 = arith.constant 11 : index
    %c0_383 = arith.constant 0 : index
    %c0_384 = arith.constant 0 : index
    %397 = vector.load %arg7[%c11, %c0_383, %c0_384] : memref<25x128x32xf32, #tpu.memory_space<vmem>>, vector<1x128x32xf32>
    %398 = vector.shape_cast %397 : vector<1x128x32xf32> to vector<128x32xf32>
    %cst_385 = arith.constant dense<0.000000e+00> : vector<2x32xf32>
    %399 = tpu.matmul %396, %398, %cst_385 {dimension_numbers = #tpu.dot_dimension_numbers<[1], [0], [0], [1], [0, 0, 1, 1], [], []>} : vector<2x128xf32>, vector<128x32xf32>, vector<2x32xf32> -> vector<2x32xf32>
    %400 = arith.addf %391, %399 : vector<2x32xf32>
    %c11_386 = arith.constant 11 : index
    %c0_387 = arith.constant 0 : index
    %c0_388 = arith.constant 0 : index
    %401 = vector.load %arg8[%c11_386, %c0_387, %c0_388] : memref<25x128x32xf32, #tpu.memory_space<vmem>>, vector<1x128x32xf32>
    %402 = vector.shape_cast %401 : vector<1x128x32xf32> to vector<128x32xf32>
    %cst_389 = arith.constant dense<0.000000e+00> : vector<2x32xf32>
    %403 = tpu.matmul %396, %402, %cst_389 {dimension_numbers = #tpu.dot_dimension_numbers<[1], [0], [0], [1], [0, 0, 1, 1], [], []>} : vector<2x128xf32>, vector<128x32xf32>, vector<2x32xf32> -> vector<2x32xf32>
    %404 = arith.addf %395, %403 : vector<2x32xf32>
    %c24_390 = arith.constant 24 : index
    %c0_391 = arith.constant 0 : index
    %405 = vector.load %arg14[%c24_390, %c0_391] : memref<50x128xf32, #tpu.memory_space<vmem>>, vector<2x128xf32>
    %c12_392 = arith.constant 12 : index
    %c0_393 = arith.constant 0 : index
    %c0_394 = arith.constant 0 : index
    %406 = vector.load %arg7[%c12_392, %c0_393, %c0_394] : memref<25x128x32xf32, #tpu.memory_space<vmem>>, vector<1x128x32xf32>
    %407 = vector.shape_cast %406 : vector<1x128x32xf32> to vector<128x32xf32>
    %cst_395 = arith.constant dense<0.000000e+00> : vector<2x32xf32>
    %408 = tpu.matmul %405, %407, %cst_395 {dimension_numbers = #tpu.dot_dimension_numbers<[1], [0], [0], [1], [0, 0, 1, 1], [], []>} : vector<2x128xf32>, vector<128x32xf32>, vector<2x32xf32> -> vector<2x32xf32>
    %409 = arith.addf %400, %408 : vector<2x32xf32>
    %c12_396 = arith.constant 12 : index
    %c0_397 = arith.constant 0 : index
    %c0_398 = arith.constant 0 : index
    %410 = vector.load %arg8[%c12_396, %c0_397, %c0_398] : memref<25x128x32xf32, #tpu.memory_space<vmem>>, vector<1x128x32xf32>
    %411 = vector.shape_cast %410 : vector<1x128x32xf32> to vector<128x32xf32>
    %cst_399 = arith.constant dense<0.000000e+00> : vector<2x32xf32>
    %412 = tpu.matmul %405, %411, %cst_399 {dimension_numbers = #tpu.dot_dimension_numbers<[1], [0], [0], [1], [0, 0, 1, 1], [], []>} : vector<2x128xf32>, vector<128x32xf32>, vector<2x32xf32> -> vector<2x32xf32>
    %413 = arith.addf %404, %412 : vector<2x32xf32>
    %c26_400 = arith.constant 26 : index
    %c0_401 = arith.constant 0 : index
    %414 = vector.load %arg14[%c26_400, %c0_401] : memref<50x128xf32, #tpu.memory_space<vmem>>, vector<2x128xf32>
    %c13 = arith.constant 13 : index
    %c0_402 = arith.constant 0 : index
    %c0_403 = arith.constant 0 : index
    %415 = vector.load %arg7[%c13, %c0_402, %c0_403] : memref<25x128x32xf32, #tpu.memory_space<vmem>>, vector<1x128x32xf32>
    %416 = vector.shape_cast %415 : vector<1x128x32xf32> to vector<128x32xf32>
    %cst_404 = arith.constant dense<0.000000e+00> : vector<2x32xf32>
    %417 = tpu.matmul %414, %416, %cst_404 {dimension_numbers = #tpu.dot_dimension_numbers<[1], [0], [0], [1], [0, 0, 1, 1], [], []>} : vector<2x128xf32>, vector<128x32xf32>, vector<2x32xf32> -> vector<2x32xf32>
    %418 = arith.addf %409, %417 : vector<2x32xf32>
    %c13_405 = arith.constant 13 : index
    %c0_406 = arith.constant 0 : index
    %c0_407 = arith.constant 0 : index
    %419 = vector.load %arg8[%c13_405, %c0_406, %c0_407] : memref<25x128x32xf32, #tpu.memory_space<vmem>>, vector<1x128x32xf32>
    %420 = vector.shape_cast %419 : vector<1x128x32xf32> to vector<128x32xf32>
    %cst_408 = arith.constant dense<0.000000e+00> : vector<2x32xf32>
    %421 = tpu.matmul %414, %420, %cst_408 {dimension_numbers = #tpu.dot_dimension_numbers<[1], [0], [0], [1], [0, 0, 1, 1], [], []>} : vector<2x128xf32>, vector<128x32xf32>, vector<2x32xf32> -> vector<2x32xf32>
    %422 = arith.addf %413, %421 : vector<2x32xf32>
    %c28 = arith.constant 28 : index
    %c0_409 = arith.constant 0 : index
    %423 = vector.load %arg14[%c28, %c0_409] : memref<50x128xf32, #tpu.memory_space<vmem>>, vector<2x128xf32>
    %c14_410 = arith.constant 14 : index
    %c0_411 = arith.constant 0 : index
    %c0_412 = arith.constant 0 : index
    %424 = vector.load %arg7[%c14_410, %c0_411, %c0_412] : memref<25x128x32xf32, #tpu.memory_space<vmem>>, vector<1x128x32xf32>
    %425 = vector.shape_cast %424 : vector<1x128x32xf32> to vector<128x32xf32>
    %cst_413 = arith.constant dense<0.000000e+00> : vector<2x32xf32>
    %426 = tpu.matmul %423, %425, %cst_413 {dimension_numbers = #tpu.dot_dimension_numbers<[1], [0], [0], [1], [0, 0, 1, 1], [], []>} : vector<2x128xf32>, vector<128x32xf32>, vector<2x32xf32> -> vector<2x32xf32>
    %427 = arith.addf %418, %426 : vector<2x32xf32>
    %c14_414 = arith.constant 14 : index
    %c0_415 = arith.constant 0 : index
    %c0_416 = arith.constant 0 : index
    %428 = vector.load %arg8[%c14_414, %c0_415, %c0_416] : memref<25x128x32xf32, #tpu.memory_space<vmem>>, vector<1x128x32xf32>
    %429 = vector.shape_cast %428 : vector<1x128x32xf32> to vector<128x32xf32>
    %cst_417 = arith.constant dense<0.000000e+00> : vector<2x32xf32>
    %430 = tpu.matmul %423, %429, %cst_417 {dimension_numbers = #tpu.dot_dimension_numbers<[1], [0], [0], [1], [0, 0, 1, 1], [], []>} : vector<2x128xf32>, vector<128x32xf32>, vector<2x32xf32> -> vector<2x32xf32>
    %431 = arith.addf %422, %430 : vector<2x32xf32>
    %c30_418 = arith.constant 30 : index
    %c0_419 = arith.constant 0 : index
    %432 = vector.load %arg14[%c30_418, %c0_419] : memref<50x128xf32, #tpu.memory_space<vmem>>, vector<2x128xf32>
    %c15 = arith.constant 15 : index
    %c0_420 = arith.constant 0 : index
    %c0_421 = arith.constant 0 : index
    %433 = vector.load %arg7[%c15, %c0_420, %c0_421] : memref<25x128x32xf32, #tpu.memory_space<vmem>>, vector<1x128x32xf32>
    %434 = vector.shape_cast %433 : vector<1x128x32xf32> to vector<128x32xf32>
    %cst_422 = arith.constant dense<0.000000e+00> : vector<2x32xf32>
    %435 = tpu.matmul %432, %434, %cst_422 {dimension_numbers = #tpu.dot_dimension_numbers<[1], [0], [0], [1], [0, 0, 1, 1], [], []>} : vector<2x128xf32>, vector<128x32xf32>, vector<2x32xf32> -> vector<2x32xf32>
    %436 = arith.addf %427, %435 : vector<2x32xf32>
    %c15_423 = arith.constant 15 : index
    %c0_424 = arith.constant 0 : index
    %c0_425 = arith.constant 0 : index
    %437 = vector.load %arg8[%c15_423, %c0_424, %c0_425] : memref<25x128x32xf32, #tpu.memory_space<vmem>>, vector<1x128x32xf32>
    %438 = vector.shape_cast %437 : vector<1x128x32xf32> to vector<128x32xf32>
    %cst_426 = arith.constant dense<0.000000e+00> : vector<2x32xf32>
    %439 = tpu.matmul %432, %438, %cst_426 {dimension_numbers = #tpu.dot_dimension_numbers<[1], [0], [0], [1], [0, 0, 1, 1], [], []>} : vector<2x128xf32>, vector<128x32xf32>, vector<2x32xf32> -> vector<2x32xf32>
    %440 = arith.addf %431, %439 : vector<2x32xf32>
    %c32 = arith.constant 32 : index
    %c0_427 = arith.constant 0 : index
    %441 = vector.load %arg14[%c32, %c0_427] : memref<50x128xf32, #tpu.memory_space<vmem>>, vector<2x128xf32>
    %c16_428 = arith.constant 16 : index
    %c0_429 = arith.constant 0 : index
    %c0_430 = arith.constant 0 : index
    %442 = vector.load %arg7[%c16_428, %c0_429, %c0_430] : memref<25x128x32xf32, #tpu.memory_space<vmem>>, vector<1x128x32xf32>
    %443 = vector.shape_cast %442 : vector<1x128x32xf32> to vector<128x32xf32>
    %cst_431 = arith.constant dense<0.000000e+00> : vector<2x32xf32>
    %444 = tpu.matmul %441, %443, %cst_431 {dimension_numbers = #tpu.dot_dimension_numbers<[1], [0], [0], [1], [0, 0, 1, 1], [], []>} : vector<2x128xf32>, vector<128x32xf32>, vector<2x32xf32> -> vector<2x32xf32>
    %445 = arith.addf %436, %444 : vector<2x32xf32>
    %c16_432 = arith.constant 16 : index
    %c0_433 = arith.constant 0 : index
    %c0_434 = arith.constant 0 : index
    %446 = vector.load %arg8[%c16_432, %c0_433, %c0_434] : memref<25x128x32xf32, #tpu.memory_space<vmem>>, vector<1x128x32xf32>
    %447 = vector.shape_cast %446 : vector<1x128x32xf32> to vector<128x32xf32>
    %cst_435 = arith.constant dense<0.000000e+00> : vector<2x32xf32>
    %448 = tpu.matmul %441, %447, %cst_435 {dimension_numbers = #tpu.dot_dimension_numbers<[1], [0], [0], [1], [0, 0, 1, 1], [], []>} : vector<2x128xf32>, vector<128x32xf32>, vector<2x32xf32> -> vector<2x32xf32>
    %449 = arith.addf %440, %448 : vector<2x32xf32>
    %c34 = arith.constant 34 : index
    %c0_436 = arith.constant 0 : index
    %450 = vector.load %arg14[%c34, %c0_436] : memref<50x128xf32, #tpu.memory_space<vmem>>, vector<2x128xf32>
    %c17 = arith.constant 17 : index
    %c0_437 = arith.constant 0 : index
    %c0_438 = arith.constant 0 : index
    %451 = vector.load %arg7[%c17, %c0_437, %c0_438] : memref<25x128x32xf32, #tpu.memory_space<vmem>>, vector<1x128x32xf32>
    %452 = vector.shape_cast %451 : vector<1x128x32xf32> to vector<128x32xf32>
    %cst_439 = arith.constant dense<0.000000e+00> : vector<2x32xf32>
    %453 = tpu.matmul %450, %452, %cst_439 {dimension_numbers = #tpu.dot_dimension_numbers<[1], [0], [0], [1], [0, 0, 1, 1], [], []>} : vector<2x128xf32>, vector<128x32xf32>, vector<2x32xf32> -> vector<2x32xf32>
    %454 = arith.addf %445, %453 : vector<2x32xf32>
    %c17_440 = arith.constant 17 : index
    %c0_441 = arith.constant 0 : index
    %c0_442 = arith.constant 0 : index
    %455 = vector.load %arg8[%c17_440, %c0_441, %c0_442] : memref<25x128x32xf32, #tpu.memory_space<vmem>>, vector<1x128x32xf32>
    %456 = vector.shape_cast %455 : vector<1x128x32xf32> to vector<128x32xf32>
    %cst_443 = arith.constant dense<0.000000e+00> : vector<2x32xf32>
    %457 = tpu.matmul %450, %456, %cst_443 {dimension_numbers = #tpu.dot_dimension_numbers<[1], [0], [0], [1], [0, 0, 1, 1], [], []>} : vector<2x128xf32>, vector<128x32xf32>, vector<2x32xf32> -> vector<2x32xf32>
    %458 = arith.addf %449, %457 : vector<2x32xf32>
    %c36_444 = arith.constant 36 : index
    %c0_445 = arith.constant 0 : index
    %459 = vector.load %arg14[%c36_444, %c0_445] : memref<50x128xf32, #tpu.memory_space<vmem>>, vector<2x128xf32>
    %c18_446 = arith.constant 18 : index
    %c0_447 = arith.constant 0 : index
    %c0_448 = arith.constant 0 : index
    %460 = vector.load %arg7[%c18_446, %c0_447, %c0_448] : memref<25x128x32xf32, #tpu.memory_space<vmem>>, vector<1x128x32xf32>
    %461 = vector.shape_cast %460 : vector<1x128x32xf32> to vector<128x32xf32>
    %cst_449 = arith.constant dense<0.000000e+00> : vector<2x32xf32>
    %462 = tpu.matmul %459, %461, %cst_449 {dimension_numbers = #tpu.dot_dimension_numbers<[1], [0], [0], [1], [0, 0, 1, 1], [], []>} : vector<2x128xf32>, vector<128x32xf32>, vector<2x32xf32> -> vector<2x32xf32>
    %463 = arith.addf %454, %462 : vector<2x32xf32>
    %c18_450 = arith.constant 18 : index
    %c0_451 = arith.constant 0 : index
    %c0_452 = arith.constant 0 : index
    %464 = vector.load %arg8[%c18_450, %c0_451, %c0_452] : memref<25x128x32xf32, #tpu.memory_space<vmem>>, vector<1x128x32xf32>
    %465 = vector.shape_cast %464 : vector<1x128x32xf32> to vector<128x32xf32>
    %cst_453 = arith.constant dense<0.000000e+00> : vector<2x32xf32>
    %466 = tpu.matmul %459, %465, %cst_453 {dimension_numbers = #tpu.dot_dimension_numbers<[1], [0], [0], [1], [0, 0, 1, 1], [], []>} : vector<2x128xf32>, vector<128x32xf32>, vector<2x32xf32> -> vector<2x32xf32>
    %467 = arith.addf %458, %466 : vector<2x32xf32>
    %c38_454 = arith.constant 38 : index
    %c0_455 = arith.constant 0 : index
    %468 = vector.load %arg14[%c38_454, %c0_455] : memref<50x128xf32, #tpu.memory_space<vmem>>, vector<2x128xf32>
    %c19 = arith.constant 19 : index
    %c0_456 = arith.constant 0 : index
    %c0_457 = arith.constant 0 : index
    %469 = vector.load %arg7[%c19, %c0_456, %c0_457] : memref<25x128x32xf32, #tpu.memory_space<vmem>>, vector<1x128x32xf32>
    %470 = vector.shape_cast %469 : vector<1x128x32xf32> to vector<128x32xf32>
    %cst_458 = arith.constant dense<0.000000e+00> : vector<2x32xf32>
    %471 = tpu.matmul %468, %470, %cst_458 {dimension_numbers = #tpu.dot_dimension_numbers<[1], [0], [0], [1], [0, 0, 1, 1], [], []>} : vector<2x128xf32>, vector<128x32xf32>, vector<2x32xf32> -> vector<2x32xf32>
    %472 = arith.addf %463, %471 : vector<2x32xf32>
    %c19_459 = arith.constant 19 : index
    %c0_460 = arith.constant 0 : index
    %c0_461 = arith.constant 0 : index
    %473 = vector.load %arg8[%c19_459, %c0_460, %c0_461] : memref<25x128x32xf32, #tpu.memory_space<vmem>>, vector<1x128x32xf32>
    %474 = vector.shape_cast %473 : vector<1x128x32xf32> to vector<128x32xf32>
    %cst_462 = arith.constant dense<0.000000e+00> : vector<2x32xf32>
    %475 = tpu.matmul %468, %474, %cst_462 {dimension_numbers = #tpu.dot_dimension_numbers<[1], [0], [0], [1], [0, 0, 1, 1], [], []>} : vector<2x128xf32>, vector<128x32xf32>, vector<2x32xf32> -> vector<2x32xf32>
    %476 = arith.addf %467, %475 : vector<2x32xf32>
    %c40_463 = arith.constant 40 : index
    %c0_464 = arith.constant 0 : index
    %477 = vector.load %arg14[%c40_463, %c0_464] : memref<50x128xf32, #tpu.memory_space<vmem>>, vector<2x128xf32>
    %c20_465 = arith.constant 20 : index
    %c0_466 = arith.constant 0 : index
    %c0_467 = arith.constant 0 : index
    %478 = vector.load %arg7[%c20_465, %c0_466, %c0_467] : memref<25x128x32xf32, #tpu.memory_space<vmem>>, vector<1x128x32xf32>
    %479 = vector.shape_cast %478 : vector<1x128x32xf32> to vector<128x32xf32>
    %cst_468 = arith.constant dense<0.000000e+00> : vector<2x32xf32>
    %480 = tpu.matmul %477, %479, %cst_468 {dimension_numbers = #tpu.dot_dimension_numbers<[1], [0], [0], [1], [0, 0, 1, 1], [], []>} : vector<2x128xf32>, vector<128x32xf32>, vector<2x32xf32> -> vector<2x32xf32>
    %481 = arith.addf %472, %480 : vector<2x32xf32>
    %c20_469 = arith.constant 20 : index
    %c0_470 = arith.constant 0 : index
    %c0_471 = arith.constant 0 : index
    %482 = vector.load %arg8[%c20_469, %c0_470, %c0_471] : memref<25x128x32xf32, #tpu.memory_space<vmem>>, vector<1x128x32xf32>
    %483 = vector.shape_cast %482 : vector<1x128x32xf32> to vector<128x32xf32>
    %cst_472 = arith.constant dense<0.000000e+00> : vector<2x32xf32>
    %484 = tpu.matmul %477, %483, %cst_472 {dimension_numbers = #tpu.dot_dimension_numbers<[1], [0], [0], [1], [0, 0, 1, 1], [], []>} : vector<2x128xf32>, vector<128x32xf32>, vector<2x32xf32> -> vector<2x32xf32>
    %485 = arith.addf %476, %484 : vector<2x32xf32>
    %c42 = arith.constant 42 : index
    %c0_473 = arith.constant 0 : index
    %486 = vector.load %arg14[%c42, %c0_473] : memref<50x128xf32, #tpu.memory_space<vmem>>, vector<2x128xf32>
    %c21 = arith.constant 21 : index
    %c0_474 = arith.constant 0 : index
    %c0_475 = arith.constant 0 : index
    %487 = vector.load %arg7[%c21, %c0_474, %c0_475] : memref<25x128x32xf32, #tpu.memory_space<vmem>>, vector<1x128x32xf32>
    %488 = vector.shape_cast %487 : vector<1x128x32xf32> to vector<128x32xf32>
    %cst_476 = arith.constant dense<0.000000e+00> : vector<2x32xf32>
    %489 = tpu.matmul %486, %488, %cst_476 {dimension_numbers = #tpu.dot_dimension_numbers<[1], [0], [0], [1], [0, 0, 1, 1], [], []>} : vector<2x128xf32>, vector<128x32xf32>, vector<2x32xf32> -> vector<2x32xf32>
    %490 = arith.addf %481, %489 : vector<2x32xf32>
    %c21_477 = arith.constant 21 : index
    %c0_478 = arith.constant 0 : index
    %c0_479 = arith.constant 0 : index
    %491 = vector.load %arg8[%c21_477, %c0_478, %c0_479] : memref<25x128x32xf32, #tpu.memory_space<vmem>>, vector<1x128x32xf32>
    %492 = vector.shape_cast %491 : vector<1x128x32xf32> to vector<128x32xf32>
    %cst_480 = arith.constant dense<0.000000e+00> : vector<2x32xf32>
    %493 = tpu.matmul %486, %492, %cst_480 {dimension_numbers = #tpu.dot_dimension_numbers<[1], [0], [0], [1], [0, 0, 1, 1], [], []>} : vector<2x128xf32>, vector<128x32xf32>, vector<2x32xf32> -> vector<2x32xf32>
    %494 = arith.addf %485, %493 : vector<2x32xf32>
    %c44 = arith.constant 44 : index
    %c0_481 = arith.constant 0 : index
    %495 = vector.load %arg14[%c44, %c0_481] : memref<50x128xf32, #tpu.memory_space<vmem>>, vector<2x128xf32>
    %c22_482 = arith.constant 22 : index
    %c0_483 = arith.constant 0 : index
    %c0_484 = arith.constant 0 : index
    %496 = vector.load %arg7[%c22_482, %c0_483, %c0_484] : memref<25x128x32xf32, #tpu.memory_space<vmem>>, vector<1x128x32xf32>
    %497 = vector.shape_cast %496 : vector<1x128x32xf32> to vector<128x32xf32>
    %cst_485 = arith.constant dense<0.000000e+00> : vector<2x32xf32>
    %498 = tpu.matmul %495, %497, %cst_485 {dimension_numbers = #tpu.dot_dimension_numbers<[1], [0], [0], [1], [0, 0, 1, 1], [], []>} : vector<2x128xf32>, vector<128x32xf32>, vector<2x32xf32> -> vector<2x32xf32>
    %499 = arith.addf %490, %498 : vector<2x32xf32>
    %c22_486 = arith.constant 22 : index
    %c0_487 = arith.constant 0 : index
    %c0_488 = arith.constant 0 : index
    %500 = vector.load %arg8[%c22_486, %c0_487, %c0_488] : memref<25x128x32xf32, #tpu.memory_space<vmem>>, vector<1x128x32xf32>
    %501 = vector.shape_cast %500 : vector<1x128x32xf32> to vector<128x32xf32>
    %cst_489 = arith.constant dense<0.000000e+00> : vector<2x32xf32>
    %502 = tpu.matmul %495, %501, %cst_489 {dimension_numbers = #tpu.dot_dimension_numbers<[1], [0], [0], [1], [0, 0, 1, 1], [], []>} : vector<2x128xf32>, vector<128x32xf32>, vector<2x32xf32> -> vector<2x32xf32>
    %503 = arith.addf %494, %502 : vector<2x32xf32>
    %c46 = arith.constant 46 : index
    %c0_490 = arith.constant 0 : index
    %504 = vector.load %arg14[%c46, %c0_490] : memref<50x128xf32, #tpu.memory_space<vmem>>, vector<2x128xf32>
    %c23 = arith.constant 23 : index
    %c0_491 = arith.constant 0 : index
    %c0_492 = arith.constant 0 : index
    %505 = vector.load %arg7[%c23, %c0_491, %c0_492] : memref<25x128x32xf32, #tpu.memory_space<vmem>>, vector<1x128x32xf32>
    %506 = vector.shape_cast %505 : vector<1x128x32xf32> to vector<128x32xf32>
    %cst_493 = arith.constant dense<0.000000e+00> : vector<2x32xf32>
    %507 = tpu.matmul %504, %506, %cst_493 {dimension_numbers = #tpu.dot_dimension_numbers<[1], [0], [0], [1], [0, 0, 1, 1], [], []>} : vector<2x128xf32>, vector<128x32xf32>, vector<2x32xf32> -> vector<2x32xf32>
    %508 = arith.addf %499, %507 : vector<2x32xf32>
    %c23_494 = arith.constant 23 : index
    %c0_495 = arith.constant 0 : index
    %c0_496 = arith.constant 0 : index
    %509 = vector.load %arg8[%c23_494, %c0_495, %c0_496] : memref<25x128x32xf32, #tpu.memory_space<vmem>>, vector<1x128x32xf32>
    %510 = vector.shape_cast %509 : vector<1x128x32xf32> to vector<128x32xf32>
    %cst_497 = arith.constant dense<0.000000e+00> : vector<2x32xf32>
    %511 = tpu.matmul %504, %510, %cst_497 {dimension_numbers = #tpu.dot_dimension_numbers<[1], [0], [0], [1], [0, 0, 1, 1], [], []>} : vector<2x128xf32>, vector<128x32xf32>, vector<2x32xf32> -> vector<2x32xf32>
    %512 = arith.addf %503, %511 : vector<2x32xf32>
    %c48_498 = arith.constant 48 : index
    %c0_499 = arith.constant 0 : index
    %513 = vector.load %arg14[%c48_498, %c0_499] : memref<50x128xf32, #tpu.memory_space<vmem>>, vector<2x128xf32>
    %c24_500 = arith.constant 24 : index
    %c0_501 = arith.constant 0 : index
    %c0_502 = arith.constant 0 : index
    %514 = vector.load %arg7[%c24_500, %c0_501, %c0_502] : memref<25x128x32xf32, #tpu.memory_space<vmem>>, vector<1x128x32xf32>
    %515 = vector.shape_cast %514 : vector<1x128x32xf32> to vector<128x32xf32>
    %cst_503 = arith.constant dense<0.000000e+00> : vector<2x32xf32>
    %516 = tpu.matmul %513, %515, %cst_503 {dimension_numbers = #tpu.dot_dimension_numbers<[1], [0], [0], [1], [0, 0, 1, 1], [], []>} : vector<2x128xf32>, vector<128x32xf32>, vector<2x32xf32> -> vector<2x32xf32>
    %517 = arith.addf %508, %516 : vector<2x32xf32>
    %c24_504 = arith.constant 24 : index
    %c0_505 = arith.constant 0 : index
    %c0_506 = arith.constant 0 : index
    %518 = vector.load %arg8[%c24_504, %c0_505, %c0_506] : memref<25x128x32xf32, #tpu.memory_space<vmem>>, vector<1x128x32xf32>
    %519 = vector.shape_cast %518 : vector<1x128x32xf32> to vector<128x32xf32>
    %cst_507 = arith.constant dense<0.000000e+00> : vector<2x32xf32>
    %520 = tpu.matmul %513, %519, %cst_507 {dimension_numbers = #tpu.dot_dimension_numbers<[1], [0], [0], [1], [0, 0, 1, 1], [], []>} : vector<2x128xf32>, vector<128x32xf32>, vector<2x32xf32> -> vector<2x32xf32>
    %521 = arith.addf %512, %520 : vector<2x32xf32>
    %c0_508 = arith.constant 0 : index
    %c0_509 = arith.constant 0 : index
    %522 = vector.load %arg9[%c0_508, %c0_509] : memref<1x32xf32, #tpu.memory_space<vmem>>, vector<1x32xf32>
    %523 = vector.broadcast %522 : vector<1x32xf32> to vector<2x32xf32>
    %524 = arith.addf %517, %523 : vector<2x32xf32>
    %c0_510 = arith.constant 0 : index
    %c0_511 = arith.constant 0 : index
    %525 = vector.load %arg10[%c0_510, %c0_511] : memref<1x32xf32, #tpu.memory_space<vmem>>, vector<1x32xf32>
    %526 = vector.broadcast %525 : vector<1x32xf32> to vector<2x32xf32>
    %527 = arith.addf %521, %526 : vector<2x32xf32>
    %c0_512 = arith.constant 0 : index
    %c0_513 = arith.constant 0 : index
    %528 = vector.load %arg11[%c0_512, %c0_513] : memref<2x32xf32, #tpu.memory_space<vmem>>, vector<2x32xf32>
    %529 = math.exp %527 : vector<2x32xf32>
    %530 = arith.mulf %528, %529 : vector<2x32xf32>
    %531 = arith.addf %524, %530 : vector<2x32xf32>
    %c0_514 = arith.constant 0 : index
    %c0_515 = arith.constant 0 : index
    %532 = vector.load %arg12[%c0_514, %c0_515] : memref<2x32xf32, #tpu.memory_space<vmem>>, vector<2x32xf32>
    tpu.vector_store %arg12[%c0_514, %c0_515], %531 {strides = array<i32>} : memref<2x32xf32, #tpu.memory_space<vmem>>, vector<2x32xf32>,
    return
  }
}

</mosaic_0001>

<bundles_post_ra>
// kernel: encoder_forward.1
= control target key start
LH: loop header
LB: loop body
LE: loop exit
PB: predicated region body
PF: predicated region fallthrough
CT: control target
= control target key end

     0   :  { %vm239_vm0 = vcmask 1043456   ;;  %vm240_vm1 = vcmask 1044480   ;;  %v16916_v2 = vmov 65535   ;;  %vm184_vm2 = vcmask 203776   ;;  %s21811_s0 = inlined_call_operand.vmem [shape: bf16[288,25], index: 0, kind: input, shape index: {}]   ;;  %s21812_s1 = inlined_call_operand.vmem [shape: bf16[25,64], index: 1, kind: input, shape index: {}]   ;;  %s21813_s2 = inlined_call_operand.vmem [shape: f32[1,64], index: 2, kind: input, shape index: {}]   ;;  %s21814_s3 = inlined_call_operand.vmem [shape: f32[1,64], index: 3, kind: input, shape index: {}]   ;;  %s21815_s4 = inlined_call_operand.vmem [shape: f32[9,64,128], index: 4, kind: input, shape index: {}]   ;;  %s21816_s5 = inlined_call_operand.vmem [shape: f32[1,128], index: 5, kind: input, shape index: {}]   ;;  %s21817_s6 = inlined_call_operand.vmem [shape: f32[1,128], index: 6, kind: input, shape index: {}]   ;;  %s21818_s7 = inlined_call_operand.vmem [shape: f32[25,128,32], index: 7, kind: input, shape index: {}]   ;;  %s21819_s8 = inlined_call_operand.vmem [shape: f32[25,128,32], index: 8, kind: input, shape index: {}]   ;;  %s21820_s9 = inlined_call_operand.vmem [shape: f32[1,32], index: 9, kind: input, shape index: {}]   ;;  %s21821_s10 = inlined_call_operand.vmem [shape: f32[1,32], index: 10, kind: input, shape index: {}]   ;;  %s21822_s11 = inlined_call_operand.vmem [shape: f32[2,32], index: 11, kind: input, shape index: {}]   ;;  %s21823_s12 = inlined_call_operand.hbm [shape: f32[2,32], index: 12, kind: output, shape index: {}]  }
   0x1   :  { %v16866_v0 = vld [vmem:[%s21812_s1] sm:$0xff]   ;;  %v16867_v1 = vld [vmem:[%s21812_s1 + $0x8] sm:$0x1f]   ;;  %v241_v3 = vsel %vm239_vm0, 4294967295, %v16916_v2  ;;  %v16870_v8 = vld [vmem:[%s21811_s0 + $0x10] sm:$0xff]  }
   0x2   :  { %12216 = vmatprep.subr.bf16.mxu0 %v16866_v0  ;;  %v16868_v4 = vld [vmem:[%s21811_s0] sm:$0xff]   ;;  %v242_v5 = vsel %vm240_vm1, %v241_v3, 0  ;;  %v16869_v7 = vld [vmem:[%s21811_s0 + $0x8] sm:$0xff]   ;;  %v16871_v9 = vld [vmem:[%s21811_s0 + $0x18] sm:$0xff]  }
   0x3   :  { %12217 = vmatpush3.bf16.msra.mxu0 %v16866_v0  ;;  %v244_v6 = vand.u32 %v16867_v1, %v242_v5  ;;  %12220 = vmatprep.mubr.msk.bf16.mxu0 %vm184_vm2, %v16868_v4  ;;  %v16872_v10 = vld [vmem:[%s21811_s0 + $0x20] sm:$0xff]  }
   0x5   :  { %12218 = vmatprep.subr.bf16.mxu0 %v244_v6 }
   0x7   :  { %12219 = vmatpush3.bf16.msra.mxu0 %v244_v6 }
   0xa   :  { %12221 = vmatmul.mubr.msk.bf16.vlgmr.msra.gmra.mrb[0].mxu0 %vm184_vm2, %v16869_v7 }
   0xb   :  { %12224 = vmatprep.mubr.msk.bf16.mxu0 %vm184_vm2, %v16870_v8 }
  0x12   :  { %12225 = vmatmul.mubr.msk.bf16.gmra.mrb[4].mxu0 %vm184_vm2, %v16871_v9 }
  0x13   :  { %12228 = vmatprep.mubr.msk.bf16.mxu0 %vm184_vm2, %v16872_v10 }
  0x14   :  { %17 = vsyncpa [#allocation5], 0  ;;  %v16873_v11 = vld [vmem:[%s21811_s0 + $0x28] sm:$0xff]   ;;  %v16874_v12 = vld [vmem:[%s21811_s0 + $0x30] sm:$0xff]   ;;  %vm423_vm3 = vcmask 523264   ;;  %s16920_s18 = smov [#allocation4]  }
  0x15   :  { %v16875_v13 = vld [vmem:[%s21811_s0 + $0x38] sm:$0xff]   ;;  %v16876_v14 = vld [vmem:[%s21811_s0 + $0x40] sm:$0xff]   ;;  %v16877_v15 = vld [vmem:[%s21811_s0 + $0x48] sm:$0xff]   ;;  %s9666_s19 = sshll.u32 %s16920_s18, 4  ;;  %s9667_s19 = int_to_ptr.vmem [resolvable:$true] %s9666_s19 }
  0x16   :  { %v16878_v16 = vld [vmem:[%s21811_s0 + $0x50] sm:$0xff]   ;;  %v16879_v17 = vld [vmem:[%s21811_s0 + $0x58] sm:$0xff]   ;;  %v16880_v18 = vld [vmem:[%s21811_s0 + $0x60] sm:$0xff]   ;;  %p16897_p1 = scmp.lt.s32.totalorder %s9667_s19, %s9667_s19 }
  0x17   :  { %v16881_v19 = vld [vmem:[%s21811_s0 + $0x68] sm:$0xff]   ;;  %v16882_v20 = vld [vmem:[%s21811_s0 + $0x70] sm:$0xff]   ;;  %v16883_v21 = vld [vmem:[%s21811_s0 + $0x78] sm:$0xff]  }
  0x18   :  { %v16884_v22 = vld [vmem:[%s21811_s0 + $0x80] sm:$0xff]   ;;  %v16885_v23 = vld [vmem:[%s21811_s0 + $0x88] sm:$0xff]  }
  0x1a   :  { %12229 = vmatmul.mubr.msk.bf16.gmra.mrb[8].mxu0 %vm184_vm2, %v16873_v11 }
  0x1b   :  { %12232 = vmatprep.mubr.msk.bf16.mxu0 %vm184_vm2, %v16874_v12 }
  0x22   :  { %12233 = vmatmul.mubr.msk.bf16.gmra.mrb[12].mxu0 %vm184_vm2, %v16875_v13 }
  0x23   :  { %12236 = vmatprep.mubr.msk.bf16.mxu0 %vm184_vm2, %v16876_v14 }
  0x2a   :  { %12237 = vmatmul.mubr.msk.bf16.gmra.mrb[16].mxu0 %vm184_vm2, %v16877_v15 }
  0x2b   :  { %12240 = vmatprep.mubr.msk.bf16.mxu0 %vm184_vm2, %v16878_v16 }
  0x32   :  { %12241 = vmatmul.mubr.msk.bf16.gmra.mrb[20].mxu0 %vm184_vm2, %v16879_v17 }
  0x33   :  { %12244 = vmatprep.mubr.msk.bf16.mxu0 %vm184_vm2, %v16880_v18 }
  0x3a   :  { %12245 = vmatmul.mubr.msk.bf16.gmra.mrb[24].mxu0 %vm184_vm2, %v16881_v19 }
  0x3b   :  { %12248 = vmatprep.mubr.msk.bf16.mxu0 %vm184_vm2, %v16882_v20 }
  0x42   :  { %12249 = vmatmul.mubr.msk.bf16.gmra.mrb[28].mxu0 %vm184_vm2, %v16883_v21 }
  0x43   :  { %12252 = vmatprep.mubr.msk.bf16.mxu0 %vm184_vm2, %v16884_v22 }
  0x4a   :  { %12253 = vmatmul.mubr.msk.bf16.gmra.mrb[32].mxu0 %vm184_vm2, %v16885_v23 }
  0xdd   :  { %v17064_v24 = vpop.f32.mrb[0].mxu0 }
  0xde   :  { %v17066_v25 = vpop.f32.mrb[1].mxu0  ;;  %v427_v31 = vsel %vm423_vm3, %v17064_v24, 0.0 }
  0xdf   :  { %v17068_v26 = vpop.f32.mrb[2].mxu0  ;;  %v424_v28 = vsel %vm423_vm3, %v17066_v25, 0.0 }
  0xe0   :  { %v17070_v27 = vpop.f32.mrb[3].mxu0  ;;  %v429_v33 = vsel %vm423_vm3, %v17068_v26, 0.0 }
  0xe1   :  { %v425_v29 = vsel %vm423_vm3, %v17070_v27, 0.0 }
  0xe2   :  { %v426_v30 = vadd.f32 %v425_v29, %v424_v28 }
  0xe4   :  { %v428_v32 = vadd.f32 %v427_v31, %v426_v30 }
  0xe5   :  { %v17080_v34 = vpop.f32.mrb[4].mxu0 }
  0xe6   :  { %v17082_v35 = vpop.f32.mrb[5].mxu0  ;;  %v430_v36 = vadd.f32 %v429_v33, %v428_v32  ;;  %v435_v43 = vsel %vm423_vm3, %v17080_v34, 0.0 }
  0xe7   :  { %v431_v37 = vsel %vm423_vm3, %v17082_v35, 0.0  ;;  %v17086_v38 = vpop.f32.mrb[6].mxu0 }
  0xe8   :  { %v432_v39 = vadd.f32 %v431_v37, %v430_v36  ;;  %v17088_v40 = vpop.f32.mrb[7].mxu0  ;;  %v437_v45 = vsel %vm423_vm3, %v17086_v38, 0.0 }
  0xe9   :  { %v433_v41 = vsel %vm423_vm3, %v17088_v40, 0.0 }
  0xea   :  { %v434_v42 = vadd.f32 %v433_v41, %v432_v39 }
  0xec   :  { %v436_v44 = vadd.f32 %v435_v43, %v434_v42 }
  0xed   :  { %v17096_v46 = vpop.f32.mrb[8].mxu0 }
  0xee   :  { %v17098_v47 = vpop.f32.mrb[9].mxu0  ;;  %v438_v48 = vadd.f32 %v437_v45, %v436_v44  ;;  %v443_v55 = vsel %vm423_vm3, %v17096_v46, 0.0 }
  0xef   :  { %v439_v49 = vsel %vm423_vm3, %v17098_v47, 0.0  ;;  %v17102_v50 = vpop.f32.mrb[10].mxu0 }
  0xf0   :  { %v440_v51 = vadd.f32 %v439_v49, %v438_v48  ;;  %v17104_v52 = vpop.f32.mrb[11].mxu0  ;;  %v445_v57 = vsel %vm423_vm3, %v17102_v50, 0.0 }
  0xf1   :  { %v441_v53 = vsel %vm423_vm3, %v17104_v52, 0.0 }
  0xf2   :  { %v442_v54 = vadd.f32 %v441_v53, %v440_v51 }
  0xf4   :  { %v444_v56 = vadd.f32 %v443_v55, %v442_v54 }
  0xf5   :  { %v17112_v58 = vpop.f32.mrb[12].mxu0 }
  0xf6   :  { %v17114_v59 = vpop.f32.mrb[13].mxu0  ;;  %v446_v60 = vadd.f32 %v445_v57, %v444_v56  ;;  %v451_v3 = vsel %vm423_vm3, %v17112_v58, 0.0 }
  0xf7   :  { %v447_v61 = vsel %vm423_vm3, %v17114_v59, 0.0  ;;  %v17118_v62 = vpop.f32.mrb[14].mxu0 }
  0xf8   :  { %v448_v63 = vadd.f32 %v447_v61, %v446_v60  ;;  %v17120_v0 = vpop.f32.mrb[15].mxu0  ;;  %v453_v5 = vsel %vm423_vm3, %v17118_v62, 0.0 }
  0xf9   :  { %v449_v1 = vsel %vm423_vm3, %v17120_v0, 0.0 }
  0xfa   :  { %v450_v2 = vadd.f32 %v449_v1, %v448_v63 }
  0xfc   :  { %v452_v4 = vadd.f32 %v451_v3, %v450_v2 }
  0xfd   :  { %v17128_v6 = vpop.f32.mrb[16].mxu0 }
  0xfe   :  { %v17130_v7 = vpop.f32.mrb[17].mxu0  ;;  %v454_v8 = vadd.f32 %v453_v5, %v452_v4  ;;  %v459_v15 = vsel %vm423_vm3, %v17128_v6, 0.0 }
  0xff   :  { %v455_v9 = vsel %vm423_vm3, %v17130_v7, 0.0  ;;  %v17134_v10 = vpop.f32.mrb[18].mxu0 }
 0x100   :  { %v456_v11 = vadd.f32 %v455_v9, %v454_v8  ;;  %v17136_v12 = vpop.f32.mrb[19].mxu0  ;;  %v461_v17 = vsel %vm423_vm3, %v17134_v10, 0.0 }
 0x101   :  { %v457_v13 = vsel %vm423_vm3, %v17136_v12, 0.0 }
 0x102   :  { %v458_v14 = vadd.f32 %v457_v13, %v456_v11 }
 0x104   :  { %v460_v16 = vadd.f32 %v459_v15, %v458_v14 }
 0x105   :  { %v17144_v18 = vpop.f32.mrb[20].mxu0 }
 0x106   :  { %v17146_v19 = vpop.f32.mrb[21].mxu0  ;;  %v462_v20 = vadd.f32 %v461_v17, %v460_v16  ;;  %v467_v31 = vsel %vm423_vm3, %v17144_v18, 0.0 }
 0x107   :  { %v463_v21 = vsel %vm423_vm3, %v17146_v19, 0.0  ;;  %v17150_v22 = vpop.f32.mrb[22].mxu0 }
 0x108   :  { %v464_v23 = vadd.f32 %v463_v21, %v462_v20  ;;  %v17152_v28 = vpop.f32.mrb[23].mxu0  ;;  %v469_v33 = vsel %vm423_vm3, %v17150_v22, 0.0 }
 0x109   :  { %v465_v29 = vsel %vm423_vm3, %v17152_v28, 0.0 }
 0x10a   :  { %v466_v30 = vadd.f32 %v465_v29, %v464_v23 }
 0x10c   :  { %v468_v32 = vadd.f32 %v467_v31, %v466_v30 }
 0x10d   :  { %v17160_v36 = vpop.f32.mrb[24].mxu0 }
 0x10e   :  { %v17162_v37 = vpop.f32.mrb[25].mxu0  ;;  %v470_v39 = vadd.f32 %v469_v33, %v468_v32  ;;  %v475_v49 = vsel %vm423_vm3, %v17160_v36, 0.0 }
 0x10f   :  { %v471_v41 = vsel %vm423_vm3, %v17162_v37, 0.0  ;;  %v17166_v42 = vpop.f32.mrb[26].mxu0 }
 0x110   :  { %v472_v43 = vadd.f32 %v471_v41, %v470_v39  ;;  %v17168_v44 = vpop.f32.mrb[27].mxu0  ;;  %v477_v53 = vsel %vm423_vm3, %v17166_v42, 0.0 }
 0x111   :  { %v473_v45 = vsel %vm423_vm3, %v17168_v44, 0.0 }
 0x112   :  { %v474_v48 = vadd.f32 %v473_v45, %v472_v43 }
 0x114   :  { %v476_v51 = vadd.f32 %v475_v49, %v474_v48 }
 0x115   :  { %v12250_v54 = vpop.f32.mrb[28].mxu0 }
 0x116   :  { %v392_v55 = vpop.f32.mrb[29].mxu0  ;;  %v478_v56 = vadd.f32 %v477_v53, %v476_v51  ;;  %v483_v3 = vsel %vm423_vm3, %v12250_v54, 0.0 }
 0x117   :  { %v479_v57 = vsel %vm423_vm3, %v392_v55, 0.0  ;;  %v12251_v60 = vpop.f32.mrb[30].mxu0 }
 0x118   :  { %v480_v61 = vadd.f32 %v479_v57, %v478_v56  ;;  %v395_v63 = vpop.f32.mrb[31].mxu0  ;;  %v485_v5 = vsel %vm423_vm3, %v12251_v60, 0.0 }
 0x119   :  { %v481_v1 = vsel %vm423_vm3, %v395_v63, 0.0 }
 0x11a   :  { %v482_v2 = vadd.f32 %v481_v1, %v480_v61 }
 0x11c   :  { %v484_v4 = vadd.f32 %v483_v3, %v482_v2 }
 0x11d   :  { %v12254_v8 = vpop.f32.mrb[32].mxu0 }
 0x11e   :  { %v408_v9 = vpop.f32.mrb[33].mxu0  ;;  %v486_v11 = vadd.f32 %v485_v5, %v484_v4  ;;  %v491_v21 = vsel %vm423_vm3, %v12254_v8, 0.0 }
 0x11f   :  { %v487_v13 = vsel %vm423_vm3, %v408_v9, 0.0  ;;  %v12255_v14 = vpop.f32.mrb[34].mxu0 }
 0x120   :  { %v488_v15 = vadd.f32 %v487_v13, %v486_v11  ;;  %v411_v16 = vpop.f32.mrb[35].mxu0  ;;  %v493_v29 = vsel %vm423_vm3, %v12255_v14, 0.0 }
 0x121   :  { %v489_v17 = vsel %vm423_vm3, %v411_v16, 0.0 }
 0x122   :  { %v490_v20 = vadd.f32 %v489_v17, %v488_v15 }
 0x124   :  { %v492_v23 = vadd.f32 %v491_v21, %v490_v20 }
 0x126   :  { %v494_v30 = vadd.f32 %v493_v29, %v492_v23 }
 0x128   :  { %v495_v31 = vrot.slane %v494_v30, 4 }
 0x12a   :  { %v496_v32 = vadd.f32 %v495_v31, %v494_v30 }
 0x12c   :  { %v497_v33 = vrot.slane %v496_v32, 2 }
 0x12e   :  { %v498_v39 = vadd.f32 %v497_v33, %v496_v32 }
 0x130   :  { %v499_v41 = vrot.slane %v498_v39, 1 }
 0x132   :  { %v500_v43 = vadd.f32 %v499_v41, %v498_v39 }
 0x134   :  { %v501_v45 = vmul.f32 0.0034722222, %v500_v43 }
 0x136   :  { %v17185_v48 = vsub.f32 %v17066_v25, %v501_v45  ;;  %v17188_v49 = vsub.f32 %v17070_v27, %v501_v45  ;;  %v17191_v51 = vsub.f32 %v17064_v24, %v501_v45  ;;  %v17194_v53 = vsub.f32 %v17068_v26, %v501_v45 }
 0x137   :  { %v17197_v56 = vsub.f32 %v17082_v35, %v501_v45  ;;  %v17200_v57 = vsub.f32 %v17088_v40, %v501_v45  ;;  %v17203_v61 = vsub.f32 %v17080_v34, %v501_v45  ;;  %v17206_v25 = vsub.f32 %v17086_v38, %v501_v45 }
 0x138   :  { %v17209_v27 = vsub.f32 %v17098_v47, %v501_v45  ;;  %v17212_v24 = vsub.f32 %v17104_v52, %v501_v45  ;;  %v17215_v26 = vsub.f32 %v17096_v46, %v501_v45  ;;  %v17218_v35 = vsub.f32 %v17102_v50, %v501_v45 }
 0x139   :  { %v17221_v40 = vsub.f32 %v17114_v59, %v501_v45  ;;  %v17224_v34 = vsub.f32 %v17120_v0, %v501_v45  ;;  %v17227_v38 = vsub.f32 %v17112_v58, %v501_v45  ;;  %v17230_v47 = vsub.f32 %v17118_v62, %v501_v45 }
 0x13a   :  { %v17233_v52 = vsub.f32 %v17130_v7, %v501_v45  ;;  %v17236_v46 = vsub.f32 %v17136_v12, %v501_v45  ;;  %v17239_v50 = vsub.f32 %v17128_v6, %v501_v45  ;;  %v17242_v59 = vsub.f32 %v17134_v10, %v501_v45 }
 0x13b   :  { %v17245_v0 = vsub.f32 %v17146_v19, %v501_v45  ;;  %v17248_v58 = vsub.f32 %v17152_v28, %v501_v45  ;;  %v17251_v62 = vsub.f32 %v17144_v18, %v501_v45  ;;  %v17254_v7 = vsub.f32 %v17150_v22, %v501_v45 }
 0x13c   :  { %v17257_v12 = vsub.f32 %v17162_v37, %v501_v45  ;;  %v17260_v6 = vsub.f32 %v17168_v44, %v501_v45  ;;  %v17263_v10 = vsub.f32 %v17160_v36, %v501_v45  ;;  %v17266_v19 = vsub.f32 %v17166_v42, %v501_v45 }
 0x13d   :  { %v17268_v28 = vsub.f32 %v392_v55, %v501_v45  ;;  %v17270_v1 = vsub.f32 %v395_v63, %v501_v45  ;;  %v17272_v18 = vsub.f32 %v12250_v54, %v501_v45  ;;  %v17274_v22 = vsub.f32 %v12251_v60, %v501_v45 }
 0x13e   :  { %v17276_v2 = vsub.f32 %v408_v9, %v501_v45  ;;  %v17278_v37 = vsub.f32 %v411_v16, %v501_v45  ;;  %v17280_v44 = vsub.f32 %v12254_v8, %v501_v45  ;;  %v17282_v3 = vsub.f32 %v12255_v14, %v501_v45  ;;  %v9714_v45 = vld [vmem:[%s21815_s4 + $0x40] sm:$0xff] }
 0x13f   :  { %v538_v36 = vmul.f32 %v17185_v48, %v17185_v48  ;;  %v539_v42 = vmul.f32 %v17188_v49, %v17188_v49  ;;  %v540_v54 = vmul.f32 %v17191_v51, %v17191_v51  ;;  %v541_v55 = vmul.f32 %v17194_v53, %v17194_v53 }
 0x140   :  { %v542_v5 = vmul.f32 %v17197_v56, %v17197_v56  ;;  %v543_v11 = vmul.f32 %v17200_v57, %v17200_v57  ;;  %v544_v15 = vmul.f32 %v17203_v61, %v17203_v61  ;;  %v545_v20 = vmul.f32 %v17206_v25, %v17206_v25 }
 0x141   :  { %v574_v60 = vsel %vm423_vm3, %v538_v36, 0.0  ;;  %v575_v63 = vsel %vm423_vm3, %v539_v42, 0.0  ;;  %v577_v8 = vsel %vm423_vm3, %v540_v54, 0.0  ;;  %v579_v13 = vsel %vm423_vm3, %v541_v55, 0.0  ;;  %v9715_v36 = vld [vmem:[%s21815_s4 + $0x48] sm:$0xff] }
 0x142   :  { %v576_v4 = vadd.f32 %v575_v63, %v574_v60  ;;  %v581_v16 = vsel %vm423_vm3, %v542_v5, 0.0  ;;  %v583_v21 = vsel %vm423_vm3, %v543_v11, 0.0  ;;  %v546_v29 = vmul.f32 %v17209_v27, %v17209_v27 }
 0x143   :  { %v585_v30 = vsel %vm423_vm3, %v544_v15, 0.0  ;;  %v547_v32 = vmul.f32 %v17212_v24, %v17212_v24  ;;  %v587_v33 = vsel %vm423_vm3, %v545_v20, 0.0  ;;  %v548_v41 = vmul.f32 %v17215_v26, %v17215_v26 }
 0x144   :  { %v578_v9 = vadd.f32 %v577_v8, %v576_v4  ;;  %v589_v43 = vsel %vm423_vm3, %v546_v29, 0.0  ;;  %v17321_v54 = vpack.c.bf16 %v9715_v36, %v9714_v45  ;;  %v549_v55 = vmul.f32 %v17218_v35, %v17218_v35  ;;  %v9716_v8 = vld [vmem:[%s21815_s4 + $0x50] sm:$0xff] }
 0x145   :  { %v591_v60 = vsel %vm423_vm3, %v547_v32, 0.0  ;;  %v550_v4 = vmul.f32 %v17221_v40, %v17221_v40  ;;  %v593_v5 = vsel %vm423_vm3, %v548_v41, 0.0  ;;  %v9721_v41 = vld [vmem:[%s21815_s4 + $0x78] sm:$0xff] }
 0x146   :  { %v580_v14 = vadd.f32 %v579_v13, %v578_v9  ;;  %14862 = vmatprep.subr.bf16.mxu1 %v17321_v54  ;;  %15006 = vmatprep.subr.bf16.mxu0 %v17321_v54  ;;  %v9717_v9 = vld [vmem:[%s21815_s4 + $0x58] sm:$0xff]  ;;  %v595_v15 = vsel %vm423_vm3, %v549_v55, 0.0  ;;  %v923_v55 = vld [vmem:[%s21815_s4 + $0x8] sm:$0xff] }
 0x147   :  { %14864 = vmatpush3.bf16.msra.mxu1 %v17321_v54  ;;  %15008 = vmatpush3.bf16.msra.mxu0 %v17321_v54  ;;  %v17339_v13 = vpack.c.bf16 %v9717_v9, %v9716_v8  ;;  %v597_v20 = vsel %vm423_vm3, %v550_v4, 0.0  ;;  %v555_v4 = vmul.f32 %v17236_v46, %v17236_v46  ;;  %v556_v9 = vmul.f32 %v17239_v50, %v17239_v50 }
 0x148   :  { %v582_v17 = vadd.f32 %v581_v16, %v580_v14  ;;  %v551_v14 = vmul.f32 %v17224_v34, %v17224_v34 }
 0x149   :  { %14866 = vmatprep.subr.bf16.mxu1 %v17339_v13  ;;  %15010 = vmatprep.subr.bf16.mxu0 %v17339_v13 }
 0x14a   :  { %v584_v23 = vadd.f32 %v583_v21, %v582_v17  ;;  %v552_v17 = vmul.f32 %v17227_v38, %v17227_v38  ;;  %v9718_v21 = vld [vmem:[%s21815_s4 + $0x60] sm:$0xff]  ;;  %v599_v32 = vsel %vm423_vm3, %v551_v14, 0.0 }
 0x14b   :  { %14868 = vmatpush3.bf16.msra.mxu1 %v17339_v13  ;;  %15012 = vmatpush3.bf16.msra.mxu0 %v17339_v13 }
 0x14c   :  { %v586_v31 = vadd.f32 %v585_v30, %v584_v23  ;;  %v9719_v23 = vld [vmem:[%s21815_s4 + $0x68] sm:$0xff]  ;;  %v601_v45 = vsel %vm423_vm3, %v552_v17, 0.0 }
 0x14d   :  { %v17357_v30 = vpack.c.bf16 %v9719_v23, %v9718_v21  ;;  %v609_v21 = vsel %vm423_vm3, %v556_v9, 0.0 }
 0x14e   :  { %v588_v39 = vadd.f32 %v587_v33, %v586_v31  ;;  %v553_v31 = vmul.f32 %v17230_v47, %v17230_v47 }
 0x14f   :  { %14870 = vmatprep.subr.bf16.mxu1 %v17357_v30  ;;  %15014 = vmatprep.subr.bf16.mxu0 %v17357_v30 }
 0x150   :  { %v590_v42 = vadd.f32 %v589_v43, %v588_v39  ;;  %v9720_v39 = vld [vmem:[%s21815_s4 + $0x70] sm:$0xff]  ;;  %v554_v43 = vmul.f32 %v17233_v52, %v17233_v52  ;;  %14872 = vmatpush3.bf16.msra.mxu1 %v17357_v30  ;;  %15016 = vmatpush3.bf16.msra.mxu0 %v17357_v30 }
 0x151   :  { %v17375_v36 = vpack.c.bf16 %v9721_v41, %v9720_v39 }
 0x152   :  { %v592_v63 = vadd.f32 %v591_v60, %v590_v42  ;;  %v922_v42 = vld [vmem:[%s21815_s4] sm:$0xff] }
 0x153   :  { %14874 = vmatprep.subr.bf16.mxu1 %v17375_v36  ;;  %15018 = vmatprep.subr.bf16.mxu0 %v17375_v36 }
 0x154   :  { %v594_v11 = vadd.f32 %v593_v5, %v592_v63  ;;  %v17383_v63 = vpack.c.bf16 %v923_v55, %v922_v42  ;;  %v603_v5 = vsel %vm423_vm3, %v553_v31, 0.0  ;;  %14876 = vmatpush3.bf16.msra.mxu1 %v17375_v36  ;;  %15020 = vmatpush3.bf16.msra.mxu0 %v17375_v36  ;;  %v562_v55 = vmul.f32 %v17257_v12, %v17257_v12 }
 0x156   :  { %v596_v16 = vadd.f32 %v595_v15, %v594_v11  ;;  %v605_v11 = vsel %vm423_vm3, %v554_v43, 0.0  ;;  %14878 = vmatprep.subr.bf16.mxu1 %v17383_v63  ;;  %15022 = vmatprep.subr.bf16.mxu0 %v17383_v63  ;;  %v557_v15 = vmul.f32 %v17242_v59, %v17242_v59  ;;  %v561_v43 = vmul.f32 %v17254_v7, %v17254_v7 }
 0x158   :  { %v598_v29 = vadd.f32 %v597_v20, %v596_v16  ;;  %v607_v16 = vsel %vm423_vm3, %v555_v4, 0.0  ;;  %v558_v20 = vmul.f32 %v17245_v0, %v17245_v0  ;;  %v611_v31 = vsel %vm423_vm3, %v557_v15, 0.0 }
 0x15a   :  { %v600_v33 = vadd.f32 %v599_v32, %v598_v29  ;;  %v559_v29 = vmul.f32 %v17248_v58, %v17248_v58  ;;  %v613_v39 = vsel %vm423_vm3, %v558_v20, 0.0 }
 0x15c   :  { %v602_v60 = vadd.f32 %v601_v45, %v600_v33  ;;  %v560_v33 = vmul.f32 %v17251_v62, %v17251_v62  ;;  %v615_v45 = vsel %vm423_vm3, %v559_v29, 0.0 }
 0x15e   :  { %v604_v8 = vadd.f32 %v603_v5, %v602_v60  ;;  %v617_v60 = vsel %vm423_vm3, %v560_v33, 0.0  ;;  %v563_v5 = vmul.f32 %v17260_v6, %v17260_v6  ;;  %v568_v33 = vmul.f32 %v17272_v18, %v17272_v18 }
 0x160   :  { %v606_v14 = vadd.f32 %v605_v11, %v604_v8  ;;  %v619_v8 = vsel %vm423_vm3, %v561_v43, 0.0  ;;  %v564_v11 = vmul.f32 %v17263_v10, %v17263_v10  ;;  %v569_v43 = vmul.f32 %v17274_v22, %v17274_v22 }
 0x162   :  { %v608_v17 = vadd.f32 %v607_v16, %v606_v14  ;;  %v621_v14 = vsel %vm423_vm3, %v562_v55, 0.0  ;;  %v565_v16 = vmul.f32 %v17266_v19, %v17266_v19  ;;  %v570_v55 = vmul.f32 %v17276_v2, %v17276_v2 }
 0x164   :  { %v610_v23 = vadd.f32 %v609_v21, %v608_v17  ;;  %v623_v17 = vsel %vm423_vm3, %v563_v5, 0.0  ;;  %v566_v21 = vmul.f32 %v17268_v28, %v17268_v28  ;;  %v627_v10 = vsel %vm423_vm3, %v565_v16, 0.0 }
 0x165   :  { %v571_v5 = vmul.f32 %v17278_v37, %v17278_v37  ;;  %v573_v16 = vmul.f32 %v17282_v3, %v17282_v3  ;;  %v17453_v3 = vld [vmem:[%s21813_s2] ss:$0 sm:$0xff] }
 0x166   :  { %v612_v32 = vadd.f32 %v611_v31, %v610_v23  ;;  %v625_v23 = vsel %vm423_vm3, %v564_v11, 0.0  ;;  %v567_v31 = vmul.f32 %v17270_v1, %v17270_v1  ;;  %v572_v11 = vmul.f32 %v17280_v44, %v17280_v44 }
 0x168   :  { %v614_v41 = vadd.f32 %v613_v39, %v612_v32  ;;  %v629_v39 = vsel %vm423_vm3, %v566_v21, 0.0  ;;  %v641_v21 = vsel %vm423_vm3, %v572_v11, 0.0 }
 0x16a   :  { %v616_v42 = vadd.f32 %v615_v45, %v614_v41  ;;  %v631_v45 = vsel %vm423_vm3, %v567_v31, 0.0 }
 0x16c   :  { %v618_v4 = vadd.f32 %v617_v60, %v616_v42  ;;  %v633_v60 = vsel %vm423_vm3, %v568_v33, 0.0 }
 0x16e   :  { %v620_v9 = vadd.f32 %v619_v8, %v618_v4  ;;  %v635_v8 = vsel %vm423_vm3, %v569_v43, 0.0 }
 0x170   :  { %v622_v15 = vadd.f32 %v621_v14, %v620_v9  ;;  %v637_v14 = vsel %vm423_vm3, %v570_v55, 0.0 }
 0x172   :  { %v624_v20 = vadd.f32 %v623_v17, %v622_v15  ;;  %v639_v17 = vsel %vm423_vm3, %v571_v5, 0.0 }
 0x174   :  { %v626_v29 = vadd.f32 %v625_v23, %v624_v20 }
 0x176   :  { %v628_v32 = vadd.f32 %v627_v10, %v626_v29  ;;  %v643_v29 = vsel %vm423_vm3, %v573_v16, 0.0 }
 0x178   :  { %v630_v41 = vadd.f32 %v629_v39, %v628_v32 }
 0x17a   :  { %v632_v42 = vadd.f32 %v631_v45, %v630_v41 }
 0x17c   :  { %v634_v4 = vadd.f32 %v633_v60, %v632_v42 }
 0x17e   :  { %v636_v9 = vadd.f32 %v635_v8, %v634_v4  ;;  %v17459_v4 = vld [vmem:[%s21814_s3] ss:$0 sm:$0xff] }
 0x180   :  { %v638_v15 = vadd.f32 %v637_v14, %v636_v9 }
 0x182   :  { %v640_v20 = vadd.f32 %v639_v17, %v638_v15 }
 0x184   :  { %v642_v23 = vadd.f32 %v641_v21, %v640_v20 }
 0x186   :  { %v644_v31 = vadd.f32 %v643_v29, %v642_v23 }
 0x188   :  { %v645_v10 = vrot.slane %v644_v31, 4 }
 0x18a   :  { %v646_v32 = vadd.f32 %v645_v10, %v644_v31 }
 0x18c   :  { %v647_v33 = vrot.slane %v646_v32, 2 }
 0x18e   :  { %v648_v39 = vadd.f32 %v647_v33, %v646_v32 }
 0x190   :  { %v649_v41 = vrot.slane %v648_v39, 1 }
 0x192   :  { %v650_v43 = vadd.f32 %v649_v41, %v648_v39 }
 0x194   :  { %v651_v45 = vmul.f32 0.0034722222, %v650_v43 }
 0x196   :  { %v652_v42 = vadd.f32 1e-05, %v651_v45 }
 0x198   :  { %16886 = vrsqrt.f32 %v652_v42 }
 0x1a2   :  { %v16887_v55 = vpop.eup %16886 }
 0x1a3   :  { %v687_v60 = vmul.f32 %v16887_v55, %v17278_v37  ;;  %v654_v11 = vmul.f32 %v16887_v55, %v17185_v48  ;;  %v655_v15 = vmul.f32 %v16887_v55, %v17188_v49  ;;  %v656_v16 = vmul.f32 %v16887_v55, %v17191_v51 }
 0x1a4   :  { %v657_v37 = vmul.f32 %v16887_v55, %v17194_v53  ;;  %v658_v17 = vmul.f32 %v16887_v55, %v17197_v56  ;;  %v659_v20 = vmul.f32 %v16887_v55, %v17200_v57  ;;  %v660_v21 = vmul.f32 %v16887_v55, %v17203_v61 }
 0x1a5   :  { %v730_v5 = vmul.f32 %v17453_v3, %v687_v60  ;;  %v661_v23 = vmul.f32 %v16887_v55, %v17206_v25  ;;  %v662_v29 = vmul.f32 %v16887_v55, %v17209_v27  ;;  %v663_v48 = vmul.f32 %v16887_v55, %v17212_v24 }
 0x1a6   :  { %v664_v49 = vmul.f32 %v16887_v55, %v17215_v26  ;;  %v665_v51 = vmul.f32 %v16887_v55, %v17218_v35  ;;  %v666_v53 = vmul.f32 %v16887_v55, %v17221_v40  ;;  %v667_v31 = vmul.f32 %v16887_v55, %v17224_v34 }
 0x1a7   :  { %v773_v8 = vadd.f32 %v17459_v4, %v730_v5  ;;  %v668_v56 = vmul.f32 %v16887_v55, %v17227_v38  ;;  %v669_v57 = vmul.f32 %v16887_v55, %v17230_v47  ;;  %v670_v61 = vmul.f32 %v16887_v55, %v17233_v52 }
 0x1a8   :  { %v671_v25 = vmul.f32 %v16887_v55, %v17236_v46  ;;  %v672_v27 = vmul.f32 %v16887_v55, %v17239_v50  ;;  %v673_v24 = vmul.f32 %v16887_v55, %v17242_v59  ;;  %v674_v26 = vmul.f32 %v16887_v55, %v17245_v0 }
 0x1a9   :  { %vm809_vm4 = vcmp.ge.f32.partialorder %v773_v8, 0.0  ;;  %v845_v9 = vmul.f32 0.1, %v773_v8  ;;  %v675_v35 = vmul.f32 %v16887_v55, %v17248_v58  ;;  %v676_v40 = vmul.f32 %v16887_v55, %v17251_v62 }
 0x1aa   :  { %v677_v34 = vmul.f32 %v16887_v55, %v17254_v7  ;;  %v678_v38 = vmul.f32 %v16887_v55, %v17257_v12  ;;  %v679_v47 = vmul.f32 %v16887_v55, %v17260_v6  ;;  %v681_v52 = vmul.f32 %v16887_v55, %v17266_v19 }
 0x1ab   :  { %v881_v14 = vsel %vm809_vm4, %v773_v8, %v845_v9  ;;  %v682_v46 = vmul.f32 %v16887_v55, %v17268_v28  ;;  %v683_v50 = vmul.f32 %v16887_v55, %v17270_v1  ;;  %v684_v59 = vmul.f32 %v16887_v55, %v17272_v18 }
 0x1ac   :  { %917 = vst.msk [vmem:[#allocation2 + $0x108] sm:$0xff] %vm423_vm3, %v881_v14  ;;  %v685_v0 = vmul.f32 %v16887_v55, %v17274_v22  ;;  %v686_v58 = vmul.f32 %v16887_v55, %v17276_v2  ;;  %v688_v62 = vmul.f32 %v16887_v55, %v17280_v44  ;;  %v697_v7 = vmul.f32 %v17453_v3, %v654_v11 }
 0x1ad   :  { %v698_v12 = vmul.f32 %v17453_v3, %v655_v15  ;;  %v699_v6 = vmul.f32 %v17453_v3, %v656_v16  ;;  %v700_v19 = vmul.f32 %v17453_v3, %v657_v37  ;;  %v701_v28 = vmul.f32 %v17453_v3, %v658_v17 }
 0x1ae   :  { %v702_v1 = vmul.f32 %v17453_v3, %v659_v20  ;;  %v703_v18 = vmul.f32 %v17453_v3, %v660_v21  ;;  %v704_v22 = vmul.f32 %v17453_v3, %v661_v23  ;;  %v705_v2 = vmul.f32 %v17453_v3, %v662_v29 }
 0x1af   :  { %v706_v44 = vmul.f32 %v17453_v3, %v663_v48  ;;  %v707_v10 = vmul.f32 %v17453_v3, %v664_v49  ;;  %v708_v32 = vmul.f32 %v17453_v3, %v665_v51  ;;  %v709_v33 = vmul.f32 %v17453_v3, %v666_v53 }
 0x1b0   :  { %v710_v39 = vmul.f32 %v17453_v3, %v667_v31  ;;  %v711_v41 = vmul.f32 %v17453_v3, %v668_v56  ;;  %v712_v43 = vmul.f32 %v17453_v3, %v669_v57  ;;  %v713_v45 = vmul.f32 %v17453_v3, %v670_v61 }
 0x1b1   :  { %v714_v42 = vmul.f32 %v17453_v3, %v671_v25  ;;  %v715_v55 = vmul.f32 %v17453_v3, %v672_v27  ;;  %v716_v60 = vmul.f32 %v17453_v3, %v673_v24  ;;  %v717_v5 = vmul.f32 %v17453_v3, %v674_v26 }
 0x1b2   :  { %v718_v8 = vmul.f32 %v17453_v3, %v675_v35  ;;  %v719_v9 = vmul.f32 %v17453_v3, %v676_v40  ;;  %v720_v11 = vmul.f32 %v17453_v3, %v677_v34  ;;  %v721_v14 = vmul.f32 %v17453_v3, %v678_v38 }
 0x1b3   :  { %v722_v15 = vmul.f32 %v17453_v3, %v679_v47  ;;  %v724_v16 = vmul.f32 %v17453_v3, %v681_v52  ;;  %v725_v37 = vmul.f32 %v17453_v3, %v682_v46  ;;  %v726_v17 = vmul.f32 %v17453_v3, %v683_v50 }
 0x1b4   :  { %v727_v20 = vmul.f32 %v17453_v3, %v684_v59  ;;  %v728_v21 = vmul.f32 %v17453_v3, %v685_v0  ;;  %v729_v23 = vmul.f32 %v17453_v3, %v686_v58  ;;  %v731_v29 = vmul.f32 %v17453_v3, %v688_v62 }
 0x1b5   :  { %v740_v48 = vadd.f32 %v17459_v4, %v697_v7  ;;  %v17532_v49 = vadd.f32 %v17459_v4, %v698_v12  ;;  %v17535_v51 = vadd.f32 %v17459_v4, %v699_v6  ;;  %v17538_v53 = vadd.f32 %v17459_v4, %v700_v19 }
 0x1b6   :  { %v17541_v31 = vadd.f32 %v17459_v4, %v701_v28  ;;  %v17544_v56 = vadd.f32 %v17459_v4, %v702_v1  ;;  %v17547_v57 = vadd.f32 %v17459_v4, %v703_v18  ;;  %v17550_v3 = vadd.f32 %v17459_v4, %v704_v22 }
 0x1b7   :  { %v17553_v61 = vadd.f32 %v17459_v4, %v705_v2  ;;  %v17556_v25 = vadd.f32 %v17459_v4, %v706_v44  ;;  %v17559_v27 = vadd.f32 %v17459_v4, %v707_v10  ;;  %v17562_v24 = vadd.f32 %v17459_v4, %v708_v32 }
 0x1b8   :  { %v17565_v26 = vadd.f32 %v17459_v4, %v709_v33  ;;  %v17568_v35 = vadd.f32 %v17459_v4, %v710_v39  ;;  %v17571_v40 = vadd.f32 %v17459_v4, %v711_v41  ;;  %v17574_v34 = vadd.f32 %v17459_v4, %v712_v43 }
 0x1b9   :  { %v17577_v38 = vadd.f32 %v17459_v4, %v713_v45  ;;  %v17580_v47 = vadd.f32 %v17459_v4, %v714_v42  ;;  %v17583_v52 = vadd.f32 %v17459_v4, %v715_v55  ;;  %v17586_v46 = vadd.f32 %v17459_v4, %v716_v60 }
 0x1ba   :  { %v17589_v50 = vadd.f32 %v17459_v4, %v717_v5  ;;  %v17592_v59 = vadd.f32 %v17459_v4, %v718_v8  ;;  %v17595_v0 = vadd.f32 %v17459_v4, %v719_v9  ;;  %v17598_v58 = vadd.f32 %v17459_v4, %v720_v11 }
 0x1bb   :  { %v17601_v62 = vadd.f32 %v17459_v4, %v721_v14  ;;  %v17604_v7 = vadd.f32 %v17459_v4, %v722_v15  ;;  %v17607_v12 = vadd.f32 %v17459_v4, %v724_v16  ;;  %v17610_v6 = vadd.f32 %v17459_v4, %v725_v37 }
 0x1bc   :  { %v17613_v19 = vadd.f32 %v17459_v4, %v726_v17  ;;  %v17616_v28 = vadd.f32 %v17459_v4, %v727_v20  ;;  %v17619_v1 = vadd.f32 %v17459_v4, %v728_v21  ;;  %v17622_v18 = vadd.f32 %v17459_v4, %v729_v23 }
 0x1bd   :  { %v17625_v22 = vadd.f32 %v17459_v4, %v731_v29  ;;  %vm776_vm5 = vcmp.ge.f32.partialorder %v740_v48, 0.0  ;;  %vm777_vm6 = vcmp.ge.f32.partialorder %v17532_v49, 0.0  ;;  %vm778_vm7 = vcmp.ge.f32.partialorder %v17535_v51, 0.0 }
 0x1be   :  { %vm779_vm8 = vcmp.ge.f32.partialorder %v17538_v53, 0.0  ;;  %vm780_vm9 = vcmp.ge.f32.partialorder %v17541_v31, 0.0  ;;  %vm781_vm10 = vcmp.ge.f32.partialorder %v17544_v56, 0.0  ;;  %vm782_vm11 = vcmp.ge.f32.partialorder %v17547_v57, 0.0 }
 0x1bf   :  { %vm783_vm12 = vcmp.ge.f32.partialorder %v17550_v3, 0.0  ;;  %v812_v4 = vmul.f32 0.1, %v740_v48  ;;  %v813_v2 = vmul.f32 0.1, %v17532_v49  ;;  %vm787_vm0 = vcmp.ge.f32.partialorder %v17562_v24, 0.0 }
 0x1c0   :  { %v814_v44 = vmul.f32 0.1, %v17535_v51  ;;  %v815_v10 = vmul.f32 0.1, %v17538_v53  ;;  %v816_v32 = vmul.f32 0.1, %v17541_v31 }
 0x1c1   :  { %vm792_vm13 = vcmp.ge.f32.partialorder %v17577_v38, 0.0  ;;  %vm793_vm15 = vcmp.ge.f32.partialorder %v17580_v47, 0.0  ;;  %v817_v33 = vmul.f32 0.1, %v17544_v56  ;;  %v818_v39 = vmul.f32 0.1, %v17547_v57 }
 0x1c2   :  { %v819_v41 = vmul.f32 0.1, %v17550_v3  ;;  %v848_v43 = vsel %vm776_vm5, %v740_v48, %v812_v4  ;;  %vm794_vm2 = vcmp.ge.f32.partialorder %v17583_v52, 0.0  ;;  %v820_v45 = vmul.f32 0.1, %v17553_v61 }
 0x1c3   :  { %v821_v42 = vmul.f32 0.1, %v17556_v25  ;;  %v822_v55 = vmul.f32 0.1, %v17559_v27  ;;  %v849_v60 = vsel %vm777_vm6, %v17532_v49, %v813_v2  ;;  %884 = vst.msk [vmem:[#allocation2] sm:$0xff] %vm423_vm3, %v848_v43  ;;  %vm798_vm5 = vcmp.ge.f32.partialorder %v17595_v0, 0.0 }
 0x1c4   :  { %vm801_vm14 = vcmp.ge.f32.partialorder %v17604_v7, 0.0  ;;  %v823_v5 = vmul.f32 0.1, %v17562_v24  ;;  %v824_v8 = vmul.f32 0.1, %v17565_v26  ;;  %v850_v11 = vsel %vm778_vm7, %v17535_v51, %v814_v44  ;;  %885 = vst.msk [vmem:[#allocation2 + $0x8] sm:$0xff] %vm423_vm3, %v849_v60 }
 0x1c5   :  { %v825_v9 = vmul.f32 0.1, %v17568_v35  ;;  %v826_v14 = vmul.f32 0.1, %v17571_v40  ;;  %v827_v15 = vmul.f32 0.1, %v17574_v34  ;;  %v851_v37 = vsel %vm779_vm8, %v17538_v53, %v815_v10 }
 0x1c6   :  { %v828_v16 = vmul.f32 0.1, %v17577_v38  ;;  %886 = vst.msk [vmem:[#allocation2 + $0x10] sm:$0xff] %vm423_vm3, %v850_v11  ;;  %vm806_vm7 = vcmp.ge.f32.partialorder %v17616_v28, 0.0  ;;  %vm807_vm6 = vcmp.ge.f32.partialorder %v17619_v1, 0.0  ;;  %vm808_vm1 = vcmp.ge.f32.partialorder %v17622_v18, 0.0 }
 0x1c7   :  { %vm810_vm4 = vcmp.ge.f32.partialorder %v17625_v22, 0.0  ;;  %v829_v17 = vmul.f32 0.1, %v17580_v47  ;;  %v830_v20 = vmul.f32 0.1, %v17583_v52  ;;  %v852_v23 = vsel %vm780_vm9, %v17541_v31, %v816_v32  ;;  %887 = vst.msk [vmem:[#allocation2 + $0x18] sm:$0xff] %vm423_vm3, %v851_v37 }
 0x1c8   :  { %v831_v21 = vmul.f32 0.1, %v17586_v46  ;;  %v832_v29 = vmul.f32 0.1, %v17589_v50  ;;  %v833_v48 = vmul.f32 0.1, %v17592_v59  ;;  %v853_v51 = vsel %vm781_vm10, %v17544_v56, %v817_v33 }
 0x1c9   :  { %v834_v49 = vmul.f32 0.1, %v17595_v0  ;;  %888 = vst.msk [vmem:[#allocation2 + $0x20] sm:$0xff] %vm423_vm3, %v852_v23  ;;  %v835_v53 = vmul.f32 0.1, %v17598_v58  ;;  %v854_v2 = vsel %vm782_vm11, %v17547_v57, %v818_v39  ;;  %889 = vst.msk [vmem:[#allocation2 + $0x28] sm:$0xff] %vm423_vm3, %v853_v51  ;;  %v855_v56 = vsel %vm783_vm12, %v17550_v3, %v819_v41 }
 0x1ca   :  { %v836_v4 = vmul.f32 0.1, %v17601_v62  ;;  %v837_v31 = vmul.f32 0.1, %v17604_v7  ;;  %v839_v44 = vmul.f32 0.1, %v17607_v12 }
 0x1cb   :  { %v840_v10 = vmul.f32 0.1, %v17610_v6  ;;  %890 = vst.msk [vmem:[#allocation2 + $0x30] sm:$0xff] %vm423_vm3, %v854_v2  ;;  %v841_v32 = vmul.f32 0.1, %v17613_v19  ;;  %vm21824_vm8 = vcmp.ge.f32.partialorder %v17553_v61, 0.0 }
 0x1cc   :  { %v842_v33 = vmul.f32 0.1, %v17616_v28  ;;  %v843_v43 = vmul.f32 0.1, %v17619_v1  ;;  %v856_v57 = vsel %vm21824_vm8, %v17553_v61, %v820_v45  ;;  %891 = vst.msk [vmem:[#allocation2 + $0x38] sm:$0xff] %vm423_vm3, %v855_v56  ;;  %vm21825_vm9 = vcmp.ge.f32.partialorder %v17556_v25, 0.0 }
 0x1cd   :  { %v844_v39 = vmul.f32 0.1, %v17622_v18  ;;  %v846_v60 = vmul.f32 0.1, %v17625_v22  ;;  %v857_v3 = vsel %vm21825_vm9, %v17556_v25, %v821_v42  ;;  %892 = vst.msk [vmem:[#allocation2 + $0x40] sm:$0xff] %vm423_vm3, %v856_v57  ;;  %vm21826_vm10 = vcmp.ge.f32.partialorder %v17559_v27, 0.0 }
 0x1ce   :  { %v858_v41 = vsel %vm21826_vm10, %v17559_v27, %v822_v55  ;;  %v859_v61 = vsel %vm787_vm0, %v17562_v24, %v823_v5  ;;  %vm21827_vm11 = vcmp.ge.f32.partialorder %v17565_v26, 0.0  ;;  %vm21828_vm12 = vcmp.ge.f32.partialorder %v17568_v35, 0.0  ;;  %893 = vst.msk [vmem:[#allocation2 + $0x48] sm:$0xff] %vm423_vm3, %v857_v3  ;;  %v929_v37 = vld [vmem:[%s21815_s4 + $0x38] sm:$0xff]  ;;  %v9732_v56 = vld [vmem:[%s21815_s4 + $0xb0] sm:$0xff]  ;;  %v9737_v57 = vld [vmem:[%s21815_s4 + $0xc8] sm:$0xff] }
 0x1cf   :  { %v860_v45 = vsel %vm21827_vm11, %v17565_v26, %v824_v8  ;;  %v861_v11 = vsel %vm21828_vm12, %v17568_v35, %v825_v9  ;;  %vm21829_vm8 = vcmp.ge.f32.partialorder %v17571_v40, 0.0  ;;  %vm21830_vm9 = vcmp.ge.f32.partialorder %v17574_v34, 0.0  ;;  %894 = vst.msk [vmem:[#allocation2 + $0x50] sm:$0xff] %vm423_vm3, %v858_v41  ;;  %895 = vst.msk [vmem:[#allocation2 + $0x58] sm:$0xff] %vm423_vm3, %v859_v61  ;;  %v920_v9 = vld [vmem:[#allocation2] sm:$0xff]  ;;  %v9739_v3 = vld [vmem:[%s21815_s4 + $0xd8] sm:$0xff] }
 0x1d0   :  { %v862_v25 = vsel %vm21829_vm8, %v17571_v40, %v826_v14  ;;  %v863_v27 = vsel %vm21830_vm9, %v17574_v34, %v827_v15  ;;  %v864_v24 = vsel %vm792_vm13, %v17577_v38, %v828_v16  ;;  %v865_v26 = vsel %vm793_vm15, %v17580_v47, %v829_v17  ;;  %896 = vst.msk [vmem:[#allocation2 + $0x60] sm:$0xff] %vm423_vm3, %v860_v45  ;;  %v17845_v14 = vld [vmem:[#allocation2 + $0xc] sm:$0xff]  ;;  %v928_v16 = vld [vmem:[%s21815_s4 + $0x30] sm:$0xff]  ;;  %v1104_v41 = vld [vmem:[#allocation2 + $0xa] sm:$0x3] }
 0x1d1   :  { %897 = vst.msk [vmem:[#allocation2 + $0x68] sm:$0xff] %vm423_vm3, %v861_v11  ;;  %v866_v35 = vsel %vm794_vm2, %v17583_v52, %v830_v20  ;;  %vm21831_vm0 = vcmp.ge.f32.partialorder %v17586_v46, 0.0  ;;  %vm21832_vm13 = vcmp.ge.f32.partialorder %v17589_v50, 0.0  ;;  %vm21833_vm15 = vcmp.ge.f32.partialorder %v17592_v59, 0.0  ;;  %898 = vst.msk [vmem:[#allocation2 + $0x70] sm:$0xff] %vm423_vm3, %v862_v25  ;;  %v9726_v20 = vld [vmem:[%s21815_s4 + $0x80] sm:$0xff] }
 0x1d2   :  { %v867_v40 = vsel %vm21831_vm0, %v17586_v46, %v831_v21  ;;  %v868_v34 = vsel %vm21832_vm13, %v17589_v50, %v832_v29  ;;  %v869_v38 = vsel %vm21833_vm15, %v17592_v59, %v833_v48  ;;  %899 = vst.msk [vmem:[#allocation2 + $0x78] sm:$0xff] %vm423_vm3, %v863_v27  ;;  %900 = vst.msk [vmem:[#allocation2 + $0x80] sm:$0xff] %vm423_vm3, %v864_v24  ;;  %vm21834_vm2 = vcmp.ge.f32.partialorder %v17598_v58, 0.0  ;;  %v9727_v21 = vld [vmem:[%s21815_s4 + $0x88] sm:$0xff]  ;;  %v9728_v29 = vld [vmem:[%s21815_s4 + $0x90] sm:$0xff] }
 0x1d3   :  { %901 = vst.msk [vmem:[#allocation2 + $0x88] sm:$0xff] %vm423_vm3, %v865_v26  ;;  %v870_v47 = vsel %vm798_vm5, %v17595_v0, %v834_v49  ;;  %v871_v52 = vsel %vm21834_vm2, %v17598_v58, %v835_v53  ;;  %vm21835_vm10 = vcmp.ge.f32.partialorder %v17601_v62, 0.0  ;;  %v873_v50 = vsel %vm801_vm14, %v17604_v7, %v837_v31  ;;  %902 = vst.msk [vmem:[#allocation2 + $0x90] sm:$0xff] %vm423_vm3, %v866_v35  ;;  %v9729_v48 = vld [vmem:[%s21815_s4 + $0x98] sm:$0xff]  ;;  %v9730_v53 = vld [vmem:[%s21815_s4 + $0xa0] sm:$0xff] }
 0x1d4   :  { %v872_v46 = vsel %vm21835_vm10, %v17601_v62, %v836_v4  ;;  %903 = vst.msk [vmem:[#allocation2 + $0x98] sm:$0xff] %vm423_vm3, %v867_v40  ;;  %904 = vst.msk [vmem:[#allocation2 + $0xa0] sm:$0xff] %vm423_vm3, %v868_v34  ;;  %vm21836_vm5 = vcmp.ge.f32.partialorder %v17607_v12, 0.0  ;;  %vm21837_vm11 = vcmp.ge.f32.partialorder %v17610_v6, 0.0  ;;  %vm21838_vm12 = vcmp.ge.f32.partialorder %v17613_v19, 0.0  ;;  %v9731_v4 = vld [vmem:[%s21815_s4 + $0xa8] sm:$0xff] }
 0x1d5   :  { %905 = vst.msk [vmem:[#allocation2 + $0xa8] sm:$0xff] %vm423_vm3, %v869_v38  ;;  %v875_v59 = vsel %vm21836_vm5, %v17607_v12, %v839_v44  ;;  %v876_v0 = vsel %vm21837_vm11, %v17610_v6, %v840_v10  ;;  %v877_v58 = vsel %vm21838_vm12, %v17613_v19, %v841_v32  ;;  %906 = vst.msk [vmem:[#allocation2 + $0xb0] sm:$0xff] %vm423_vm3, %v870_v47  ;;  %v924_v19 = vld [vmem:[%s21815_s4 + $0x10] sm:$0xff]  ;;  %v921_v49 = vld [vmem:[#allocation2 + $0x8] sm:$0x3]  ;;  %vm5115_vm14 = vcmask 1041408  }
 0x1d6   :  { %907 = vst.msk [vmem:[#allocation2 + $0xb8] sm:$0xff] %vm423_vm3, %v871_v52  ;;  %908 = vst.msk [vmem:[#allocation2 + $0xc0] sm:$0xff] %vm423_vm3, %v872_v46  ;;  %v878_v62 = vsel %vm806_vm7, %v17616_v28, %v842_v33  ;;  %v879_v7 = vsel %vm807_vm6, %v17619_v1, %v843_v43  ;;  %v880_v12 = vsel %vm808_vm1, %v17622_v18, %v844_v39  ;;  %v925_v28 = vld [vmem:[%s21815_s4 + $0x18] sm:$0xff]  ;;  %v926_v18 = vld [vmem:[%s21815_s4 + $0x20] sm:$0xff]  ;;  %vm9658_vm13 = vcmask 254976  }
 0x1d7   :  { %909 = vst.msk [vmem:[#allocation2 + $0xc8] sm:$0xff] %vm423_vm3, %v873_v50  ;;  %v882_v6 = vsel %vm810_vm4, %v17625_v22, %v846_v60  ;;  %911 = vst.msk [vmem:[#allocation2 + $0xd8] sm:$0xff] %vm423_vm3, %v875_v59  ;;  %v930_v1 = vld [vmem:[#allocation2 + $0x48] sm:$0xff]  ;;  %v927_v22 = vld [vmem:[%s21815_s4 + $0x28] sm:$0xff]  ;;  %v17836_v8 = vpack.c.bf16 %v925_v28, %v924_v19  ;;  %v17862_v17 = vpack.c.bf16 %v929_v37, %v928_v16 }
 0x1d8   :  { %912 = vst.msk [vmem:[#allocation2 + $0xe0] sm:$0xff] %vm423_vm3, %v876_v0  ;;  %913 = vst.msk [vmem:[#allocation2 + $0xe8] sm:$0xff] %vm423_vm3, %v877_v58  ;;  %12272 = vmatprep.mubr.msk.f32.mxu1 %vm423_vm3, %v930_v1  ;;  %v17834_v42 = vld [vmem:[#allocation2 + $0x54] sm:$0xff]  ;;  %v931_v55 = vld [vmem:[#allocation2 + $0x50] sm:$0x3]  ;;  %v17847_v15 = vpack.c.bf16 %v927_v22, %v926_v18  ;;  %v17874_v23 = vpack.c.bf16 %v9727_v21, %v9726_v20  ;;  %v17887_v51 = vpack.c.bf16 %v9729_v48, %v9728_v29 }
 0x1d9   :  { %914 = vst.msk [vmem:[#allocation2 + $0xf0] sm:$0xff] %vm423_vm3, %v878_v62  ;;  %915 = vst.msk [vmem:[#allocation2 + $0xf8] sm:$0xff] %vm423_vm3, %v879_v7  ;;  %v1774_v5 = vld [vmem:[#allocation2 + $0x5c] sm:$0x3]  ;;  %12443 = vmatprep.mubr.msk.f32.mxu0 %vm423_vm3, %v17834_v42  ;;  %12273 = vmatmul.mubr.msk.f32.vlgmr.msra.gmra.mrb[0].mxu1 %vm423_vm3, %v931_v55  ;;  %v1764_v31 = vld [vmem:[#allocation2 + $0x14] sm:$0x3]  ;;  %v17902_v10 = vpack.c.bf16 %v9731_v4, %v9730_v53 }
 0x1da   :  { %916 = vst.msk [vmem:[#allocation2 + $0x100] sm:$0xff] %vm423_vm3, %v880_v12  ;;  %918 = vst.msk [vmem:[#allocation2 + $0x110] sm:$0xff] %vm423_vm3, %v882_v6  ;;  %14880 = vmatpush3.bf16.msra.mxu1 %v17383_v63  ;;  %12444 = vmatmul.mubr.msk.f32.vlgmr.msra.gmra.mrb[36].mxu0 %vm423_vm3, %v1774_v5  ;;  %v1103_v2 = vld [vmem:[#allocation2 + $0x2] sm:$0xff]  ;;  %v17900_v44 = vld [vmem:[#allocation2 + $0xe] sm:$0xff] }
 0x1db   :  { %15024 = vmatpush3.bf16.msra.mxu0 %v17383_v63  ;;  %12291 = vmatprep.mubr.msk.f32.mxu1 %vm423_vm3, %v920_v9  ;;  %v9733_v32 = vld [vmem:[%s21815_s4 + $0xb8] sm:$0xff]  ;;  %v9736_v43 = vld [vmem:[%s21815_s4 + $0xc0] sm:$0xff]  ;;  %v9738_v60 = vld [vmem:[%s21815_s4 + $0xd0] sm:$0xff] }
 0x1dc   :  { %12462 = vmatprep.mubr.msk.f32.mxu0 %vm423_vm3, %v17845_v14  ;;  %14882 = vmatprep.subr.bf16.mxu1 %v17836_v8  ;;  %v17917_v33 = vpack.c.bf16 %v9733_v32, %v9732_v56  ;;  %v17929_v39 = vpack.c.bf16 %v9737_v57, %v9736_v43  ;;  %v17942_v61 = vpack.c.bf16 %v9739_v3, %v9738_v60  ;;  %v9740_v45 = vld [vmem:[%s21815_s4 + $0xe0] sm:$0xff]  ;;  %v9741_v11 = vld [vmem:[%s21815_s4 + $0xe8] sm:$0xff]  ;;  %v9742_v35 = vld [vmem:[%s21815_s4 + $0xf0] sm:$0xff] }
 0x1dd   :  { %15026 = vmatprep.subr.bf16.mxu0 %v17836_v8  ;;  %v1946_v25 = vld [vmem:[#allocation2 + $0x16] sm:$0x3]  ;;  %v2038_v24 = vld [vmem:[#allocation2 + $0x9c] sm:$0xff]  ;;  %v17955_v26 = vpack.c.bf16 %v9741_v11, %v9740_v45  ;;  %v9743_v40 = vld [vmem:[%s21815_s4 + $0xf8] sm:$0xff] }
 0x1de   :  { %14884 = vmatpush3.bf16.msra.mxu1 %v17836_v8  ;;  %v1197_v27 = vld [vmem:[#allocation2 + $0x90] sm:$0xff]  ;;  %v17969_v34 = vpack.c.bf16 %v9743_v40, %v9742_v35  ;;  %v9747_v47 = vld [vmem:[%s21815_s4 + $0x108] sm:$0xff]  ;;  %v9748_v46 = vld [vmem:[%s21815_s4 + $0x110] sm:$0xff] }
 0x1df   :  { %15028 = vmatpush3.bf16.msra.mxu0 %v17836_v8  ;;  %14886 = vmatprep.subr.bf16.mxu1 %v17847_v15  ;;  %v9746_v38 = vld [vmem:[%s21815_s4 + $0x100] sm:$0xff]  ;;  %v9749_v50 = vld [vmem:[%s21815_s4 + $0x118] sm:$0xff]  ;;  %v1198_v59 = vld [vmem:[#allocation2 + $0x98] sm:$0x3] }
 0x1e0   :  { %15030 = vmatprep.subr.bf16.mxu0 %v17847_v15  ;;  %v17981_v52 = vpack.c.bf16 %v9747_v47, %v9746_v38  ;;  %v17994_v0 = vpack.c.bf16 %v9749_v50, %v9748_v46  ;;  %v9750_v58 = vld [vmem:[%s21815_s4 + $0x120] sm:$0xff]  ;;  %v9751_v62 = vld [vmem:[%s21815_s4 + $0x128] sm:$0xff]  ;;  %v2039_v7 = vld [vmem:[#allocation2 + $0xa4] sm:$0x3] }
 0x1e1   :  { %v1291_v12 = vld [vmem:[#allocation2 + $0xd8] sm:$0xff]  ;;  %v2131_v6 = vld [vmem:[#allocation2 + $0xe4] sm:$0xff]  ;;  %v18007_v19 = vpack.c.bf16 %v9751_v62, %v9750_v58  ;;  %v9756_v22 = vld [vmem:[%s21815_s4 + $0x140] sm:$0xff] }
 0x1e2   :  { %14888 = vmatpush3.bf16.msra.mxu1 %v17847_v15  ;;  %v9752_v28 = vld [vmem:[%s21815_s4 + $0x130] sm:$0xff]  ;;  %v9753_v1 = vld [vmem:[%s21815_s4 + $0x138] sm:$0xff]  ;;  %v9757_v55 = vld [vmem:[%s21815_s4 + $0x148] sm:$0xff] }
 0x1e3   :  { %15032 = vmatpush3.bf16.msra.mxu0 %v17847_v15  ;;  %14890 = vmatprep.subr.bf16.mxu1 %v17862_v17  ;;  %v18021_v18 = vpack.c.bf16 %v9753_v1, %v9752_v28  ;;  %v18033_v5 = vpack.c.bf16 %v9757_v55, %v9756_v22  ;;  %v9758_v9 = vld [vmem:[%s21815_s4 + $0x150] sm:$0xff]  ;;  %v9759_v16 = vld [vmem:[%s21815_s4 + $0x158] sm:$0xff]  ;;  %v9760_v21 = vld [vmem:[%s21815_s4 + $0x160] sm:$0xff] }
 0x1e4   :  { %15034 = vmatprep.subr.bf16.mxu0 %v17862_v17  ;;  %v1292_v37 = vld [vmem:[#allocation2 + $0xe0] sm:$0x3]  ;;  %v18046_v20 = vpack.c.bf16 %v9759_v16, %v9758_v9  ;;  %v9761_v29 = vld [vmem:[%s21815_s4 + $0x168] sm:$0xff]  ;;  %v2132_v48 = vld [vmem:[#allocation2 + $0xec] sm:$0x3] }
 0x1e5   :  { %v2224_v53 = vld [vmem:[#allocation2 + $0x9e] sm:$0xff]  ;;  %v18059_v4 = vpack.c.bf16 %v9761_v29, %v9760_v21  ;;  %v9766_v32 = vld [vmem:[%s21815_s4 + $0x180] sm:$0xff]  ;;  %v9769_v3 = vld [vmem:[%s21815_s4 + $0x198] sm:$0xff] }
 0x1e6   :  { %14892 = vmatpush3.bf16.msra.mxu1 %v17862_v17  ;;  %v9767_v43 = vld [vmem:[%s21815_s4 + $0x188] sm:$0xff]  ;;  %v9768_v60 = vld [vmem:[%s21815_s4 + $0x190] sm:$0xff]  ;;  %v9770_v11 = vld [vmem:[%s21815_s4 + $0x1a0] sm:$0xff] }
 0x1e7   :  { %15036 = vmatpush3.bf16.msra.mxu0 %v17862_v17  ;;  %14894 = vmatprep.subr.bf16.mxu1 %v17874_v23  ;;  %v18085_v57 = vpack.c.bf16 %v9767_v43, %v9766_v32  ;;  %v18098_v45 = vpack.c.bf16 %v9769_v3, %v9768_v60  ;;  %v9772_v40 = vld [vmem:[%s21815_s4 + $0x1b0] sm:$0xff]  ;;  %v9773_v38 = vld [vmem:[%s21815_s4 + $0x1b8] sm:$0xff]  ;;  %v9776_v47 = vld [vmem:[%s21815_s4 + $0x1c0] sm:$0xff] }
 0x1e8   :  { %15038 = vmatprep.subr.bf16.mxu0 %v17874_v23  ;;  %v9777_v46 = vld [vmem:[%s21815_s4 + $0x1c8] sm:$0xff]  ;;  %v9779_v58 = vld [vmem:[%s21815_s4 + $0x1d8] sm:$0xff]  ;;  %v1480_v62 = vld [vmem:[#allocation2 + $0x14] sm:$0x3] }
 0x1e9   :  { %12292 = vmatmul.mubr.msk.f32.vlgmr.msra.gmra.mrb[0].mxu1 %vm423_vm3, %v921_v49  ;;  %v1385_v49 = vld [vmem:[#allocation2 + $0x92] sm:$0xff]  ;;  %v18141_v50 = vpack.c.bf16 %v9777_v46, %v9776_v47  ;;  %v2318_v28 = vld [vmem:[#allocation2 + $0x20] sm:$0x3]  ;;  %v9783_v9 = vld [vmem:[%s21815_s4 + $0x1f8] sm:$0xff] }
 0x1ea   :  { %12463 = vmatmul.mubr.msk.f32.vlgmr.msra.gmra.mrb[36].mxu0 %vm423_vm3, %v1764_v31  ;;  %14896 = vmatpush3.bf16.msra.mxu1 %v17874_v23  ;;  %v9762_v31 = vld [vmem:[%s21815_s4 + $0x170] sm:$0xff]  ;;  %v9786_v16 = vld [vmem:[%s21815_s4 + $0x200] sm:$0xff]  ;;  %v2411_v32 = vld [vmem:[#allocation2 + $0x68] sm:$0x3] }
 0x1eb   :  { %12310 = vmatprep.mubr.msk.f32.mxu1 %vm423_vm3, %v1103_v2  ;;  %15040 = vmatpush3.bf16.msra.mxu0 %v17874_v23  ;;  %v9763_v2 = vld [vmem:[%s21815_s4 + $0x178] sm:$0xff]  ;;  %v2410_v1 = vld [vmem:[#allocation2 + $0x60] sm:$0xff] }
 0x1ec   :  { %12481 = vmatprep.mubr.msk.f32.mxu0 %vm423_vm3, %v17900_v44  ;;  %14898 = vmatprep.subr.bf16.mxu1 %v17887_v51  ;;  %v18073_v56 = vpack.c.bf16 %v9763_v2, %v9762_v31  ;;  %v9782_v55 = vld [vmem:[%s21815_s4 + $0x1f0] sm:$0xff]  ;;  %v9790_v31 = vld [vmem:[%s21815_s4 + $0x220] sm:$0xff]  ;;  %v9791_v2 = vld [vmem:[%s21815_s4 + $0x228] sm:$0xff] }
 0x1ed   :  { %15042 = vmatprep.subr.bf16.mxu0 %v17887_v51  ;;  %v9788_v29 = vld [vmem:[%s21815_s4 + $0x210] sm:$0xff]  ;;  %v18223_v60 = vpack.c.bf16 %v9791_v2, %v9790_v31  ;;  %v10045_v47 = vld [vmem:[%s21815_s4 + $0x58] sm:$0xff]  ;;  %v10054_v2 = vld [vmem:[%s21815_s4 + $0x80] sm:$0xff] }
 0x1ee   :  { %14900 = vmatpush3.bf16.msra.mxu1 %v17887_v51  ;;  %v18221_v43 = vld [vmem:[#allocation2 + $0x1a] sm:$0xff] }
 0x1ef   :  { %15044 = vmatpush3.bf16.msra.mxu0 %v17887_v51  ;;  %14902 = vmatprep.subr.bf16.mxu1 %v17902_v10  ;;  %v9792_v3 = vld [vmem:[%s21815_s4 + $0x230] sm:$0xff] }
 0x1f0   :  { %15046 = vmatprep.subr.bf16.mxu0 %v17902_v10 }
 0x1f2   :  { %14904 = vmatpush3.bf16.msra.mxu1 %v17902_v10 }
 0x1f3   :  { %15048 = vmatpush3.bf16.msra.mxu0 %v17902_v10  ;;  %14906 = vmatprep.subr.bf16.mxu1 %v17917_v33 }
 0x1f4   :  { %15050 = vmatprep.subr.bf16.mxu0 %v17917_v33 }
 0x1f6   :  { %14908 = vmatpush3.bf16.msra.mxu1 %v17917_v33 }
 0x1f7   :  { %15052 = vmatpush3.bf16.msra.mxu0 %v17917_v33  ;;  %14910 = vmatprep.subr.bf16.mxu1 %v17929_v39 }
 0x1f8   :  { %15054 = vmatprep.subr.bf16.mxu0 %v17929_v39 }
 0x1f9   :  { %12311 = vmatmul.mubr.msk.f32.vlgmr.msra.gmra.mrb[0].mxu1 %vm423_vm3, %v1104_v41  ;;  %v1386_v41 = vld [vmem:[#allocation2 + $0x9a] sm:$0x3] }
 0x1fa   :  { %12482 = vmatmul.mubr.msk.f32.vlgmr.msra.gmra.mrb[36].mxu0 %vm423_vm3, %v1946_v25  ;;  %14912 = vmatpush3.bf16.msra.mxu1 %v17929_v39  ;;  %v9771_v25 = vld [vmem:[%s21815_s4 + $0x1a8] sm:$0xff] }
 0x1fb   :  { %12329 = vmatprep.mubr.msk.f32.mxu1 %vm423_vm3, %v1197_v27  ;;  %15056 = vmatpush3.bf16.msra.mxu0 %v17929_v39  ;;  %v2225_v27 = vld [vmem:[#allocation2 + $0xa6] sm:$0x3]  ;;  %v18114_v35 = vpack.c.bf16 %v9771_v25, %v9770_v11  ;;  %v1668_v11 = vld [vmem:[#allocation2 + $0x16] sm:$0x3]  ;;  %v2504_v25 = vld [vmem:[#allocation2 + $0x22] sm:$0x3] }
 0x1fc   :  { %12500 = vmatprep.mubr.msk.f32.mxu0 %vm423_vm3, %v2038_v24  ;;  %14914 = vmatprep.subr.bf16.mxu1 %v17942_v61  ;;  %v18112_v24 = vld [vmem:[#allocation2 + $0x18] sm:$0xff] }
 0x1fd   :  { %15058 = vmatprep.subr.bf16.mxu0 %v17942_v61 }
 0x1fe   :  { %14916 = vmatpush3.bf16.msra.mxu1 %v17942_v61 }
 0x1ff   :  { %15060 = vmatpush3.bf16.msra.mxu0 %v17942_v61  ;;  %14918 = vmatprep.subr.bf16.mxu1 %v17955_v26 }
 0x200   :  { %15062 = vmatprep.subr.bf16.mxu0 %v17955_v26 }
 0x202   :  { %14920 = vmatpush3.bf16.msra.mxu1 %v17955_v26 }
 0x203   :  { %15064 = vmatpush3.bf16.msra.mxu0 %v17955_v26  ;;  %14922 = vmatprep.subr.bf16.mxu1 %v17969_v34 }
 0x204   :  { %15066 = vmatprep.subr.bf16.mxu0 %v17969_v34 }
 0x206   :  { %14924 = vmatpush3.bf16.msra.mxu1 %v17969_v34 }
 0x207   :  { %15068 = vmatpush3.bf16.msra.mxu0 %v17969_v34  ;;  %14926 = vmatprep.subr.bf16.mxu1 %v17981_v52 }
 0x208   :  { %15070 = vmatprep.subr.bf16.mxu0 %v17981_v52 }
 0x209   :  { %12330 = vmatmul.mubr.msk.f32.vlgmr.msra.gmra.mrb[0].mxu1 %vm423_vm3, %v1198_v59  ;;  %v9778_v59 = vld [vmem:[%s21815_s4 + $0x1d0] sm:$0xff] }
 0x20a   :  { %12501 = vmatmul.mubr.msk.f32.vlgmr.msra.gmra.mrb[36].mxu0 %vm423_vm3, %v2039_v7  ;;  %14928 = vmatpush3.bf16.msra.mxu1 %v17981_v52  ;;  %v18154_v7 = vpack.c.bf16 %v9779_v58, %v9778_v59  ;;  %v10046_v59 = vld [vmem:[%s21815_s4 + $0x60] sm:$0xff]  ;;  %v10047_v58 = vld [vmem:[%s21815_s4 + $0x68] sm:$0xff] }
 0x20b   :  { %12348 = vmatprep.mubr.msk.f32.mxu1 %vm423_vm3, %v1291_v12  ;;  %15072 = vmatpush3.bf16.msra.mxu0 %v17981_v52  ;;  %v9780_v12 = vld [vmem:[%s21815_s4 + $0x1e0] sm:$0xff] }
 0x20c   :  { %12519 = vmatprep.mubr.msk.f32.mxu0 %vm423_vm3, %v2131_v6  ;;  %14930 = vmatprep.subr.bf16.mxu1 %v17994_v0  ;;  %v9781_v6 = vld [vmem:[%s21815_s4 + $0x1e8] sm:$0xff] }
 0x20d   :  { %15074 = vmatprep.subr.bf16.mxu0 %v17994_v0  ;;  %v18168_v22 = vpack.c.bf16 %v9781_v6, %v9780_v12  ;;  %v10048_v12 = vld [vmem:[%s21815_s4 + $0x70] sm:$0xff]  ;;  %v10049_v6 = vld [vmem:[%s21815_s4 + $0x78] sm:$0xff] }
 0x20e   :  { %14932 = vmatpush3.bf16.msra.mxu1 %v17994_v0 }
 0x20f   :  { %15076 = vmatpush3.bf16.msra.mxu0 %v17994_v0  ;;  %14934 = vmatprep.subr.bf16.mxu1 %v18007_v19 }
 0x210   :  { %15078 = vmatprep.subr.bf16.mxu0 %v18007_v19 }
 0x212   :  { %14936 = vmatpush3.bf16.msra.mxu1 %v18007_v19 }
 0x213   :  { %15080 = vmatpush3.bf16.msra.mxu0 %v18007_v19  ;;  %14938 = vmatprep.subr.bf16.mxu1 %v18021_v18 }
 0x214   :  { %15082 = vmatprep.subr.bf16.mxu0 %v18021_v18 }
 0x216   :  { %14940 = vmatpush3.bf16.msra.mxu1 %v18021_v18 }
 0x217   :  { %15084 = vmatpush3.bf16.msra.mxu0 %v18021_v18  ;;  %14942 = vmatprep.subr.bf16.mxu1 %v18033_v5 }
 0x218   :  { %15086 = vmatprep.subr.bf16.mxu0 %v18033_v5 }
 0x219   :  { %12349 = vmatmul.mubr.msk.f32.vlgmr.msra.gmra.mrb[0].mxu1 %vm423_vm3, %v1292_v37  ;;  %v9787_v37 = vld [vmem:[%s21815_s4 + $0x208] sm:$0xff] }
 0x21a   :  { %12520 = vmatmul.mubr.msk.f32.vlgmr.msra.gmra.mrb[36].mxu0 %vm423_vm3, %v2132_v48  ;;  %14944 = vmatpush3.bf16.msra.mxu1 %v18033_v5  ;;  %v18194_v21 = vpack.c.bf16 %v9787_v37, %v9786_v16  ;;  %v9789_v48 = vld [vmem:[%s21815_s4 + $0x218] sm:$0xff]  ;;  %v4279_v37 = vld [vmem:[#allocation2 + $0x80] sm:$0x3] }
 0x21b   :  { %12367 = vmatprep.mubr.msk.f32.mxu1 %vm423_vm3, %v1385_v49  ;;  %15088 = vmatpush3.bf16.msra.mxu0 %v18033_v5  ;;  %v1574_v49 = vld [vmem:[#allocation2 + $0x5c] sm:$0x3] }
 0x21c   :  { %12538 = vmatprep.mubr.msk.f32.mxu0 %vm423_vm3, %v2224_v53  ;;  %14946 = vmatprep.subr.bf16.mxu1 %v18046_v20  ;;  %v18207_v53 = vpack.c.bf16 %v9789_v48, %v9788_v29  ;;  %v4275_v29 = vld [vmem:[%s21815_s4 + $0x28] sm:$0xff] }
 0x21d   :  { %15090 = vmatprep.subr.bf16.mxu0 %v18046_v20 }
 0x21e   :  { %14948 = vmatpush3.bf16.msra.mxu1 %v18046_v20 }
 0x21f   :  { %15092 = vmatpush3.bf16.msra.mxu0 %v18046_v20  ;;  %14950 = vmatprep.subr.bf16.mxu1 %v18059_v4 }
 0x220   :  { %15094 = vmatprep.subr.bf16.mxu0 %v18059_v4 }
 0x222   :  { %14952 = vmatpush3.bf16.msra.mxu1 %v18059_v4 }
 0x223   :  { %15096 = vmatpush3.bf16.msra.mxu0 %v18059_v4  ;;  %14954 = vmatprep.subr.bf16.mxu1 %v18073_v56 }
 0x224   :  { %15098 = vmatprep.subr.bf16.mxu0 %v18073_v56 }
 0x226   :  { %14956 = vmatpush3.bf16.msra.mxu1 %v18073_v56 }
 0x227   :  { %15100 = vmatpush3.bf16.msra.mxu0 %v18073_v56  ;;  %14958 = vmatprep.subr.bf16.mxu1 %v18085_v57 }
 0x228   :  { %15102 = vmatprep.subr.bf16.mxu0 %v18085_v57 }
 0x229   :  { %12368 = vmatmul.mubr.msk.f32.vlgmr.msra.gmra.mrb[0].mxu1 %vm423_vm3, %v1386_v41  ;;  %v9793_v41 = vld [vmem:[%s21815_s4 + $0x238] sm:$0xff] }
 0x22a   :  { %12539 = vmatmul.mubr.msk.f32.vlgmr.msra.gmra.mrb[36].mxu0 %vm423_vm3, %v2225_v27  ;;  %14960 = vmatpush3.bf16.msra.mxu1 %v18085_v57  ;;  %v18254_v27 = vld [vmem:[#allocation2 + $0x6c] sm:$0xff] }
 0x22b   :  { %12386 = vmatprep.mubr.msk.f32.mxu1 %vm423_vm3, %v17845_v14  ;;  %15104 = vmatpush3.bf16.msra.mxu0 %v18085_v57  ;;  %v18129_v14 = vpack.c.bf16 %v9773_v38, %v9772_v40  ;;  %v10043_v40 = vld [vmem:[%s21815_s4 + $0x48] sm:$0xff] }
 0x22c   :  { %12557 = vmatprep.mubr.msk.f32.mxu0 %vm423_vm3, %v18112_v24  ;;  %14962 = vmatprep.subr.bf16.mxu1 %v18098_v45 }
 0x22d   :  { %15106 = vmatprep.subr.bf16.mxu0 %v18098_v45 }
 0x22e   :  { %14964 = vmatpush3.bf16.msra.mxu1 %v18098_v45 }
 0x22f   :  { %15108 = vmatpush3.bf16.msra.mxu0 %v18098_v45  ;;  %14966 = vmatprep.subr.bf16.mxu1 %v18114_v35 }
 0x230   :  { %15110 = vmatprep.subr.bf16.mxu0 %v18114_v35 }
 0x232   :  { %14968 = vmatpush3.bf16.msra.mxu1 %v18114_v35 }
 0x233   :  { %15112 = vmatpush3.bf16.msra.mxu0 %v18114_v35  ;;  %14970 = vmatprep.subr.bf16.mxu1 %v18129_v14 }
 0x234   :  { %15114 = vmatprep.subr.bf16.mxu0 %v18129_v14 }
 0x236   :  { %14972 = vmatpush3.bf16.msra.mxu1 %v18129_v14 }
 0x237   :  { %15116 = vmatpush3.bf16.msra.mxu0 %v18129_v14  ;;  %14974 = vmatprep.subr.bf16.mxu1 %v18141_v50 }
 0x238   :  { %15118 = vmatprep.subr.bf16.mxu0 %v18141_v50 }
 0x239   :  { %12387 = vmatmul.mubr.msk.f32.vlgmr.msra.gmra.mrb[0].mxu1 %vm423_vm3, %v1480_v62  ;;  %v4174_v62 = vld [vmem:[#allocation2 + $0x3a] sm:$0x3] }
 0x23a   :  { %12558 = vmatmul.mubr.msk.f32.vlgmr.msra.gmra.mrb[36].mxu0 %vm423_vm3, %v2318_v28  ;;  %14976 = vmatpush3.bf16.msra.mxu1 %v18141_v50  ;;  %v15449_v28 = vpack.c.bf16 %v10049_v6, %v10048_v12  ;;  %v10086_v12 = vld [vmem:[%s21815_s4 + $0x150] sm:$0xff]  ;;  %v10087_v6 = vld [vmem:[%s21815_s4 + $0x158] sm:$0xff] }
 0x23b   :  { %12405 = vmatprep.mubr.msk.f32.mxu1 %vm423_vm3, %v17834_v42  ;;  %15120 = vmatpush3.bf16.msra.mxu0 %v18141_v50  ;;  %v18182_v42 = vpack.c.bf16 %v9783_v9, %v9782_v55  ;;  %v4272_v9 = vld [vmem:[%s21815_s4 + $0x10] sm:$0xff] }
 0x23c   :  { %12576 = vmatprep.mubr.msk.f32.mxu0 %vm423_vm3, %v2410_v1  ;;  %14978 = vmatprep.subr.bf16.mxu1 %v18154_v7 }
 0x23d   :  { %15122 = vmatprep.subr.bf16.mxu0 %v18154_v7 }
 0x23e   :  { %14980 = vmatpush3.bf16.msra.mxu1 %v18154_v7 }
 0x23f   :  { %15124 = vmatpush3.bf16.msra.mxu0 %v18154_v7  ;;  %14982 = vmatprep.subr.bf16.mxu1 %v18168_v22 }
 0x240   :  { %15126 = vmatprep.subr.bf16.mxu0 %v18168_v22 }
 0x242   :  { %14984 = vmatpush3.bf16.msra.mxu1 %v18168_v22 }
 0x243   :  { %15128 = vmatpush3.bf16.msra.mxu0 %v18168_v22  ;;  %14986 = vmatprep.subr.bf16.mxu1 %v18182_v42 }
 0x244   :  { %15130 = vmatprep.subr.bf16.mxu0 %v18182_v42 }
 0x246   :  { %14988 = vmatpush3.bf16.msra.mxu1 %v18182_v42 }
 0x247   :  { %15132 = vmatpush3.bf16.msra.mxu0 %v18182_v42  ;;  %14990 = vmatprep.subr.bf16.mxu1 %v18194_v21 }
 0x248   :  { %15134 = vmatprep.subr.bf16.mxu0 %v18194_v21 }
 0x249   :  { %12406 = vmatmul.mubr.msk.f32.vlgmr.msra.gmra.mrb[0].mxu1 %vm423_vm3, %v1574_v49  ;;  %v4276_v49 = vld [vmem:[%s21815_s4 + $0x30] sm:$0xff] }
 0x24a   :  { %12577 = vmatmul.mubr.msk.f32.vlgmr.msra.gmra.mrb[36].mxu0 %vm423_vm3, %v2411_v32  ;;  %14992 = vmatpush3.bf16.msra.mxu1 %v18194_v21  ;;  %v10055_v32 = vld [vmem:[%s21815_s4 + $0x88] sm:$0xff] }
 0x24b   :  { %12424 = vmatprep.mubr.msk.f32.mxu1 %vm423_vm3, %v17900_v44  ;;  %15136 = vmatpush3.bf16.msra.mxu0 %v18194_v21  ;;  %v18238_v44 = vpack.c.bf16 %v9793_v41, %v9792_v3  ;;  %v10057_v3 = vld [vmem:[%s21815_s4 + $0x98] sm:$0xff] }
 0x24c   :  { %12595 = vmatprep.mubr.msk.f32.mxu0 %vm423_vm3, %v18221_v43  ;;  %14994 = vmatprep.subr.bf16.mxu1 %v18207_v53 }
 0x24d   :  { %15138 = vmatprep.subr.bf16.mxu0 %v18207_v53 }
 0x24e   :  { %14996 = vmatpush3.bf16.msra.mxu1 %v18207_v53 }
 0x24f   :  { %15140 = vmatpush3.bf16.msra.mxu0 %v18207_v53  ;;  %14998 = vmatprep.subr.bf16.mxu1 %v18223_v60 }
 0x250   :  { %15142 = vmatprep.subr.bf16.mxu0 %v18223_v60 }
 0x252   :  { %15000 = vmatpush3.bf16.msra.mxu1 %v18223_v60 }
 0x253   :  { %15144 = vmatpush3.bf16.msra.mxu0 %v18223_v60  ;;  %15002 = vmatprep.subr.bf16.mxu1 %v18238_v44 }
 0x254   :  { %15146 = vmatprep.subr.bf16.mxu0 %v18238_v44 }
 0x256   :  { %15004 = vmatpush3.bf16.msra.mxu1 %v18238_v44 }
 0x257   :  { %15148 = vmatpush3.bf16.msra.mxu0 %v18238_v44  ;;  %15150 = vmatprep.subr.bf16.mxu1 %v17321_v54 }
 0x258   :  { %15294 = vmatprep.subr.bf16.mxu0 %v17321_v54 }
 0x259   :  { %12425 = vmatmul.mubr.msk.f32.vlgmr.msra.gmra.mrb[0].mxu1 %vm423_vm3, %v1668_v11  ;;  %v10058_v11 = vld [vmem:[%s21815_s4 + $0xa0] sm:$0xff] }
 0x25a   :  { %12596 = vmatmul.mubr.msk.f32.vlgmr.msra.gmra.mrb[36].mxu0 %vm423_vm3, %v2504_v25  ;;  %15152 = vmatpush3.bf16.msra.mxu1 %v17321_v54  ;;  %v10059_v25 = vld [vmem:[%s21815_s4 + $0xa8] sm:$0xff] }
 0x25b   :  { %12614 = vmatprep.mubr.msk.f32.mxu1 %vm423_vm3, %v2410_v1  ;;  %15296 = vmatpush3.bf16.msra.mxu0 %v17321_v54  ;;  %v2609_v54 = vld [vmem:[#allocation2 + $0x68] sm:$0x3]  ;;  %v4270_v1 = vld [vmem:[%s21815_s4] sm:$0xff] }
 0x25c   :  { %12785 = vmatprep.mubr.msk.f32.mxu0 %vm423_vm3, %v18254_v27  ;;  %15154 = vmatprep.subr.bf16.mxu1 %v17339_v13 }
 0x25d   :  { %15298 = vmatprep.subr.bf16.mxu0 %v17339_v13 }
 0x25e   :  { %15156 = vmatpush3.bf16.msra.mxu1 %v17339_v13 }
 0x25f   :  { %15300 = vmatpush3.bf16.msra.mxu0 %v17339_v13  ;;  %15158 = vmatprep.subr.bf16.mxu1 %v17357_v30  ;;  %v3444_v13 = vld [vmem:[#allocation2 + $0x74] sm:$0x3] }
 0x260   :  { %15302 = vmatprep.subr.bf16.mxu0 %v17357_v30 }
 0x262   :  { %15160 = vmatpush3.bf16.msra.mxu1 %v17357_v30 }
 0x263   :  { %15304 = vmatpush3.bf16.msra.mxu0 %v17357_v30  ;;  %15162 = vmatprep.subr.bf16.mxu1 %v17375_v36  ;;  %v18278_v30 = vld [vmem:[#allocation2 + $0x24] sm:$0xff] }
 0x264   :  { %15306 = vmatprep.subr.bf16.mxu0 %v17375_v36 }
 0x266   :  { %15164 = vmatpush3.bf16.msra.mxu1 %v17375_v36 }
 0x267   :  { %15308 = vmatpush3.bf16.msra.mxu0 %v17375_v36  ;;  %15166 = vmatprep.subr.bf16.mxu1 %v17383_v63  ;;  %v2599_v36 = vld [vmem:[#allocation2 + $0x20] sm:$0x3] }
 0x268   :  { %15310 = vmatprep.subr.bf16.mxu0 %v17383_v63 }
 0x269   :  { %12615 = vmatmul.mubr.msk.f32.vlgmr.msra.gmra.mrb[2].mxu1 %vm423_vm3, %v2609_v54  ;;  %v10060_v54 = vld [vmem:[%s21815_s4 + $0xb0] sm:$0xff] }
 0x26a   :  { %12786 = vmatmul.mubr.msk.f32.vlgmr.msra.gmra.mrb[38].mxu0 %vm423_vm3, %v3444_v13  ;;  %15168 = vmatpush3.bf16.msra.mxu1 %v17383_v63  ;;  %v10061_v13 = vld [vmem:[%s21815_s4 + $0xb8] sm:$0xff] }
 0x26b   :  { %12633 = vmatprep.mubr.msk.f32.mxu1 %vm423_vm3, %v18112_v24  ;;  %15312 = vmatpush3.bf16.msra.mxu0 %v17383_v63  ;;  %v3434_v63 = vld [vmem:[#allocation2 + $0x2c] sm:$0x3]  ;;  %v18431_v24 = vld [vmem:[#allocation2 + $0x32] sm:$0xff] }
 0x26c   :  { %12804 = vmatprep.mubr.msk.f32.mxu0 %vm423_vm3, %v18278_v30  ;;  %15170 = vmatprep.subr.bf16.mxu1 %v17836_v8 }
 0x26d   :  { %15314 = vmatprep.subr.bf16.mxu0 %v17836_v8 }
 0x26e   :  { %15172 = vmatpush3.bf16.msra.mxu1 %v17836_v8 }
 0x26f   :  { %15316 = vmatpush3.bf16.msra.mxu0 %v17836_v8  ;;  %15174 = vmatprep.subr.bf16.mxu1 %v17847_v15  ;;  %v18302_v8 = vld [vmem:[#allocation2 + $0x26] sm:$0xff] }
 0x270   :  { %15318 = vmatprep.subr.bf16.mxu0 %v17847_v15 }
 0x272   :  { %15176 = vmatpush3.bf16.msra.mxu1 %v17847_v15 }
 0x273   :  { %15320 = vmatpush3.bf16.msra.mxu0 %v17847_v15  ;;  %15178 = vmatprep.subr.bf16.mxu1 %v17862_v17  ;;  %v2781_v15 = vld [vmem:[#allocation2 + $0x22] sm:$0x3] }
 0x274   :  { %15322 = vmatprep.subr.bf16.mxu0 %v17862_v17 }
 0x276   :  { %15180 = vmatpush3.bf16.msra.mxu1 %v17862_v17 }
 0x277   :  { %15324 = vmatpush3.bf16.msra.mxu0 %v17862_v17  ;;  %15182 = vmatprep.subr.bf16.mxu1 %v17874_v23  ;;  %v3616_v17 = vld [vmem:[#allocation2 + $0x2e] sm:$0x3] }
 0x278   :  { %15326 = vmatprep.subr.bf16.mxu0 %v17874_v23 }
 0x279   :  { %12634 = vmatmul.mubr.msk.f32.vlgmr.msra.gmra.mrb[2].mxu1 %vm423_vm3, %v2599_v36  ;;  %v10064_v36 = vld [vmem:[%s21815_s4 + $0xc0] sm:$0xff] }
 0x27a   :  { %12805 = vmatmul.mubr.msk.f32.vlgmr.msra.gmra.mrb[38].mxu0 %vm423_vm3, %v3434_v63  ;;  %15184 = vmatpush3.bf16.msra.mxu1 %v17874_v23  ;;  %v10065_v63 = vld [vmem:[%s21815_s4 + $0xc8] sm:$0xff] }
 0x27b   :  { %12652 = vmatprep.mubr.msk.f32.mxu1 %vm423_vm3, %v18221_v43  ;;  %15328 = vmatpush3.bf16.msra.mxu0 %v17874_v23  ;;  %v2873_v23 = vld [vmem:[#allocation2 + $0xa8] sm:$0xff]  ;;  %v15469_v43 = vpack.c.bf16 %v10055_v32, %v10054_v2 }
 0x27c   :  { %12823 = vmatprep.mubr.msk.f32.mxu0 %vm423_vm3, %v18302_v8  ;;  %15186 = vmatprep.subr.bf16.mxu1 %v17887_v51  ;;  %v4730_v32 = vld [vmem:[#allocation2 + $0xca] sm:$0x3] }
 0x27d   :  { %15330 = vmatprep.subr.bf16.mxu0 %v17887_v51 }
 0x27e   :  { %15188 = vmatpush3.bf16.msra.mxu1 %v17887_v51 }
 0x27f   :  { %15332 = vmatpush3.bf16.msra.mxu0 %v17887_v51  ;;  %15190 = vmatprep.subr.bf16.mxu1 %v17902_v10  ;;  %v3708_v51 = vld [vmem:[#allocation2 + $0xb4] sm:$0xff] }
 0x280   :  { %15334 = vmatprep.subr.bf16.mxu0 %v17902_v10 }
 0x282   :  { %15192 = vmatpush3.bf16.msra.mxu1 %v17902_v10 }
 0x283   :  { %15336 = vmatpush3.bf16.msra.mxu0 %v17902_v10  ;;  %15194 = vmatprep.subr.bf16.mxu1 %v17917_v33  ;;  %v2874_v10 = vld [vmem:[#allocation2 + $0xb0] sm:$0x3] }
 0x284   :  { %15338 = vmatprep.subr.bf16.mxu0 %v17917_v33 }
 0x286   :  { %15196 = vmatpush3.bf16.msra.mxu1 %v17917_v33 }
 0x287   :  { %15340 = vmatpush3.bf16.msra.mxu0 %v17917_v33  ;;  %15198 = vmatprep.subr.bf16.mxu1 %v17929_v39  ;;  %v3709_v33 = vld [vmem:[#allocation2 + $0xbc] sm:$0x3] }
 0x288   :  { %15342 = vmatprep.subr.bf16.mxu0 %v17929_v39 }
 0x289   :  { %12653 = vmatmul.mubr.msk.f32.vlgmr.msra.gmra.mrb[2].mxu1 %vm423_vm3, %v2781_v15  ;;  %v10066_v15 = vld [vmem:[%s21815_s4 + $0xd0] sm:$0xff] }
 0x28a   :  { %12824 = vmatmul.mubr.msk.f32.vlgmr.msra.gmra.mrb[38].mxu0 %vm423_vm3, %v3616_v17  ;;  %15200 = vmatpush3.bf16.msra.mxu1 %v17929_v39  ;;  %v10067_v17 = vld [vmem:[%s21815_s4 + $0xd8] sm:$0xff] }
 0x28b   :  { %12671 = vmatprep.mubr.msk.f32.mxu1 %vm423_vm3, %v2873_v23  ;;  %15344 = vmatpush3.bf16.msra.mxu0 %v17929_v39  ;;  %v2966_v39 = vld [vmem:[#allocation2 + $0xf0] sm:$0xff]  ;;  %v15489_v23 = vpack.c.bf16 %v10067_v17, %v10066_v15  ;;  %v10109_v17 = vld [vmem:[%s21815_s4 + $0x1e8] sm:$0xff] }
 0x28c   :  { %12842 = vmatprep.mubr.msk.f32.mxu0 %vm423_vm3, %v3708_v51  ;;  %15202 = vmatprep.subr.bf16.mxu1 %v17942_v61  ;;  %v4451_v51 = vld [vmem:[#allocation2 + $0x3a] sm:$0x3]  ;;  %v10108_v15 = vld [vmem:[%s21815_s4 + $0x1e0] sm:$0xff] }
 0x28d   :  { %15346 = vmatprep.subr.bf16.mxu0 %v17942_v61 }
 0x28e   :  { %15204 = vmatpush3.bf16.msra.mxu1 %v17942_v61 }
 0x28f   :  { %15348 = vmatpush3.bf16.msra.mxu0 %v17942_v61  ;;  %15206 = vmatprep.subr.bf16.mxu1 %v17955_v26  ;;  %v3801_v61 = vld [vmem:[#allocation2 + $0xfc] sm:$0xff] }
 0x290   :  { %15350 = vmatprep.subr.bf16.mxu0 %v17955_v26 }
 0x292   :  { %15208 = vmatpush3.bf16.msra.mxu1 %v17955_v26 }
 0x293   :  { %15352 = vmatpush3.bf16.msra.mxu0 %v17955_v26  ;;  %15210 = vmatprep.subr.bf16.mxu1 %v17969_v34  ;;  %v2967_v26 = vld [vmem:[#allocation2 + $0xf8] sm:$0x3] }
 0x294   :  { %15354 = vmatprep.subr.bf16.mxu0 %v17969_v34 }
 0x296   :  { %15212 = vmatpush3.bf16.msra.mxu1 %v17969_v34 }
 0x297   :  { %15356 = vmatpush3.bf16.msra.mxu0 %v17969_v34  ;;  %15214 = vmatprep.subr.bf16.mxu1 %v17981_v52  ;;  %v3802_v34 = vld [vmem:[#allocation2 + $0x104] sm:$0x3] }
 0x298   :  { %15358 = vmatprep.subr.bf16.mxu0 %v17981_v52 }
 0x299   :  { %12672 = vmatmul.mubr.msk.f32.vlgmr.msra.gmra.mrb[2].mxu1 %vm423_vm3, %v2874_v10  ;;  %v10068_v10 = vld [vmem:[%s21815_s4 + $0xe0] sm:$0xff] }
 0x29a   :  { %12843 = vmatmul.mubr.msk.f32.vlgmr.msra.gmra.mrb[38].mxu0 %vm423_vm3, %v3709_v33  ;;  %15216 = vmatpush3.bf16.msra.mxu1 %v17981_v52  ;;  %v10069_v33 = vld [vmem:[%s21815_s4 + $0xe8] sm:$0xff] }
 0x29b   :  { %12690 = vmatprep.mubr.msk.f32.mxu1 %vm423_vm3, %v2966_v39  ;;  %15360 = vmatpush3.bf16.msra.mxu0 %v17981_v52  ;;  %v3059_v52 = vld [vmem:[#allocation2 + $0xaa] sm:$0xff]  ;;  %v4543_v39 = vld [vmem:[#allocation2 + $0xc0] sm:$0xff] }
 0x29c   :  { %12861 = vmatprep.mubr.msk.f32.mxu0 %vm423_vm3, %v3801_v61  ;;  %15218 = vmatprep.subr.bf16.mxu1 %v17994_v0  ;;  %v15493_v61 = vpack.c.bf16 %v10069_v33, %v10068_v10  ;;  %v10110_v10 = vld [vmem:[%s21815_s4 + $0x1f0] sm:$0xff]  ;;  %v10111_v33 = vld [vmem:[%s21815_s4 + $0x1f8] sm:$0xff] }
 0x29d   :  { %15362 = vmatprep.subr.bf16.mxu0 %v17994_v0 }
 0x29e   :  { %15220 = vmatpush3.bf16.msra.mxu1 %v17994_v0 }
 0x29f   :  { %15364 = vmatpush3.bf16.msra.mxu0 %v17994_v0  ;;  %15222 = vmatprep.subr.bf16.mxu1 %v18007_v19  ;;  %v3894_v0 = vld [vmem:[#allocation2 + $0xb6] sm:$0xff] }
 0x2a0   :  { %15366 = vmatprep.subr.bf16.mxu0 %v18007_v19 }
 0x2a2   :  { %15224 = vmatpush3.bf16.msra.mxu1 %v18007_v19 }
 0x2a3   :  { %15368 = vmatpush3.bf16.msra.mxu0 %v18007_v19  ;;  %15226 = vmatprep.subr.bf16.mxu1 %v18021_v18  ;;  %v3060_v19 = vld [vmem:[#allocation2 + $0xb2] sm:$0x3] }
 0x2a4   :  { %15370 = vmatprep.subr.bf16.mxu0 %v18021_v18 }
 0x2a6   :  { %15228 = vmatpush3.bf16.msra.mxu1 %v18021_v18 }
 0x2a7   :  { %15372 = vmatpush3.bf16.msra.mxu0 %v18021_v18  ;;  %15230 = vmatprep.subr.bf16.mxu1 %v18033_v5  ;;  %v3895_v18 = vld [vmem:[#allocation2 + $0xbe] sm:$0x3] }
 0x2a8   :  { %15374 = vmatprep.subr.bf16.mxu0 %v18033_v5 }
 0x2a9   :  { %12691 = vmatmul.mubr.msk.f32.vlgmr.msra.gmra.mrb[2].mxu1 %vm423_vm3, %v2967_v26  ;;  %v10070_v26 = vld [vmem:[%s21815_s4 + $0xf0] sm:$0xff] }
 0x2aa   :  { %12862 = vmatmul.mubr.msk.f32.vlgmr.msra.gmra.mrb[38].mxu0 %vm423_vm3, %v3802_v34  ;;  %15232 = vmatpush3.bf16.msra.mxu1 %v18033_v5  ;;  %v10071_v34 = vld [vmem:[%s21815_s4 + $0xf8] sm:$0xff] }
 0x2ab   :  { %12709 = vmatprep.mubr.msk.f32.mxu1 %vm423_vm3, %v3059_v52  ;;  %15376 = vmatpush3.bf16.msra.mxu0 %v18033_v5  ;;  %v18386_v5 = vld [vmem:[#allocation2 + $0x30] sm:$0xff]  ;;  %v15497_v52 = vpack.c.bf16 %v10071_v34, %v10070_v26  ;;  %v10115_v26 = vld [vmem:[%s21815_s4 + $0x208] sm:$0xff] }
 0x2ac   :  { %12880 = vmatprep.mubr.msk.f32.mxu0 %vm423_vm3, %v3894_v0  ;;  %15234 = vmatprep.subr.bf16.mxu1 %v18046_v20  ;;  %v10074_v0 = vld [vmem:[%s21815_s4 + $0x100] sm:$0xff] }
 0x2ad   :  { %15378 = vmatprep.subr.bf16.mxu0 %v18046_v20 }
 0x2ae   :  { %15236 = vmatpush3.bf16.msra.mxu1 %v18046_v20 }
 0x2af   :  { %15380 = vmatpush3.bf16.msra.mxu0 %v18046_v20  ;;  %15238 = vmatprep.subr.bf16.mxu1 %v18059_v4  ;;  %v3153_v20 = vld [vmem:[#allocation2 + $0x2c] sm:$0x3] }
 0x2b0   :  { %15382 = vmatprep.subr.bf16.mxu0 %v18059_v4 }
 0x2b2   :  { %15240 = vmatpush3.bf16.msra.mxu1 %v18059_v4 }
 0x2b3   :  { %15384 = vmatpush3.bf16.msra.mxu0 %v18059_v4  ;;  %15242 = vmatprep.subr.bf16.mxu1 %v18073_v56  ;;  %v3988_v4 = vld [vmem:[#allocation2 + $0x38] sm:$0x3] }
 0x2b4   :  { %15386 = vmatprep.subr.bf16.mxu0 %v18073_v56 }
 0x2b6   :  { %15244 = vmatpush3.bf16.msra.mxu1 %v18073_v56 }
 0x2b7   :  { %15388 = vmatpush3.bf16.msra.mxu0 %v18073_v56  ;;  %15246 = vmatprep.subr.bf16.mxu1 %v18085_v57  ;;  %v4080_v56 = vld [vmem:[#allocation2 + $0x78] sm:$0xff] }
 0x2b8   :  { %15390 = vmatprep.subr.bf16.mxu0 %v18085_v57 }
 0x2b9   :  { %12710 = vmatmul.mubr.msk.f32.vlgmr.msra.gmra.mrb[2].mxu1 %vm423_vm3, %v3060_v19  ;;  %v10075_v19 = vld [vmem:[%s21815_s4 + $0x108] sm:$0xff] }
 0x2ba   :  { %12881 = vmatmul.mubr.msk.f32.vlgmr.msra.gmra.mrb[38].mxu0 %vm423_vm3, %v3895_v18  ;;  %15248 = vmatpush3.bf16.msra.mxu1 %v18085_v57  ;;  %v15501_v18 = vpack.c.bf16 %v10075_v19, %v10074_v0  ;;  %v10117_v0 = vld [vmem:[%s21815_s4 + $0x218] sm:$0xff] }
 0x2bb   :  { %12728 = vmatprep.mubr.msk.f32.mxu1 %vm423_vm3, %v18278_v30  ;;  %15392 = vmatpush3.bf16.msra.mxu0 %v18085_v57  ;;  %v3246_v57 = vld [vmem:[#allocation2 + $0x74] sm:$0x3]  ;;  %v15481_v30 = vpack.c.bf16 %v10061_v13, %v10060_v54  ;;  %v10105_v54 = vld [vmem:[%s21815_s4 + $0x1c8] sm:$0xff] }
 0x2bc   :  { %12899 = vmatprep.mubr.msk.f32.mxu0 %vm423_vm3, %v18386_v5  ;;  %15250 = vmatprep.subr.bf16.mxu1 %v18098_v45 }
 0x2bd   :  { %15394 = vmatprep.subr.bf16.mxu0 %v18098_v45 }
 0x2be   :  { %15252 = vmatpush3.bf16.msra.mxu1 %v18098_v45 }
 0x2bf   :  { %15396 = vmatpush3.bf16.msra.mxu0 %v18098_v45  ;;  %15254 = vmatprep.subr.bf16.mxu1 %v18114_v35  ;;  %v4081_v45 = vld [vmem:[#allocation2 + $0x80] sm:$0x3] }
 0x2c0   :  { %15398 = vmatprep.subr.bf16.mxu0 %v18114_v35 }
 0x2c2   :  { %15256 = vmatpush3.bf16.msra.mxu1 %v18114_v35 }
 0x2c3   :  { %15400 = vmatpush3.bf16.msra.mxu0 %v18114_v35  ;;  %15258 = vmatprep.subr.bf16.mxu1 %v18129_v14  ;;  %v10042_v35 = vld [vmem:[%s21815_s4 + $0x40] sm:$0xff] }
 0x2c4   :  { %15402 = vmatprep.subr.bf16.mxu0 %v18129_v14  ;;  %v15437_v38 = vpack.c.bf16 %v10043_v40, %v10042_v35 }
 0x2c6   :  { %15260 = vmatpush3.bf16.msra.mxu1 %v18129_v14 }
 0x2c7   :  { %15404 = vmatpush3.bf16.msra.mxu0 %v18129_v14  ;;  %15262 = vmatprep.subr.bf16.mxu1 %v18141_v50  ;;  %v10044_v14 = vld [vmem:[%s21815_s4 + $0x50] sm:$0xff] }
 0x2c8   :  { %15406 = vmatprep.subr.bf16.mxu0 %v18141_v50  ;;  %v15441_v46 = vpack.c.bf16 %v10045_v47, %v10044_v14  ;;  %v10081_v14 = vld [vmem:[%s21815_s4 + $0x138] sm:$0xff] }
 0x2c9   :  { %12729 = vmatmul.mubr.msk.f32.vlgmr.msra.gmra.mrb[2].mxu1 %vm423_vm3, %v3153_v20  ;;  %v10077_v20 = vld [vmem:[%s21815_s4 + $0x118] sm:$0xff] }
 0x2ca   :  { %12900 = vmatmul.mubr.msk.f32.vlgmr.msra.gmra.mrb[38].mxu0 %vm423_vm3, %v3988_v4  ;;  %15264 = vmatpush3.bf16.msra.mxu1 %v18141_v50 }
 0x2cb   :  { %12747 = vmatprep.mubr.msk.f32.mxu1 %vm423_vm3, %v18254_v27  ;;  %15408 = vmatpush3.bf16.msra.mxu0 %v18141_v50  ;;  %v3339_v50 = vld [vmem:[#allocation2 + $0x2e] sm:$0x3]  ;;  %v15477_v27 = vpack.c.bf16 %v10059_v25, %v10058_v11 }
 0x2cc   :  { %12918 = vmatprep.mubr.msk.f32.mxu0 %vm423_vm3, %v4080_v56  ;;  %15266 = vmatprep.subr.bf16.mxu1 %v18154_v7  ;;  %v10101_v11 = vld [vmem:[%s21815_s4 + $0x1b8] sm:$0xff] }
 0x2cd   :  { %15410 = vmatprep.subr.bf16.mxu0 %v18154_v7 }
 0x2ce   :  { %15268 = vmatpush3.bf16.msra.mxu1 %v18154_v7 }
 0x2cf   :  { %15412 = vmatpush3.bf16.msra.mxu0 %v18154_v7  ;;  %15270 = vmatprep.subr.bf16.mxu1 %v18168_v22  ;;  %v15445_v7 = vpack.c.bf16 %v10047_v58, %v10046_v59  ;;  %v10084_v58 = vld [vmem:[%s21815_s4 + $0x140] sm:$0xff] }
 0x2d0   :  { %15414 = vmatprep.subr.bf16.mxu0 %v18168_v22 }
 0x2d2   :  { %15272 = vmatpush3.bf16.msra.mxu1 %v18168_v22 }
 0x2d3   :  { %15416 = vmatpush3.bf16.msra.mxu0 %v18168_v22  ;;  %15274 = vmatprep.subr.bf16.mxu1 %v18182_v42  ;;  %v4271_v22 = vld [vmem:[%s21815_s4 + $0x8] sm:$0xff] }
 0x2d4   :  { %15418 = vmatprep.subr.bf16.mxu0 %v18182_v42  ;;  %v15453_v55 = vpack.c.bf16 %v4271_v22, %v4270_v1  ;;  %v4637_v1 = vld [vmem:[#allocation2 + $0x110] sm:$0x3] }
 0x2d5   :  { %v10088_v22 = vld [vmem:[%s21815_s4 + $0x160] sm:$0xff] }
 0x2d6   :  { %15276 = vmatpush3.bf16.msra.mxu1 %v18182_v42 }
 0x2d7   :  { %15420 = vmatpush3.bf16.msra.mxu0 %v18182_v42  ;;  %15278 = vmatprep.subr.bf16.mxu1 %v18194_v21  ;;  %v4273_v42 = vld [vmem:[%s21815_s4 + $0x18] sm:$0xff] }
 0x2d8   :  { %15422 = vmatprep.subr.bf16.mxu0 %v18194_v21  ;;  %v15457_v16 = vpack.c.bf16 %v4273_v42, %v4272_v9  ;;  %v4729_v9 = vld [vmem:[#allocation2 + $0xc2] sm:$0xff] }
 0x2d9   :  { %12748 = vmatmul.mubr.msk.f32.vlgmr.msra.gmra.mrb[2].mxu1 %vm423_vm3, %v3246_v57  ;;  %v10078_v57 = vld [vmem:[%s21815_s4 + $0x120] sm:$0xff] }
 0x2da   :  { %12919 = vmatmul.mubr.msk.f32.vlgmr.msra.gmra.mrb[38].mxu0 %vm423_vm3, %v4081_v45  ;;  %15280 = vmatpush3.bf16.msra.mxu1 %v18194_v21  ;;  %v10079_v45 = vld [vmem:[%s21815_s4 + $0x128] sm:$0xff] }
 0x2db   :  { %12766 = vmatprep.mubr.msk.f32.mxu1 %vm423_vm3, %v18302_v8  ;;  %15424 = vmatpush3.bf16.msra.mxu0 %v18194_v21  ;;  %v4274_v21 = vld [vmem:[%s21815_s4 + $0x20] sm:$0xff]  ;;  %v15485_v8 = vpack.c.bf16 %v10065_v63, %v10064_v36  ;;  %v15509_v35 = vpack.c.bf16 %v10079_v45, %v10078_v57  ;;  %v10107_v36 = vld [vmem:[%s21815_s4 + $0x1d8] sm:$0xff]  ;;  %v10120_v57 = vld [vmem:[%s21815_s4 + $0x230] sm:$0xff] }
 0x2dc   :  { %12937 = vmatprep.mubr.msk.f32.mxu0 %vm423_vm3, %v18431_v24  ;;  %15282 = vmatprep.subr.bf16.mxu1 %v18207_v53  ;;  %v15461_v48 = vpack.c.bf16 %v4275_v29, %v4274_v21  ;;  %v10094_v29 = vld [vmem:[%s21815_s4 + $0x180] sm:$0xff]  ;;  %v10121_v45 = vld [vmem:[%s21815_s4 + $0x238] sm:$0xff] }
 0x2dd   :  { %15426 = vmatprep.subr.bf16.mxu0 %v18207_v53 }
 0x2de   :  { %15284 = vmatpush3.bf16.msra.mxu1 %v18207_v53 }
 0x2df   :  { %15428 = vmatpush3.bf16.msra.mxu0 %v18207_v53  ;;  %15286 = vmatprep.subr.bf16.mxu1 %v18223_v60  ;;  %v4277_v53 = vld [vmem:[%s21815_s4 + $0x38] sm:$0xff] }
 0x2e0   :  { %15430 = vmatprep.subr.bf16.mxu0 %v18223_v60  ;;  %v15465_v31 = vpack.c.bf16 %v4277_v53, %v4276_v49  ;;  %v10096_v53 = vld [vmem:[%s21815_s4 + $0x190] sm:$0xff] }
 0x2e2   :  { %15288 = vmatpush3.bf16.msra.mxu1 %v18223_v60 }
 0x2e3   :  { %15432 = vmatpush3.bf16.msra.mxu0 %v18223_v60  ;;  %15290 = vmatprep.subr.bf16.mxu1 %v18238_v44  ;;  %v10056_v60 = vld [vmem:[%s21815_s4 + $0x90] sm:$0xff] }
 0x2e4   :  { %15434 = vmatprep.subr.bf16.mxu0 %v18238_v44  ;;  %v15473_v41 = vpack.c.bf16 %v10057_v3, %v10056_v60  ;;  %v10099_v60 = vld [vmem:[%s21815_s4 + $0x1a8] sm:$0xff] }
 0x2e5   :  { %v4822_v3 = vld [vmem:[#allocation2 + $0x3c] sm:$0xff] }
 0x2e6   :  { %15292 = vmatpush3.bf16.msra.mxu1 %v18238_v44 }
 0x2e7   :  { %15436 = vmatpush3.bf16.msra.mxu0 %v18238_v44  ;;  %15438 = vmatprep.subr.bf16.mxu1 %v15437_v38  ;;  %v4269_v44 = vld [vmem:[#allocation2 + $0x38] sm:$0x3] }
 0x2e9   :  { %12767 = vmatmul.mubr.msk.f32.vlgmr.msra.gmra.mrb[2].mxu1 %vm423_vm3, %v3339_v50 }
 0x2ea   :  { %12938 = vmatmul.mubr.msk.f32.vlgmr.msra.gmra.mrb[38].mxu0 %vm423_vm3, %v4174_v62  ;;  %15440 = vmatpush3.bf16.msra.mxu1 %v15437_v38  ;;  %v10080_v38 = vld [vmem:[%s21815_s4 + $0x130] sm:$0xff]  ;;  %v10085_v62 = vld [vmem:[%s21815_s4 + $0x148] sm:$0xff] }
 0x2eb   :  { %12956 = vmatprep.mubr.msk.f32.mxu1 %vm423_vm3, %v4080_v56  ;;  %15442 = vmatprep.subr.bf16.mxu1 %v15441_v46  ;;  %v4544_v56 = vld [vmem:[#allocation2 + $0xc8] sm:$0x3]  ;;  %v15513_v59 = vpack.c.bf16 %v10081_v14, %v10080_v38 }
 0x2ee   :  { %15444 = vmatpush3.bf16.msra.mxu1 %v15441_v46 }
 0x2ef   :  { %15446 = vmatprep.subr.bf16.mxu1 %v15445_v7 }
 0x2f2   :  { %15448 = vmatpush3.bf16.msra.mxu1 %v15445_v7  ;;  %v15517_v7 = vpack.c.bf16 %v10085_v62, %v10084_v58  ;;  %v5235_v58 = vld [vmem:[%s21819_s8] sm:$0xff] }
 0x2f3   :  { %15450 = vmatprep.subr.bf16.mxu1 %v15449_v28 }
 0x2f6   :  { %15452 = vmatpush3.bf16.msra.mxu1 %v15449_v28  ;;  %v15521_v28 = vpack.c.bf16 %v10087_v6, %v10086_v12  ;;  %v16917_v12 = vmov 0.0|0.0  }
 0x2f7   :  { %15454 = vmatprep.subr.bf16.mxu1 %v15453_v55  ;;  %15581 = vmatprep.subr.bf16.mxu0 %v16917_v12 }
 0x2f9   :  { %12957 = vmatmul.mubr.msk.f32.vlgmr.msra.gmra.mrb[4].mxu1 %vm423_vm3, %v4279_v37  ;;  %v10091_v37 = vld [vmem:[%s21815_s4 + $0x178] sm:$0xff] }
 0x2fa   :  { %15456 = vmatpush3.bf16.msra.mxu1 %v15453_v55  ;;  %12975 = vmatprep.mubr.msk.f32.mxu1 %vm423_vm3, %v18386_v5  ;;  %v10076_v5 = vld [vmem:[%s21815_s4 + $0x110] sm:$0xff]  ;;  %v10089_v55 = vld [vmem:[%s21815_s4 + $0x168] sm:$0xff] }
 0x2fb   :  { %15458 = vmatprep.subr.bf16.mxu1 %v15457_v16  ;;  %v15505_v4 = vpack.c.bf16 %v10077_v20, %v10076_v5  ;;  %v15525_v42 = vpack.c.bf16 %v10089_v55, %v10088_v22  ;;  %v10118_v5 = vld [vmem:[%s21815_s4 + $0x220] sm:$0xff]  ;;  %v10119_v20 = vld [vmem:[%s21815_s4 + $0x228] sm:$0xff]  ;;  %v5237_v22 = vld [vmem:[%s21819_s8 + $0x10] sm:$0xff] }
 0x2fe   :  { %15460 = vmatpush3.bf16.msra.mxu1 %v15457_v16  ;;  %v10090_v16 = vld [vmem:[%s21815_s4 + $0x170] sm:$0xff] }
 0x2ff   :  { %15462 = vmatprep.subr.bf16.mxu1 %v15461_v48  ;;  %v15529_v21 = vpack.c.bf16 %v10091_v37, %v10090_v16  ;;  %v10130_v16 = vld [vmem:[%s21818_s7 + $0xa0] sm:$0xff]  ;;  %v10131_v37 = vld [vmem:[%s21818_s7 + $0xa8] sm:$0xff] }
 0x302   :  { %15464 = vmatpush3.bf16.msra.mxu1 %v15461_v48  ;;  %v10095_v48 = vld [vmem:[%s21815_s4 + $0x188] sm:$0xff] }
 0x303   :  { %15466 = vmatprep.subr.bf16.mxu1 %v15465_v31  ;;  %v15533_v49 = vpack.c.bf16 %v10095_v48, %v10094_v29  ;;  %v15588_v29 = vpack.c.bf16 %v10131_v37, %v10130_v16  ;;  %v5240_v48 = vld [vmem:[%s21819_s8 + $0x28] sm:$0xff] }
 0x306   :  { %15468 = vmatpush3.bf16.msra.mxu1 %v15465_v31  ;;  %v10097_v31 = vld [vmem:[%s21815_s4 + $0x198] sm:$0xff] }
 0x307   :  { %15470 = vmatprep.subr.bf16.mxu1 %v15469_v43  ;;  %v15537_v2 = vpack.c.bf16 %v10097_v31, %v10096_v53  ;;  %v10132_v53 = vld [vmem:[%s21818_s7 + $0xb0] sm:$0xff]  ;;  %v10133_v31 = vld [vmem:[%s21818_s7 + $0xb8] sm:$0xff] }
 0x309   :  { %12976 = vmatmul.mubr.msk.f32.vlgmr.msra.gmra.mrb[4].mxu1 %vm423_vm3, %v4269_v44  ;;  %v10100_v44 = vld [vmem:[%s21815_s4 + $0x1b0] sm:$0xff] }
 0x30a   :  { %15472 = vmatpush3.bf16.msra.mxu1 %v15469_v43  ;;  %12994 = vmatprep.mubr.msk.f32.mxu1 %vm423_vm3, %v18431_v24  ;;  %v4636_v24 = vld [vmem:[#allocation2 + $0x108] sm:$0xff]  ;;  %v10098_v43 = vld [vmem:[%s21815_s4 + $0x1a0] sm:$0xff]  ;;  %v15545_v25 = vpack.c.bf16 %v10101_v11, %v10100_v44  ;;  %v10135_v44 = vld [vmem:[%s21818_s7 + $0xc8] sm:$0xff] }
 0x30b   :  { %15474 = vmatprep.subr.bf16.mxu1 %v15473_v41  ;;  %v5243_v11 = vld [vmem:[%s21819_s8 + $0x40] sm:$0xff] }
 0x30e   :  { %15476 = vmatpush3.bf16.msra.mxu1 %v15473_v41  ;;  %v15541_v41 = vpack.c.bf16 %v10099_v60, %v10098_v43  ;;  %v5242_v43 = vld [vmem:[%s21819_s8 + $0x38] sm:$0xff]  ;;  %v16919_v60 = vmov 0.0  }
 0x30f   :  { %15478 = vmatprep.subr.bf16.mxu1 %v15477_v27 }
 0x312   :  { %15480 = vmatpush3.bf16.msra.mxu1 %v15477_v27  ;;  %v10104_v27 = vld [vmem:[%s21815_s4 + $0x1c0] sm:$0xff] }
 0x313   :  { %15482 = vmatprep.subr.bf16.mxu1 %v15481_v30  ;;  %v15549_v13 = vpack.c.bf16 %v10105_v54, %v10104_v27 }
 0x316   :  { %15484 = vmatpush3.bf16.msra.mxu1 %v15481_v30  ;;  %v10106_v30 = vld [vmem:[%s21815_s4 + $0x1d0] sm:$0xff] }
 0x317   :  { %15486 = vmatprep.subr.bf16.mxu1 %v15485_v8  ;;  %v15553_v63 = vpack.c.bf16 %v10107_v36, %v10106_v30  ;;  %v10137_v30 = vld [vmem:[%s21818_s7 + $0xd8] sm:$0xff]  ;;  %v5245_v36 = vld [vmem:[%s21819_s8 + $0x50] sm:$0xff] }
 0x319   :  { %12995 = vmatmul.mubr.msk.f32.vlgmr.msra.gmra.mrb[4].mxu1 %vm423_vm3, %v4451_v51  ;;  %v15557_v51 = vpack.c.bf16 %v10109_v17, %v10108_v15  ;;  %v10138_v17 = vld [vmem:[%s21818_s7 + $0xe0] sm:$0xff] }
 0x31a   :  { %15488 = vmatpush3.bf16.msra.mxu1 %v15485_v8  ;;  %13013 = vmatprep.mubr.msk.f32.mxu1 %vm423_vm3, %v4543_v39  ;;  %v4823_v8 = vld [vmem:[#allocation2 + $0x44] sm:$0x3]  ;;  %v15561_v39 = vpack.c.bf16 %v10111_v33, %v10110_v10  ;;  %v5248_v10 = vld [vmem:[%s21819_s8 + $0x68] sm:$0xff] }
 0x31b   :  { %15490 = vmatprep.subr.bf16.mxu1 %v15489_v23 }
 0x31e   :  { %15492 = vmatpush3.bf16.msra.mxu1 %v15489_v23  ;;  %v4915_v23 = vld [vmem:[#allocation2 + $0x84] sm:$0xff] }
 0x31f   :  { %15494 = vmatprep.subr.bf16.mxu1 %v15493_v61 }
 0x322   :  { %15496 = vmatpush3.bf16.msra.mxu1 %v15493_v61  ;;  %v10114_v61 = vld [vmem:[%s21815_s4 + $0x200] sm:$0xff] }
 0x323   :  { %15498 = vmatprep.subr.bf16.mxu1 %v15497_v52  ;;  %v15565_v34 = vpack.c.bf16 %v10115_v26, %v10114_v61  ;;  %v10140_v61 = vld [vmem:[%s21818_s7 + $0xf0] sm:$0xff]  ;;  %v10141_v26 = vld [vmem:[%s21818_s7 + $0xf8] sm:$0xff] }
 0x326   :  { %15500 = vmatpush3.bf16.msra.mxu1 %v15497_v52  ;;  %v10116_v52 = vld [vmem:[%s21815_s4 + $0x210] sm:$0xff] }
 0x327   :  { %15502 = vmatprep.subr.bf16.mxu1 %v15501_v18  ;;  %v15569_v19 = vpack.c.bf16 %v10117_v0, %v10116_v52  ;;  %v5250_v52 = vld [vmem:[%s21819_s8 + $0x78] sm:$0xff]  ;;  %v15603_v0 = vpack.c.bf16 %v10141_v26, %v10140_v61 }
 0x329   :  { %13014 = vmatmul.mubr.msk.f32.vlgmr.msra.gmra.mrb[4].mxu1 %vm423_vm3, %v4544_v56  ;;  %v15573_v56 = vpack.c.bf16 %v10119_v20, %v10118_v5 }
 0x32a   :  { %15504 = vmatpush3.bf16.msra.mxu1 %v15501_v18  ;;  %13032 = vmatprep.mubr.msk.f32.mxu1 %vm423_vm3, %v4636_v24  ;;  %v4916_v18 = vld [vmem:[#allocation2 + $0x8c] sm:$0x3]  ;;  %v15577_v24 = vpack.c.bf16 %v10121_v45, %v10120_v57 }
 0x32b   :  { %15506 = vmatprep.subr.bf16.mxu1 %v15505_v4 }
 0x32c   :  { %v12426_v40 = vpop.f32.mrb[0].mxu1 }
 0x32d   :  { %1762 = vst [vmem:[#allocation3 + $0x8] sm:$0x3] %v12426_v40  ;;  %v12597_v47 = vpop.f32.mrb[36].mxu0  ;;  %v18580_v46 = vpop.f32.mrb[1].mxu1 }
 0x32e   :  { %2597 = vst [vmem:[#allocation3 + $0x12] sm:$0x3] %v12597_v47  ;;  %v2585_v50 = vpop.f32.mrb[37].mxu0  ;;  %15508 = vmatpush3.bf16.msra.mxu1 %v15505_v4  ;;  %v5008_v4 = vld [vmem:[#allocation2 + $0x3e] sm:$0xff] }
 0x32f   :  { %2596 = vst [vmem:[#allocation3 + $0xa] sm:$0xff] %v2585_v50  ;;  %15510 = vmatprep.subr.bf16.mxu1 %v15509_v35  ;;  %v10126_v50 = vld [vmem:[%s21818_s7 + $0x80] sm:$0xff] }
 0x332   :  { %15512 = vmatpush3.bf16.msra.mxu1 %v15509_v35  ;;  %v5009_v35 = vld [vmem:[#allocation2 + $0x46] sm:$0x3] }
 0x333   :  { %15514 = vmatprep.subr.bf16.mxu1 %v15513_v59 }
 0x336   :  { %15516 = vmatpush3.bf16.msra.mxu1 %v15513_v59  ;;  %v10127_v59 = vld [vmem:[%s21818_s7 + $0x88] sm:$0xff] }
 0x337   :  { %15518 = vmatprep.subr.bf16.mxu1 %v15517_v7  ;;  %v15582_v62 = vpack.c.bf16 %v10127_v59, %v10126_v50 }
 0x339   :  { %13033 = vmatmul.mubr.msk.f32.vlgmr.msra.gmra.mrb[4].mxu1 %vm423_vm3, %v4637_v1  ;;  %15583 = vmatpush3.bf16.msra.mxu0 %v15582_v62  ;;  %v10129_v1 = vld [vmem:[%s21818_s7 + $0x98] sm:$0xff] }
 0x33a   :  { %15520 = vmatpush3.bf16.msra.mxu1 %v15517_v7  ;;  %13051 = vmatprep.mubr.msk.f32.mxu1 %vm423_vm3, %v4729_v9  ;;  %v5236_v7 = vld [vmem:[%s21819_s8 + $0x8] sm:$0xff]  ;;  %v5238_v9 = vld [vmem:[%s21819_s8 + $0x18] sm:$0xff] }
 0x33b   :  { %15522 = vmatprep.subr.bf16.mxu1 %v15521_v28  ;;  %v15654_v6 = vpack.c.bf16 %v5236_v7, %v5235_v58  ;;  %15584 = vmatprep.subr.bf16.mxu0 %v16917_v12 }
 0x33e   :  { %15524 = vmatpush3.bf16.msra.mxu1 %v15521_v28  ;;  %v10128_v28 = vld [vmem:[%s21818_s7 + $0x90] sm:$0xff] }
 0x33f   :  { %15526 = vmatprep.subr.bf16.mxu1 %v15525_v42  ;;  %v15585_v55 = vpack.c.bf16 %v10129_v1, %v10128_v28 }
 0x341   :  { %15586 = vmatpush3.bf16.msra.mxu0 %v15585_v55 }
 0x342   :  { %15528 = vmatpush3.bf16.msra.mxu1 %v15525_v42  ;;  %v15657_v42 = vpack.c.bf16 %v5238_v9, %v5237_v22  ;;  %15587 = vmatprep.subr.bf16.mxu0 %v16917_v12 }
 0x343   :  { %15530 = vmatprep.subr.bf16.mxu1 %v15529_v21 }
 0x345   :  { %15589 = vmatpush3.bf16.msra.mxu0 %v15588_v29 }
 0x346   :  { %15532 = vmatpush3.bf16.msra.mxu1 %v15529_v21  ;;  %v5239_v21 = vld [vmem:[%s21819_s8 + $0x20] sm:$0xff]  ;;  %15590 = vmatprep.subr.bf16.mxu0 %v16917_v12 }
 0x347   :  { %15534 = vmatprep.subr.bf16.mxu1 %v15533_v49 }
 0x349   :  { %13052 = vmatmul.mubr.msk.f32.vlgmr.msra.gmra.mrb[4].mxu1 %vm423_vm3, %v4730_v32  ;;  %v15591_v32 = vpack.c.bf16 %v10133_v31, %v10132_v53 }
 0x34a   :  { %15536 = vmatpush3.bf16.msra.mxu1 %v15533_v49  ;;  %13070 = vmatprep.mubr.msk.f32.mxu1 %vm423_vm3, %v4822_v3  ;;  %v15660_v49 = vpack.c.bf16 %v5240_v48, %v5239_v21 }
 0x34b   :  { %15538 = vmatprep.subr.bf16.mxu1 %v15537_v2  ;;  %15592 = vmatpush3.bf16.msra.mxu0 %v15591_v32 }
 0x34c   :  { %15593 = vmatprep.subr.bf16.mxu0 %v16917_v12 }
 0x34e   :  { %15540 = vmatpush3.bf16.msra.mxu1 %v15537_v2  ;;  %v5241_v2 = vld [vmem:[%s21819_s8 + $0x30] sm:$0xff] }
 0x34f   :  { %15542 = vmatprep.subr.bf16.mxu1 %v15541_v41  ;;  %v15663_v3 = vpack.c.bf16 %v5242_v43, %v5241_v2 }
 0x352   :  { %15544 = vmatpush3.bf16.msra.mxu1 %v15541_v41  ;;  %v10134_v41 = vld [vmem:[%s21818_s7 + $0xc0] sm:$0xff] }
 0x353   :  { %15546 = vmatprep.subr.bf16.mxu1 %v15545_v25  ;;  %v15594_v27 = vpack.c.bf16 %v10135_v44, %v10134_v41 }
 0x355   :  { %15595 = vmatpush3.bf16.msra.mxu0 %v15594_v27 }
 0x356   :  { %15548 = vmatpush3.bf16.msra.mxu1 %v15545_v25  ;;  %v5244_v25 = vld [vmem:[%s21819_s8 + $0x48] sm:$0xff]  ;;  %15596 = vmatprep.subr.bf16.mxu0 %v16917_v12 }
 0x357   :  { %15550 = vmatprep.subr.bf16.mxu1 %v15549_v13  ;;  %v15666_v54 = vpack.c.bf16 %v5244_v25, %v5243_v11 }
 0x359   :  { %13071 = vmatmul.mubr.msk.f32.vlgmr.msra.gmra.mrb[4].mxu1 %vm423_vm3, %v4823_v8 }
 0x35a   :  { %15552 = vmatpush3.bf16.msra.mxu1 %v15549_v13  ;;  %13089 = vmatprep.mubr.msk.f32.mxu1 %vm423_vm3, %v4915_v23  ;;  %v10136_v13 = vld [vmem:[%s21818_s7 + $0xd0] sm:$0xff]  ;;  %v10139_v23 = vld [vmem:[%s21818_s7 + $0xe8] sm:$0xff] }
 0x35b   :  { %15554 = vmatprep.subr.bf16.mxu1 %v15553_v63  ;;  %v15597_v8 = vpack.c.bf16 %v10137_v30, %v10136_v13  ;;  %v15600_v33 = vpack.c.bf16 %v10139_v23, %v10138_v17  ;;  %v10124_v23 = vld [vmem:[%s21816_s5] ss:$0 sm:$0xff] }
 0x35d   :  { %15598 = vmatpush3.bf16.msra.mxu0 %v15597_v8 }
 0x35e   :  { %15556 = vmatpush3.bf16.msra.mxu1 %v15553_v63  ;;  %v5246_v63 = vld [vmem:[%s21819_s8 + $0x58] sm:$0xff]  ;;  %15599 = vmatprep.subr.bf16.mxu0 %v16917_v12 }
 0x35f   :  { %15558 = vmatprep.subr.bf16.mxu1 %v15557_v51  ;;  %v15669_v15 = vpack.c.bf16 %v5246_v63, %v5245_v36 }
 0x361   :  { %15601 = vmatpush3.bf16.msra.mxu0 %v15600_v33 }
 0x362   :  { %15560 = vmatpush3.bf16.msra.mxu1 %v15557_v51  ;;  %v5247_v51 = vld [vmem:[%s21819_s8 + $0x60] sm:$0xff]  ;;  %15602 = vmatprep.subr.bf16.mxu0 %v16917_v12 }
 0x363   :  { %15562 = vmatprep.subr.bf16.mxu1 %v15561_v39 }
 0x365   :  { %15604 = vmatpush3.bf16.msra.mxu0 %v15603_v0 }
 0x366   :  { %15564 = vmatpush3.bf16.msra.mxu1 %v15561_v39  ;;  %v15672_v39 = vpack.c.bf16 %v5248_v10, %v5247_v51  ;;  %15605 = vmatprep.subr.bf16.mxu0 %v16917_v12 }
 0x367   :  { %15566 = vmatprep.subr.bf16.mxu1 %v15565_v34 }
 0x369   :  { %13090 = vmatmul.mubr.msk.f32.vlgmr.msra.gmra.mrb[4].mxu1 %vm423_vm3, %v4916_v18  ;;  %v5104_v18 = vld [vmem:[#allocation3 + $0x8] sm:$0xff] }
 0x36a   :  { %15568 = vmatpush3.bf16.msra.mxu1 %v15565_v34  ;;  %13108 = vmatprep.mubr.msk.f32.mxu1 %vm423_vm3, %v5008_v4  ;;  %v5249_v34 = vld [vmem:[%s21819_s8 + $0x70] sm:$0xff]  ;;  %v5110_v20 = vadd.f32 %v5104_v18, %v18580_v46 }
 0x36b   :  { %15570 = vmatprep.subr.bf16.mxu1 %v15569_v19 }
 0x36e   :  { %15572 = vmatpush3.bf16.msra.mxu1 %v15569_v19  ;;  %v15675_v19 = vpack.c.bf16 %v5250_v52, %v5249_v34  ;;  %v10125_v52 = vld [vmem:[%s21817_s6] ss:$0 sm:$0xff] }
 0x36f   :  { %15574 = vmatprep.subr.bf16.mxu1 %v15573_v56 }
 0x372   :  { %15576 = vmatpush3.bf16.msra.mxu1 %v15573_v56 }
 0x373   :  { %15578 = vmatprep.subr.bf16.mxu1 %v15577_v24 }
 0x376   :  { %15580 = vmatpush3.bf16.msra.mxu1 %v15577_v24 }
 0x377   :  { %15653 = vmatprep.subr.bf16.mxu1 %v16917_v12 }
 0x379   :  { %13109 = vmatmul.mubr.msk.f32.vlgmr.msra.gmra.mrb[4].mxu1 %vm423_vm3, %v5009_v35  ;;  %vm16918_vm3 = vmmov 0  }
 0x37a   :  { %15655 = vmatpush3.bf16.msra.mxu1 %v15654_v6  ;;  %13143 = vmatprep.mubr.msk.f32.mxu0 %vm16918_vm3, %v16919_v60 }
 0x37b   :  { %15656 = vmatprep.subr.bf16.mxu1 %v16917_v12  ;;  %13248 = vmatprep.mubr.msk.f32.mxu1 %vm16918_vm3, %v16919_v60 }
 0x37e   :  { %15658 = vmatpush3.bf16.msra.mxu1 %v15657_v42 }
 0x37f   :  { %15659 = vmatprep.subr.bf16.mxu1 %v16917_v12 }
 0x382   :  { %15661 = vmatpush3.bf16.msra.mxu1 %v15660_v49 }
 0x383   :  { %15662 = vmatprep.subr.bf16.mxu1 %v16917_v12 }
 0x386   :  { %15664 = vmatpush3.bf16.msra.mxu1 %v15663_v3 }
 0x387   :  { %15665 = vmatprep.subr.bf16.mxu1 %v16917_v12 }
 0x38a   :  { %15667 = vmatpush3.bf16.msra.mxu1 %v15666_v54 }
 0x38b   :  { %15668 = vmatprep.subr.bf16.mxu1 %v16917_v12 }
 0x38e   :  { %15670 = vmatpush3.bf16.msra.mxu1 %v15669_v15 }
 0x38f   :  { %15671 = vmatprep.subr.bf16.mxu1 %v16917_v12 }
 0x392   :  { %15673 = vmatpush3.bf16.msra.mxu1 %v15672_v39 }
 0x393   :  { %15674 = vmatprep.subr.bf16.mxu1 %v16917_v12 }
 0x396   :  { %15676 = vmatpush3.bf16.msra.mxu1 %v15675_v19 }
 0x397   :  { %15701 = vmatprep.subr.bf16.mxu1 %v16917_v12 }
 0x3bc   :  { %v12768_v40 = vpop.f32.mrb[2].mxu1 }
 0x3bd   :  { %3432 = vst [vmem:[#allocation3 + $0x1c] sm:$0x3] %v12768_v40  ;;  %v12939_v38 = vpop.f32.mrb[38].mxu0  ;;  %v3420_v14 = vpop.f32.mrb[3].mxu1 }
 0x3be   :  { %4267 = vst [vmem:[#allocation3 + $0x26] sm:$0x3] %v12939_v38  ;;  %3431 = vst [vmem:[#allocation3 + $0x14] sm:$0xff] %v3420_v14  ;;  %v4255_v47 = vpop.f32.mrb[39].mxu0 }
 0x3bf   :  { %4266 = vst [vmem:[#allocation3 + $0x1e] sm:$0xff] %v4255_v47 }
 0x3c5   :  { %v5105_v5 = vld [vmem:[#allocation3 + $0x10] sm:$0xff] }
 0x3c6   :  { %v5111_v4 = vadd.f32 %v5110_v20, %v5105_v5  ;;  %v5106_v56 = vld [vmem:[#allocation3 + $0x18] sm:$0xff]  ;;  %v5107_v45 = vld [vmem:[#allocation3 + $0x20] sm:$0xff] }
 0x3c8   :  { %v5112_v57 = vadd.f32 %v5111_v4, %v5106_v56 }
 0x3ca   :  { %v5113_v35 = vadd.f32 %v5112_v57, %v5107_v45 }
 0x44c   :  { %v13110_v24 = vpop.f32.mrb[4].mxu1 }
 0x44d   :  { %5102 = vst [vmem:[#allocation3 + $0x30] sm:$0x3] %v13110_v24  ;;  %v5090_v40 = vpop.f32.mrb[5].mxu1 }
 0x44e   :  { %v5114_v38 = vadd.f32 %v5113_v35, %v5090_v40 }
 0x454   :  { %v5109_v14 = vld [vmem:[#allocation3 + $0x30] sm:$0x3] }
 0x455   :  { %v5116_v47 = vsel %vm5115_vm14, %v5109_v14, 0.0 }
 0x456   :  { %v5117_v50 = vadd.f32 %v5116_v47, %v5114_v38 }
 0x458   :  { %v5118_v59 = vrot.slane %v5117_v50, 4 }
 0x45a   :  { %v5119_v58 = vadd.f32 %v5118_v59, %v5117_v50 }
 0x45c   :  { %v5120_v62 = vrot.slane %v5119_v58, 2 }
 0x45e   :  { %v5121_v7 = vadd.f32 %v5120_v62, %v5119_v58 }
 0x460   :  { %v5122_v6 = vrot.slane %v5121_v7, 1 }
 0x462   :  { %v5123_v28 = vadd.f32 %v5122_v6, %v5121_v7 }
 0x464   :  { %v5124_v1 = vmul.f32 0.02, %v5123_v28 }
 0x466   :  { %v5125_v22 = vsub.f32 %v18580_v46, %v5124_v1  ;;  %v5126_v55 = vsub.f32 %v5104_v18, %v5124_v1  ;;  %v5127_v9 = vsub.f32 %v5105_v5, %v5124_v1  ;;  %v5130_v42 = vsub.f32 %v5090_v40, %v5124_v1 }
 0x467   :  { %v5128_v16 = vsub.f32 %v5106_v56, %v5124_v1  ;;  %v5129_v29 = vsub.f32 %v5107_v45, %v5124_v1  ;;  %v5131_v53 = vsub.f32 %v5109_v14, %v5124_v1 }
 0x468   :  { %v5132_v37 = vmul.f32 %v5125_v22, %v5125_v22  ;;  %v5133_v21 = vmul.f32 %v5126_v55, %v5126_v55  ;;  %v5134_v48 = vmul.f32 %v5127_v9, %v5127_v9  ;;  %v5137_v41 = vmul.f32 %v5130_v42, %v5130_v42 }
 0x469   :  { %v5135_v31 = vmul.f32 %v5128_v16, %v5128_v16  ;;  %v5136_v32 = vmul.f32 %v5129_v29, %v5129_v29  ;;  %v5138_v3 = vmul.f32 %v5131_v53, %v5131_v53 }
 0x46a   :  { %v5139_v49 = vadd.f32 %v5133_v21, %v5132_v37  ;;  %v5219_v37 = vld [vmem:[%s21818_s7] sm:$0xff]  ;;  %v5220_v21 = vld [vmem:[%s21818_s7 + $0x8] sm:$0xff] }
 0x46b   :  { %v5144_v46 = vsel %vm5115_vm14, %v5138_v3, 0.0 }
 0x46c   :  { %v5140_v2 = vadd.f32 %v5139_v49, %v5134_v48  ;;  %v10175_v48 = vld [vmem:[%s21819_s8 + $0x108] sm:$0xff]  ;;  %v15606_v49 = vpack.c.bf16 %v5220_v21, %v5219_v37  ;;  %v10146_v21 = vld [vmem:[%s21819_s8 + $0xa0] sm:$0xff] }
 0x46e   :  { %v5141_v43 = vadd.f32 %v5140_v2, %v5135_v31  ;;  %v5221_v31 = vld [vmem:[%s21818_s7 + $0x10] sm:$0xff]  ;;  %v5222_v2 = vld [vmem:[%s21818_s7 + $0x18] sm:$0xff] }
 0x470   :  { %v5142_v44 = vadd.f32 %v5141_v43, %v5136_v32  ;;  %v10176_v32 = vld [vmem:[%s21819_s8 + $0x110] sm:$0xff]  ;;  %v10177_v43 = vld [vmem:[%s21819_s8 + $0x118] sm:$0xff] }
 0x472   :  { %v5143_v11 = vadd.f32 %v5142_v44, %v5137_v41  ;;  %v15609_v44 = vpack.c.bf16 %v5222_v2, %v5221_v31  ;;  %v10148_v2 = vld [vmem:[%s21819_s8 + $0xb0] sm:$0xff] }
 0x474   :  { %v5145_v25 = vadd.f32 %v5144_v46, %v5143_v11  ;;  %v15705_v11 = vpack.c.bf16 %v10177_v43, %v10176_v32  ;;  %v5223_v46 = vld [vmem:[%s21818_s7 + $0x20] sm:$0xff]  ;;  %v10149_v32 = vld [vmem:[%s21819_s8 + $0xb8] sm:$0xff]  ;;  %v10212_v43 = vld [vmem:[%s21819_s8 + $0x1b0] sm:$0xff] }
 0x476   :  { %v5146_v27 = vrot.slane %v5145_v25, 4 }
 0x478   :  { %v5147_v54 = vadd.f32 %v5146_v27, %v5145_v25  ;;  %v5224_v25 = vld [vmem:[%s21818_s7 + $0x28] sm:$0xff]  ;;  %v10178_v27 = vld [vmem:[%s21819_s8 + $0x120] sm:$0xff] }
 0x47a   :  { %v5148_v13 = vrot.slane %v5147_v54, 2 }
 0x47c   :  { %v5149_v30 = vadd.f32 %v5148_v13, %v5147_v54  ;;  %v10179_v54 = vld [vmem:[%s21819_s8 + $0x128] sm:$0xff]  ;;  %v15612_v13 = vpack.c.bf16 %v5224_v25, %v5223_v46  ;;  %v10150_v46 = vld [vmem:[%s21819_s8 + $0xc0] sm:$0xff] }
 0x47d   :  { %v10151_v25 = vld [vmem:[%s21819_s8 + $0xc8] sm:$0xff] }
 0x47e   :  { %v5150_v36 = vrot.slane %v5149_v30, 1 }
 0x480   :  { %v5151_v63 = vadd.f32 %v5150_v36, %v5149_v30  ;;  %v15708_v30 = vpack.c.bf16 %v10179_v54, %v10178_v27  ;;  %v5225_v36 = vld [vmem:[%s21818_s7 + $0x30] sm:$0xff]  ;;  %v10214_v27 = vld [vmem:[%s21819_s8 + $0x1c0] sm:$0xff]  ;;  %v10215_v54 = vld [vmem:[%s21819_s8 + $0x1c8] sm:$0xff] }
 0x482   :  { %v5152_v8 = vmul.f32 0.02, %v5151_v63  ;;  %v5226_v63 = vld [vmem:[%s21818_s7 + $0x38] sm:$0xff] }
 0x484   :  { %v5153_v15 = vadd.f32 1e-05, %v5152_v8  ;;  %v10180_v8 = vld [vmem:[%s21819_s8 + $0x130] sm:$0xff] }
 0x486   :  { %16888 = vrsqrt.f32 %v5153_v15  ;;  %v10181_v15 = vld [vmem:[%s21819_s8 + $0x138] sm:$0xff] }
 0x490   :  { %v16889_v17 = vpop.eup %16888 }
 0x491   :  { %v5155_v51 = vmul.f32 %v16889_v17, %v5125_v22  ;;  %v5156_v10 = vmul.f32 %v16889_v17, %v5126_v55  ;;  %v5157_v33 = vmul.f32 %v16889_v17, %v5127_v9  ;;  %v5158_v39 = vmul.f32 %v16889_v17, %v5128_v16 }
 0x492   :  { %v5159_v61 = vmul.f32 %v16889_v17, %v5129_v29  ;;  %v5160_v26 = vmul.f32 %v16889_v17, %v5130_v42  ;;  %v5161_v34 = vmul.f32 %v16889_v17, %v5131_v53  ;;  %v10174_v29 = vld [vmem:[%s21819_s8 + $0x100] sm:$0xff]  ;;  %v15615_v17 = vpack.c.bf16 %v5226_v63, %v5225_v36  ;;  %v10152_v36 = vld [vmem:[%s21819_s8 + $0xd0] sm:$0xff]  ;;  %v10153_v63 = vld [vmem:[%s21819_s8 + $0xd8] sm:$0xff] }
 0x493   :  { %v5169_v0 = vmul.f32 %v10124_v23, %v5155_v51  ;;  %v5170_v19 = vmul.f32 %v10124_v23, %v5156_v10  ;;  %v5171_v18 = vmul.f32 %v10124_v23, %v5157_v33  ;;  %v5172_v5 = vmul.f32 %v10124_v23, %v5158_v39  ;;  %v5227_v51 = vld [vmem:[%s21818_s7 + $0x40] sm:$0xff]  ;;  %v5228_v10 = vld [vmem:[%s21818_s7 + $0x48] sm:$0xff] }
 0x494   :  { %v5173_v20 = vmul.f32 %v10124_v23, %v5159_v61  ;;  %v5174_v4 = vmul.f32 %v10124_v23, %v5160_v26  ;;  %v5175_v56 = vmul.f32 %v10124_v23, %v5161_v34  ;;  %v15702_v53 = vpack.c.bf16 %v10175_v48, %v10174_v29  ;;  %v10182_v33 = vld [vmem:[%s21819_s8 + $0x140] sm:$0xff]  ;;  %v10183_v39 = vld [vmem:[%s21819_s8 + $0x148] sm:$0xff]  ;;  %v5229_v34 = vld [vmem:[%s21818_s7 + $0x50] sm:$0xff] }
 0x495   :  { %v5183_v57 = vadd.f32 %v10125_v52, %v5169_v0  ;;  %v5184_v45 = vadd.f32 %v10125_v52, %v5170_v19  ;;  %v5185_v24 = vadd.f32 %v10125_v52, %v5171_v18  ;;  %v5186_v35 = vadd.f32 %v10125_v52, %v5172_v5  ;;  %v10184_v0 = vld [vmem:[%s21819_s8 + $0x150] sm:$0xff]  ;;  %v10185_v19 = vld [vmem:[%s21819_s8 + $0x158] sm:$0xff]  ;;  %v10147_v29 = vld [vmem:[%s21819_s8 + $0xa8] sm:$0xff] }
 0x496   :  { %v5187_v40 = vadd.f32 %v10125_v52, %v5173_v20  ;;  %v5188_v38 = vadd.f32 %v10125_v52, %v5174_v4  ;;  %v5189_v14 = vadd.f32 %v10125_v52, %v5175_v56  ;;  %v15711_v23 = vpack.c.bf16 %v10181_v15, %v10180_v8  ;;  %v5230_v52 = vld [vmem:[%s21818_s7 + $0x58] sm:$0xff]  ;;  %v5231_v20 = vld [vmem:[%s21818_s7 + $0x60] sm:$0xff]  ;;  %v5232_v4 = vld [vmem:[%s21818_s7 + $0x68] sm:$0xff] }
 0x497   :  { %vm5190_vm1 = vcmp.ge.f32.partialorder %v5183_v57, 0.0  ;;  %vm5191_vm4 = vcmp.ge.f32.partialorder %v5184_v45, 0.0  ;;  %vm5192_vm6 = vcmp.ge.f32.partialorder %v5185_v24, 0.0  ;;  %vm5193_vm7 = vcmp.ge.f32.partialorder %v5186_v35, 0.0  ;;  %v10186_v56 = vld [vmem:[%s21819_s8 + $0x160] sm:$0xff]  ;;  %v10216_v8 = vld [vmem:[%s21819_s8 + $0x1d0] sm:$0xff] }
 0x498   :  { %vm5194_vm8 = vcmp.ge.f32.partialorder %v5187_v40, 0.0  ;;  %vm5195_vm9 = vcmp.ge.f32.partialorder %v5188_v38, 0.0  ;;  %vm5196_vm0 = vcmp.ge.f32.partialorder %v5189_v14, 0.0  ;;  %v5197_v47 = vmul.f32 0.1, %v5183_v57  ;;  %v10210_v48 = vld [vmem:[%s21819_s8 + $0x1a0] sm:$0xff] }
 0x499   :  { %v5198_v50 = vmul.f32 0.1, %v5184_v45  ;;  %v5199_v59 = vmul.f32 0.1, %v5185_v24  ;;  %v5200_v58 = vmul.f32 0.1, %v5186_v35  ;;  %v15618_v61 = vpack.c.bf16 %v5228_v10, %v5227_v51 }
 0x49a   :  { %v5201_v62 = vmul.f32 0.1, %v5187_v40  ;;  %v5202_v7 = vmul.f32 0.1, %v5188_v38  ;;  %v5203_v6 = vmul.f32 0.1, %v5189_v14  ;;  %v5204_v28 = vsel %vm5190_vm1, %v5183_v57, %v5197_v47 }
 0x49b   :  { %v5205_v1 = vsel %vm5191_vm4, %v5184_v45, %v5198_v50  ;;  %v5206_v22 = vsel %vm5192_vm6, %v5185_v24, %v5199_v59  ;;  %v5207_v55 = vsel %vm5193_vm7, %v5186_v35, %v5200_v58  ;;  %5211 = vst [vmem:[#allocation3] sm:$0xff] %v5204_v28  ;;  %v15714_v26 = vpack.c.bf16 %v10183_v39, %v10182_v33  ;;  %v10187_v57 = vld [vmem:[%s21819_s8 + $0x168] sm:$0xff]  ;;  %v5233_v35 = vld [vmem:[%s21818_s7 + $0x70] sm:$0xff]  ;;  %v10142_v59 = vld [vmem:[%s21819_s8 + $0x80] sm:$0xff] }
 0x49c   :  { %v5208_v9 = vsel %vm5194_vm8, %v5187_v40, %v5201_v62  ;;  %v5209_v42 = vsel %vm5195_vm9, %v5188_v38, %v5202_v7  ;;  %v5210_v16 = vsel %vm5196_vm0, %v5189_v14, %v5203_v6  ;;  %5212 = vst [vmem:[#allocation3 + $0x8] sm:$0xff] %v5205_v1  ;;  %5213 = vst [vmem:[#allocation3 + $0x10] sm:$0xff] %v5206_v22  ;;  %v5234_v40 = vld [vmem:[%s21818_s7 + $0x78] sm:$0xff]  ;;  %v10188_v38 = vld [vmem:[%s21819_s8 + $0x170] sm:$0xff] }
 0x49d   :  { %5214 = vst [vmem:[#allocation3 + $0x18] sm:$0xff] %v5207_v55  ;;  %5215 = vst [vmem:[#allocation3 + $0x20] sm:$0xff] %v5208_v9  ;;  %v15621_v18 = vpack.c.bf16 %v5230_v52, %v5229_v34  ;;  %v15717_v5 = vpack.c.bf16 %v10185_v19, %v10184_v0  ;;  %v15624_v45 = vpack.c.bf16 %v5232_v4, %v5231_v20  ;;  %v10189_v14 = vld [vmem:[%s21819_s8 + $0x178] sm:$0xff]  ;;  %v10143_v58 = vld [vmem:[%s21819_s8 + $0x88] sm:$0xff] }
 0x49e   :  { %5216 = vst [vmem:[#allocation3 + $0x28] sm:$0xff] %v5209_v42  ;;  %5217 = vst [vmem:[#allocation3 + $0x30] sm:$0x3] %v5210_v16  ;;  %v15720_v24 = vpack.c.bf16 %v10187_v57, %v10186_v56  ;;  %v15627_v47 = vpack.c.bf16 %v5234_v40, %v5233_v35  ;;  %v15723_v50 = vpack.c.bf16 %v10189_v14, %v10188_v38  ;;  %v10206_v62 = vld [vmem:[%s21819_s8 + $0x180] sm:$0xff]  ;;  %v10207_v7 = vld [vmem:[%s21819_s8 + $0x188] sm:$0xff] }
 0x49f   :  { %v15630_v6 = vpack.c.bf16 %v10143_v58, %v10142_v59  ;;  %v15750_v28 = vpack.c.bf16 %v10207_v7, %v10206_v62  ;;  %v10144_v1 = vld [vmem:[%s21819_s8 + $0x90] sm:$0xff]  ;;  %v10145_v22 = vld [vmem:[%s21819_s8 + $0x98] sm:$0xff]  ;;  %v10154_v51 = vld [vmem:[%s21819_s8 + $0xe0] sm:$0xff] }
 0x4a0   :  { %v10208_v55 = vld [vmem:[%s21819_s8 + $0x190] sm:$0xff]  ;;  %v10209_v9 = vld [vmem:[%s21819_s8 + $0x198] sm:$0xff]  ;;  %v15633_v16 = vpack.c.bf16 %v10145_v22, %v10144_v1  ;;  %v10155_v10 = vld [vmem:[%s21819_s8 + $0xe8] sm:$0xff] }
 0x4a1   :  { %v15753_v37 = vpack.c.bf16 %v10209_v9, %v10208_v55  ;;  %v10217_v15 = vld [vmem:[%s21819_s8 + $0x1d8] sm:$0xff]  ;;  %v10218_v33 = vld [vmem:[%s21819_s8 + $0x1e0] sm:$0xff]  ;;  %v10219_v39 = vld [vmem:[%s21819_s8 + $0x1e8] sm:$0xff] }
 0x4a2   :  { %v18839_v3 = vld [vmem:[#allocation3 + $0x2] sm:$0x3]  ;;  %v18841_v41 = vld [vmem:[#allocation3] sm:$0x3]  ;;  %v18961_v42 = vld [vmem:[#allocation3 + $0x4] sm:$0x3] }
 0x4a3   :  { %13144 = vmatmul.mubr.f32.vlgmr.msra.gmra.mrb[40].mxu0 %v18839_v3  ;;  %13249 = vmatmul.mubr.f32.vlgmr.msra.gmra.mrb[6].mxu1 %v18841_v41  ;;  %v10156_v34 = vld [vmem:[%s21819_s8 + $0xf0] sm:$0xff]  ;;  %v10157_v52 = vld [vmem:[%s21819_s8 + $0xf8] sm:$0xff]  ;;  %v10158_v20 = vld [vmem:[%s21818_s7 + $0x100] sm:$0xff] }
 0x4a4   :  { %15607 = vmatpush3.bf16.msra.mxu0 %v15606_v49  ;;  %15703 = vmatpush3.bf16.msra.mxu1 %v15702_v53  ;;  %v10211_v49 = vld [vmem:[%s21819_s8 + $0x1a8] sm:$0xff]  ;;  %v15636_v53 = vpack.c.bf16 %v10147_v29, %v10146_v21  ;;  %v10220_v0 = vld [vmem:[%s21819_s8 + $0x1f0] sm:$0xff]  ;;  %v10221_v19 = vld [vmem:[%s21819_s8 + $0x1f8] sm:$0xff] }
 0x4a5   :  { %15608 = vmatprep.subr.bf16.mxu0 %v16917_v12  ;;  %15704 = vmatprep.subr.bf16.mxu1 %v16917_v12  ;;  %v15756_v31 = vpack.c.bf16 %v10211_v49, %v10210_v48  ;;  %v10159_v4 = vld [vmem:[%s21818_s7 + $0x108] sm:$0xff]  ;;  %v10238_v56 = vld [vmem:[%s21819_s8 + $0x200] sm:$0xff]  ;;  %v10160_v35 = vld [vmem:[%s21818_s7 + $0x110] sm:$0xff] }
 0x4a6   :  { %13178 = vmatprep.mubr.msk.f32.mxu0 %vm16918_vm3, %v16919_v60  ;;  %13318 = vmatprep.mubr.msk.f32.mxu1 %vm16918_vm3, %v16919_v60  ;;  %v10239_v57 = vld [vmem:[%s21819_s8 + $0x208] sm:$0xff]  ;;  %v10161_v40 = vld [vmem:[%s21818_s7 + $0x118] sm:$0xff]  ;;  %v10240_v38 = vld [vmem:[%s21819_s8 + $0x210] sm:$0xff] }
 0x4a7   :  { %v10241_v14 = vld [vmem:[%s21819_s8 + $0x218] sm:$0xff]  ;;  %v10162_v58 = vld [vmem:[%s21818_s7 + $0x120] sm:$0xff]  ;;  %v10163_v62 = vld [vmem:[%s21818_s7 + $0x128] sm:$0xff] }
 0x4a8   :  { %15610 = vmatpush3.bf16.msra.mxu0 %v15609_v44  ;;  %15706 = vmatpush3.bf16.msra.mxu1 %v15705_v11  ;;  %v15639_v44 = vpack.c.bf16 %v10149_v32, %v10148_v2  ;;  %v15801_v59 = vpack.c.bf16 %v10241_v14, %v10240_v38  ;;  %v10243_v7 = vld [vmem:[%s21819_s8 + $0x228] sm:$0xff]  ;;  %v10164_v1 = vld [vmem:[%s21818_s7 + $0x130] sm:$0xff]  ;;  %v10165_v22 = vld [vmem:[%s21818_s7 + $0x138] sm:$0xff] }
 0x4a9   :  { %15611 = vmatprep.subr.bf16.mxu0 %v16917_v12  ;;  %15707 = vmatprep.subr.bf16.mxu1 %v16917_v12  ;;  %v10244_v55 = vld [vmem:[%s21819_s8 + $0x230] sm:$0xff]  ;;  %v10245_v9 = vld [vmem:[%s21819_s8 + $0x238] sm:$0xff]  ;;  %v10166_v21 = vld [vmem:[%s21818_s7 + $0x140] sm:$0xff] }
 0x4aa   :  { %v10167_v29 = vld [vmem:[%s21818_s7 + $0x148] sm:$0xff]  ;;  %v10246_v48 = vld [vmem:[%s21819_s8 + $0x240] sm:$0xff]  ;;  %v10168_v2 = vld [vmem:[%s21818_s7 + $0x150] sm:$0xff] }
 0x4ab   :  { %v10247_v49 = vld [vmem:[%s21819_s8 + $0x248] sm:$0xff]  ;;  %v10169_v32 = vld [vmem:[%s21818_s7 + $0x158] sm:$0xff]  ;;  %v10276_v38 = vld [vmem:[%s21819_s8 + $0x2b0] sm:$0xff] }
 0x4ac   :  { %15613 = vmatpush3.bf16.msra.mxu0 %v15612_v13  ;;  %15709 = vmatpush3.bf16.msra.mxu1 %v15708_v30  ;;  %v15642_v13 = vpack.c.bf16 %v10151_v25, %v10150_v46  ;;  %v15762_v30 = vpack.c.bf16 %v10215_v54, %v10214_v27  ;;  %v10170_v46 = vld [vmem:[%s21818_s7 + $0x160] sm:$0xff]  ;;  %v10171_v25 = vld [vmem:[%s21818_s7 + $0x168] sm:$0xff]  ;;  %v10277_v14 = vld [vmem:[%s21819_s8 + $0x2b8] sm:$0xff] }
 0x4ad   :  { %15614 = vmatprep.subr.bf16.mxu0 %v16917_v12  ;;  %15710 = vmatprep.subr.bf16.mxu1 %v16917_v12  ;;  %v10250_v27 = vld [vmem:[%s21819_s8 + $0x260] sm:$0xff]  ;;  %v10251_v54 = vld [vmem:[%s21819_s8 + $0x268] sm:$0xff] }
 0x4b0   :  { %15616 = vmatpush3.bf16.msra.mxu0 %v15615_v17  ;;  %15712 = vmatpush3.bf16.msra.mxu1 %v15711_v23  ;;  %v15645_v17 = vpack.c.bf16 %v10153_v63, %v10152_v36  ;;  %v15765_v23 = vpack.c.bf16 %v10217_v15, %v10216_v8  ;;  %v10172_v36 = vld [vmem:[%s21818_s7 + $0x170] sm:$0xff]  ;;  %v10173_v63 = vld [vmem:[%s21818_s7 + $0x178] sm:$0xff] }
 0x4b1   :  { %15617 = vmatprep.subr.bf16.mxu0 %v16917_v12  ;;  %15713 = vmatprep.subr.bf16.mxu1 %v16917_v12  ;;  %v10252_v8 = vld [vmem:[%s21819_s8 + $0x270] sm:$0xff]  ;;  %v10253_v15 = vld [vmem:[%s21819_s8 + $0x278] sm:$0xff] }
 0x4b4   :  { %15619 = vmatpush3.bf16.msra.mxu0 %v15618_v61  ;;  %15715 = vmatpush3.bf16.msra.mxu1 %v15714_v26  ;;  %v15648_v61 = vpack.c.bf16 %v10155_v10, %v10154_v51  ;;  %v15768_v26 = vpack.c.bf16 %v10219_v39, %v10218_v33  ;;  %v10190_v51 = vld [vmem:[%s21818_s7 + $0x180] sm:$0xff]  ;;  %v10191_v10 = vld [vmem:[%s21818_s7 + $0x188] sm:$0xff] }
 0x4b5   :  { %15620 = vmatprep.subr.bf16.mxu0 %v16917_v12  ;;  %15716 = vmatprep.subr.bf16.mxu1 %v16917_v12  ;;  %v10270_v33 = vld [vmem:[%s21819_s8 + $0x280] sm:$0xff]  ;;  %v10271_v39 = vld [vmem:[%s21819_s8 + $0x288] sm:$0xff] }
 0x4b8   :  { %15622 = vmatpush3.bf16.msra.mxu0 %v15621_v18  ;;  %15718 = vmatpush3.bf16.msra.mxu1 %v15717_v5  ;;  %v15651_v18 = vpack.c.bf16 %v10157_v52, %v10156_v34  ;;  %v15771_v5 = vpack.c.bf16 %v10221_v19, %v10220_v0  ;;  %v10192_v34 = vld [vmem:[%s21818_s7 + $0x190] sm:$0xff]  ;;  %v10193_v52 = vld [vmem:[%s21818_s7 + $0x198] sm:$0xff] }
 0x4b9   :  { %15623 = vmatprep.subr.bf16.mxu0 %v16917_v12  ;;  %15719 = vmatprep.subr.bf16.mxu1 %v16917_v12  ;;  %v10272_v0 = vld [vmem:[%s21819_s8 + $0x290] sm:$0xff]  ;;  %v10273_v19 = vld [vmem:[%s21819_s8 + $0x298] sm:$0xff] }
 0x4bc   :  { %15625 = vmatpush3.bf16.msra.mxu0 %v15624_v45  ;;  %15721 = vmatpush3.bf16.msra.mxu1 %v15720_v24  ;;  %v15678_v45 = vpack.c.bf16 %v10159_v4, %v10158_v20  ;;  %v15798_v24 = vpack.c.bf16 %v10239_v57, %v10238_v56  ;;  %v15849_v20 = vpack.c.bf16 %v10273_v19, %v10272_v0  ;;  %v10194_v4 = vld [vmem:[%s21818_s7 + $0x1a0] sm:$0xff]  ;;  %v10195_v56 = vld [vmem:[%s21818_s7 + $0x1a8] sm:$0xff]  ;;  %v10308_v0 = vld [vmem:[%s21819_s8 + $0x330] sm:$0xff] }
 0x4bd   :  { %15626 = vmatprep.subr.bf16.mxu0 %v16917_v12  ;;  %15722 = vmatprep.subr.bf16.mxu1 %v16917_v12  ;;  %v10275_v57 = vld [vmem:[%s21819_s8 + $0x2a8] sm:$0xff]  ;;  %v10309_v19 = vld [vmem:[%s21819_s8 + $0x338] sm:$0xff] }
 0x4c0   :  { %15628 = vmatpush3.bf16.msra.mxu0 %v15627_v47  ;;  %15724 = vmatpush3.bf16.msra.mxu1 %v15723_v50  ;;  %v19081_v47 = vld [vmem:[#allocation3 + $0x6] sm:$0x3]  ;;  %v15681_v50 = vpack.c.bf16 %v10161_v40, %v10160_v35  ;;  %v10197_v40 = vld [vmem:[%s21818_s7 + $0x1b8] sm:$0xff] }
 0x4c1   :  { %15629 = vmatprep.subr.bf16.mxu0 %v16917_v12  ;;  %15749 = vmatprep.subr.bf16.mxu1 %v16917_v12  ;;  %v10196_v35 = vld [vmem:[%s21818_s7 + $0x1b0] sm:$0xff] }
 0x4c3   :  { %13179 = vmatmul.mubr.f32.vlgmr.msra.gmra.mrb[42].mxu0 %v18841_v41  ;;  %13319 = vmatmul.mubr.f32.vlgmr.msra.gmra.mrb[8].mxu1 %v18961_v42  ;;  %v10213_v41 = vld [vmem:[%s21819_s8 + $0x1b8] sm:$0xff] }
 0x4c4   :  { %15631 = vmatpush3.bf16.msra.mxu0 %v15630_v6  ;;  %15751 = vmatpush3.bf16.msra.mxu1 %v15750_v28  ;;  %v15759_v11 = vpack.c.bf16 %v10213_v41, %v10212_v43  ;;  %v15684_v6 = vpack.c.bf16 %v10163_v62, %v10162_v58  ;;  %v10248_v43 = vld [vmem:[%s21819_s8 + $0x250] sm:$0xff]  ;;  %v10249_v41 = vld [vmem:[%s21819_s8 + $0x258] sm:$0xff]  ;;  %v10198_v58 = vld [vmem:[%s21818_s7 + $0x1c0] sm:$0xff] }
 0x4c5   :  { %15632 = vmatprep.subr.bf16.mxu0 %v16917_v12  ;;  %15752 = vmatprep.subr.bf16.mxu1 %v16917_v12  ;;  %v10199_v62 = vld [vmem:[%s21818_s7 + $0x1c8] sm:$0xff] }
 0x4c6   :  { %13213 = vmatprep.mubr.msk.f32.mxu0 %vm16918_vm3, %v16919_v60  ;;  %13388 = vmatprep.mubr.msk.f32.mxu1 %vm16918_vm3, %v16919_v60 }
 0x4c8   :  { %15634 = vmatpush3.bf16.msra.mxu0 %v15633_v16  ;;  %15754 = vmatpush3.bf16.msra.mxu1 %v15753_v37  ;;  %v15687_v16 = vpack.c.bf16 %v10165_v22, %v10164_v1  ;;  %v15807_v37 = vpack.c.bf16 %v10245_v9, %v10244_v55  ;;  %v10200_v1 = vld [vmem:[%s21818_s7 + $0x1d0] sm:$0xff]  ;;  %v10201_v22 = vld [vmem:[%s21818_s7 + $0x1d8] sm:$0xff] }
 0x4c9   :  { %15635 = vmatprep.subr.bf16.mxu0 %v16917_v12  ;;  %15755 = vmatprep.subr.bf16.mxu1 %v16917_v12  ;;  %v10280_v55 = vld [vmem:[%s21819_s8 + $0x2d0] sm:$0xff]  ;;  %v10281_v9 = vld [vmem:[%s21819_s8 + $0x2d8] sm:$0xff] }
 0x4cc   :  { %15637 = vmatpush3.bf16.msra.mxu0 %v15636_v53  ;;  %15757 = vmatpush3.bf16.msra.mxu1 %v15756_v31  ;;  %v15690_v53 = vpack.c.bf16 %v10167_v29, %v10166_v21  ;;  %v15810_v31 = vpack.c.bf16 %v10247_v49, %v10246_v48  ;;  %v10202_v21 = vld [vmem:[%s21818_s7 + $0x1e0] sm:$0xff]  ;;  %v10203_v29 = vld [vmem:[%s21818_s7 + $0x1e8] sm:$0xff] }
 0x4cd   :  { %15638 = vmatprep.subr.bf16.mxu0 %v16917_v12  ;;  %15758 = vmatprep.subr.bf16.mxu1 %v16917_v12  ;;  %v10282_v48 = vld [vmem:[%s21819_s8 + $0x2e0] sm:$0xff]  ;;  %v10283_v49 = vld [vmem:[%s21819_s8 + $0x2e8] sm:$0xff] }
 0x4d0   :  { %15640 = vmatpush3.bf16.msra.mxu0 %v15639_v44  ;;  %15760 = vmatpush3.bf16.msra.mxu1 %v15759_v11  ;;  %v15693_v44 = vpack.c.bf16 %v10169_v32, %v10168_v2  ;;  %v15813_v11 = vpack.c.bf16 %v10249_v41, %v10248_v43  ;;  %v10204_v2 = vld [vmem:[%s21818_s7 + $0x1f0] sm:$0xff]  ;;  %v10205_v32 = vld [vmem:[%s21818_s7 + $0x1f8] sm:$0xff] }
 0x4d1   :  { %15641 = vmatprep.subr.bf16.mxu0 %v16917_v12  ;;  %15761 = vmatprep.subr.bf16.mxu1 %v16917_v12  ;;  %v10284_v43 = vld [vmem:[%s21819_s8 + $0x2f0] sm:$0xff]  ;;  %v10285_v41 = vld [vmem:[%s21819_s8 + $0x2f8] sm:$0xff] }
 0x4d4   :  { %15643 = vmatpush3.bf16.msra.mxu0 %v15642_v13  ;;  %15763 = vmatpush3.bf16.msra.mxu1 %v15762_v30  ;;  %v15696_v13 = vpack.c.bf16 %v10171_v25, %v10170_v46  ;;  %v15816_v30 = vpack.c.bf16 %v10251_v54, %v10250_v27  ;;  %v10222_v46 = vld [vmem:[%s21818_s7 + $0x200] sm:$0xff]  ;;  %v10223_v25 = vld [vmem:[%s21818_s7 + $0x208] sm:$0xff] }
 0x4d5   :  { %15644 = vmatprep.subr.bf16.mxu0 %v16917_v12  ;;  %15764 = vmatprep.subr.bf16.mxu1 %v16917_v12  ;;  %v10302_v27 = vld [vmem:[%s21819_s8 + $0x300] sm:$0xff]  ;;  %v10303_v54 = vld [vmem:[%s21819_s8 + $0x308] sm:$0xff] }
 0x4d8   :  { %15646 = vmatpush3.bf16.msra.mxu0 %v15645_v17  ;;  %15766 = vmatpush3.bf16.msra.mxu1 %v15765_v23  ;;  %v15699_v17 = vpack.c.bf16 %v10173_v63, %v10172_v36  ;;  %v15819_v23 = vpack.c.bf16 %v10253_v15, %v10252_v8  ;;  %v10224_v36 = vld [vmem:[%s21818_s7 + $0x210] sm:$0xff]  ;;  %v10225_v63 = vld [vmem:[%s21818_s7 + $0x218] sm:$0xff] }
 0x4d9   :  { %15647 = vmatprep.subr.bf16.mxu0 %v16917_v12  ;;  %15767 = vmatprep.subr.bf16.mxu1 %v16917_v12  ;;  %v10304_v8 = vld [vmem:[%s21819_s8 + $0x310] sm:$0xff]  ;;  %v10305_v15 = vld [vmem:[%s21819_s8 + $0x318] sm:$0xff] }
 0x4dc   :  { %15649 = vmatpush3.bf16.msra.mxu0 %v15648_v61  ;;  %15769 = vmatpush3.bf16.msra.mxu1 %v15768_v26  ;;  %v15726_v61 = vpack.c.bf16 %v10191_v10, %v10190_v51  ;;  %v15846_v26 = vpack.c.bf16 %v10271_v39, %v10270_v33  ;;  %v15897_v51 = vpack.c.bf16 %v10305_v15, %v10304_v8  ;;  %v10226_v10 = vld [vmem:[%s21818_s7 + $0x220] sm:$0xff]  ;;  %v10227_v33 = vld [vmem:[%s21818_s7 + $0x228] sm:$0xff]  ;;  %v10340_v8 = vld [vmem:[%s21819_s8 + $0x3b0] sm:$0xff] }
 0x4dd   :  { %15650 = vmatprep.subr.bf16.mxu0 %v16917_v12  ;;  %15770 = vmatprep.subr.bf16.mxu1 %v16917_v12  ;;  %v10307_v39 = vld [vmem:[%s21819_s8 + $0x328] sm:$0xff]  ;;  %v10341_v15 = vld [vmem:[%s21819_s8 + $0x3b8] sm:$0xff] }
 0x4e0   :  { %15652 = vmatpush3.bf16.msra.mxu0 %v15651_v18  ;;  %15772 = vmatpush3.bf16.msra.mxu1 %v15771_v5  ;;  %v19201_v18 = vld [vmem:[#allocation3 + $0x8] sm:$0x3]  ;;  %v15729_v5 = vpack.c.bf16 %v10193_v52, %v10192_v34  ;;  %v10228_v34 = vld [vmem:[%s21818_s7 + $0x230] sm:$0xff] }
 0x4e1   :  { %15677 = vmatprep.subr.bf16.mxu0 %v16917_v12  ;;  %15797 = vmatprep.subr.bf16.mxu1 %v16917_v12  ;;  %v10229_v52 = vld [vmem:[%s21818_s7 + $0x238] sm:$0xff] }
 0x4e3   :  { %13214 = vmatmul.mubr.f32.vlgmr.msra.gmra.mrb[44].mxu0 %v18839_v3  ;;  %13389 = vmatmul.mubr.f32.vlgmr.msra.gmra.mrb[10].mxu1 %v19081_v47  ;;  %v10242_v3 = vld [vmem:[%s21819_s8 + $0x220] sm:$0xff] }
 0x4e4   :  { %15679 = vmatpush3.bf16.msra.mxu0 %v15678_v45  ;;  %15799 = vmatpush3.bf16.msra.mxu1 %v15798_v24  ;;  %v15804_v28 = vpack.c.bf16 %v10243_v7, %v10242_v3  ;;  %v15732_v45 = vpack.c.bf16 %v10195_v56, %v10194_v4  ;;  %v10278_v3 = vld [vmem:[%s21819_s8 + $0x2c0] sm:$0xff]  ;;  %v10279_v7 = vld [vmem:[%s21819_s8 + $0x2c8] sm:$0xff] }
 0x4e5   :  { %15680 = vmatprep.subr.bf16.mxu0 %v16917_v12  ;;  %15800 = vmatprep.subr.bf16.mxu1 %v16917_v12  ;;  %v10230_v4 = vld [vmem:[%s21818_s7 + $0x240] sm:$0xff]  ;;  %v10231_v56 = vld [vmem:[%s21818_s7 + $0x248] sm:$0xff] }
 0x4e6   :  { %13283 = vmatprep.mubr.msk.f32.mxu0 %vm16918_vm3, %v16919_v60  ;;  %13458 = vmatprep.mubr.msk.f32.mxu1 %vm16918_vm3, %v16919_v60 }
 0x4e8   :  { %15682 = vmatpush3.bf16.msra.mxu0 %v15681_v50  ;;  %15802 = vmatpush3.bf16.msra.mxu1 %v15801_v59  ;;  %v15735_v50 = vpack.c.bf16 %v10197_v40, %v10196_v35  ;;  %v15855_v59 = vpack.c.bf16 %v10277_v14, %v10276_v38  ;;  %v10232_v35 = vld [vmem:[%s21818_s7 + $0x250] sm:$0xff]  ;;  %v10233_v40 = vld [vmem:[%s21818_s7 + $0x258] sm:$0xff] }
 0x4e9   :  { %15683 = vmatprep.subr.bf16.mxu0 %v16917_v12  ;;  %15803 = vmatprep.subr.bf16.mxu1 %v16917_v12  ;;  %v10312_v38 = vld [vmem:[%s21819_s8 + $0x350] sm:$0xff]  ;;  %v10313_v14 = vld [vmem:[%s21819_s8 + $0x358] sm:$0xff] }
 0x4ec   :  { %15685 = vmatpush3.bf16.msra.mxu0 %v15684_v6  ;;  %15805 = vmatpush3.bf16.msra.mxu1 %v15804_v28  ;;  %v15738_v6 = vpack.c.bf16 %v10199_v62, %v10198_v58  ;;  %v15858_v28 = vpack.c.bf16 %v10279_v7, %v10278_v3  ;;  %v10234_v58 = vld [vmem:[%s21818_s7 + $0x260] sm:$0xff]  ;;  %v10235_v62 = vld [vmem:[%s21818_s7 + $0x268] sm:$0xff] }
 0x4ed   :  { %15686 = vmatprep.subr.bf16.mxu0 %v16917_v12  ;;  %15806 = vmatprep.subr.bf16.mxu1 %v16917_v12  ;;  %v10314_v3 = vld [vmem:[%s21819_s8 + $0x360] sm:$0xff]  ;;  %v10315_v7 = vld [vmem:[%s21819_s8 + $0x368] sm:$0xff] }
 0x4f0   :  { %15688 = vmatpush3.bf16.msra.mxu0 %v15687_v16  ;;  %15808 = vmatpush3.bf16.msra.mxu1 %v15807_v37  ;;  %v15741_v16 = vpack.c.bf16 %v10201_v22, %v10200_v1  ;;  %v15861_v37 = vpack.c.bf16 %v10281_v9, %v10280_v55  ;;  %v10236_v1 = vld [vmem:[%s21818_s7 + $0x270] sm:$0xff]  ;;  %v10237_v22 = vld [vmem:[%s21818_s7 + $0x278] sm:$0xff] }
 0x4f1   :  { %15689 = vmatprep.subr.bf16.mxu0 %v16917_v12  ;;  %15809 = vmatprep.subr.bf16.mxu1 %v16917_v12  ;;  %v10316_v55 = vld [vmem:[%s21819_s8 + $0x370] sm:$0xff]  ;;  %v10317_v9 = vld [vmem:[%s21819_s8 + $0x378] sm:$0xff] }
 0x4f4   :  { %15691 = vmatpush3.bf16.msra.mxu0 %v15690_v53  ;;  %15811 = vmatpush3.bf16.msra.mxu1 %v15810_v31  ;;  %v15744_v53 = vpack.c.bf16 %v10203_v29, %v10202_v21  ;;  %v15864_v31 = vpack.c.bf16 %v10283_v49, %v10282_v48  ;;  %v10254_v21 = vld [vmem:[%s21818_s7 + $0x280] sm:$0xff]  ;;  %v10255_v29 = vld [vmem:[%s21818_s7 + $0x288] sm:$0xff] }
 0x4f5   :  { %15692 = vmatprep.subr.bf16.mxu0 %v16917_v12  ;;  %15812 = vmatprep.subr.bf16.mxu1 %v16917_v12  ;;  %v10334_v48 = vld [vmem:[%s21819_s8 + $0x380] sm:$0xff]  ;;  %v10335_v49 = vld [vmem:[%s21819_s8 + $0x388] sm:$0xff] }
 0x4f8   :  { %15694 = vmatpush3.bf16.msra.mxu0 %v15693_v44  ;;  %15814 = vmatpush3.bf16.msra.mxu1 %v15813_v11  ;;  %v15747_v44 = vpack.c.bf16 %v10205_v32, %v10204_v2  ;;  %v15867_v11 = vpack.c.bf16 %v10285_v41, %v10284_v43  ;;  %v10256_v2 = vld [vmem:[%s21818_s7 + $0x290] sm:$0xff]  ;;  %v10257_v32 = vld [vmem:[%s21818_s7 + $0x298] sm:$0xff] }
 0x4f9   :  { %15695 = vmatprep.subr.bf16.mxu0 %v16917_v12  ;;  %15815 = vmatprep.subr.bf16.mxu1 %v16917_v12  ;;  %v10336_v43 = vld [vmem:[%s21819_s8 + $0x390] sm:$0xff]  ;;  %v10337_v41 = vld [vmem:[%s21819_s8 + $0x398] sm:$0xff] }
 0x4fc   :  { %15697 = vmatpush3.bf16.msra.mxu0 %v15696_v13  ;;  %15817 = vmatpush3.bf16.msra.mxu1 %v15816_v30  ;;  %v15774_v13 = vpack.c.bf16 %v10223_v25, %v10222_v46  ;;  %v15894_v30 = vpack.c.bf16 %v10303_v54, %v10302_v27  ;;  %v15945_v46 = vpack.c.bf16 %v10337_v41, %v10336_v43  ;;  %v10258_v25 = vld [vmem:[%s21818_s7 + $0x2a0] sm:$0xff]  ;;  %v10259_v27 = vld [vmem:[%s21818_s7 + $0x2a8] sm:$0xff]  ;;  %v10372_v43 = vld [vmem:[%s21819_s8 + $0x430] sm:$0xff] }
 0x4fd   :  { %15698 = vmatprep.subr.bf16.mxu0 %v16917_v12  ;;  %15818 = vmatprep.subr.bf16.mxu1 %v16917_v12  ;;  %v10339_v54 = vld [vmem:[%s21819_s8 + $0x3a8] sm:$0xff]  ;;  %v10373_v41 = vld [vmem:[%s21819_s8 + $0x438] sm:$0xff] }
 0x500   :  { %15700 = vmatpush3.bf16.msra.mxu0 %v15699_v17  ;;  %15820 = vmatpush3.bf16.msra.mxu1 %v15819_v23  ;;  %v19321_v17 = vld [vmem:[#allocation3 + $0xa] sm:$0x3]  ;;  %v15777_v23 = vpack.c.bf16 %v10225_v63, %v10224_v36  ;;  %v10260_v36 = vld [vmem:[%s21818_s7 + $0x2b0] sm:$0xff] }
 0x501   :  { %15725 = vmatprep.subr.bf16.mxu0 %v16917_v12  ;;  %15845 = vmatprep.subr.bf16.mxu1 %v16917_v12  ;;  %v10261_v63 = vld [vmem:[%s21818_s7 + $0x2b8] sm:$0xff] }
 0x503   :  { %13284 = vmatmul.mubr.f32.vlgmr.msra.gmra.mrb[46].mxu0 %v18961_v42  ;;  %13459 = vmatmul.mubr.f32.vlgmr.msra.gmra.mrb[12].mxu1 %v19201_v18  ;;  %v10274_v42 = vld [vmem:[%s21819_s8 + $0x2a0] sm:$0xff] }
 0x504   :  { %15727 = vmatpush3.bf16.msra.mxu0 %v15726_v61  ;;  %15847 = vmatpush3.bf16.msra.mxu1 %v15846_v26  ;;  %v15852_v24 = vpack.c.bf16 %v10275_v57, %v10274_v42  ;;  %v15780_v61 = vpack.c.bf16 %v10227_v33, %v10226_v10  ;;  %v10310_v42 = vld [vmem:[%s21819_s8 + $0x340] sm:$0xff]  ;;  %v10311_v57 = vld [vmem:[%s21819_s8 + $0x348] sm:$0xff] }
 0x505   :  { %15728 = vmatprep.subr.bf16.mxu0 %v16917_v12  ;;  %15848 = vmatprep.subr.bf16.mxu1 %v16917_v12  ;;  %v10262_v10 = vld [vmem:[%s21818_s7 + $0x2c0] sm:$0xff]  ;;  %v10263_v33 = vld [vmem:[%s21818_s7 + $0x2c8] sm:$0xff] }
 0x506   :  { %13353 = vmatprep.mubr.msk.f32.mxu0 %vm16918_vm3, %v16919_v60  ;;  %13528 = vmatprep.mubr.msk.f32.mxu1 %vm16918_vm3, %v16919_v60 }
 0x508   :  { %15730 = vmatpush3.bf16.msra.mxu0 %v15729_v5  ;;  %15850 = vmatpush3.bf16.msra.mxu1 %v15849_v20  ;;  %v15783_v5 = vpack.c.bf16 %v10229_v52, %v10228_v34  ;;  %v15903_v20 = vpack.c.bf16 %v10309_v19, %v10308_v0  ;;  %v10264_v34 = vld [vmem:[%s21818_s7 + $0x2d0] sm:$0xff]  ;;  %v10265_v52 = vld [vmem:[%s21818_s7 + $0x2d8] sm:$0xff] }
 0x509   :  { %15731 = vmatprep.subr.bf16.mxu0 %v16917_v12  ;;  %15851 = vmatprep.subr.bf16.mxu1 %v16917_v12  ;;  %v10344_v0 = vld [vmem:[%s21819_s8 + $0x3d0] sm:$0xff]  ;;  %v10345_v19 = vld [vmem:[%s21819_s8 + $0x3d8] sm:$0xff] }
 0x50c   :  { %15733 = vmatpush3.bf16.msra.mxu0 %v15732_v45  ;;  %15853 = vmatpush3.bf16.msra.mxu1 %v15852_v24  ;;  %v15786_v45 = vpack.c.bf16 %v10231_v56, %v10230_v4  ;;  %v15906_v24 = vpack.c.bf16 %v10311_v57, %v10310_v42  ;;  %v10266_v4 = vld [vmem:[%s21818_s7 + $0x2e0] sm:$0xff]  ;;  %v10267_v56 = vld [vmem:[%s21818_s7 + $0x2e8] sm:$0xff] }
 0x50d   :  { %15734 = vmatprep.subr.bf16.mxu0 %v16917_v12  ;;  %15854 = vmatprep.subr.bf16.mxu1 %v16917_v12  ;;  %v10346_v42 = vld [vmem:[%s21819_s8 + $0x3e0] sm:$0xff]  ;;  %v10347_v57 = vld [vmem:[%s21819_s8 + $0x3e8] sm:$0xff] }
 0x510   :  { %15736 = vmatpush3.bf16.msra.mxu0 %v15735_v50  ;;  %15856 = vmatpush3.bf16.msra.mxu1 %v15855_v59  ;;  %v15789_v50 = vpack.c.bf16 %v10233_v40, %v10232_v35  ;;  %v15909_v59 = vpack.c.bf16 %v10313_v14, %v10312_v38  ;;  %v10268_v35 = vld [vmem:[%s21818_s7 + $0x2f0] sm:$0xff]  ;;  %v10269_v40 = vld [vmem:[%s21818_s7 + $0x2f8] sm:$0xff] }
 0x511   :  { %15737 = vmatprep.subr.bf16.mxu0 %v16917_v12  ;;  %15857 = vmatprep.subr.bf16.mxu1 %v16917_v12  ;;  %v10348_v38 = vld [vmem:[%s21819_s8 + $0x3f0] sm:$0xff]  ;;  %v10349_v14 = vld [vmem:[%s21819_s8 + $0x3f8] sm:$0xff] }
 0x514   :  { %15739 = vmatpush3.bf16.msra.mxu0 %v15738_v6  ;;  %15859 = vmatpush3.bf16.msra.mxu1 %v15858_v28  ;;  %v15792_v6 = vpack.c.bf16 %v10235_v62, %v10234_v58  ;;  %v15912_v28 = vpack.c.bf16 %v10315_v7, %v10314_v3  ;;  %v10286_v58 = vld [vmem:[%s21818_s7 + $0x300] sm:$0xff]  ;;  %v10287_v62 = vld [vmem:[%s21818_s7 + $0x308] sm:$0xff] }
 0x515   :  { %15740 = vmatprep.subr.bf16.mxu0 %v16917_v12  ;;  %15860 = vmatprep.subr.bf16.mxu1 %v16917_v12  ;;  %v10366_v3 = vld [vmem:[%s21819_s8 + $0x400] sm:$0xff]  ;;  %v10367_v7 = vld [vmem:[%s21819_s8 + $0x408] sm:$0xff] }
 0x518   :  { %15742 = vmatpush3.bf16.msra.mxu0 %v15741_v16  ;;  %15862 = vmatpush3.bf16.msra.mxu1 %v15861_v37  ;;  %v15795_v16 = vpack.c.bf16 %v10237_v22, %v10236_v1  ;;  %v15915_v37 = vpack.c.bf16 %v10317_v9, %v10316_v55  ;;  %v10288_v1 = vld [vmem:[%s21818_s7 + $0x310] sm:$0xff]  ;;  %v10289_v22 = vld [vmem:[%s21818_s7 + $0x318] sm:$0xff] }
 0x519   :  { %15743 = vmatprep.subr.bf16.mxu0 %v16917_v12  ;;  %15863 = vmatprep.subr.bf16.mxu1 %v16917_v12  ;;  %v10368_v55 = vld [vmem:[%s21819_s8 + $0x410] sm:$0xff]  ;;  %v10369_v9 = vld [vmem:[%s21819_s8 + $0x418] sm:$0xff] }
 0x51c   :  { %15745 = vmatpush3.bf16.msra.mxu0 %v15744_v53  ;;  %15865 = vmatpush3.bf16.msra.mxu1 %v15864_v31  ;;  %v15822_v53 = vpack.c.bf16 %v10255_v29, %v10254_v21  ;;  %v15942_v31 = vpack.c.bf16 %v10335_v49, %v10334_v48  ;;  %v15993_v21 = vpack.c.bf16 %v10369_v9, %v10368_v55  ;;  %v10290_v29 = vld [vmem:[%s21818_s7 + $0x320] sm:$0xff]  ;;  %v10291_v48 = vld [vmem:[%s21818_s7 + $0x328] sm:$0xff] }
 0x51d   :  { %15746 = vmatprep.subr.bf16.mxu0 %v16917_v12  ;;  %15866 = vmatprep.subr.bf16.mxu1 %v16917_v12  ;;  %v10371_v49 = vld [vmem:[%s21819_s8 + $0x428] sm:$0xff] }
 0x520   :  { %15748 = vmatpush3.bf16.msra.mxu0 %v15747_v44  ;;  %15868 = vmatpush3.bf16.msra.mxu1 %v15867_v11  ;;  %v19441_v44 = vld [vmem:[#allocation3 + $0xc] sm:$0x3]  ;;  %v15825_v11 = vpack.c.bf16 %v10257_v32, %v10256_v2  ;;  %v10292_v2 = vld [vmem:[%s21818_s7 + $0x330] sm:$0xff] }
 0x521   :  { %15773 = vmatprep.subr.bf16.mxu0 %v16917_v12  ;;  %15893 = vmatprep.subr.bf16.mxu1 %v16917_v12  ;;  %v10293_v32 = vld [vmem:[%s21818_s7 + $0x338] sm:$0xff] }
 0x523   :  { %13354 = vmatmul.mubr.f32.vlgmr.msra.gmra.mrb[48].mxu0 %v19081_v47  ;;  %13529 = vmatmul.mubr.f32.vlgmr.msra.gmra.mrb[14].mxu1 %v19321_v17  ;;  %v10306_v47 = vld [vmem:[%s21819_s8 + $0x320] sm:$0xff] }
 0x524   :  { %15775 = vmatpush3.bf16.msra.mxu0 %v15774_v13  ;;  %15895 = vmatpush3.bf16.msra.mxu1 %v15894_v30  ;;  %v15900_v26 = vpack.c.bf16 %v10307_v39, %v10306_v47  ;;  %v15828_v13 = vpack.c.bf16 %v10259_v27, %v10258_v25  ;;  %v10342_v47 = vld [vmem:[%s21819_s8 + $0x3c0] sm:$0xff]  ;;  %v10343_v39 = vld [vmem:[%s21819_s8 + $0x3c8] sm:$0xff] }
 0x525   :  { %15776 = vmatprep.subr.bf16.mxu0 %v16917_v12  ;;  %15896 = vmatprep.subr.bf16.mxu1 %v16917_v12  ;;  %v10294_v25 = vld [vmem:[%s21818_s7 + $0x340] sm:$0xff]  ;;  %v10295_v27 = vld [vmem:[%s21818_s7 + $0x348] sm:$0xff] }
 0x526   :  { %13423 = vmatprep.mubr.msk.f32.mxu0 %vm16918_vm3, %v16919_v60  ;;  %13598 = vmatprep.mubr.msk.f32.mxu1 %vm16918_vm3, %v16919_v60 }
 0x528   :  { %15778 = vmatpush3.bf16.msra.mxu0 %v15777_v23  ;;  %15898 = vmatpush3.bf16.msra.mxu1 %v15897_v51  ;;  %v15831_v23 = vpack.c.bf16 %v10261_v63, %v10260_v36  ;;  %v15951_v51 = vpack.c.bf16 %v10341_v15, %v10340_v8  ;;  %v10296_v36 = vld [vmem:[%s21818_s7 + $0x350] sm:$0xff]  ;;  %v10297_v63 = vld [vmem:[%s21818_s7 + $0x358] sm:$0xff] }
 0x529   :  { %15779 = vmatprep.subr.bf16.mxu0 %v16917_v12  ;;  %15899 = vmatprep.subr.bf16.mxu1 %v16917_v12  ;;  %v10376_v8 = vld [vmem:[%s21819_s8 + $0x450] sm:$0xff]  ;;  %v10377_v15 = vld [vmem:[%s21819_s8 + $0x458] sm:$0xff] }
 0x52c   :  { %15781 = vmatpush3.bf16.msra.mxu0 %v15780_v61  ;;  %15901 = vmatpush3.bf16.msra.mxu1 %v15900_v26  ;;  %v15834_v61 = vpack.c.bf16 %v10263_v33, %v10262_v10  ;;  %v15954_v26 = vpack.c.bf16 %v10343_v39, %v10342_v47  ;;  %v10298_v10 = vld [vmem:[%s21818_s7 + $0x360] sm:$0xff]  ;;  %v10299_v33 = vld [vmem:[%s21818_s7 + $0x368] sm:$0xff] }
 0x52d   :  { %15782 = vmatprep.subr.bf16.mxu0 %v16917_v12  ;;  %15902 = vmatprep.subr.bf16.mxu1 %v16917_v12  ;;  %v10378_v47 = vld [vmem:[%s21819_s8 + $0x460] sm:$0xff]  ;;  %v10379_v39 = vld [vmem:[%s21819_s8 + $0x468] sm:$0xff] }
 0x530   :  { %15784 = vmatpush3.bf16.msra.mxu0 %v15783_v5  ;;  %15904 = vmatpush3.bf16.msra.mxu1 %v15903_v20  ;;  %v15837_v5 = vpack.c.bf16 %v10265_v52, %v10264_v34  ;;  %v15957_v20 = vpack.c.bf16 %v10345_v19, %v10344_v0  ;;  %v15888_v0 = vpack.c.bf16 %v10299_v33, %v10298_v10 }
 0x531   :  { %15785 = vmatprep.subr.bf16.mxu0 %v16917_v12  ;;  %15905 = vmatprep.subr.bf16.mxu1 %v16917_v12  ;;  %v16008_v19 = vpack.c.bf16 %v10379_v39, %v10378_v47  ;;  %v10332_v39 = vld [vmem:[%s21818_s7 + $0x3f0] sm:$0xff] }
 0x534   :  { %15787 = vmatpush3.bf16.msra.mxu0 %v15786_v45  ;;  %15907 = vmatpush3.bf16.msra.mxu1 %v15906_v24  ;;  %v15840_v45 = vpack.c.bf16 %v10267_v56, %v10266_v4  ;;  %v15960_v24 = vpack.c.bf16 %v10347_v57, %v10346_v42  ;;  %v10380_v4 = vld [vmem:[%s21819_s8 + $0x470] sm:$0xff]  ;;  %v10381_v56 = vld [vmem:[%s21819_s8 + $0x478] sm:$0xff] }
 0x535   :  { %15788 = vmatprep.subr.bf16.mxu0 %v16917_v12  ;;  %15908 = vmatprep.subr.bf16.mxu1 %v16917_v12  ;;  %v16011_v57 = vpack.c.bf16 %v10381_v56, %v10380_v4  ;;  %v10430_v4 = vld [vmem:[%s21819_s8 + $0x500] sm:$0xff]  ;;  %v10431_v56 = vld [vmem:[%s21819_s8 + $0x508] sm:$0xff] }
 0x538   :  { %15790 = vmatpush3.bf16.msra.mxu0 %v15789_v50  ;;  %15910 = vmatpush3.bf16.msra.mxu1 %v15909_v59  ;;  %v15843_v50 = vpack.c.bf16 %v10269_v40, %v10268_v35  ;;  %v15963_v59 = vpack.c.bf16 %v10349_v14, %v10348_v38  ;;  %v10398_v35 = vld [vmem:[%s21819_s8 + $0x480] sm:$0xff]  ;;  %v10399_v40 = vld [vmem:[%s21819_s8 + $0x488] sm:$0xff] }
 0x539   :  { %15791 = vmatprep.subr.bf16.mxu0 %v16917_v12  ;;  %15911 = vmatprep.subr.bf16.mxu1 %v16917_v12  ;;  %v16038_v14 = vpack.c.bf16 %v10399_v40, %v10398_v35  ;;  %v10432_v35 = vld [vmem:[%s21819_s8 + $0x510] sm:$0xff]  ;;  %v10433_v40 = vld [vmem:[%s21819_s8 + $0x518] sm:$0xff] }
 0x53c   :  { %15793 = vmatpush3.bf16.msra.mxu0 %v15792_v6  ;;  %15913 = vmatpush3.bf16.msra.mxu1 %v15912_v28  ;;  %v15870_v6 = vpack.c.bf16 %v10287_v62, %v10286_v58  ;;  %v15990_v28 = vpack.c.bf16 %v10367_v7, %v10366_v3  ;;  %v10400_v58 = vld [vmem:[%s21819_s8 + $0x490] sm:$0xff]  ;;  %v10401_v62 = vld [vmem:[%s21819_s8 + $0x498] sm:$0xff]  ;;  %v19685_v3 = vld [vmem:[#allocation3 + $0x10] sm:$0x3] }
 0x53d   :  { %15794 = vmatprep.subr.bf16.mxu0 %v16917_v12  ;;  %15914 = vmatprep.subr.bf16.mxu1 %v16917_v12 }
 0x540   :  { %15796 = vmatpush3.bf16.msra.mxu0 %v15795_v16  ;;  %15916 = vmatpush3.bf16.msra.mxu1 %v15915_v37  ;;  %v19561_v16 = vld [vmem:[#allocation3 + $0xe] sm:$0x3]  ;;  %v15873_v37 = vpack.c.bf16 %v10289_v22, %v10288_v1  ;;  %v10323_v1 = vld [vmem:[%s21818_s7 + $0x3a8] sm:$0xff] }
 0x541   :  { %15821 = vmatprep.subr.bf16.mxu0 %v16917_v12  ;;  %15941 = vmatprep.subr.bf16.mxu1 %v16917_v12  ;;  %v10403_v22 = vld [vmem:[%s21819_s8 + $0x4a8] sm:$0xff] }
 0x543   :  { %13424 = vmatmul.mubr.f32.vlgmr.msra.gmra.mrb[50].mxu0 %v19201_v18  ;;  %13599 = vmatmul.mubr.f32.vlgmr.msra.gmra.mrb[16].mxu1 %v19441_v44  ;;  %v10338_v18 = vld [vmem:[%s21819_s8 + $0x3a0] sm:$0xff] }
 0x544   :  { %15823 = vmatpush3.bf16.msra.mxu0 %v15822_v53  ;;  %15943 = vmatpush3.bf16.msra.mxu1 %v15942_v31  ;;  %v15948_v30 = vpack.c.bf16 %v10339_v54, %v10338_v18  ;;  %v15876_v53 = vpack.c.bf16 %v10291_v48, %v10290_v29  ;;  %v10374_v18 = vld [vmem:[%s21819_s8 + $0x440] sm:$0xff]  ;;  %v10375_v54 = vld [vmem:[%s21819_s8 + $0x448] sm:$0xff]  ;;  %v10404_v29 = vld [vmem:[%s21819_s8 + $0x4b0] sm:$0xff] }
 0x545   :  { %15824 = vmatprep.subr.bf16.mxu0 %v16917_v12  ;;  %15944 = vmatprep.subr.bf16.mxu1 %v16917_v12  ;;  %v10405_v48 = vld [vmem:[%s21819_s8 + $0x4b8] sm:$0xff] }
 0x546   :  { %13493 = vmatprep.mubr.msk.f32.mxu0 %vm16918_vm3, %v16919_v60  ;;  %13668 = vmatprep.mubr.msk.f32.mxu1 %vm16918_vm3, %v16919_v60 }
 0x548   :  { %15826 = vmatpush3.bf16.msra.mxu0 %v15825_v11  ;;  %15946 = vmatpush3.bf16.msra.mxu1 %v15945_v46  ;;  %v15879_v11 = vpack.c.bf16 %v10293_v32, %v10292_v2  ;;  %v15999_v46 = vpack.c.bf16 %v10373_v41, %v10372_v43  ;;  %v10406_v2 = vld [vmem:[%s21819_s8 + $0x4c0] sm:$0xff]  ;;  %v10407_v32 = vld [vmem:[%s21819_s8 + $0x4c8] sm:$0xff] }
 0x549   :  { %15827 = vmatprep.subr.bf16.mxu0 %v16917_v12  ;;  %15947 = vmatprep.subr.bf16.mxu1 %v16917_v12  ;;  %v16050_v41 = vpack.c.bf16 %v10407_v32, %v10406_v2  ;;  %v10440_v2 = vld [vmem:[%s21819_s8 + $0x550] sm:$0xff]  ;;  %v10441_v32 = vld [vmem:[%s21819_s8 + $0x558] sm:$0xff] }
 0x54c   :  { %15829 = vmatpush3.bf16.msra.mxu0 %v15828_v13  ;;  %15949 = vmatpush3.bf16.msra.mxu1 %v15948_v30  ;;  %v15882_v13 = vpack.c.bf16 %v10295_v27, %v10294_v25  ;;  %v16002_v30 = vpack.c.bf16 %v10375_v54, %v10374_v18  ;;  %v10408_v25 = vld [vmem:[%s21819_s8 + $0x4d0] sm:$0xff]  ;;  %v10409_v27 = vld [vmem:[%s21819_s8 + $0x4d8] sm:$0xff] }
 0x54d   :  { %15830 = vmatprep.subr.bf16.mxu0 %v16917_v12  ;;  %15950 = vmatprep.subr.bf16.mxu1 %v16917_v12  ;;  %v16053_v54 = vpack.c.bf16 %v10409_v27, %v10408_v25  ;;  %v10442_v25 = vld [vmem:[%s21819_s8 + $0x560] sm:$0xff]  ;;  %v10443_v27 = vld [vmem:[%s21819_s8 + $0x568] sm:$0xff] }
 0x550   :  { %15832 = vmatpush3.bf16.msra.mxu0 %v15831_v23  ;;  %15952 = vmatpush3.bf16.msra.mxu1 %v15951_v51  ;;  %v15885_v23 = vpack.c.bf16 %v10297_v63, %v10296_v36  ;;  %v16005_v51 = vpack.c.bf16 %v10377_v15, %v10376_v8  ;;  %v10410_v36 = vld [vmem:[%s21819_s8 + $0x4e0] sm:$0xff]  ;;  %v10411_v63 = vld [vmem:[%s21819_s8 + $0x4e8] sm:$0xff] }
 0x551   :  { %15833 = vmatprep.subr.bf16.mxu0 %v16917_v12  ;;  %15953 = vmatprep.subr.bf16.mxu1 %v16917_v12  ;;  %v16056_v47 = vpack.c.bf16 %v10411_v63, %v10410_v36 }
 0x554   :  { %15835 = vmatpush3.bf16.msra.mxu0 %v15834_v61  ;;  %15955 = vmatpush3.bf16.msra.mxu1 %v15954_v26 }
 0x555   :  { %15836 = vmatprep.subr.bf16.mxu0 %v16917_v12  ;;  %15956 = vmatprep.subr.bf16.mxu1 %v16917_v12 }
 0x558   :  { %15838 = vmatpush3.bf16.msra.mxu0 %v15837_v5  ;;  %15958 = vmatpush3.bf16.msra.mxu1 %v15957_v20  ;;  %v10300_v5 = vld [vmem:[%s21818_s7 + $0x370] sm:$0xff]  ;;  %v10301_v20 = vld [vmem:[%s21818_s7 + $0x378] sm:$0xff] }
 0x559   :  { %15839 = vmatprep.subr.bf16.mxu0 %v16917_v12  ;;  %15959 = vmatprep.subr.bf16.mxu1 %v16917_v12  ;;  %v15891_v42 = vpack.c.bf16 %v10301_v20, %v10300_v5  ;;  %v10350_v5 = vld [vmem:[%s21818_s7 + $0x400] sm:$0xff]  ;;  %v10351_v20 = vld [vmem:[%s21818_s7 + $0x408] sm:$0xff] }
 0x55c   :  { %15841 = vmatpush3.bf16.msra.mxu0 %v15840_v45  ;;  %15961 = vmatpush3.bf16.msra.mxu1 %v15960_v24  ;;  %v10318_v45 = vld [vmem:[%s21818_s7 + $0x380] sm:$0xff]  ;;  %v10319_v24 = vld [vmem:[%s21818_s7 + $0x388] sm:$0xff] }
 0x55d   :  { %15842 = vmatprep.subr.bf16.mxu0 %v16917_v12  ;;  %15962 = vmatprep.subr.bf16.mxu1 %v16917_v12  ;;  %v15918_v38 = vpack.c.bf16 %v10319_v24, %v10318_v45  ;;  %v10352_v45 = vld [vmem:[%s21818_s7 + $0x410] sm:$0xff]  ;;  %v10353_v24 = vld [vmem:[%s21818_s7 + $0x418] sm:$0xff] }
 0x560   :  { %15844 = vmatpush3.bf16.msra.mxu0 %v15843_v50  ;;  %15964 = vmatpush3.bf16.msra.mxu1 %v15963_v59  ;;  %v10320_v50 = vld [vmem:[%s21818_s7 + $0x390] sm:$0xff]  ;;  %v10321_v59 = vld [vmem:[%s21818_s7 + $0x398] sm:$0xff] }
 0x561   :  { %15869 = vmatprep.subr.bf16.mxu0 %v16917_v12  ;;  %15989 = vmatprep.subr.bf16.mxu1 %v16917_v12  ;;  %v15921_v7 = vpack.c.bf16 %v10321_v59, %v10320_v50  ;;  %v16089_v50 = vpack.c.bf16 %v10433_v40, %v10432_v35  ;;  %v10354_v59 = vld [vmem:[%s21818_s7 + $0x420] sm:$0xff] }
 0x562   :  { %v10386_v40 = vld [vmem:[%s21818_s7 + $0x4a0] sm:$0xff] }
 0x563   :  { %13494 = vmatmul.mubr.f32.vlgmr.msra.gmra.mrb[52].mxu0 %v19321_v17  ;;  %13669 = vmatmul.mubr.f32.vlgmr.msra.gmra.mrb[18].mxu1 %v19561_v16  ;;  %v10370_v17 = vld [vmem:[%s21819_s8 + $0x420] sm:$0xff] }
 0x564   :  { %15871 = vmatpush3.bf16.msra.mxu0 %v15870_v6  ;;  %15991 = vmatpush3.bf16.msra.mxu1 %v15990_v28  ;;  %v15996_v31 = vpack.c.bf16 %v10371_v49, %v10370_v17  ;;  %v16041_v6 = vpack.c.bf16 %v10401_v62, %v10400_v58  ;;  %v10322_v28 = vld [vmem:[%s21818_s7 + $0x3a0] sm:$0xff]  ;;  %v16047_v49 = vpack.c.bf16 %v10405_v48, %v10404_v29  ;;  %v10355_v58 = vld [vmem:[%s21818_s7 + $0x428] sm:$0xff] }
 0x565   :  { %15872 = vmatprep.subr.bf16.mxu0 %v16917_v12  ;;  %15992 = vmatprep.subr.bf16.mxu1 %v16917_v12  ;;  %v15924_v55 = vpack.c.bf16 %v10323_v1, %v10322_v28  ;;  %v10435_v62 = vld [vmem:[%s21819_s8 + $0x528] sm:$0xff]  ;;  %v10356_v28 = vld [vmem:[%s21818_s7 + $0x430] sm:$0xff]  ;;  %v10357_v1 = vld [vmem:[%s21818_s7 + $0x438] sm:$0xff] }
 0x566   :  { %13563 = vmatprep.mubr.msk.f32.mxu0 %vm16918_vm3, %v16919_v60  ;;  %13738 = vmatprep.mubr.msk.f32.mxu1 %vm16918_vm3, %v16919_v60  ;;  %v10438_v29 = vld [vmem:[%s21819_s8 + $0x540] sm:$0xff]  ;;  %v10439_v48 = vld [vmem:[%s21819_s8 + $0x548] sm:$0xff] }
 0x568   :  { %15874 = vmatpush3.bf16.msra.mxu0 %v15873_v37  ;;  %15994 = vmatpush3.bf16.msra.mxu1 %v15993_v21  ;;  %v10324_v37 = vld [vmem:[%s21818_s7 + $0x3b0] sm:$0xff]  ;;  %v10325_v21 = vld [vmem:[%s21818_s7 + $0x3b8] sm:$0xff] }
 0x569   :  { %15875 = vmatprep.subr.bf16.mxu0 %v16917_v12  ;;  %15995 = vmatprep.subr.bf16.mxu1 %v16917_v12  ;;  %v15927_v17 = vpack.c.bf16 %v10325_v21, %v10324_v37  ;;  %v10358_v37 = vld [vmem:[%s21818_s7 + $0x440] sm:$0xff]  ;;  %v10359_v21 = vld [vmem:[%s21818_s7 + $0x448] sm:$0xff] }
 0x56c   :  { %15877 = vmatpush3.bf16.msra.mxu0 %v15876_v53  ;;  %15997 = vmatpush3.bf16.msra.mxu1 %v15996_v31  ;;  %v10326_v53 = vld [vmem:[%s21818_s7 + $0x3c0] sm:$0xff]  ;;  %v10327_v31 = vld [vmem:[%s21818_s7 + $0x3c8] sm:$0xff] }
 0x56d   :  { %15878 = vmatprep.subr.bf16.mxu0 %v16917_v12  ;;  %15998 = vmatprep.subr.bf16.mxu1 %v16917_v12  ;;  %v15930_v43 = vpack.c.bf16 %v10327_v31, %v10326_v53  ;;  %v10360_v53 = vld [vmem:[%s21818_s7 + $0x450] sm:$0xff]  ;;  %v10361_v31 = vld [vmem:[%s21818_s7 + $0x458] sm:$0xff] }
 0x570   :  { %15880 = vmatpush3.bf16.msra.mxu0 %v15879_v11  ;;  %16000 = vmatpush3.bf16.msra.mxu1 %v15999_v46  ;;  %v10328_v11 = vld [vmem:[%s21818_s7 + $0x3d0] sm:$0xff]  ;;  %v10329_v46 = vld [vmem:[%s21818_s7 + $0x3d8] sm:$0xff] }
 0x571   :  { %15881 = vmatprep.subr.bf16.mxu0 %v16917_v12  ;;  %16001 = vmatprep.subr.bf16.mxu1 %v16917_v12  ;;  %v15933_v18 = vpack.c.bf16 %v10329_v46, %v10328_v11  ;;  %v10362_v11 = vld [vmem:[%s21818_s7 + $0x460] sm:$0xff]  ;;  %v10363_v46 = vld [vmem:[%s21818_s7 + $0x468] sm:$0xff] }
 0x572   :  { %v15984_v63 = vpack.c.bf16 %v10363_v46, %v10362_v11 }
 0x574   :  { %15883 = vmatpush3.bf16.msra.mxu0 %v15882_v13  ;;  %16003 = vmatpush3.bf16.msra.mxu1 %v16002_v30  ;;  %v10330_v13 = vld [vmem:[%s21818_s7 + $0x3e0] sm:$0xff]  ;;  %v10331_v30 = vld [vmem:[%s21818_s7 + $0x3e8] sm:$0xff] }
 0x575   :  { %15884 = vmatprep.subr.bf16.mxu0 %v16917_v12  ;;  %16004 = vmatprep.subr.bf16.mxu1 %v16917_v12  ;;  %v15936_v33 = vpack.c.bf16 %v10331_v30, %v10330_v13 }
 0x576   :  { %v19639_v61 = vpop.f32.mrb[40].mxu0  ;;  %v19641_v26 = vpop.f32.mrb[6].mxu1 }
 0x577   :  { %v13145_v34 = vpop.f32.mrb[41].mxu0  ;;  %v13250_v52 = vpop.f32.mrb[7].mxu1 }
 0x578   :  { %15886 = vmatpush3.bf16.msra.mxu0 %v15885_v23  ;;  %16006 = vmatpush3.bf16.msra.mxu1 %v16005_v51  ;;  %v10333_v34 = vld [vmem:[%s21818_s7 + $0x3f8] sm:$0xff] }
 0x579   :  { %15887 = vmatprep.subr.bf16.mxu0 %v16917_v12  ;;  %16007 = vmatprep.subr.bf16.mxu1 %v16917_v12  ;;  %v10413_v52 = vld [vmem:[%s21819_s8 + $0x4f8] sm:$0xff] }
 0x57c   :  { %15889 = vmatpush3.bf16.msra.mxu0 %v15888_v0  ;;  %16009 = vmatpush3.bf16.msra.mxu1 %v16008_v19  ;;  %v15939_v0 = vpack.c.bf16 %v10333_v34, %v10332_v39 }
 0x57d   :  { %15890 = vmatprep.subr.bf16.mxu0 %v16917_v12  ;;  %16010 = vmatprep.subr.bf16.mxu1 %v16917_v12 }
 0x580   :  { %15892 = vmatpush3.bf16.msra.mxu0 %v15891_v42  ;;  %16012 = vmatpush3.bf16.msra.mxu1 %v16011_v57  ;;  %v15966_v42 = vpack.c.bf16 %v10351_v20, %v10350_v5  ;;  %v16086_v57 = vpack.c.bf16 %v10431_v56, %v10430_v4  ;;  %v10384_v4 = vld [vmem:[%s21818_s7 + $0x490] sm:$0xff]  ;;  %v10385_v56 = vld [vmem:[%s21818_s7 + $0x498] sm:$0xff] }
 0x581   :  { %15917 = vmatprep.subr.bf16.mxu0 %v16917_v12  ;;  %16037 = vmatprep.subr.bf16.mxu1 %v16917_v12 }
 0x583   :  { %13564 = vmatmul.mubr.f32.vlgmr.msra.gmra.mrb[54].mxu0 %v19441_v44  ;;  %13739 = vmatmul.mubr.f32.vlgmr.msra.gmra.mrb[20].mxu1 %v19685_v3  ;;  %v10402_v44 = vld [vmem:[%s21819_s8 + $0x4a0] sm:$0xff] }
 0x584   :  { %15919 = vmatpush3.bf16.msra.mxu0 %v15918_v38  ;;  %16039 = vmatpush3.bf16.msra.mxu1 %v16038_v14  ;;  %v16044_v9 = vpack.c.bf16 %v10403_v22, %v10402_v44  ;;  %v19810_v38 = vld [vmem:[#allocation3 + $0x12] sm:$0x3]  ;;  %v15969_v14 = vpack.c.bf16 %v10353_v24, %v10352_v45  ;;  %v10436_v44 = vld [vmem:[%s21819_s8 + $0x530] sm:$0xff]  ;;  %v10437_v22 = vld [vmem:[%s21819_s8 + $0x538] sm:$0xff]  ;;  %v16017_v24 = vpack.c.bf16 %v10385_v56, %v10384_v4 }
 0x585   :  { %15920 = vmatprep.subr.bf16.mxu0 %v16917_v12  ;;  %16040 = vmatprep.subr.bf16.mxu1 %v16917_v12  ;;  %v19934_v45 = vld [vmem:[#allocation3 + $0x14] sm:$0x3] }
 0x586   :  { %13633 = vmatprep.mubr.msk.f32.mxu0 %vm16918_vm3, %v16919_v60  ;;  %13808 = vmatprep.mubr.msk.f32.mxu1 %vm16918_vm3, %v16919_v60  ;;  %v10418_v56 = vld [vmem:[%s21818_s7 + $0x520] sm:$0xff] }
 0x588   :  { %15922 = vmatpush3.bf16.msra.mxu0 %v15921_v7  ;;  %16042 = vmatpush3.bf16.msra.mxu1 %v16041_v6  ;;  %v15972_v7 = vpack.c.bf16 %v10355_v58, %v10354_v59 }
 0x589   :  { %15923 = vmatprep.subr.bf16.mxu0 %v16917_v12  ;;  %16043 = vmatprep.subr.bf16.mxu1 %v16917_v12 }
 0x58c   :  { %15925 = vmatpush3.bf16.msra.mxu0 %v15924_v55  ;;  %16045 = vmatpush3.bf16.msra.mxu1 %v16044_v9  ;;  %v15975_v55 = vpack.c.bf16 %v10357_v1, %v10356_v28  ;;  %v16095_v9 = vpack.c.bf16 %v10437_v22, %v10436_v44  ;;  %v10390_v44 = vld [vmem:[%s21818_s7 + $0x4c0] sm:$0xff]  ;;  %v10391_v22 = vld [vmem:[%s21818_s7 + $0x4c8] sm:$0xff] }
 0x58d   :  { %15926 = vmatprep.subr.bf16.mxu0 %v16917_v12  ;;  %16046 = vmatprep.subr.bf16.mxu1 %v16917_v12 }
 0x590   :  { %15928 = vmatpush3.bf16.msra.mxu0 %v15927_v17  ;;  %16048 = vmatpush3.bf16.msra.mxu1 %v16047_v49  ;;  %v15978_v17 = vpack.c.bf16 %v10359_v21, %v10358_v37  ;;  %v16098_v49 = vpack.c.bf16 %v10439_v48, %v10438_v29  ;;  %v16026_v37 = vpack.c.bf16 %v10391_v22, %v10390_v44  ;;  %v10392_v29 = vld [vmem:[%s21818_s7 + $0x4d0] sm:$0xff]  ;;  %v10393_v48 = vld [vmem:[%s21818_s7 + $0x4d8] sm:$0xff] }
 0x591   :  { %15929 = vmatprep.subr.bf16.mxu0 %v16917_v12  ;;  %16049 = vmatprep.subr.bf16.mxu1 %v16917_v12  ;;  %v10424_v44 = vld [vmem:[%s21818_s7 + $0x550] sm:$0xff]  ;;  %v10425_v22 = vld [vmem:[%s21818_s7 + $0x558] sm:$0xff] }
 0x594   :  { %15931 = vmatpush3.bf16.msra.mxu0 %v15930_v43  ;;  %16051 = vmatpush3.bf16.msra.mxu1 %v16050_v41  ;;  %v15981_v43 = vpack.c.bf16 %v10361_v31, %v10360_v53  ;;  %v16101_v41 = vpack.c.bf16 %v10441_v32, %v10440_v2  ;;  %v16029_v53 = vpack.c.bf16 %v10393_v48, %v10392_v29  ;;  %v10394_v2 = vld [vmem:[%s21818_s7 + $0x4e0] sm:$0xff]  ;;  %v10395_v32 = vld [vmem:[%s21818_s7 + $0x4e8] sm:$0xff] }
 0x595   :  { %15932 = vmatprep.subr.bf16.mxu0 %v16917_v12  ;;  %16052 = vmatprep.subr.bf16.mxu1 %v16917_v12  ;;  %v10426_v29 = vld [vmem:[%s21818_s7 + $0x560] sm:$0xff]  ;;  %v10427_v48 = vld [vmem:[%s21818_s7 + $0x568] sm:$0xff] }
 0x596   :  { %v5405_v8 = vpop.f32.mrb[42].mxu0  ;;  %v19763_v15 = vpop.f32.mrb[8].mxu1 }
 0x597   :  { %v19766_v23 = vadd.f32 %v5405_v8, %v19639_v61  ;;  %v13180_v51 = vpop.f32.mrb[43].mxu0  ;;  %v13320_v10 = vpop.f32.mrb[9].mxu1  ;;  %v10412_v61 = vld [vmem:[%s21819_s8 + $0x4f0] sm:$0xff]  ;;  %v16104_v8 = vpack.c.bf16 %v10443_v27, %v10442_v25 }
 0x598   :  { %15934 = vmatpush3.bf16.msra.mxu0 %v15933_v18  ;;  %16054 = vmatpush3.bf16.msra.mxu1 %v16053_v54  ;;  %v16059_v19 = vpack.c.bf16 %v10413_v52, %v10412_v61  ;;  %v10364_v51 = vld [vmem:[%s21818_s7 + $0x470] sm:$0xff]  ;;  %v10382_v61 = vld [vmem:[%s21818_s7 + $0x480] sm:$0xff]  ;;  %v10383_v52 = vld [vmem:[%s21818_s7 + $0x488] sm:$0xff] }
 0x599   :  { %15935 = vmatprep.subr.bf16.mxu0 %v16917_v12  ;;  %16055 = vmatprep.subr.bf16.mxu1 %v16917_v12  ;;  %v16014_v5 = vpack.c.bf16 %v10383_v52, %v10382_v61  ;;  %v10416_v61 = vld [vmem:[%s21818_s7 + $0x510] sm:$0xff]  ;;  %v10417_v52 = vld [vmem:[%s21818_s7 + $0x518] sm:$0xff] }
 0x59c   :  { %15937 = vmatpush3.bf16.msra.mxu0 %v15936_v33  ;;  %16057 = vmatpush3.bf16.msra.mxu1 %v16056_v47  ;;  %v10444_v33 = vld [vmem:[%s21819_s8 + $0x570] sm:$0xff]  ;;  %v10445_v47 = vld [vmem:[%s21819_s8 + $0x578] sm:$0xff] }
 0x59d   :  { %15938 = vmatprep.subr.bf16.mxu0 %v16917_v12  ;;  %16058 = vmatprep.subr.bf16.mxu1 %v16917_v12  ;;  %v16107_v34 = vpack.c.bf16 %v10445_v47, %v10444_v33  ;;  %v10415_v33 = vld [vmem:[%s21818_s7 + $0x508] sm:$0xff]  ;;  %v10494_v47 = vld [vmem:[%s21819_s8 + $0x600] sm:$0xff] }
 0x5a0   :  { %15940 = vmatpush3.bf16.msra.mxu0 %v15939_v0  ;;  %16060 = vmatpush3.bf16.msra.mxu1 %v16059_v19  ;;  %v10462_v0 = vld [vmem:[%s21819_s8 + $0x580] sm:$0xff]  ;;  %v10463_v19 = vld [vmem:[%s21819_s8 + $0x588] sm:$0xff] }
 0x5a1   :  { %15965 = vmatprep.subr.bf16.mxu0 %v16917_v12  ;;  %16085 = vmatprep.subr.bf16.mxu1 %v16917_v12  ;;  %v16134_v20 = vpack.c.bf16 %v10463_v19, %v10462_v0  ;;  %v10496_v0 = vld [vmem:[%s21819_s8 + $0x610] sm:$0xff]  ;;  %v10497_v19 = vld [vmem:[%s21819_s8 + $0x618] sm:$0xff] }
 0x5a2   :  { %v16185_v4 = vpack.c.bf16 %v10497_v19, %v10496_v0  ;;  %v10451_v0 = vld [vmem:[%s21818_s7 + $0x5a8] sm:$0xff] }
 0x5a3   :  { %13634 = vmatmul.mubr.f32.vlgmr.msra.gmra.mrb[56].mxu0 %v19561_v16  ;;  %13809 = vmatmul.mubr.f32.vlgmr.msra.gmra.mrb[22].mxu1 %v19810_v38  ;;  %v10434_v16 = vld [vmem:[%s21819_s8 + $0x520] sm:$0xff]  ;;  %v10531_v19 = vld [vmem:[%s21819_s8 + $0x6a8] sm:$0xff] }
 0x5a4   :  { %15967 = vmatpush3.bf16.msra.mxu0 %v15966_v42  ;;  %16087 = vmatpush3.bf16.msra.mxu1 %v16086_v57  ;;  %v16092_v6 = vpack.c.bf16 %v10435_v62, %v10434_v16  ;;  %v10464_v42 = vld [vmem:[%s21819_s8 + $0x590] sm:$0xff]  ;;  %v10465_v57 = vld [vmem:[%s21819_s8 + $0x598] sm:$0xff] }
 0x5a5   :  { %15968 = vmatprep.subr.bf16.mxu0 %v16917_v12  ;;  %16088 = vmatprep.subr.bf16.mxu1 %v16917_v12  ;;  %v16137_v35 = vpack.c.bf16 %v10465_v57, %v10464_v42  ;;  %v10388_v16 = vld [vmem:[%s21818_s7 + $0x4b0] sm:$0xff]  ;;  %v10389_v62 = vld [vmem:[%s21818_s7 + $0x4b8] sm:$0xff]  ;;  %v10419_v42 = vld [vmem:[%s21818_s7 + $0x528] sm:$0xff] }
 0x5a6   :  { %13703 = vmatprep.mubr.msk.f32.mxu0 %vm16918_vm3, %v16919_v60  ;;  %13878 = vmatprep.mubr.msk.f32.mxu1 %vm16918_vm3, %v16919_v60  ;;  %v16023_v28 = vpack.c.bf16 %v10389_v62, %v10388_v16  ;;  %v10499_v57 = vld [vmem:[%s21819_s8 + $0x628] sm:$0xff]  ;;  %v10422_v16 = vld [vmem:[%s21818_s7 + $0x540] sm:$0xff] }
 0x5a7   :  { %v10423_v62 = vld [vmem:[%s21818_s7 + $0x548] sm:$0xff] }
 0x5a8   :  { %15970 = vmatpush3.bf16.msra.mxu0 %v15969_v14  ;;  %16090 = vmatpush3.bf16.msra.mxu1 %v16089_v50  ;;  %v10387_v14 = vld [vmem:[%s21818_s7 + $0x4a8] sm:$0xff] }
 0x5a9   :  { %15971 = vmatprep.subr.bf16.mxu0 %v16917_v12  ;;  %16091 = vmatprep.subr.bf16.mxu1 %v16917_v12  ;;  %v10467_v50 = vld [vmem:[%s21819_s8 + $0x5a8] sm:$0xff]  ;;  %v16020_v59 = vpack.c.bf16 %v10387_v14, %v10386_v40  ;;  %v10420_v40 = vld [vmem:[%s21818_s7 + $0x530] sm:$0xff]  ;;  %v10421_v14 = vld [vmem:[%s21818_s7 + $0x538] sm:$0xff] }
 0x5ac   :  { %15973 = vmatpush3.bf16.msra.mxu0 %v15972_v7  ;;  %16093 = vmatpush3.bf16.msra.mxu1 %v16092_v6  ;;  %v10468_v7 = vld [vmem:[%s21819_s8 + $0x5b0] sm:$0xff]  ;;  %v10469_v6 = vld [vmem:[%s21819_s8 + $0x5b8] sm:$0xff] }
 0x5ad   :  { %15974 = vmatprep.subr.bf16.mxu0 %v16917_v12  ;;  %16094 = vmatprep.subr.bf16.mxu1 %v16917_v12  ;;  %v16143_v1 = vpack.c.bf16 %v10469_v6, %v10468_v7  ;;  %v10502_v7 = vld [vmem:[%s21819_s8 + $0x640] sm:$0xff]  ;;  %v10503_v6 = vld [vmem:[%s21819_s8 + $0x648] sm:$0xff] }
 0x5b0   :  { %15976 = vmatpush3.bf16.msra.mxu0 %v15975_v55  ;;  %16096 = vmatpush3.bf16.msra.mxu1 %v16095_v9  ;;  %v10470_v55 = vld [vmem:[%s21819_s8 + $0x5c0] sm:$0xff]  ;;  %v10471_v9 = vld [vmem:[%s21819_s8 + $0x5c8] sm:$0xff] }
 0x5b1   :  { %15977 = vmatprep.subr.bf16.mxu0 %v16917_v12  ;;  %16097 = vmatprep.subr.bf16.mxu1 %v16917_v12  ;;  %v16146_v21 = vpack.c.bf16 %v10471_v9, %v10470_v55  ;;  %v10504_v55 = vld [vmem:[%s21819_s8 + $0x650] sm:$0xff]  ;;  %v10505_v9 = vld [vmem:[%s21819_s8 + $0x658] sm:$0xff] }
 0x5b4   :  { %15979 = vmatpush3.bf16.msra.mxu0 %v15978_v17  ;;  %16099 = vmatpush3.bf16.msra.mxu1 %v16098_v49  ;;  %v10472_v17 = vld [vmem:[%s21819_s8 + $0x5d0] sm:$0xff]  ;;  %v10473_v49 = vld [vmem:[%s21819_s8 + $0x5d8] sm:$0xff] }
 0x5b5   :  { %15980 = vmatprep.subr.bf16.mxu0 %v16917_v12  ;;  %16100 = vmatprep.subr.bf16.mxu1 %v16917_v12  ;;  %v16149_v31 = vpack.c.bf16 %v10473_v49, %v10472_v17  ;;  %v10506_v17 = vld [vmem:[%s21819_s8 + $0x660] sm:$0xff]  ;;  %v10507_v49 = vld [vmem:[%s21819_s8 + $0x668] sm:$0xff] }
 0x5b6   :  { %v5492_v18 = vpop.f32.mrb[44].mxu0  ;;  %v5915_v54 = vpop.f32.mrb[10].mxu1 }
 0x5b7   :  { %v5563_v13 = vadd.f32 %v19641_v26, %v5492_v18  ;;  %v13215_v30 = vpop.f32.mrb[45].mxu0  ;;  %v13390_v36 = vpop.f32.mrb[11].mxu1  ;;  %v10365_v26 = vld [vmem:[%s21818_s7 + $0x478] sm:$0xff] }
 0x5b8   :  { %15982 = vmatpush3.bf16.msra.mxu0 %v15981_v43  ;;  %16102 = vmatpush3.bf16.msra.mxu1 %v16101_v41  ;;  %v10474_v43 = vld [vmem:[%s21819_s8 + $0x5e0] sm:$0xff]  ;;  %v10475_v41 = vld [vmem:[%s21819_s8 + $0x5e8] sm:$0xff]  ;;  %v10396_v36 = vld [vmem:[%s21818_s7 + $0x4f0] sm:$0xff] }
 0x5b9   :  { %v5742_v10 = vadd.f32 %v19763_v15, %v5563_v13  ;;  %15983 = vmatprep.subr.bf16.mxu0 %v16917_v12  ;;  %16103 = vmatprep.subr.bf16.mxu1 %v16917_v12  ;;  %v15987_v15 = vpack.c.bf16 %v10365_v26, %v10364_v51  ;;  %v16032_v13 = vpack.c.bf16 %v10395_v32, %v10394_v2  ;;  %v10414_v26 = vld [vmem:[%s21818_s7 + $0x500] sm:$0xff] }
 0x5ba   :  { %v16152_v30 = vpack.c.bf16 %v10475_v41, %v10474_v43 }
 0x5bb   :  { %v19904_v39 = vadd.f32 %v5915_v54, %v5742_v10 }
 0x5bc   :  { %15985 = vmatpush3.bf16.msra.mxu0 %v15984_v63  ;;  %16105 = vmatpush3.bf16.msra.mxu1 %v16104_v8  ;;  %v10476_v63 = vld [vmem:[%s21819_s8 + $0x5f0] sm:$0xff]  ;;  %v10477_v8 = vld [vmem:[%s21819_s8 + $0x5f8] sm:$0xff] }
 0x5bd   :  { %15986 = vmatprep.subr.bf16.mxu0 %v16917_v12  ;;  %16106 = vmatprep.subr.bf16.mxu1 %v16917_v12  ;;  %v16155_v10 = vpack.c.bf16 %v10477_v8, %v10476_v63  ;;  %v10526_v63 = vld [vmem:[%s21819_s8 + $0x680] sm:$0xff]  ;;  %v10527_v8 = vld [vmem:[%s21819_s8 + $0x688] sm:$0xff] }
 0x5c0   :  { %15988 = vmatpush3.bf16.msra.mxu0 %v15987_v15  ;;  %16108 = vmatpush3.bf16.msra.mxu1 %v16107_v34  ;;  %v16062_v15 = vpack.c.bf16 %v10415_v33, %v10414_v26  ;;  %v10448_v26 = vld [vmem:[%s21818_s7 + $0x590] sm:$0xff]  ;;  %v10449_v33 = vld [vmem:[%s21818_s7 + $0x598] sm:$0xff] }
 0x5c1   :  { %16013 = vmatprep.subr.bf16.mxu0 %v16917_v12  ;;  %16133 = vmatprep.subr.bf16.mxu1 %v16917_v12 }
 0x5c3   :  { %13704 = vmatmul.mubr.f32.vlgmr.msra.gmra.mrb[58].mxu0 %v19685_v3  ;;  %13879 = vmatmul.mubr.f32.vlgmr.msra.gmra.mrb[24].mxu1 %v19934_v45  ;;  %v10466_v3 = vld [vmem:[%s21819_s8 + $0x5a0] sm:$0xff] }
 0x5c4   :  { %16015 = vmatpush3.bf16.msra.mxu0 %v16014_v5  ;;  %16135 = vmatpush3.bf16.msra.mxu1 %v16134_v20  ;;  %v16140_v58 = vpack.c.bf16 %v10467_v50, %v10466_v3  ;;  %v20060_v5 = vld [vmem:[#allocation3 + $0x16] sm:$0x3]  ;;  %v16065_v20 = vpack.c.bf16 %v10417_v52, %v10416_v61  ;;  %v10500_v3 = vld [vmem:[%s21819_s8 + $0x630] sm:$0xff]  ;;  %v10501_v50 = vld [vmem:[%s21819_s8 + $0x638] sm:$0xff] }
 0x5c5   :  { %16016 = vmatprep.subr.bf16.mxu0 %v16917_v12  ;;  %16136 = vmatprep.subr.bf16.mxu1 %v16917_v12  ;;  %v10450_v52 = vld [vmem:[%s21818_s7 + $0x5a0] sm:$0xff] }
 0x5c6   :  { %13773 = vmatprep.mubr.msk.f32.mxu0 %vm16918_vm3, %v16919_v60  ;;  %13948 = vmatprep.mubr.msk.f32.mxu1 %vm16918_vm3, %v16919_v60 }
 0x5c8   :  { %16018 = vmatpush3.bf16.msra.mxu0 %v16017_v24  ;;  %16138 = vmatpush3.bf16.msra.mxu1 %v16137_v35  ;;  %v16068_v24 = vpack.c.bf16 %v10419_v42, %v10418_v56  ;;  %v10452_v56 = vld [vmem:[%s21818_s7 + $0x5b0] sm:$0xff]  ;;  %v10453_v42 = vld [vmem:[%s21818_s7 + $0x5b8] sm:$0xff] }
 0x5c9   :  { %16019 = vmatprep.subr.bf16.mxu0 %v16917_v12  ;;  %16139 = vmatprep.subr.bf16.mxu1 %v16917_v12 }
 0x5cc   :  { %16021 = vmatpush3.bf16.msra.mxu0 %v16020_v59  ;;  %16141 = vmatpush3.bf16.msra.mxu1 %v16140_v58  ;;  %v16071_v59 = vpack.c.bf16 %v10421_v14, %v10420_v40  ;;  %v16191_v58 = vpack.c.bf16 %v10501_v50, %v10500_v3  ;;  %v10454_v40 = vld [vmem:[%s21818_s7 + $0x5c0] sm:$0xff]  ;;  %v10455_v14 = vld [vmem:[%s21818_s7 + $0x5c8] sm:$0xff] }
 0x5cd   :  { %16022 = vmatprep.subr.bf16.mxu0 %v16917_v12  ;;  %16142 = vmatprep.subr.bf16.mxu1 %v16917_v12  ;;  %v10534_v3 = vld [vmem:[%s21819_s8 + $0x6c0] sm:$0xff]  ;;  %v10535_v50 = vld [vmem:[%s21819_s8 + $0x6c8] sm:$0xff] }
 0x5d0   :  { %16024 = vmatpush3.bf16.msra.mxu0 %v16023_v28  ;;  %16144 = vmatpush3.bf16.msra.mxu1 %v16143_v1  ;;  %v16074_v28 = vpack.c.bf16 %v10423_v62, %v10422_v16  ;;  %v16194_v1 = vpack.c.bf16 %v10503_v6, %v10502_v7  ;;  %v10456_v16 = vld [vmem:[%s21818_s7 + $0x5d0] sm:$0xff]  ;;  %v10457_v62 = vld [vmem:[%s21818_s7 + $0x5d8] sm:$0xff] }
 0x5d1   :  { %16025 = vmatprep.subr.bf16.mxu0 %v16917_v12  ;;  %16145 = vmatprep.subr.bf16.mxu1 %v16917_v12  ;;  %v10536_v7 = vld [vmem:[%s21819_s8 + $0x6d0] sm:$0xff]  ;;  %v10537_v6 = vld [vmem:[%s21819_s8 + $0x6d8] sm:$0xff] }
 0x5d4   :  { %16027 = vmatpush3.bf16.msra.mxu0 %v16026_v37  ;;  %16147 = vmatpush3.bf16.msra.mxu1 %v16146_v21  ;;  %v16077_v37 = vpack.c.bf16 %v10425_v22, %v10424_v44  ;;  %v16197_v21 = vpack.c.bf16 %v10505_v9, %v10504_v55  ;;  %v10458_v44 = vld [vmem:[%s21818_s7 + $0x5e0] sm:$0xff]  ;;  %v10459_v22 = vld [vmem:[%s21818_s7 + $0x5e8] sm:$0xff] }
 0x5d5   :  { %16028 = vmatprep.subr.bf16.mxu0 %v16917_v12  ;;  %16148 = vmatprep.subr.bf16.mxu1 %v16917_v12  ;;  %v10538_v55 = vld [vmem:[%s21819_s8 + $0x6e0] sm:$0xff]  ;;  %v10539_v9 = vld [vmem:[%s21819_s8 + $0x6e8] sm:$0xff] }
 0x5d6   :  { %v5650_v11 = vpop.f32.mrb[46].mxu0  ;;  %v6092_v46 = vpop.f32.mrb[12].mxu1 }
 0x5d7   :  { %v20013_v25 = vadd.f32 %v5650_v11, %v19766_v23  ;;  %v20016_v27 = vadd.f32 %v6092_v46, %v19904_v39  ;;  %v13285_v18 = vpop.f32.mrb[47].mxu0  ;;  %v13460_v54 = vpop.f32.mrb[13].mxu1  ;;  %v10397_v23 = vld [vmem:[%s21818_s7 + $0x4f8] sm:$0xff]  ;;  %v10495_v39 = vld [vmem:[%s21819_s8 + $0x608] sm:$0xff]  ;;  %v16080_v11 = vpack.c.bf16 %v10427_v48, %v10426_v29  ;;  %v16200_v46 = vpack.c.bf16 %v10507_v49, %v10506_v17 }
 0x5d8   :  { %16030 = vmatpush3.bf16.msra.mxu0 %v16029_v53  ;;  %16150 = vmatpush3.bf16.msra.mxu1 %v16149_v31  ;;  %v16035_v51 = vpack.c.bf16 %v10397_v23, %v10396_v36  ;;  %v16182_v34 = vpack.c.bf16 %v10495_v39, %v10494_v47  ;;  %v10428_v18 = vld [vmem:[%s21818_s7 + $0x570] sm:$0xff]  ;;  %v10509_v54 = vld [vmem:[%s21819_s8 + $0x678] sm:$0xff]  ;;  %v10446_v36 = vld [vmem:[%s21818_s7 + $0x580] sm:$0xff] }
 0x5d9   :  { %16031 = vmatprep.subr.bf16.mxu0 %v16917_v12  ;;  %16151 = vmatprep.subr.bf16.mxu1 %v16917_v12  ;;  %v10447_v23 = vld [vmem:[%s21818_s7 + $0x588] sm:$0xff]  ;;  %v10528_v47 = vld [vmem:[%s21819_s8 + $0x690] sm:$0xff]  ;;  %v10529_v39 = vld [vmem:[%s21819_s8 + $0x698] sm:$0xff] }
 0x5da   :  { %v16233_v61 = vpack.c.bf16 %v10529_v39, %v10528_v47  ;;  %v10483_v47 = vld [vmem:[%s21818_s7 + $0x628] sm:$0xff] }
 0x5db   :  { %v10563_v39 = vld [vmem:[%s21819_s8 + $0x728] sm:$0xff] }
 0x5dc   :  { %16033 = vmatpush3.bf16.msra.mxu0 %v16032_v13  ;;  %16153 = vmatpush3.bf16.msra.mxu1 %v16152_v30 }
 0x5dd   :  { %16034 = vmatprep.subr.bf16.mxu0 %v16917_v12  ;;  %16154 = vmatprep.subr.bf16.mxu1 %v16917_v12 }
 0x5e0   :  { %16036 = vmatpush3.bf16.msra.mxu0 %v16035_v51  ;;  %16156 = vmatpush3.bf16.msra.mxu1 %v16155_v10  ;;  %v16110_v51 = vpack.c.bf16 %v10447_v23, %v10446_v36  ;;  %v16230_v10 = vpack.c.bf16 %v10527_v8, %v10526_v63  ;;  %v10480_v36 = vld [vmem:[%s21818_s7 + $0x610] sm:$0xff]  ;;  %v10481_v23 = vld [vmem:[%s21818_s7 + $0x618] sm:$0xff] }
 0x5e1   :  { %16061 = vmatprep.subr.bf16.mxu0 %v16917_v12  ;;  %16181 = vmatprep.subr.bf16.mxu1 %v16917_v12  ;;  %v10560_v63 = vld [vmem:[%s21819_s8 + $0x710] sm:$0xff]  ;;  %v10561_v8 = vld [vmem:[%s21819_s8 + $0x718] sm:$0xff] }
 0x5e3   :  { %13774 = vmatmul.mubr.f32.vlgmr.msra.gmra.mrb[60].mxu0 %v19810_v38  ;;  %13949 = vmatmul.mubr.f32.vlgmr.msra.gmra.mrb[26].mxu1 %v20060_v5  ;;  %v10498_v38 = vld [vmem:[%s21819_s8 + $0x620] sm:$0xff] }
 0x5e4   :  { %16063 = vmatpush3.bf16.msra.mxu0 %v16062_v15  ;;  %16183 = vmatpush3.bf16.msra.mxu1 %v16182_v34  ;;  %v16188_v35 = vpack.c.bf16 %v10499_v57, %v10498_v38  ;;  %v20186_v15 = vld [vmem:[#allocation3 + $0x18] sm:$0x3]  ;;  %v16113_v34 = vpack.c.bf16 %v10449_v33, %v10448_v26  ;;  %v10532_v38 = vld [vmem:[%s21819_s8 + $0x6b0] sm:$0xff]  ;;  %v10533_v57 = vld [vmem:[%s21819_s8 + $0x6b8] sm:$0xff]  ;;  %v16281_v26 = vpack.c.bf16 %v10561_v8, %v10560_v63 }
 0x5e5   :  { %16064 = vmatprep.subr.bf16.mxu0 %v16917_v12  ;;  %16184 = vmatprep.subr.bf16.mxu1 %v16917_v12  ;;  %v10482_v33 = vld [vmem:[%s21818_s7 + $0x620] sm:$0xff]  ;;  %v10515_v63 = vld [vmem:[%s21818_s7 + $0x6a8] sm:$0xff] }
 0x5e6   :  { %13843 = vmatprep.mubr.msk.f32.mxu0 %vm16918_vm3, %v16919_v60  ;;  %14018 = vmatprep.mubr.msk.f32.mxu1 %vm16918_vm3, %v16919_v60  ;;  %v10595_v8 = vld [vmem:[%s21819_s8 + $0x7a8] sm:$0xff] }
 0x5e8   :  { %16066 = vmatpush3.bf16.msra.mxu0 %v16065_v20  ;;  %16186 = vmatpush3.bf16.msra.mxu1 %v16185_v4  ;;  %v16116_v20 = vpack.c.bf16 %v10451_v0, %v10450_v52  ;;  %v10484_v52 = vld [vmem:[%s21818_s7 + $0x630] sm:$0xff]  ;;  %v10485_v0 = vld [vmem:[%s21818_s7 + $0x638] sm:$0xff] }
 0x5e9   :  { %16067 = vmatprep.subr.bf16.mxu0 %v16917_v12  ;;  %16187 = vmatprep.subr.bf16.mxu1 %v16917_v12 }
 0x5ec   :  { %16069 = vmatpush3.bf16.msra.mxu0 %v16068_v24  ;;  %16189 = vmatpush3.bf16.msra.mxu1 %v16188_v35  ;;  %v16119_v24 = vpack.c.bf16 %v10453_v42, %v10452_v56  ;;  %v16239_v35 = vpack.c.bf16 %v10533_v57, %v10532_v38  ;;  %v10486_v56 = vld [vmem:[%s21818_s7 + $0x640] sm:$0xff]  ;;  %v10487_v42 = vld [vmem:[%s21818_s7 + $0x648] sm:$0xff] }
 0x5ed   :  { %16070 = vmatprep.subr.bf16.mxu0 %v16917_v12  ;;  %16190 = vmatprep.subr.bf16.mxu1 %v16917_v12  ;;  %v10566_v38 = vld [vmem:[%s21819_s8 + $0x740] sm:$0xff]  ;;  %v10567_v57 = vld [vmem:[%s21819_s8 + $0x748] sm:$0xff] }
 0x5f0   :  { %16072 = vmatpush3.bf16.msra.mxu0 %v16071_v59  ;;  %16192 = vmatpush3.bf16.msra.mxu1 %v16191_v58  ;;  %v16122_v59 = vpack.c.bf16 %v10455_v14, %v10454_v40  ;;  %v16242_v58 = vpack.c.bf16 %v10535_v50, %v10534_v3  ;;  %v10488_v40 = vld [vmem:[%s21818_s7 + $0x650] sm:$0xff]  ;;  %v10489_v14 = vld [vmem:[%s21818_s7 + $0x658] sm:$0xff] }
 0x5f1   :  { %16073 = vmatprep.subr.bf16.mxu0 %v16917_v12  ;;  %16193 = vmatprep.subr.bf16.mxu1 %v16917_v12  ;;  %v10568_v3 = vld [vmem:[%s21819_s8 + $0x750] sm:$0xff]  ;;  %v10569_v50 = vld [vmem:[%s21819_s8 + $0x758] sm:$0xff] }
 0x5f4   :  { %16075 = vmatpush3.bf16.msra.mxu0 %v16074_v28  ;;  %16195 = vmatpush3.bf16.msra.mxu1 %v16194_v1  ;;  %v16125_v28 = vpack.c.bf16 %v10457_v62, %v10456_v16  ;;  %v16245_v1 = vpack.c.bf16 %v10537_v6, %v10536_v7  ;;  %v10490_v16 = vld [vmem:[%s21818_s7 + $0x660] sm:$0xff]  ;;  %v10491_v62 = vld [vmem:[%s21818_s7 + $0x668] sm:$0xff] }
 0x5f5   :  { %16076 = vmatprep.subr.bf16.mxu0 %v16917_v12  ;;  %16196 = vmatprep.subr.bf16.mxu1 %v16917_v12  ;;  %v10570_v7 = vld [vmem:[%s21819_s8 + $0x760] sm:$0xff]  ;;  %v10571_v6 = vld [vmem:[%s21819_s8 + $0x768] sm:$0xff] }
 0x5f6   :  { %v5827_v53 = vpop.f32.mrb[48].mxu0  ;;  %v6269_v31 = vpop.f32.mrb[14].mxu1 }
 0x5f7   :  { %v20139_v2 = vadd.f32 %v5827_v53, %v20013_v25  ;;  %v20142_v32 = vadd.f32 %v6269_v31, %v20016_v27  ;;  %v13355_v43 = vpop.f32.mrb[49].mxu0  ;;  %v13530_v41 = vpop.f32.mrb[15].mxu1  ;;  %v10429_v25 = vld [vmem:[%s21818_s7 + $0x578] sm:$0xff]  ;;  %v10508_v27 = vld [vmem:[%s21819_s8 + $0x670] sm:$0xff]  ;;  %v16128_v53 = vpack.c.bf16 %v10459_v22, %v10458_v44  ;;  %v16248_v31 = vpack.c.bf16 %v10539_v9, %v10538_v55 }
 0x5f8   :  { %16078 = vmatpush3.bf16.msra.mxu0 %v16077_v37  ;;  %16198 = vmatpush3.bf16.msra.mxu1 %v16197_v21  ;;  %v16083_v13 = vpack.c.bf16 %v10429_v25, %v10428_v18  ;;  %v16203_v30 = vpack.c.bf16 %v10509_v54, %v10508_v27  ;;  %v10460_v43 = vld [vmem:[%s21818_s7 + $0x5f0] sm:$0xff]  ;;  %v10541_v41 = vld [vmem:[%s21819_s8 + $0x6f8] sm:$0xff]  ;;  %v10478_v18 = vld [vmem:[%s21818_s7 + $0x600] sm:$0xff] }
 0x5f9   :  { %16079 = vmatprep.subr.bf16.mxu0 %v16917_v12  ;;  %16199 = vmatprep.subr.bf16.mxu1 %v16917_v12  ;;  %v10479_v25 = vld [vmem:[%s21818_s7 + $0x608] sm:$0xff]  ;;  %v10558_v27 = vld [vmem:[%s21819_s8 + $0x700] sm:$0xff] }
 0x5fa   :  { %v10559_v54 = vld [vmem:[%s21819_s8 + $0x708] sm:$0xff] }
 0x5fc   :  { %16081 = vmatpush3.bf16.msra.mxu0 %v16080_v11  ;;  %16201 = vmatpush3.bf16.msra.mxu1 %v16200_v46 }
 0x5fd   :  { %16082 = vmatprep.subr.bf16.mxu0 %v16917_v12  ;;  %16202 = vmatprep.subr.bf16.mxu1 %v16917_v12 }
 0x600   :  { %16084 = vmatpush3.bf16.msra.mxu0 %v16083_v13  ;;  %16204 = vmatpush3.bf16.msra.mxu1 %v16203_v30  ;;  %v16158_v13 = vpack.c.bf16 %v10479_v25, %v10478_v18  ;;  %v16278_v30 = vpack.c.bf16 %v10559_v54, %v10558_v27  ;;  %v10512_v18 = vld [vmem:[%s21818_s7 + $0x690] sm:$0xff]  ;;  %v10513_v25 = vld [vmem:[%s21818_s7 + $0x698] sm:$0xff] }
 0x601   :  { %16109 = vmatprep.subr.bf16.mxu0 %v16917_v12  ;;  %16229 = vmatprep.subr.bf16.mxu1 %v16917_v12  ;;  %v10592_v27 = vld [vmem:[%s21819_s8 + $0x790] sm:$0xff]  ;;  %v10593_v54 = vld [vmem:[%s21819_s8 + $0x798] sm:$0xff] }
 0x603   :  { %13844 = vmatmul.mubr.f32.vlgmr.msra.gmra.mrb[62].mxu0 %v19934_v45  ;;  %14019 = vmatmul.mubr.f32.vlgmr.msra.gmra.mrb[28].mxu1 %v20186_v15  ;;  %v10530_v45 = vld [vmem:[%s21819_s8 + $0x6a0] sm:$0xff] }
 0x604   :  { %16111 = vmatpush3.bf16.msra.mxu0 %v16110_v51  ;;  %16231 = vmatpush3.bf16.msra.mxu1 %v16230_v10  ;;  %v16236_v4 = vpack.c.bf16 %v10531_v19, %v10530_v45  ;;  %v20312_v51 = vld [vmem:[#allocation3 + $0x1a] sm:$0x3]  ;;  %v16161_v10 = vpack.c.bf16 %v10481_v23, %v10480_v36  ;;  %v10564_v45 = vld [vmem:[%s21819_s8 + $0x730] sm:$0xff]  ;;  %v10565_v19 = vld [vmem:[%s21819_s8 + $0x738] sm:$0xff]  ;;  %v16329_v36 = vpack.c.bf16 %v10593_v54, %v10592_v27 }
 0x605   :  { %16112 = vmatprep.subr.bf16.mxu0 %v16917_v12  ;;  %16232 = vmatprep.subr.bf16.mxu1 %v16917_v12  ;;  %v10514_v23 = vld [vmem:[%s21818_s7 + $0x6a0] sm:$0xff]  ;;  %v10547_v27 = vld [vmem:[%s21818_s7 + $0x728] sm:$0xff] }
 0x606   :  { %13913 = vmatprep.mubr.msk.f32.mxu0 %vm16918_vm3, %v16919_v60  ;;  %14088 = vmatprep.mubr.msk.f32.mxu1 %vm16918_vm3, %v16919_v60  ;;  %v10627_v54 = vld [vmem:[%s21819_s8 + $0x828] sm:$0xff] }
 0x608   :  { %16114 = vmatpush3.bf16.msra.mxu0 %v16113_v34  ;;  %16234 = vmatpush3.bf16.msra.mxu1 %v16233_v61  ;;  %v16164_v34 = vpack.c.bf16 %v10483_v47, %v10482_v33  ;;  %v10516_v33 = vld [vmem:[%s21818_s7 + $0x6b0] sm:$0xff]  ;;  %v10517_v47 = vld [vmem:[%s21818_s7 + $0x6b8] sm:$0xff] }
 0x609   :  { %16115 = vmatprep.subr.bf16.mxu0 %v16917_v12  ;;  %16235 = vmatprep.subr.bf16.mxu1 %v16917_v12 }
 0x60c   :  { %16117 = vmatpush3.bf16.msra.mxu0 %v16116_v20  ;;  %16237 = vmatpush3.bf16.msra.mxu1 %v16236_v4  ;;  %v16167_v20 = vpack.c.bf16 %v10485_v0, %v10484_v52  ;;  %v16287_v4 = vpack.c.bf16 %v10565_v19, %v10564_v45  ;;  %v10518_v52 = vld [vmem:[%s21818_s7 + $0x6c0] sm:$0xff]  ;;  %v10519_v0 = vld [vmem:[%s21818_s7 + $0x6c8] sm:$0xff] }
 0x60d   :  { %16118 = vmatprep.subr.bf16.mxu0 %v16917_v12  ;;  %16238 = vmatprep.subr.bf16.mxu1 %v16917_v12  ;;  %v10598_v45 = vld [vmem:[%s21819_s8 + $0x7c0] sm:$0xff]  ;;  %v10599_v19 = vld [vmem:[%s21819_s8 + $0x7c8] sm:$0xff] }
 0x610   :  { %16120 = vmatpush3.bf16.msra.mxu0 %v16119_v24  ;;  %16240 = vmatpush3.bf16.msra.mxu1 %v16239_v35  ;;  %v16170_v24 = vpack.c.bf16 %v10487_v42, %v10486_v56  ;;  %v16290_v35 = vpack.c.bf16 %v10567_v57, %v10566_v38  ;;  %v10520_v56 = vld [vmem:[%s21818_s7 + $0x6d0] sm:$0xff]  ;;  %v10521_v42 = vld [vmem:[%s21818_s7 + $0x6d8] sm:$0xff] }
 0x611   :  { %16121 = vmatprep.subr.bf16.mxu0 %v16917_v12  ;;  %16241 = vmatprep.subr.bf16.mxu1 %v16917_v12  ;;  %v10600_v38 = vld [vmem:[%s21819_s8 + $0x7d0] sm:$0xff]  ;;  %v10601_v57 = vld [vmem:[%s21819_s8 + $0x7d8] sm:$0xff] }
 0x614   :  { %16123 = vmatpush3.bf16.msra.mxu0 %v16122_v59  ;;  %16243 = vmatpush3.bf16.msra.mxu1 %v16242_v58  ;;  %v16173_v59 = vpack.c.bf16 %v10489_v14, %v10488_v40  ;;  %v16293_v58 = vpack.c.bf16 %v10569_v50, %v10568_v3  ;;  %v10522_v40 = vld [vmem:[%s21818_s7 + $0x6e0] sm:$0xff]  ;;  %v10523_v14 = vld [vmem:[%s21818_s7 + $0x6e8] sm:$0xff] }
 0x615   :  { %16124 = vmatprep.subr.bf16.mxu0 %v16917_v12  ;;  %16244 = vmatprep.subr.bf16.mxu1 %v16917_v12  ;;  %v10602_v3 = vld [vmem:[%s21819_s8 + $0x7e0] sm:$0xff]  ;;  %v10603_v50 = vld [vmem:[%s21819_s8 + $0x7e8] sm:$0xff] }
 0x616   :  { %v6004_v37 = vpop.f32.mrb[50].mxu0  ;;  %v6446_v21 = vpop.f32.mrb[16].mxu1 }
 0x617   :  { %v20265_v29 = vadd.f32 %v6004_v37, %v20139_v2  ;;  %v20268_v48 = vadd.f32 %v6446_v21, %v20142_v32  ;;  %v13425_v17 = vpop.f32.mrb[51].mxu0  ;;  %v13600_v49 = vpop.f32.mrb[17].mxu1  ;;  %v10461_v2 = vld [vmem:[%s21818_s7 + $0x5f8] sm:$0xff]  ;;  %v10540_v32 = vld [vmem:[%s21819_s8 + $0x6f0] sm:$0xff]  ;;  %v16176_v37 = vpack.c.bf16 %v10491_v62, %v10490_v16  ;;  %v16296_v21 = vpack.c.bf16 %v10571_v6, %v10570_v7 }
 0x618   :  { %16126 = vmatpush3.bf16.msra.mxu0 %v16125_v28  ;;  %16246 = vmatpush3.bf16.msra.mxu1 %v16245_v1  ;;  %v16131_v11 = vpack.c.bf16 %v10461_v2, %v10460_v43  ;;  %v16251_v46 = vpack.c.bf16 %v10541_v41, %v10540_v32  ;;  %v10492_v17 = vld [vmem:[%s21818_s7 + $0x670] sm:$0xff]  ;;  %v10573_v49 = vld [vmem:[%s21819_s8 + $0x778] sm:$0xff]  ;;  %v10510_v43 = vld [vmem:[%s21818_s7 + $0x680] sm:$0xff] }
 0x619   :  { %16127 = vmatprep.subr.bf16.mxu0 %v16917_v12  ;;  %16247 = vmatprep.subr.bf16.mxu1 %v16917_v12  ;;  %v10511_v2 = vld [vmem:[%s21818_s7 + $0x688] sm:$0xff]  ;;  %v10590_v32 = vld [vmem:[%s21819_s8 + $0x780] sm:$0xff] }
 0x61a   :  { %v10591_v41 = vld [vmem:[%s21819_s8 + $0x788] sm:$0xff] }
 0x61c   :  { %16129 = vmatpush3.bf16.msra.mxu0 %v16128_v53  ;;  %16249 = vmatpush3.bf16.msra.mxu1 %v16248_v31 }
 0x61d   :  { %16130 = vmatprep.subr.bf16.mxu0 %v16917_v12  ;;  %16250 = vmatprep.subr.bf16.mxu1 %v16917_v12 }
 0x620   :  { %16132 = vmatpush3.bf16.msra.mxu0 %v16131_v11  ;;  %16252 = vmatpush3.bf16.msra.mxu1 %v16251_v46  ;;  %v16206_v11 = vpack.c.bf16 %v10511_v2, %v10510_v43  ;;  %v16326_v46 = vpack.c.bf16 %v10591_v41, %v10590_v32  ;;  %v10544_v43 = vld [vmem:[%s21818_s7 + $0x710] sm:$0xff]  ;;  %v10545_v2 = vld [vmem:[%s21818_s7 + $0x718] sm:$0xff] }
 0x621   :  { %16157 = vmatprep.subr.bf16.mxu0 %v16917_v12  ;;  %16277 = vmatprep.subr.bf16.mxu1 %v16917_v12  ;;  %v10624_v32 = vld [vmem:[%s21819_s8 + $0x810] sm:$0xff]  ;;  %v10625_v41 = vld [vmem:[%s21819_s8 + $0x818] sm:$0xff] }
 0x623   :  { %13914 = vmatmul.mubr.f32.vlgmr.msra.gmra.mrb[64].mxu0 %v20060_v5  ;;  %14089 = vmatmul.mubr.f32.vlgmr.msra.gmra.mrb[30].mxu1 %v20312_v51  ;;  %v10562_v5 = vld [vmem:[%s21819_s8 + $0x720] sm:$0xff] }
 0x624   :  { %16159 = vmatpush3.bf16.msra.mxu0 %v16158_v13  ;;  %16279 = vmatpush3.bf16.msra.mxu1 %v16278_v30  ;;  %v16284_v61 = vpack.c.bf16 %v10563_v39, %v10562_v5  ;;  %v20438_v13 = vld [vmem:[#allocation3 + $0x1c] sm:$0x3]  ;;  %v16209_v30 = vpack.c.bf16 %v10513_v25, %v10512_v18  ;;  %v10596_v5 = vld [vmem:[%s21819_s8 + $0x7b0] sm:$0xff]  ;;  %v10597_v39 = vld [vmem:[%s21819_s8 + $0x7b8] sm:$0xff]  ;;  %v16377_v18 = vpack.c.bf16 %v10625_v41, %v10624_v32 }
 0x625   :  { %16160 = vmatprep.subr.bf16.mxu0 %v16917_v12  ;;  %16280 = vmatprep.subr.bf16.mxu1 %v16917_v12  ;;  %v10546_v25 = vld [vmem:[%s21818_s7 + $0x720] sm:$0xff]  ;;  %v10579_v32 = vld [vmem:[%s21818_s7 + $0x7a8] sm:$0xff] }
 0x626   :  { %13983 = vmatprep.mubr.msk.f32.mxu0 %vm16918_vm3, %v16919_v60  ;;  %14158 = vmatprep.mubr.msk.f32.mxu1 %vm16918_vm3, %v16919_v60  ;;  %v10659_v41 = vld [vmem:[%s21819_s8 + $0x8a8] sm:$0xff] }
 0x628   :  { %16162 = vmatpush3.bf16.msra.mxu0 %v16161_v10  ;;  %16282 = vmatpush3.bf16.msra.mxu1 %v16281_v26  ;;  %v16212_v10 = vpack.c.bf16 %v10515_v63, %v10514_v23  ;;  %v10548_v23 = vld [vmem:[%s21818_s7 + $0x730] sm:$0xff]  ;;  %v10549_v63 = vld [vmem:[%s21818_s7 + $0x738] sm:$0xff] }
 0x629   :  { %16163 = vmatprep.subr.bf16.mxu0 %v16917_v12  ;;  %16283 = vmatprep.subr.bf16.mxu1 %v16917_v12 }
 0x62c   :  { %16165 = vmatpush3.bf16.msra.mxu0 %v16164_v34  ;;  %16285 = vmatpush3.bf16.msra.mxu1 %v16284_v61  ;;  %v16215_v34 = vpack.c.bf16 %v10517_v47, %v10516_v33  ;;  %v16335_v61 = vpack.c.bf16 %v10597_v39, %v10596_v5  ;;  %v10550_v33 = vld [vmem:[%s21818_s7 + $0x740] sm:$0xff]  ;;  %v10551_v47 = vld [vmem:[%s21818_s7 + $0x748] sm:$0xff] }
 0x62d   :  { %16166 = vmatprep.subr.bf16.mxu0 %v16917_v12  ;;  %16286 = vmatprep.subr.bf16.mxu1 %v16917_v12  ;;  %v10630_v5 = vld [vmem:[%s21819_s8 + $0x840] sm:$0xff]  ;;  %v10631_v39 = vld [vmem:[%s21819_s8 + $0x848] sm:$0xff] }
 0x630   :  { %16168 = vmatpush3.bf16.msra.mxu0 %v16167_v20  ;;  %16288 = vmatpush3.bf16.msra.mxu1 %v16287_v4  ;;  %v16218_v20 = vpack.c.bf16 %v10519_v0, %v10518_v52  ;;  %v16338_v4 = vpack.c.bf16 %v10599_v19, %v10598_v45  ;;  %v10552_v52 = vld [vmem:[%s21818_s7 + $0x750] sm:$0xff]  ;;  %v10553_v0 = vld [vmem:[%s21818_s7 + $0x758] sm:$0xff] }
 0x631   :  { %16169 = vmatprep.subr.bf16.mxu0 %v16917_v12  ;;  %16289 = vmatprep.subr.bf16.mxu1 %v16917_v12  ;;  %v10632_v45 = vld [vmem:[%s21819_s8 + $0x850] sm:$0xff]  ;;  %v10633_v19 = vld [vmem:[%s21819_s8 + $0x858] sm:$0xff] }
 0x634   :  { %16171 = vmatpush3.bf16.msra.mxu0 %v16170_v24  ;;  %16291 = vmatpush3.bf16.msra.mxu1 %v16290_v35  ;;  %v16221_v24 = vpack.c.bf16 %v10521_v42, %v10520_v56  ;;  %v16341_v35 = vpack.c.bf16 %v10601_v57, %v10600_v38  ;;  %v10554_v56 = vld [vmem:[%s21818_s7 + $0x760] sm:$0xff]  ;;  %v10555_v42 = vld [vmem:[%s21818_s7 + $0x768] sm:$0xff] }
 0x635   :  { %16172 = vmatprep.subr.bf16.mxu0 %v16917_v12  ;;  %16292 = vmatprep.subr.bf16.mxu1 %v16917_v12  ;;  %v10634_v38 = vld [vmem:[%s21819_s8 + $0x860] sm:$0xff]  ;;  %v10635_v57 = vld [vmem:[%s21819_s8 + $0x868] sm:$0xff] }
 0x636   :  { %v6181_v28 = vpop.f32.mrb[52].mxu0  ;;  %v6623_v1 = vpop.f32.mrb[18].mxu1 }
 0x637   :  { %v20391_v44 = vadd.f32 %v6181_v28, %v20265_v29  ;;  %v20394_v22 = vadd.f32 %v6623_v1, %v20268_v48  ;;  %v13495_v55 = vpop.f32.mrb[53].mxu0  ;;  %v13670_v9 = vpop.f32.mrb[19].mxu1  ;;  %v10493_v29 = vld [vmem:[%s21818_s7 + $0x678] sm:$0xff]  ;;  %v10572_v48 = vld [vmem:[%s21819_s8 + $0x770] sm:$0xff]  ;;  %v16224_v28 = vpack.c.bf16 %v10523_v14, %v10522_v40  ;;  %v16344_v1 = vpack.c.bf16 %v10603_v50, %v10602_v3 }
 0x638   :  { %16174 = vmatpush3.bf16.msra.mxu0 %v16173_v59  ;;  %16294 = vmatpush3.bf16.msra.mxu1 %v16293_v58  ;;  %v16179_v53 = vpack.c.bf16 %v10493_v29, %v10492_v17  ;;  %v16299_v31 = vpack.c.bf16 %v10573_v49, %v10572_v48  ;;  %v10524_v55 = vld [vmem:[%s21818_s7 + $0x6f0] sm:$0xff]  ;;  %v10605_v9 = vld [vmem:[%s21819_s8 + $0x7f8] sm:$0xff]  ;;  %v10542_v17 = vld [vmem:[%s21818_s7 + $0x700] sm:$0xff] }
 0x639   :  { %16175 = vmatprep.subr.bf16.mxu0 %v16917_v12  ;;  %16295 = vmatprep.subr.bf16.mxu1 %v16917_v12  ;;  %v10543_v29 = vld [vmem:[%s21818_s7 + $0x708] sm:$0xff]  ;;  %v10622_v48 = vld [vmem:[%s21819_s8 + $0x800] sm:$0xff] }
 0x63a   :  { %v10623_v49 = vld [vmem:[%s21819_s8 + $0x808] sm:$0xff] }
 0x63c   :  { %16177 = vmatpush3.bf16.msra.mxu0 %v16176_v37  ;;  %16297 = vmatpush3.bf16.msra.mxu1 %v16296_v21 }
 0x63d   :  { %16178 = vmatprep.subr.bf16.mxu0 %v16917_v12  ;;  %16298 = vmatprep.subr.bf16.mxu1 %v16917_v12 }
 0x640   :  { %16180 = vmatpush3.bf16.msra.mxu0 %v16179_v53  ;;  %16300 = vmatpush3.bf16.msra.mxu1 %v16299_v31  ;;  %v16254_v53 = vpack.c.bf16 %v10543_v29, %v10542_v17  ;;  %v16374_v31 = vpack.c.bf16 %v10623_v49, %v10622_v48  ;;  %v10576_v17 = vld [vmem:[%s21818_s7 + $0x790] sm:$0xff]  ;;  %v10577_v29 = vld [vmem:[%s21818_s7 + $0x798] sm:$0xff] }
 0x641   :  { %16205 = vmatprep.subr.bf16.mxu0 %v16917_v12  ;;  %16325 = vmatprep.subr.bf16.mxu1 %v16917_v12  ;;  %v10656_v48 = vld [vmem:[%s21819_s8 + $0x890] sm:$0xff]  ;;  %v10657_v49 = vld [vmem:[%s21819_s8 + $0x898] sm:$0xff] }
 0x643   :  { %13984 = vmatmul.mubr.f32.vlgmr.msra.gmra.mrb[66].mxu0 %v20186_v15  ;;  %14159 = vmatmul.mubr.f32.vlgmr.msra.gmra.mrb[32].mxu1 %v20438_v13  ;;  %v10594_v15 = vld [vmem:[%s21819_s8 + $0x7a0] sm:$0xff] }
 0x644   :  { %16207 = vmatpush3.bf16.msra.mxu0 %v16206_v11  ;;  %16327 = vmatpush3.bf16.msra.mxu1 %v16326_v46  ;;  %v16332_v26 = vpack.c.bf16 %v10595_v8, %v10594_v15  ;;  %v20564_v11 = vld [vmem:[#allocation3 + $0x1e] sm:$0x3]  ;;  %v16257_v46 = vpack.c.bf16 %v10545_v2, %v10544_v43  ;;  %v10628_v15 = vld [vmem:[%s21819_s8 + $0x830] sm:$0xff]  ;;  %v10629_v8 = vld [vmem:[%s21819_s8 + $0x838] sm:$0xff]  ;;  %v16425_v43 = vpack.c.bf16 %v10657_v49, %v10656_v48 }
 0x645   :  { %16208 = vmatprep.subr.bf16.mxu0 %v16917_v12  ;;  %16328 = vmatprep.subr.bf16.mxu1 %v16917_v12  ;;  %v10578_v2 = vld [vmem:[%s21818_s7 + $0x7a0] sm:$0xff]  ;;  %v10611_v48 = vld [vmem:[%s21818_s7 + $0x828] sm:$0xff] }
 0x646   :  { %14053 = vmatprep.mubr.msk.f32.mxu0 %vm16918_vm3, %v16919_v60  ;;  %14228 = vmatprep.mubr.msk.f32.mxu1 %vm16918_vm3, %v16919_v60  ;;  %v10691_v49 = vld [vmem:[%s21819_s8 + $0x928] sm:$0xff] }
 0x648   :  { %16210 = vmatpush3.bf16.msra.mxu0 %v16209_v30  ;;  %16330 = vmatpush3.bf16.msra.mxu1 %v16329_v36  ;;  %v16260_v30 = vpack.c.bf16 %v10547_v27, %v10546_v25  ;;  %v10580_v25 = vld [vmem:[%s21818_s7 + $0x7b0] sm:$0xff]  ;;  %v10581_v27 = vld [vmem:[%s21818_s7 + $0x7b8] sm:$0xff] }
 0x649   :  { %16211 = vmatprep.subr.bf16.mxu0 %v16917_v12  ;;  %16331 = vmatprep.subr.bf16.mxu1 %v16917_v12 }
 0x64c   :  { %16213 = vmatpush3.bf16.msra.mxu0 %v16212_v10  ;;  %16333 = vmatpush3.bf16.msra.mxu1 %v16332_v26  ;;  %v16263_v10 = vpack.c.bf16 %v10549_v63, %v10548_v23  ;;  %v16383_v26 = vpack.c.bf16 %v10629_v8, %v10628_v15  ;;  %v10582_v23 = vld [vmem:[%s21818_s7 + $0x7c0] sm:$0xff]  ;;  %v10583_v63 = vld [vmem:[%s21818_s7 + $0x7c8] sm:$0xff] }
 0x64d   :  { %16214 = vmatprep.subr.bf16.mxu0 %v16917_v12  ;;  %16334 = vmatprep.subr.bf16.mxu1 %v16917_v12  ;;  %v10662_v15 = vld [vmem:[%s21819_s8 + $0x8c0] sm:$0xff]  ;;  %v10663_v8 = vld [vmem:[%s21819_s8 + $0x8c8] sm:$0xff] }
 0x650   :  { %16216 = vmatpush3.bf16.msra.mxu0 %v16215_v34  ;;  %16336 = vmatpush3.bf16.msra.mxu1 %v16335_v61  ;;  %v16266_v34 = vpack.c.bf16 %v10551_v47, %v10550_v33  ;;  %v16386_v61 = vpack.c.bf16 %v10631_v39, %v10630_v5  ;;  %v10584_v33 = vld [vmem:[%s21818_s7 + $0x7d0] sm:$0xff]  ;;  %v10585_v47 = vld [vmem:[%s21818_s7 + $0x7d8] sm:$0xff] }
 0x651   :  { %16217 = vmatprep.subr.bf16.mxu0 %v16917_v12  ;;  %16337 = vmatprep.subr.bf16.mxu1 %v16917_v12  ;;  %v10664_v5 = vld [vmem:[%s21819_s8 + $0x8d0] sm:$0xff]  ;;  %v10665_v39 = vld [vmem:[%s21819_s8 + $0x8d8] sm:$0xff] }
 0x654   :  { %16219 = vmatpush3.bf16.msra.mxu0 %v16218_v20  ;;  %16339 = vmatpush3.bf16.msra.mxu1 %v16338_v4  ;;  %v16269_v20 = vpack.c.bf16 %v10553_v0, %v10552_v52  ;;  %v16389_v4 = vpack.c.bf16 %v10633_v19, %v10632_v45  ;;  %v10586_v52 = vld [vmem:[%s21818_s7 + $0x7e0] sm:$0xff]  ;;  %v10587_v0 = vld [vmem:[%s21818_s7 + $0x7e8] sm:$0xff] }
 0x655   :  { %16220 = vmatprep.subr.bf16.mxu0 %v16917_v12  ;;  %16340 = vmatprep.subr.bf16.mxu1 %v16917_v12  ;;  %v10666_v45 = vld [vmem:[%s21819_s8 + $0x8e0] sm:$0xff]  ;;  %v10667_v19 = vld [vmem:[%s21819_s8 + $0x8e8] sm:$0xff] }
 0x656   :  { %v6358_v59 = vpop.f32.mrb[54].mxu0  ;;  %v6800_v58 = vpop.f32.mrb[20].mxu1 }
 0x657   :  { %v20517_v16 = vadd.f32 %v6358_v59, %v20391_v44  ;;  %v20520_v62 = vadd.f32 %v6800_v58, %v20394_v22  ;;  %v13565_v7 = vpop.f32.mrb[55].mxu0  ;;  %v13740_v6 = vpop.f32.mrb[21].mxu1  ;;  %v10525_v44 = vld [vmem:[%s21818_s7 + $0x6f8] sm:$0xff]  ;;  %v10604_v22 = vld [vmem:[%s21819_s8 + $0x7f0] sm:$0xff]  ;;  %v16272_v59 = vpack.c.bf16 %v10555_v42, %v10554_v56  ;;  %v16392_v58 = vpack.c.bf16 %v10635_v57, %v10634_v38 }
 0x658   :  { %16222 = vmatpush3.bf16.msra.mxu0 %v16221_v24  ;;  %16342 = vmatpush3.bf16.msra.mxu1 %v16341_v35  ;;  %v16227_v37 = vpack.c.bf16 %v10525_v44, %v10524_v55  ;;  %v16347_v21 = vpack.c.bf16 %v10605_v9, %v10604_v22  ;;  %v10556_v7 = vld [vmem:[%s21818_s7 + $0x770] sm:$0xff]  ;;  %v10637_v6 = vld [vmem:[%s21819_s8 + $0x878] sm:$0xff]  ;;  %v10574_v55 = vld [vmem:[%s21818_s7 + $0x780] sm:$0xff] }
 0x659   :  { %16223 = vmatprep.subr.bf16.mxu0 %v16917_v12  ;;  %16343 = vmatprep.subr.bf16.mxu1 %v16917_v12  ;;  %v10575_v44 = vld [vmem:[%s21818_s7 + $0x788] sm:$0xff]  ;;  %v10654_v22 = vld [vmem:[%s21819_s8 + $0x880] sm:$0xff] }
 0x65a   :  { %v10655_v9 = vld [vmem:[%s21819_s8 + $0x888] sm:$0xff] }
 0x65c   :  { %16225 = vmatpush3.bf16.msra.mxu0 %v16224_v28  ;;  %16345 = vmatpush3.bf16.msra.mxu1 %v16344_v1 }
 0x65d   :  { %16226 = vmatprep.subr.bf16.mxu0 %v16917_v12  ;;  %16346 = vmatprep.subr.bf16.mxu1 %v16917_v12 }
 0x660   :  { %16228 = vmatpush3.bf16.msra.mxu0 %v16227_v37  ;;  %16348 = vmatpush3.bf16.msra.mxu1 %v16347_v21  ;;  %v16302_v37 = vpack.c.bf16 %v10575_v44, %v10574_v55  ;;  %v16422_v21 = vpack.c.bf16 %v10655_v9, %v10654_v22  ;;  %v10608_v55 = vld [vmem:[%s21818_s7 + $0x810] sm:$0xff]  ;;  %v10609_v44 = vld [vmem:[%s21818_s7 + $0x818] sm:$0xff] }
 0x661   :  { %16253 = vmatprep.subr.bf16.mxu0 %v16917_v12  ;;  %16373 = vmatprep.subr.bf16.mxu1 %v16917_v12  ;;  %v10688_v22 = vld [vmem:[%s21819_s8 + $0x910] sm:$0xff]  ;;  %v10689_v9 = vld [vmem:[%s21819_s8 + $0x918] sm:$0xff] }
 0x663   :  { %14054 = vmatmul.mubr.f32.vlgmr.msra.gmra.mrb[68].mxu0 %v20312_v51  ;;  %14229 = vmatmul.mubr.f32.vlgmr.msra.gmra.mrb[34].mxu1 %v20564_v11  ;;  %v10626_v51 = vld [vmem:[%s21819_s8 + $0x820] sm:$0xff] }
 0x664   :  { %16255 = vmatpush3.bf16.msra.mxu0 %v16254_v53  ;;  %16375 = vmatpush3.bf16.msra.mxu1 %v16374_v31  ;;  %v16380_v36 = vpack.c.bf16 %v10627_v54, %v10626_v51  ;;  %v20690_v53 = vld [vmem:[#allocation3 + $0x20] sm:$0x3]  ;;  %v16305_v31 = vpack.c.bf16 %v10577_v29, %v10576_v17  ;;  %v10661_v54 = vld [vmem:[%s21819_s8 + $0x8b8] sm:$0xff]  ;;  %v16473_v17 = vpack.c.bf16 %v10689_v9, %v10688_v22  ;;  %v10610_v29 = vld [vmem:[%s21818_s7 + $0x820] sm:$0xff] }
 0x665   :  { %16256 = vmatprep.subr.bf16.mxu0 %v16917_v12  ;;  %16376 = vmatprep.subr.bf16.mxu1 %v16917_v12  ;;  %v10660_v51 = vld [vmem:[%s21819_s8 + $0x8b0] sm:$0xff]  ;;  %v10643_v22 = vld [vmem:[%s21818_s7 + $0x8a8] sm:$0xff] }
 0x666   :  { %14123 = vmatprep.mubr.msk.f32.mxu0 %vm16918_vm3, %v16919_v60  ;;  %14298 = vmatprep.mubr.msk.f32.mxu1 %vm16918_vm3, %v16919_v60  ;;  %v10723_v9 = vld [vmem:[%s21819_s8 + $0x9a8] sm:$0xff] }
 0x668   :  { %16258 = vmatpush3.bf16.msra.mxu0 %v16257_v46  ;;  %16378 = vmatpush3.bf16.msra.mxu1 %v16377_v18  ;;  %v16308_v46 = vpack.c.bf16 %v10579_v32, %v10578_v2  ;;  %v10612_v2 = vld [vmem:[%s21818_s7 + $0x830] sm:$0xff]  ;;  %v10613_v32 = vld [vmem:[%s21818_s7 + $0x838] sm:$0xff] }
 0x669   :  { %16259 = vmatprep.subr.bf16.mxu0 %v16917_v12  ;;  %16379 = vmatprep.subr.bf16.mxu1 %v16917_v12 }
 0x66c   :  { %16261 = vmatpush3.bf16.msra.mxu0 %v16260_v30  ;;  %16381 = vmatpush3.bf16.msra.mxu1 %v16380_v36  ;;  %v16311_v30 = vpack.c.bf16 %v10581_v27, %v10580_v25  ;;  %v16431_v36 = vpack.c.bf16 %v10661_v54, %v10660_v51  ;;  %v10614_v25 = vld [vmem:[%s21818_s7 + $0x840] sm:$0xff]  ;;  %v10615_v27 = vld [vmem:[%s21818_s7 + $0x848] sm:$0xff] }
 0x66d   :  { %16262 = vmatprep.subr.bf16.mxu0 %v16917_v12  ;;  %16382 = vmatprep.subr.bf16.mxu1 %v16917_v12  ;;  %v10694_v51 = vld [vmem:[%s21819_s8 + $0x940] sm:$0xff]  ;;  %v10695_v54 = vld [vmem:[%s21819_s8 + $0x948] sm:$0xff] }
 0x670   :  { %16264 = vmatpush3.bf16.msra.mxu0 %v16263_v10  ;;  %16384 = vmatpush3.bf16.msra.mxu1 %v16383_v26  ;;  %v16314_v10 = vpack.c.bf16 %v10583_v63, %v10582_v23  ;;  %v16434_v26 = vpack.c.bf16 %v10663_v8, %v10662_v15  ;;  %v10616_v23 = vld [vmem:[%s21818_s7 + $0x850] sm:$0xff]  ;;  %v10617_v63 = vld [vmem:[%s21818_s7 + $0x858] sm:$0xff] }
 0x671   :  { %16265 = vmatprep.subr.bf16.mxu0 %v16917_v12  ;;  %16385 = vmatprep.subr.bf16.mxu1 %v16917_v12  ;;  %v10696_v15 = vld [vmem:[%s21819_s8 + $0x950] sm:$0xff]  ;;  %v10697_v8 = vld [vmem:[%s21819_s8 + $0x958] sm:$0xff] }
 0x674   :  { %16267 = vmatpush3.bf16.msra.mxu0 %v16266_v34  ;;  %16387 = vmatpush3.bf16.msra.mxu1 %v16386_v61  ;;  %v16317_v34 = vpack.c.bf16 %v10585_v47, %v10584_v33  ;;  %v16437_v61 = vpack.c.bf16 %v10665_v39, %v10664_v5  ;;  %v10618_v33 = vld [vmem:[%s21818_s7 + $0x860] sm:$0xff]  ;;  %v10619_v47 = vld [vmem:[%s21818_s7 + $0x868] sm:$0xff] }
 0x675   :  { %16268 = vmatprep.subr.bf16.mxu0 %v16917_v12  ;;  %16388 = vmatprep.subr.bf16.mxu1 %v16917_v12  ;;  %v10698_v5 = vld [vmem:[%s21819_s8 + $0x960] sm:$0xff]  ;;  %v10699_v39 = vld [vmem:[%s21819_s8 + $0x968] sm:$0xff] }
 0x676   :  { %v6535_v24 = vpop.f32.mrb[56].mxu0  ;;  %v6977_v35 = vpop.f32.mrb[22].mxu1 }
 0x677   :  { %v20643_v40 = vadd.f32 %v6535_v24, %v20517_v16  ;;  %v20646_v14 = vadd.f32 %v6977_v35, %v20520_v62  ;;  %v13635_v3 = vpop.f32.mrb[57].mxu0  ;;  %v13810_v50 = vpop.f32.mrb[23].mxu1  ;;  %v10557_v16 = vld [vmem:[%s21818_s7 + $0x778] sm:$0xff]  ;;  %v10636_v62 = vld [vmem:[%s21819_s8 + $0x870] sm:$0xff]  ;;  %v16320_v24 = vpack.c.bf16 %v10587_v0, %v10586_v52  ;;  %v16440_v35 = vpack.c.bf16 %v10667_v19, %v10666_v45 }
 0x678   :  { %16270 = vmatpush3.bf16.msra.mxu0 %v16269_v20  ;;  %16390 = vmatpush3.bf16.msra.mxu1 %v16389_v4  ;;  %v16275_v28 = vpack.c.bf16 %v10557_v16, %v10556_v7  ;;  %v16395_v1 = vpack.c.bf16 %v10637_v6, %v10636_v62  ;;  %v10588_v3 = vld [vmem:[%s21818_s7 + $0x7f0] sm:$0xff]  ;;  %v10669_v50 = vld [vmem:[%s21819_s8 + $0x8f8] sm:$0xff]  ;;  %v10606_v7 = vld [vmem:[%s21818_s7 + $0x800] sm:$0xff] }
 0x679   :  { %16271 = vmatprep.subr.bf16.mxu0 %v16917_v12  ;;  %16391 = vmatprep.subr.bf16.mxu1 %v16917_v12  ;;  %v10607_v16 = vld [vmem:[%s21818_s7 + $0x808] sm:$0xff]  ;;  %v10686_v62 = vld [vmem:[%s21819_s8 + $0x900] sm:$0xff] }
 0x67a   :  { %v10687_v6 = vld [vmem:[%s21819_s8 + $0x908] sm:$0xff] }
 0x67c   :  { %16273 = vmatpush3.bf16.msra.mxu0 %v16272_v59  ;;  %16393 = vmatpush3.bf16.msra.mxu1 %v16392_v58 }
 0x67d   :  { %16274 = vmatprep.subr.bf16.mxu0 %v16917_v12  ;;  %16394 = vmatprep.subr.bf16.mxu1 %v16917_v12 }
 0x680   :  { %16276 = vmatpush3.bf16.msra.mxu0 %v16275_v28  ;;  %16396 = vmatpush3.bf16.msra.mxu1 %v16395_v1  ;;  %v16350_v28 = vpack.c.bf16 %v10607_v16, %v10606_v7  ;;  %v16470_v1 = vpack.c.bf16 %v10687_v6, %v10686_v62  ;;  %v10640_v7 = vld [vmem:[%s21818_s7 + $0x890] sm:$0xff]  ;;  %v10641_v16 = vld [vmem:[%s21818_s7 + $0x898] sm:$0xff] }
 0x681   :  { %16301 = vmatprep.subr.bf16.mxu0 %v16917_v12  ;;  %16421 = vmatprep.subr.bf16.mxu1 %v16917_v12  ;;  %v10720_v62 = vld [vmem:[%s21819_s8 + $0x990] sm:$0xff]  ;;  %v10721_v6 = vld [vmem:[%s21819_s8 + $0x998] sm:$0xff] }
 0x683   :  { %14124 = vmatmul.mubr.f32.vlgmr.msra.gmra.mrb[70].mxu0 %v20438_v13  ;;  %14299 = vmatmul.mubr.f32.vlgmr.msra.gmra.mrb[36].mxu1 %v20690_v53  ;;  %v10658_v13 = vld [vmem:[%s21819_s8 + $0x8a0] sm:$0xff] }
 0x684   :  { %16303 = vmatpush3.bf16.msra.mxu0 %v16302_v37  ;;  %16423 = vmatpush3.bf16.msra.mxu1 %v16422_v21  ;;  %v16428_v18 = vpack.c.bf16 %v10659_v41, %v10658_v13  ;;  %v20816_v37 = vld [vmem:[#allocation3 + $0x22] sm:$0x3]  ;;  %v16353_v21 = vpack.c.bf16 %v10609_v44, %v10608_v55  ;;  %v10693_v41 = vld [vmem:[%s21819_s8 + $0x938] sm:$0xff]  ;;  %v16521_v55 = vpack.c.bf16 %v10721_v6, %v10720_v62  ;;  %v10642_v44 = vld [vmem:[%s21818_s7 + $0x8a0] sm:$0xff] }
 0x685   :  { %16304 = vmatprep.subr.bf16.mxu0 %v16917_v12  ;;  %16424 = vmatprep.subr.bf16.mxu1 %v16917_v12  ;;  %v10692_v13 = vld [vmem:[%s21819_s8 + $0x930] sm:$0xff]  ;;  %v10675_v62 = vld [vmem:[%s21818_s7 + $0x928] sm:$0xff] }
 0x686   :  { %14193 = vmatprep.mubr.msk.f32.mxu0 %vm16918_vm3, %v16919_v60  ;;  %14368 = vmatprep.mubr.msk.f32.mxu1 %vm16918_vm3, %v16919_v60  ;;  %v10755_v6 = vld [vmem:[%s21819_s8 + $0xa28] sm:$0xff] }
 0x688   :  { %16306 = vmatpush3.bf16.msra.mxu0 %v16305_v31  ;;  %16426 = vmatpush3.bf16.msra.mxu1 %v16425_v43  ;;  %v16356_v31 = vpack.c.bf16 %v10611_v48, %v10610_v29  ;;  %v10644_v29 = vld [vmem:[%s21818_s7 + $0x8b0] sm:$0xff]  ;;  %v10645_v48 = vld [vmem:[%s21818_s7 + $0x8b8] sm:$0xff] }
 0x689   :  { %16307 = vmatprep.subr.bf16.mxu0 %v16917_v12  ;;  %16427 = vmatprep.subr.bf16.mxu1 %v16917_v12 }
 0x68c   :  { %16309 = vmatpush3.bf16.msra.mxu0 %v16308_v46  ;;  %16429 = vmatpush3.bf16.msra.mxu1 %v16428_v18  ;;  %v16359_v46 = vpack.c.bf16 %v10613_v32, %v10612_v2  ;;  %v16479_v18 = vpack.c.bf16 %v10693_v41, %v10692_v13  ;;  %v10646_v2 = vld [vmem:[%s21818_s7 + $0x8c0] sm:$0xff]  ;;  %v10647_v32 = vld [vmem:[%s21818_s7 + $0x8c8] sm:$0xff] }
 0x68d   :  { %16310 = vmatprep.subr.bf16.mxu0 %v16917_v12  ;;  %16430 = vmatprep.subr.bf16.mxu1 %v16917_v12  ;;  %v10726_v13 = vld [vmem:[%s21819_s8 + $0x9c0] sm:$0xff]  ;;  %v10727_v41 = vld [vmem:[%s21819_s8 + $0x9c8] sm:$0xff] }
 0x690   :  { %16312 = vmatpush3.bf16.msra.mxu0 %v16311_v30  ;;  %16432 = vmatpush3.bf16.msra.mxu1 %v16431_v36  ;;  %v16362_v30 = vpack.c.bf16 %v10615_v27, %v10614_v25  ;;  %v16482_v36 = vpack.c.bf16 %v10695_v54, %v10694_v51  ;;  %v10648_v25 = vld [vmem:[%s21818_s7 + $0x8d0] sm:$0xff]  ;;  %v10649_v27 = vld [vmem:[%s21818_s7 + $0x8d8] sm:$0xff] }
 0x691   :  { %16313 = vmatprep.subr.bf16.mxu0 %v16917_v12  ;;  %16433 = vmatprep.subr.bf16.mxu1 %v16917_v12  ;;  %v10728_v51 = vld [vmem:[%s21819_s8 + $0x9d0] sm:$0xff]  ;;  %v10729_v54 = vld [vmem:[%s21819_s8 + $0x9d8] sm:$0xff] }
 0x694   :  { %16315 = vmatpush3.bf16.msra.mxu0 %v16314_v10  ;;  %16435 = vmatpush3.bf16.msra.mxu1 %v16434_v26  ;;  %v16365_v10 = vpack.c.bf16 %v10617_v63, %v10616_v23  ;;  %v16485_v26 = vpack.c.bf16 %v10697_v8, %v10696_v15  ;;  %v10650_v23 = vld [vmem:[%s21818_s7 + $0x8e0] sm:$0xff]  ;;  %v10651_v63 = vld [vmem:[%s21818_s7 + $0x8e8] sm:$0xff] }
 0x695   :  { %16316 = vmatprep.subr.bf16.mxu0 %v16917_v12  ;;  %16436 = vmatprep.subr.bf16.mxu1 %v16917_v12  ;;  %v10730_v15 = vld [vmem:[%s21819_s8 + $0x9e0] sm:$0xff]  ;;  %v10731_v8 = vld [vmem:[%s21819_s8 + $0x9e8] sm:$0xff] }
 0x696   :  { %v6712_v20 = vpop.f32.mrb[58].mxu0  ;;  %v7154_v4 = vpop.f32.mrb[24].mxu1 }
 0x697   :  { %v20769_v56 = vadd.f32 %v6712_v20, %v20643_v40  ;;  %v20772_v42 = vadd.f32 %v7154_v4, %v20646_v14  ;;  %v13705_v38 = vpop.f32.mrb[59].mxu0  ;;  %v13880_v57 = vpop.f32.mrb[25].mxu1  ;;  %v10589_v40 = vld [vmem:[%s21818_s7 + $0x7f8] sm:$0xff]  ;;  %v10668_v14 = vld [vmem:[%s21819_s8 + $0x8f0] sm:$0xff]  ;;  %v16368_v20 = vpack.c.bf16 %v10619_v47, %v10618_v33  ;;  %v16488_v4 = vpack.c.bf16 %v10699_v39, %v10698_v5 }
 0x698   :  { %16318 = vmatpush3.bf16.msra.mxu0 %v16317_v34  ;;  %16438 = vmatpush3.bf16.msra.mxu1 %v16437_v61  ;;  %v16323_v59 = vpack.c.bf16 %v10589_v40, %v10588_v3  ;;  %v16443_v58 = vpack.c.bf16 %v10669_v50, %v10668_v14  ;;  %v10620_v38 = vld [vmem:[%s21818_s7 + $0x870] sm:$0xff]  ;;  %v10701_v57 = vld [vmem:[%s21819_s8 + $0x978] sm:$0xff]  ;;  %v10638_v3 = vld [vmem:[%s21818_s7 + $0x880] sm:$0xff] }
 0x699   :  { %16319 = vmatprep.subr.bf16.mxu0 %v16917_v12  ;;  %16439 = vmatprep.subr.bf16.mxu1 %v16917_v12  ;;  %v10639_v40 = vld [vmem:[%s21818_s7 + $0x888] sm:$0xff]  ;;  %v10718_v14 = vld [vmem:[%s21819_s8 + $0x980] sm:$0xff] }
 0x69a   :  { %v10719_v50 = vld [vmem:[%s21819_s8 + $0x988] sm:$0xff] }
 0x69c   :  { %16321 = vmatpush3.bf16.msra.mxu0 %v16320_v24  ;;  %16441 = vmatpush3.bf16.msra.mxu1 %v16440_v35 }
 0x69d   :  { %16322 = vmatprep.subr.bf16.mxu0 %v16917_v12  ;;  %16442 = vmatprep.subr.bf16.mxu1 %v16917_v12 }
 0x6a0   :  { %16324 = vmatpush3.bf16.msra.mxu0 %v16323_v59  ;;  %16444 = vmatpush3.bf16.msra.mxu1 %v16443_v58  ;;  %v16398_v59 = vpack.c.bf16 %v10639_v40, %v10638_v3  ;;  %v16518_v58 = vpack.c.bf16 %v10719_v50, %v10718_v14  ;;  %v10672_v3 = vld [vmem:[%s21818_s7 + $0x910] sm:$0xff]  ;;  %v10673_v40 = vld [vmem:[%s21818_s7 + $0x918] sm:$0xff] }
 0x6a1   :  { %16349 = vmatprep.subr.bf16.mxu0 %v16917_v12  ;;  %16469 = vmatprep.subr.bf16.mxu1 %v16917_v12  ;;  %v10752_v14 = vld [vmem:[%s21819_s8 + $0xa10] sm:$0xff]  ;;  %v10753_v50 = vld [vmem:[%s21819_s8 + $0xa18] sm:$0xff] }
 0x6a3   :  { %14194 = vmatmul.mubr.f32.vlgmr.msra.gmra.mrb[72].mxu0 %v20564_v11  ;;  %14369 = vmatmul.mubr.f32.vlgmr.msra.gmra.mrb[38].mxu1 %v20816_v37  ;;  %v10690_v11 = vld [vmem:[%s21819_s8 + $0x920] sm:$0xff] }
 0x6a4   :  { %16351 = vmatpush3.bf16.msra.mxu0 %v16350_v28  ;;  %16471 = vmatpush3.bf16.msra.mxu1 %v16470_v1  ;;  %v16476_v43 = vpack.c.bf16 %v10691_v49, %v10690_v11  ;;  %v20942_v28 = vld [vmem:[#allocation3 + $0x24] sm:$0x3]  ;;  %v16401_v1 = vpack.c.bf16 %v10641_v16, %v10640_v7  ;;  %v10725_v49 = vld [vmem:[%s21819_s8 + $0x9b8] sm:$0xff]  ;;  %v16569_v7 = vpack.c.bf16 %v10753_v50, %v10752_v14  ;;  %v10674_v16 = vld [vmem:[%s21818_s7 + $0x920] sm:$0xff] }
 0x6a5   :  { %16352 = vmatprep.subr.bf16.mxu0 %v16917_v12  ;;  %16472 = vmatprep.subr.bf16.mxu1 %v16917_v12  ;;  %v10724_v11 = vld [vmem:[%s21819_s8 + $0x9b0] sm:$0xff]  ;;  %v10707_v14 = vld [vmem:[%s21818_s7 + $0x9a8] sm:$0xff] }
 0x6a6   :  { %14263 = vmatprep.mubr.msk.f32.mxu0 %vm16918_vm3, %v16919_v60  ;;  %14438 = vmatprep.mubr.msk.f32.mxu1 %vm16918_vm3, %v16919_v60  ;;  %v10787_v50 = vld [vmem:[%s21819_s8 + $0xaa8] sm:$0xff] }
 0x6a8   :  { %16354 = vmatpush3.bf16.msra.mxu0 %v16353_v21  ;;  %16474 = vmatpush3.bf16.msra.mxu1 %v16473_v17  ;;  %v16404_v21 = vpack.c.bf16 %v10643_v22, %v10642_v44  ;;  %v10676_v44 = vld [vmem:[%s21818_s7 + $0x930] sm:$0xff]  ;;  %v10677_v22 = vld [vmem:[%s21818_s7 + $0x938] sm:$0xff] }
 0x6a9   :  { %16355 = vmatprep.subr.bf16.mxu0 %v16917_v12  ;;  %16475 = vmatprep.subr.bf16.mxu1 %v16917_v12 }
 0x6ac   :  { %16357 = vmatpush3.bf16.msra.mxu0 %v16356_v31  ;;  %16477 = vmatpush3.bf16.msra.mxu1 %v16476_v43  ;;  %v16407_v31 = vpack.c.bf16 %v10645_v48, %v10644_v29  ;;  %v16527_v43 = vpack.c.bf16 %v10725_v49, %v10724_v11  ;;  %v10678_v29 = vld [vmem:[%s21818_s7 + $0x940] sm:$0xff]  ;;  %v10679_v48 = vld [vmem:[%s21818_s7 + $0x948] sm:$0xff] }
 0x6ad   :  { %16358 = vmatprep.subr.bf16.mxu0 %v16917_v12  ;;  %16478 = vmatprep.subr.bf16.mxu1 %v16917_v12  ;;  %v10758_v11 = vld [vmem:[%s21819_s8 + $0xa40] sm:$0xff]  ;;  %v10759_v49 = vld [vmem:[%s21819_s8 + $0xa48] sm:$0xff] }
 0x6b0   :  { %16360 = vmatpush3.bf16.msra.mxu0 %v16359_v46  ;;  %16480 = vmatpush3.bf16.msra.mxu1 %v16479_v18  ;;  %v16410_v46 = vpack.c.bf16 %v10647_v32, %v10646_v2  ;;  %v16530_v18 = vpack.c.bf16 %v10727_v41, %v10726_v13  ;;  %v10680_v2 = vld [vmem:[%s21818_s7 + $0x950] sm:$0xff]  ;;  %v10681_v32 = vld [vmem:[%s21818_s7 + $0x958] sm:$0xff] }
 0x6b1   :  { %16361 = vmatprep.subr.bf16.mxu0 %v16917_v12  ;;  %16481 = vmatprep.subr.bf16.mxu1 %v16917_v12  ;;  %v10760_v13 = vld [vmem:[%s21819_s8 + $0xa50] sm:$0xff]  ;;  %v10761_v41 = vld [vmem:[%s21819_s8 + $0xa58] sm:$0xff] }
 0x6b4   :  { %16363 = vmatpush3.bf16.msra.mxu0 %v16362_v30  ;;  %16483 = vmatpush3.bf16.msra.mxu1 %v16482_v36  ;;  %v16413_v30 = vpack.c.bf16 %v10649_v27, %v10648_v25  ;;  %v16533_v36 = vpack.c.bf16 %v10729_v54, %v10728_v51  ;;  %v10682_v25 = vld [vmem:[%s21818_s7 + $0x960] sm:$0xff]  ;;  %v10683_v27 = vld [vmem:[%s21818_s7 + $0x968] sm:$0xff] }
 0x6b5   :  { %16364 = vmatprep.subr.bf16.mxu0 %v16917_v12  ;;  %16484 = vmatprep.subr.bf16.mxu1 %v16917_v12  ;;  %v10762_v51 = vld [vmem:[%s21819_s8 + $0xa60] sm:$0xff]  ;;  %v10763_v54 = vld [vmem:[%s21819_s8 + $0xa68] sm:$0xff] }
 0x6b6   :  { %v6889_v34 = vpop.f32.mrb[60].mxu0  ;;  %v7331_v61 = vpop.f32.mrb[26].mxu1 }
 0x6b7   :  { %v20895_v52 = vadd.f32 %v6889_v34, %v20769_v56  ;;  %v20898_v0 = vadd.f32 %v7331_v61, %v20772_v42  ;;  %v13775_v45 = vpop.f32.mrb[61].mxu0  ;;  %v13950_v19 = vpop.f32.mrb[27].mxu1  ;;  %v10621_v56 = vld [vmem:[%s21818_s7 + $0x878] sm:$0xff]  ;;  %v10700_v42 = vld [vmem:[%s21819_s8 + $0x970] sm:$0xff]  ;;  %v16416_v34 = vpack.c.bf16 %v10651_v63, %v10650_v23  ;;  %v16536_v61 = vpack.c.bf16 %v10731_v8, %v10730_v15 }
 0x6b8   :  { %16366 = vmatpush3.bf16.msra.mxu0 %v16365_v10  ;;  %16486 = vmatpush3.bf16.msra.mxu1 %v16485_v26  ;;  %v16371_v24 = vpack.c.bf16 %v10621_v56, %v10620_v38  ;;  %v16491_v35 = vpack.c.bf16 %v10701_v57, %v10700_v42  ;;  %v10652_v45 = vld [vmem:[%s21818_s7 + $0x8f0] sm:$0xff]  ;;  %v10733_v19 = vld [vmem:[%s21819_s8 + $0x9f8] sm:$0xff]  ;;  %v10670_v38 = vld [vmem:[%s21818_s7 + $0x900] sm:$0xff] }
 0x6b9   :  { %16367 = vmatprep.subr.bf16.mxu0 %v16917_v12  ;;  %16487 = vmatprep.subr.bf16.mxu1 %v16917_v12  ;;  %v10671_v56 = vld [vmem:[%s21818_s7 + $0x908] sm:$0xff]  ;;  %v10750_v42 = vld [vmem:[%s21819_s8 + $0xa00] sm:$0xff] }
 0x6ba   :  { %v10751_v57 = vld [vmem:[%s21819_s8 + $0xa08] sm:$0xff] }
 0x6bc   :  { %16369 = vmatpush3.bf16.msra.mxu0 %v16368_v20  ;;  %16489 = vmatpush3.bf16.msra.mxu1 %v16488_v4 }
 0x6bd   :  { %16370 = vmatprep.subr.bf16.mxu0 %v16917_v12  ;;  %16490 = vmatprep.subr.bf16.mxu1 %v16917_v12 }
 0x6c0   :  { %16372 = vmatpush3.bf16.msra.mxu0 %v16371_v24  ;;  %16492 = vmatpush3.bf16.msra.mxu1 %v16491_v35  ;;  %v16446_v24 = vpack.c.bf16 %v10671_v56, %v10670_v38  ;;  %v16566_v35 = vpack.c.bf16 %v10751_v57, %v10750_v42  ;;  %v10704_v38 = vld [vmem:[%s21818_s7 + $0x990] sm:$0xff]  ;;  %v10705_v56 = vld [vmem:[%s21818_s7 + $0x998] sm:$0xff] }
 0x6c1   :  { %16397 = vmatprep.subr.bf16.mxu0 %v16917_v12  ;;  %16517 = vmatprep.subr.bf16.mxu1 %v16917_v12  ;;  %v10784_v42 = vld [vmem:[%s21819_s8 + $0xa90] sm:$0xff]  ;;  %v10785_v57 = vld [vmem:[%s21819_s8 + $0xa98] sm:$0xff] }
 0x6c3   :  { %14264 = vmatmul.mubr.f32.vlgmr.msra.gmra.mrb[74].mxu0 %v20690_v53  ;;  %14439 = vmatmul.mubr.f32.vlgmr.msra.gmra.mrb[40].mxu1 %v20942_v28  ;;  %v10722_v53 = vld [vmem:[%s21819_s8 + $0x9a0] sm:$0xff] }
 0x6c4   :  { %16399 = vmatpush3.bf16.msra.mxu0 %v16398_v59  ;;  %16519 = vmatpush3.bf16.msra.mxu1 %v16518_v58  ;;  %v16524_v17 = vpack.c.bf16 %v10723_v9, %v10722_v53  ;;  %v21068_v59 = vld [vmem:[#allocation3 + $0x26] sm:$0x3]  ;;  %v16449_v58 = vpack.c.bf16 %v10673_v40, %v10672_v3  ;;  %v10757_v9 = vld [vmem:[%s21819_s8 + $0xa38] sm:$0xff]  ;;  %v16617_v3 = vpack.c.bf16 %v10785_v57, %v10784_v42  ;;  %v10706_v40 = vld [vmem:[%s21818_s7 + $0x9a0] sm:$0xff] }
 0x6c5   :  { %16400 = vmatprep.subr.bf16.mxu0 %v16917_v12  ;;  %16520 = vmatprep.subr.bf16.mxu1 %v16917_v12  ;;  %v10756_v53 = vld [vmem:[%s21819_s8 + $0xa30] sm:$0xff]  ;;  %v10739_v42 = vld [vmem:[%s21818_s7 + $0xa28] sm:$0xff] }
 0x6c6   :  { %14333 = vmatprep.mubr.msk.f32.mxu0 %vm16918_vm3, %v16919_v60  ;;  %14508 = vmatprep.mubr.msk.f32.mxu1 %vm16918_vm3, %v16919_v60  ;;  %v10819_v57 = vld [vmem:[%s21819_s8 + $0xb28] sm:$0xff] }
 0x6c8   :  { %16402 = vmatpush3.bf16.msra.mxu0 %v16401_v1  ;;  %16522 = vmatpush3.bf16.msra.mxu1 %v16521_v55  ;;  %v16452_v1 = vpack.c.bf16 %v10675_v62, %v10674_v16  ;;  %v10708_v16 = vld [vmem:[%s21818_s7 + $0x9b0] sm:$0xff]  ;;  %v10709_v62 = vld [vmem:[%s21818_s7 + $0x9b8] sm:$0xff] }
 0x6c9   :  { %16403 = vmatprep.subr.bf16.mxu0 %v16917_v12  ;;  %16523 = vmatprep.subr.bf16.mxu1 %v16917_v12 }
 0x6cc   :  { %16405 = vmatpush3.bf16.msra.mxu0 %v16404_v21  ;;  %16525 = vmatpush3.bf16.msra.mxu1 %v16524_v17  ;;  %v16455_v21 = vpack.c.bf16 %v10677_v22, %v10676_v44  ;;  %v16575_v17 = vpack.c.bf16 %v10757_v9, %v10756_v53  ;;  %v10710_v44 = vld [vmem:[%s21818_s7 + $0x9c0] sm:$0xff]  ;;  %v10711_v22 = vld [vmem:[%s21818_s7 + $0x9c8] sm:$0xff] }
 0x6cd   :  { %16406 = vmatprep.subr.bf16.mxu0 %v16917_v12  ;;  %16526 = vmatprep.subr.bf16.mxu1 %v16917_v12  ;;  %v10790_v53 = vld [vmem:[%s21819_s8 + $0xac0] sm:$0xff]  ;;  %v10791_v9 = vld [vmem:[%s21819_s8 + $0xac8] sm:$0xff] }
 0x6d0   :  { %16408 = vmatpush3.bf16.msra.mxu0 %v16407_v31  ;;  %16528 = vmatpush3.bf16.msra.mxu1 %v16527_v43  ;;  %v16458_v31 = vpack.c.bf16 %v10679_v48, %v10678_v29  ;;  %v16578_v43 = vpack.c.bf16 %v10759_v49, %v10758_v11  ;;  %v10712_v29 = vld [vmem:[%s21818_s7 + $0x9d0] sm:$0xff]  ;;  %v10713_v48 = vld [vmem:[%s21818_s7 + $0x9d8] sm:$0xff] }
 0x6d1   :  { %16409 = vmatprep.subr.bf16.mxu0 %v16917_v12  ;;  %16529 = vmatprep.subr.bf16.mxu1 %v16917_v12  ;;  %v10792_v11 = vld [vmem:[%s21819_s8 + $0xad0] sm:$0xff]  ;;  %v10793_v49 = vld [vmem:[%s21819_s8 + $0xad8] sm:$0xff] }
 0x6d4   :  { %16411 = vmatpush3.bf16.msra.mxu0 %v16410_v46  ;;  %16531 = vmatpush3.bf16.msra.mxu1 %v16530_v18  ;;  %v16461_v46 = vpack.c.bf16 %v10681_v32, %v10680_v2  ;;  %v16581_v18 = vpack.c.bf16 %v10761_v41, %v10760_v13  ;;  %v10714_v2 = vld [vmem:[%s21818_s7 + $0x9e0] sm:$0xff]  ;;  %v10715_v32 = vld [vmem:[%s21818_s7 + $0x9e8] sm:$0xff] }
 0x6d5   :  { %16412 = vmatprep.subr.bf16.mxu0 %v16917_v12  ;;  %16532 = vmatprep.subr.bf16.mxu1 %v16917_v12  ;;  %v10794_v13 = vld [vmem:[%s21819_s8 + $0xae0] sm:$0xff]  ;;  %v10795_v41 = vld [vmem:[%s21819_s8 + $0xae8] sm:$0xff] }
 0x6d6   :  { %v7066_v10 = vpop.f32.mrb[62].mxu0  ;;  %v7508_v26 = vpop.f32.mrb[28].mxu1 }
 0x6d7   :  { %v21021_v33 = vadd.f32 %v7066_v10, %v20895_v52  ;;  %v21024_v47 = vadd.f32 %v7508_v26, %v20898_v0  ;;  %v13845_v5 = vpop.f32.mrb[63].mxu0  ;;  %v14020_v39 = vpop.f32.mrb[29].mxu1  ;;  %v10653_v52 = vld [vmem:[%s21818_s7 + $0x8f8] sm:$0xff]  ;;  %v10732_v0 = vld [vmem:[%s21819_s8 + $0x9f0] sm:$0xff]  ;;  %v16464_v10 = vpack.c.bf16 %v10683_v27, %v10682_v25  ;;  %v16584_v26 = vpack.c.bf16 %v10763_v54, %v10762_v51 }
 0x6d8   :  { %16414 = vmatpush3.bf16.msra.mxu0 %v16413_v30  ;;  %16534 = vmatpush3.bf16.msra.mxu1 %v16533_v36  ;;  %v16419_v20 = vpack.c.bf16 %v10653_v52, %v10652_v45  ;;  %v16539_v4 = vpack.c.bf16 %v10733_v19, %v10732_v0  ;;  %v10684_v5 = vld [vmem:[%s21818_s7 + $0x970] sm:$0xff]  ;;  %v10765_v39 = vld [vmem:[%s21819_s8 + $0xa78] sm:$0xff]  ;;  %v10702_v45 = vld [vmem:[%s21818_s7 + $0x980] sm:$0xff] }
 0x6d9   :  { %16415 = vmatprep.subr.bf16.mxu0 %v16917_v12  ;;  %16535 = vmatprep.subr.bf16.mxu1 %v16917_v12  ;;  %v10703_v52 = vld [vmem:[%s21818_s7 + $0x988] sm:$0xff]  ;;  %v10782_v0 = vld [vmem:[%s21819_s8 + $0xa80] sm:$0xff] }
 0x6da   :  { %v10783_v19 = vld [vmem:[%s21819_s8 + $0xa88] sm:$0xff] }
 0x6dc   :  { %16417 = vmatpush3.bf16.msra.mxu0 %v16416_v34  ;;  %16537 = vmatpush3.bf16.msra.mxu1 %v16536_v61 }
 0x6dd   :  { %16418 = vmatprep.subr.bf16.mxu0 %v16917_v12  ;;  %16538 = vmatprep.subr.bf16.mxu1 %v16917_v12 }
 0x6e0   :  { %16420 = vmatpush3.bf16.msra.mxu0 %v16419_v20  ;;  %16540 = vmatpush3.bf16.msra.mxu1 %v16539_v4  ;;  %v16494_v20 = vpack.c.bf16 %v10703_v52, %v10702_v45  ;;  %v16614_v4 = vpack.c.bf16 %v10783_v19, %v10782_v0  ;;  %v10736_v45 = vld [vmem:[%s21818_s7 + $0xa10] sm:$0xff]  ;;  %v10737_v52 = vld [vmem:[%s21818_s7 + $0xa18] sm:$0xff] }
 0x6e1   :  { %16445 = vmatprep.subr.bf16.mxu0 %v16917_v12  ;;  %16565 = vmatprep.subr.bf16.mxu1 %v16917_v12  ;;  %v10816_v0 = vld [vmem:[%s21819_s8 + $0xb10] sm:$0xff]  ;;  %v10817_v19 = vld [vmem:[%s21819_s8 + $0xb18] sm:$0xff] }
 0x6e3   :  { %14334 = vmatmul.mubr.f32.vlgmr.msra.gmra.mrb[76].mxu0 %v20816_v37  ;;  %14509 = vmatmul.mubr.f32.vlgmr.msra.gmra.mrb[42].mxu1 %v21068_v59  ;;  %v10754_v37 = vld [vmem:[%s21819_s8 + $0xa20] sm:$0xff] }
 0x6e4   :  { %16447 = vmatpush3.bf16.msra.mxu0 %v16446_v24  ;;  %16567 = vmatpush3.bf16.msra.mxu1 %v16566_v35  ;;  %v16572_v55 = vpack.c.bf16 %v10755_v6, %v10754_v37  ;;  %v21194_v24 = vld [vmem:[#allocation3 + $0x28] sm:$0x3]  ;;  %v16497_v35 = vpack.c.bf16 %v10705_v56, %v10704_v38  ;;  %v10788_v37 = vld [vmem:[%s21819_s8 + $0xab0] sm:$0xff]  ;;  %v16665_v38 = vpack.c.bf16 %v10817_v19, %v10816_v0  ;;  %v10738_v56 = vld [vmem:[%s21818_s7 + $0xa20] sm:$0xff] }
 0x6e5   :  { %16448 = vmatprep.subr.bf16.mxu0 %v16917_v12  ;;  %16568 = vmatprep.subr.bf16.mxu1 %v16917_v12  ;;  %v10789_v6 = vld [vmem:[%s21819_s8 + $0xab8] sm:$0xff]  ;;  %v10771_v0 = vld [vmem:[%s21818_s7 + $0xaa8] sm:$0xff] }
 0x6e6   :  { %14403 = vmatprep.mubr.msk.f32.mxu0 %vm16918_vm3, %v16919_v60  ;;  %14578 = vmatprep.mubr.msk.f32.mxu1 %vm16918_vm3, %v16919_v60  ;;  %v10851_v19 = vld [vmem:[%s21819_s8 + $0xba8] sm:$0xff] }
 0x6e8   :  { %16450 = vmatpush3.bf16.msra.mxu0 %v16449_v58  ;;  %16570 = vmatpush3.bf16.msra.mxu1 %v16569_v7  ;;  %v16500_v58 = vpack.c.bf16 %v10707_v14, %v10706_v40  ;;  %v10740_v40 = vld [vmem:[%s21818_s7 + $0xa30] sm:$0xff]  ;;  %v10741_v14 = vld [vmem:[%s21818_s7 + $0xa38] sm:$0xff] }
 0x6e9   :  { %16451 = vmatprep.subr.bf16.mxu0 %v16917_v12  ;;  %16571 = vmatprep.subr.bf16.mxu1 %v16917_v12 }
 0x6ec   :  { %16453 = vmatpush3.bf16.msra.mxu0 %v16452_v1  ;;  %16573 = vmatpush3.bf16.msra.mxu1 %v16572_v55  ;;  %v16503_v1 = vpack.c.bf16 %v10709_v62, %v10708_v16  ;;  %v16623_v55 = vpack.c.bf16 %v10789_v6, %v10788_v37  ;;  %v10742_v16 = vld [vmem:[%s21818_s7 + $0xa40] sm:$0xff]  ;;  %v10743_v62 = vld [vmem:[%s21818_s7 + $0xa48] sm:$0xff] }
 0x6ed   :  { %16454 = vmatprep.subr.bf16.mxu0 %v16917_v12  ;;  %16574 = vmatprep.subr.bf16.mxu1 %v16917_v12  ;;  %v10822_v37 = vld [vmem:[%s21819_s8 + $0xb40] sm:$0xff]  ;;  %v10823_v6 = vld [vmem:[%s21819_s8 + $0xb48] sm:$0xff] }
 0x6f0   :  { %16456 = vmatpush3.bf16.msra.mxu0 %v16455_v21  ;;  %16576 = vmatpush3.bf16.msra.mxu1 %v16575_v17  ;;  %v16506_v21 = vpack.c.bf16 %v10711_v22, %v10710_v44  ;;  %v16626_v17 = vpack.c.bf16 %v10791_v9, %v10790_v53  ;;  %v10744_v44 = vld [vmem:[%s21818_s7 + $0xa50] sm:$0xff]  ;;  %v10745_v22 = vld [vmem:[%s21818_s7 + $0xa58] sm:$0xff] }
 0x6f1   :  { %16457 = vmatprep.subr.bf16.mxu0 %v16917_v12  ;;  %16577 = vmatprep.subr.bf16.mxu1 %v16917_v12  ;;  %v10824_v53 = vld [vmem:[%s21819_s8 + $0xb50] sm:$0xff]  ;;  %v10825_v9 = vld [vmem:[%s21819_s8 + $0xb58] sm:$0xff] }
 0x6f4   :  { %16459 = vmatpush3.bf16.msra.mxu0 %v16458_v31  ;;  %16579 = vmatpush3.bf16.msra.mxu1 %v16578_v43  ;;  %v16509_v31 = vpack.c.bf16 %v10713_v48, %v10712_v29  ;;  %v16629_v43 = vpack.c.bf16 %v10793_v49, %v10792_v11  ;;  %v10746_v29 = vld [vmem:[%s21818_s7 + $0xa60] sm:$0xff]  ;;  %v10747_v48 = vld [vmem:[%s21818_s7 + $0xa68] sm:$0xff] }
 0x6f5   :  { %16460 = vmatprep.subr.bf16.mxu0 %v16917_v12  ;;  %16580 = vmatprep.subr.bf16.mxu1 %v16917_v12  ;;  %v10826_v11 = vld [vmem:[%s21819_s8 + $0xb60] sm:$0xff]  ;;  %v10827_v49 = vld [vmem:[%s21819_s8 + $0xb68] sm:$0xff] }
 0x6f6   :  { %v7243_v30 = vpop.f32.mrb[64].mxu0  ;;  %v7685_v36 = vpop.f32.mrb[30].mxu1 }
 0x6f7   :  { %v21147_v23 = vadd.f32 %v7243_v30, %v21021_v33  ;;  %v21150_v63 = vadd.f32 %v7685_v36, %v21024_v47  ;;  %v13915_v15 = vpop.f32.mrb[65].mxu0  ;;  %v14090_v8 = vpop.f32.mrb[31].mxu1  ;;  %v10685_v33 = vld [vmem:[%s21818_s7 + $0x978] sm:$0xff]  ;;  %v10764_v47 = vld [vmem:[%s21819_s8 + $0xa70] sm:$0xff]  ;;  %v16512_v30 = vpack.c.bf16 %v10715_v32, %v10714_v2  ;;  %v16632_v36 = vpack.c.bf16 %v10795_v41, %v10794_v13 }
 0x6f8   :  { %16462 = vmatpush3.bf16.msra.mxu0 %v16461_v46  ;;  %16582 = vmatpush3.bf16.msra.mxu1 %v16581_v18  ;;  %v16467_v34 = vpack.c.bf16 %v10685_v33, %v10684_v5  ;;  %v16587_v61 = vpack.c.bf16 %v10765_v39, %v10764_v47  ;;  %v10716_v15 = vld [vmem:[%s21818_s7 + $0x9f0] sm:$0xff]  ;;  %v10797_v8 = vld [vmem:[%s21819_s8 + $0xaf8] sm:$0xff]  ;;  %v10734_v5 = vld [vmem:[%s21818_s7 + $0xa00] sm:$0xff] }
 0x6f9   :  { %16463 = vmatprep.subr.bf16.mxu0 %v16917_v12  ;;  %16583 = vmatprep.subr.bf16.mxu1 %v16917_v12  ;;  %v10735_v33 = vld [vmem:[%s21818_s7 + $0xa08] sm:$0xff]  ;;  %v10814_v47 = vld [vmem:[%s21819_s8 + $0xb00] sm:$0xff] }
 0x6fa   :  { %v10815_v39 = vld [vmem:[%s21819_s8 + $0xb08] sm:$0xff] }
 0x6fc   :  { %16465 = vmatpush3.bf16.msra.mxu0 %v16464_v10  ;;  %16585 = vmatpush3.bf16.msra.mxu1 %v16584_v26 }
 0x6fd   :  { %16466 = vmatprep.subr.bf16.mxu0 %v16917_v12  ;;  %16586 = vmatprep.subr.bf16.mxu1 %v16917_v12 }
 0x700   :  { %16468 = vmatpush3.bf16.msra.mxu0 %v16467_v34  ;;  %16588 = vmatpush3.bf16.msra.mxu1 %v16587_v61  ;;  %v16542_v34 = vpack.c.bf16 %v10735_v33, %v10734_v5  ;;  %v16662_v61 = vpack.c.bf16 %v10815_v39, %v10814_v47  ;;  %v10768_v5 = vld [vmem:[%s21818_s7 + $0xa90] sm:$0xff]  ;;  %v10769_v33 = vld [vmem:[%s21818_s7 + $0xa98] sm:$0xff] }
 0x701   :  { %16493 = vmatprep.subr.bf16.mxu0 %v16917_v12  ;;  %16613 = vmatprep.subr.bf16.mxu1 %v16917_v12  ;;  %v10848_v47 = vld [vmem:[%s21819_s8 + $0xb90] sm:$0xff]  ;;  %v10849_v39 = vld [vmem:[%s21819_s8 + $0xb98] sm:$0xff] }
 0x703   :  { %14404 = vmatmul.mubr.f32.vlgmr.msra.gmra.mrb[78].mxu0 %v20942_v28  ;;  %14579 = vmatmul.mubr.f32.vlgmr.msra.gmra.mrb[44].mxu1 %v21194_v24  ;;  %v10786_v28 = vld [vmem:[%s21819_s8 + $0xaa0] sm:$0xff] }
 0x704   :  { %16495 = vmatpush3.bf16.msra.mxu0 %v16494_v20  ;;  %16615 = vmatpush3.bf16.msra.mxu1 %v16614_v4  ;;  %v16620_v7 = vpack.c.bf16 %v10787_v50, %v10786_v28  ;;  %v21320_v20 = vld [vmem:[#allocation3 + $0x2a] sm:$0x3]  ;;  %v16545_v4 = vpack.c.bf16 %v10737_v52, %v10736_v45  ;;  %v10820_v28 = vld [vmem:[%s21819_s8 + $0xb30] sm:$0xff]  ;;  %v16713_v45 = vpack.c.bf16 %v10849_v39, %v10848_v47  ;;  %v10770_v52 = vld [vmem:[%s21818_s7 + $0xaa0] sm:$0xff] }
 0x705   :  { %16496 = vmatprep.subr.bf16.mxu0 %v16917_v12  ;;  %16616 = vmatprep.subr.bf16.mxu1 %v16917_v12  ;;  %v10821_v50 = vld [vmem:[%s21819_s8 + $0xb38] sm:$0xff]  ;;  %v10803_v47 = vld [vmem:[%s21818_s7 + $0xb28] sm:$0xff] }
 0x706   :  { %14473 = vmatprep.mubr.msk.f32.mxu0 %vm16918_vm3, %v16919_v60  ;;  %14648 = vmatprep.mubr.msk.f32.mxu1 %vm16918_vm3, %v16919_v60  ;;  %v10883_v39 = vld [vmem:[%s21819_s8 + $0xc28] sm:$0xff] }
 0x708   :  { %16498 = vmatpush3.bf16.msra.mxu0 %v16497_v35  ;;  %16618 = vmatpush3.bf16.msra.mxu1 %v16617_v3  ;;  %v16548_v35 = vpack.c.bf16 %v10739_v42, %v10738_v56  ;;  %v10772_v56 = vld [vmem:[%s21818_s7 + $0xab0] sm:$0xff]  ;;  %v10773_v42 = vld [vmem:[%s21818_s7 + $0xab8] sm:$0xff] }
 0x709   :  { %16499 = vmatprep.subr.bf16.mxu0 %v16917_v12  ;;  %16619 = vmatprep.subr.bf16.mxu1 %v16917_v12 }
 0x70c   :  { %16501 = vmatpush3.bf16.msra.mxu0 %v16500_v58  ;;  %16621 = vmatpush3.bf16.msra.mxu1 %v16620_v7  ;;  %v16551_v58 = vpack.c.bf16 %v10741_v14, %v10740_v40  ;;  %v16671_v7 = vpack.c.bf16 %v10821_v50, %v10820_v28  ;;  %v10774_v40 = vld [vmem:[%s21818_s7 + $0xac0] sm:$0xff]  ;;  %v10775_v14 = vld [vmem:[%s21818_s7 + $0xac8] sm:$0xff] }
 0x70d   :  { %16502 = vmatprep.subr.bf16.mxu0 %v16917_v12  ;;  %16622 = vmatprep.subr.bf16.mxu1 %v16917_v12  ;;  %v10854_v28 = vld [vmem:[%s21819_s8 + $0xbc0] sm:$0xff]  ;;  %v10855_v50 = vld [vmem:[%s21819_s8 + $0xbc8] sm:$0xff] }
 0x710   :  { %16504 = vmatpush3.bf16.msra.mxu0 %v16503_v1  ;;  %16624 = vmatpush3.bf16.msra.mxu1 %v16623_v55  ;;  %v16554_v1 = vpack.c.bf16 %v10743_v62, %v10742_v16  ;;  %v16674_v55 = vpack.c.bf16 %v10823_v6, %v10822_v37  ;;  %v10776_v16 = vld [vmem:[%s21818_s7 + $0xad0] sm:$0xff]  ;;  %v10777_v62 = vld [vmem:[%s21818_s7 + $0xad8] sm:$0xff] }
 0x711   :  { %16505 = vmatprep.subr.bf16.mxu0 %v16917_v12  ;;  %16625 = vmatprep.subr.bf16.mxu1 %v16917_v12  ;;  %v10856_v37 = vld [vmem:[%s21819_s8 + $0xbd0] sm:$0xff]  ;;  %v10857_v6 = vld [vmem:[%s21819_s8 + $0xbd8] sm:$0xff] }
 0x714   :  { %16507 = vmatpush3.bf16.msra.mxu0 %v16506_v21  ;;  %16627 = vmatpush3.bf16.msra.mxu1 %v16626_v17  ;;  %v16557_v21 = vpack.c.bf16 %v10745_v22, %v10744_v44  ;;  %v16677_v17 = vpack.c.bf16 %v10825_v9, %v10824_v53  ;;  %v10778_v44 = vld [vmem:[%s21818_s7 + $0xae0] sm:$0xff]  ;;  %v10779_v22 = vld [vmem:[%s21818_s7 + $0xae8] sm:$0xff] }
 0x715   :  { %16508 = vmatprep.subr.bf16.mxu0 %v16917_v12  ;;  %16628 = vmatprep.subr.bf16.mxu1 %v16917_v12  ;;  %v10858_v53 = vld [vmem:[%s21819_s8 + $0xbe0] sm:$0xff]  ;;  %v10859_v9 = vld [vmem:[%s21819_s8 + $0xbe8] sm:$0xff] }
 0x716   :  { %v7420_v46 = vpop.f32.mrb[66].mxu0  ;;  %v7862_v18 = vpop.f32.mrb[32].mxu1 }
 0x717   :  { %v21273_v25 = vadd.f32 %v7420_v46, %v21147_v23  ;;  %v21276_v27 = vadd.f32 %v7862_v18, %v21150_v63  ;;  %v13985_v51 = vpop.f32.mrb[67].mxu0  ;;  %v14160_v54 = vpop.f32.mrb[33].mxu1  ;;  %v10717_v23 = vld [vmem:[%s21818_s7 + $0x9f8] sm:$0xff]  ;;  %v10796_v63 = vld [vmem:[%s21819_s8 + $0xaf0] sm:$0xff]  ;;  %v16560_v46 = vpack.c.bf16 %v10747_v48, %v10746_v29  ;;  %v16680_v18 = vpack.c.bf16 %v10827_v49, %v10826_v11 }
 0x718   :  { %16510 = vmatpush3.bf16.msra.mxu0 %v16509_v31  ;;  %16630 = vmatpush3.bf16.msra.mxu1 %v16629_v43  ;;  %v16515_v10 = vpack.c.bf16 %v10717_v23, %v10716_v15  ;;  %v16635_v26 = vpack.c.bf16 %v10797_v8, %v10796_v63  ;;  %v10748_v51 = vld [vmem:[%s21818_s7 + $0xa70] sm:$0xff]  ;;  %v10829_v54 = vld [vmem:[%s21819_s8 + $0xb78] sm:$0xff]  ;;  %v10766_v15 = vld [vmem:[%s21818_s7 + $0xa80] sm:$0xff] }
 0x719   :  { %16511 = vmatprep.subr.bf16.mxu0 %v16917_v12  ;;  %16631 = vmatprep.subr.bf16.mxu1 %v16917_v12  ;;  %v10767_v23 = vld [vmem:[%s21818_s7 + $0xa88] sm:$0xff]  ;;  %v10846_v63 = vld [vmem:[%s21819_s8 + $0xb80] sm:$0xff] }
 0x71a   :  { %v10847_v8 = vld [vmem:[%s21819_s8 + $0xb88] sm:$0xff] }
 0x71c   :  { %16513 = vmatpush3.bf16.msra.mxu0 %v16512_v30  ;;  %16633 = vmatpush3.bf16.msra.mxu1 %v16632_v36 }
 0x71d   :  { %16514 = vmatprep.subr.bf16.mxu0 %v16917_v12  ;;  %16634 = vmatprep.subr.bf16.mxu1 %v16917_v12 }
 0x720   :  { %16516 = vmatpush3.bf16.msra.mxu0 %v16515_v10  ;;  %16636 = vmatpush3.bf16.msra.mxu1 %v16635_v26  ;;  %v16590_v10 = vpack.c.bf16 %v10767_v23, %v10766_v15  ;;  %v16710_v26 = vpack.c.bf16 %v10847_v8, %v10846_v63  ;;  %v10800_v15 = vld [vmem:[%s21818_s7 + $0xb10] sm:$0xff]  ;;  %v10801_v23 = vld [vmem:[%s21818_s7 + $0xb18] sm:$0xff] }
 0x721   :  { %16541 = vmatprep.subr.bf16.mxu0 %v16917_v12  ;;  %16661 = vmatprep.subr.bf16.mxu1 %v16917_v12  ;;  %v10880_v63 = vld [vmem:[%s21819_s8 + $0xc10] sm:$0xff]  ;;  %v10881_v8 = vld [vmem:[%s21819_s8 + $0xc18] sm:$0xff] }
 0x723   :  { %14474 = vmatmul.mubr.f32.vlgmr.msra.gmra.mrb[80].mxu0 %v21068_v59  ;;  %14649 = vmatmul.mubr.f32.vlgmr.msra.gmra.mrb[46].mxu1 %v21320_v20  ;;  %v10818_v59 = vld [vmem:[%s21819_s8 + $0xb20] sm:$0xff] }
 0x724   :  { %16543 = vmatpush3.bf16.msra.mxu0 %v16542_v34  ;;  %16663 = vmatpush3.bf16.msra.mxu1 %v16662_v61  ;;  %v16668_v3 = vpack.c.bf16 %v10819_v57, %v10818_v59  ;;  %v21446_v34 = vld [vmem:[#allocation3 + $0x2c] sm:$0x3]  ;;  %v16593_v61 = vpack.c.bf16 %v10769_v33, %v10768_v5  ;;  %v10852_v59 = vld [vmem:[%s21819_s8 + $0xbb0] sm:$0xff]  ;;  %v16761_v5 = vpack.c.bf16 %v10881_v8, %v10880_v63  ;;  %v10802_v33 = vld [vmem:[%s21818_s7 + $0xb20] sm:$0xff] }
 0x725   :  { %16544 = vmatprep.subr.bf16.mxu0 %v16917_v12  ;;  %16664 = vmatprep.subr.bf16.mxu1 %v16917_v12  ;;  %v10853_v57 = vld [vmem:[%s21819_s8 + $0xbb8] sm:$0xff]  ;;  %v10840_v8 = vld [vmem:[%s21818_s7 + $0xbd0] sm:$0xff] }
 0x726   :  { %14543 = vmatprep.mubr.msk.f32.mxu0 %vm16918_vm3, %v16919_v60  ;;  %14718 = vmatprep.mubr.msk.f32.mxu1 %vm16918_vm3, %v16919_v60 }
 0x728   :  { %16546 = vmatpush3.bf16.msra.mxu0 %v16545_v4  ;;  %16666 = vmatpush3.bf16.msra.mxu1 %v16665_v38  ;;  %v16596_v4 = vpack.c.bf16 %v10771_v0, %v10770_v52  ;;  %v10804_v52 = vld [vmem:[%s21818_s7 + $0xb30] sm:$0xff]  ;;  %v10805_v0 = vld [vmem:[%s21818_s7 + $0xb38] sm:$0xff] }
 0x729   :  { %16547 = vmatprep.subr.bf16.mxu0 %v16917_v12  ;;  %16667 = vmatprep.subr.bf16.mxu1 %v16917_v12 }
 0x72c   :  { %16549 = vmatpush3.bf16.msra.mxu0 %v16548_v35  ;;  %16669 = vmatpush3.bf16.msra.mxu1 %v16668_v3  ;;  %v16599_v35 = vpack.c.bf16 %v10773_v42, %v10772_v56  ;;  %v16719_v3 = vpack.c.bf16 %v10853_v57, %v10852_v59  ;;  %v10806_v56 = vld [vmem:[%s21818_s7 + $0xb40] sm:$0xff]  ;;  %v10807_v42 = vld [vmem:[%s21818_s7 + $0xb48] sm:$0xff] }
 0x72d   :  { %16550 = vmatprep.subr.bf16.mxu0 %v16917_v12  ;;  %16670 = vmatprep.subr.bf16.mxu1 %v16917_v12  ;;  %v10886_v59 = vld [vmem:[%s21819_s8 + $0xc40] sm:$0xff]  ;;  %v10887_v57 = vld [vmem:[%s21819_s8 + $0xc48] sm:$0xff] }
 0x730   :  { %16552 = vmatpush3.bf16.msra.mxu0 %v16551_v58  ;;  %16672 = vmatpush3.bf16.msra.mxu1 %v16671_v7  ;;  %v16602_v58 = vpack.c.bf16 %v10775_v14, %v10774_v40  ;;  %v16722_v7 = vpack.c.bf16 %v10855_v50, %v10854_v28  ;;  %v10808_v40 = vld [vmem:[%s21818_s7 + $0xb50] sm:$0xff]  ;;  %v10809_v14 = vld [vmem:[%s21818_s7 + $0xb58] sm:$0xff] }
 0x731   :  { %16553 = vmatprep.subr.bf16.mxu0 %v16917_v12  ;;  %16673 = vmatprep.subr.bf16.mxu1 %v16917_v12  ;;  %v10888_v28 = vld [vmem:[%s21819_s8 + $0xc50] sm:$0xff]  ;;  %v10889_v50 = vld [vmem:[%s21819_s8 + $0xc58] sm:$0xff] }
 0x734   :  { %16555 = vmatpush3.bf16.msra.mxu0 %v16554_v1  ;;  %16675 = vmatpush3.bf16.msra.mxu1 %v16674_v55  ;;  %v16605_v1 = vpack.c.bf16 %v10777_v62, %v10776_v16  ;;  %v16725_v55 = vpack.c.bf16 %v10857_v6, %v10856_v37  ;;  %v10810_v16 = vld [vmem:[%s21818_s7 + $0xb60] sm:$0xff]  ;;  %v10811_v62 = vld [vmem:[%s21818_s7 + $0xb68] sm:$0xff] }
 0x735   :  { %16556 = vmatprep.subr.bf16.mxu0 %v16917_v12  ;;  %16676 = vmatprep.subr.bf16.mxu1 %v16917_v12  ;;  %v10890_v37 = vld [vmem:[%s21819_s8 + $0xc60] sm:$0xff]  ;;  %v10891_v6 = vld [vmem:[%s21819_s8 + $0xc68] sm:$0xff] }
 0x736   :  { %v7597_v31 = vpop.f32.mrb[68].mxu0  ;;  %v8039_v43 = vpop.f32.mrb[34].mxu1 }
 0x737   :  { %v21399_v2 = vadd.f32 %v7597_v31, %v21273_v25  ;;  %v21402_v32 = vadd.f32 %v8039_v43, %v21276_v27  ;;  %v14055_v13 = vpop.f32.mrb[69].mxu0  ;;  %v14230_v41 = vpop.f32.mrb[35].mxu1  ;;  %v10749_v25 = vld [vmem:[%s21818_s7 + $0xa78] sm:$0xff]  ;;  %v10828_v27 = vld [vmem:[%s21819_s8 + $0xb70] sm:$0xff]  ;;  %v16608_v31 = vpack.c.bf16 %v10779_v22, %v10778_v44  ;;  %v16728_v43 = vpack.c.bf16 %v10859_v9, %v10858_v53 }
 0x738   :  { %16558 = vmatpush3.bf16.msra.mxu0 %v16557_v21  ;;  %16678 = vmatpush3.bf16.msra.mxu1 %v16677_v17  ;;  %v16563_v30 = vpack.c.bf16 %v10749_v25, %v10748_v51  ;;  %v16683_v36 = vpack.c.bf16 %v10829_v54, %v10828_v27  ;;  %v10780_v13 = vld [vmem:[%s21818_s7 + $0xaf0] sm:$0xff]  ;;  %v10861_v41 = vld [vmem:[%s21819_s8 + $0xbf8] sm:$0xff]  ;;  %v10798_v51 = vld [vmem:[%s21818_s7 + $0xb00] sm:$0xff] }
 0x739   :  { %16559 = vmatprep.subr.bf16.mxu0 %v16917_v12  ;;  %16679 = vmatprep.subr.bf16.mxu1 %v16917_v12  ;;  %v10799_v25 = vld [vmem:[%s21818_s7 + $0xb08] sm:$0xff]  ;;  %v10878_v27 = vld [vmem:[%s21819_s8 + $0xc00] sm:$0xff] }
 0x73a   :  { %v10879_v54 = vld [vmem:[%s21819_s8 + $0xc08] sm:$0xff] }
 0x73c   :  { %16561 = vmatpush3.bf16.msra.mxu0 %v16560_v46  ;;  %16681 = vmatpush3.bf16.msra.mxu1 %v16680_v18 }
 0x73d   :  { %16562 = vmatprep.subr.bf16.mxu0 %v16917_v12  ;;  %16682 = vmatprep.subr.bf16.mxu1 %v16917_v12 }
 0x740   :  { %16564 = vmatpush3.bf16.msra.mxu0 %v16563_v30  ;;  %16684 = vmatpush3.bf16.msra.mxu1 %v16683_v36  ;;  %v16638_v30 = vpack.c.bf16 %v10799_v25, %v10798_v51  ;;  %v16758_v36 = vpack.c.bf16 %v10879_v54, %v10878_v27  ;;  %v10834_v25 = vld [vmem:[%s21818_s7 + $0xba0] sm:$0xff]  ;;  %v10835_v27 = vld [vmem:[%s21818_s7 + $0xba8] sm:$0xff] }
 0x741   :  { %16589 = vmatprep.subr.bf16.mxu0 %v16917_v12  ;;  %16709 = vmatprep.subr.bf16.mxu1 %v16917_v12  ;;  %v16692_v54 = vpack.c.bf16 %v10835_v27, %v10834_v25 }
 0x743   :  { %14544 = vmatmul.mubr.f32.vlgmr.msra.gmra.mrb[82].mxu0 %v21194_v24  ;;  %14719 = vmatmul.mubr.f32.vlgmr.msra.gmra.mrb[48].mxu1 %v21446_v34  ;;  %v10850_v24 = vld [vmem:[%s21819_s8 + $0xba0] sm:$0xff] }
 0x744   :  { %16591 = vmatpush3.bf16.msra.mxu0 %v16590_v10  ;;  %16711 = vmatpush3.bf16.msra.mxu1 %v16710_v26  ;;  %v16716_v38 = vpack.c.bf16 %v10851_v19, %v10850_v24  ;;  %v21572_v10 = vld [vmem:[#allocation3 + $0x2e] sm:$0x3]  ;;  %v16641_v26 = vpack.c.bf16 %v10801_v23, %v10800_v15  ;;  %v10884_v24 = vld [vmem:[%s21819_s8 + $0xc30] sm:$0xff]  ;;  %v10838_v15 = vld [vmem:[%s21818_s7 + $0xbc0] sm:$0xff] }
 0x745   :  { %16592 = vmatprep.subr.bf16.mxu0 %v16917_v12  ;;  %16712 = vmatprep.subr.bf16.mxu1 %v16917_v12  ;;  %v10885_v19 = vld [vmem:[%s21819_s8 + $0xc38] sm:$0xff]  ;;  %v10839_v23 = vld [vmem:[%s21818_s7 + $0xbc8] sm:$0xff] }
 0x746   :  { %14613 = vmatprep.mubr.msk.f32.mxu0 %vm16918_vm3, %v16919_v60  ;;  %14788 = vmatprep.mubr.msk.f32.mxu1 %vm16918_vm3, %v16919_v60  ;;  %v16698_v63 = vpack.c.bf16 %v10839_v23, %v10838_v15 }
 0x748   :  { %16594 = vmatpush3.bf16.msra.mxu0 %v16593_v61  ;;  %16714 = vmatpush3.bf16.msra.mxu1 %v16713_v45  ;;  %v16644_v61 = vpack.c.bf16 %v10803_v47, %v10802_v33  ;;  %v10842_v33 = vld [vmem:[%s21818_s7 + $0xbe0] sm:$0xff]  ;;  %v10843_v47 = vld [vmem:[%s21818_s7 + $0xbe8] sm:$0xff] }
 0x749   :  { %16595 = vmatprep.subr.bf16.mxu0 %v16917_v12  ;;  %16715 = vmatprep.subr.bf16.mxu1 %v16917_v12 }
 0x74c   :  { %16597 = vmatpush3.bf16.msra.mxu0 %v16596_v4  ;;  %16717 = vmatpush3.bf16.msra.mxu1 %v16716_v38  ;;  %v16647_v4 = vpack.c.bf16 %v10805_v0, %v10804_v52  ;;  %v16767_v38 = vpack.c.bf16 %v10885_v19, %v10884_v24  ;;  %v16704_v24 = vpack.c.bf16 %v10843_v47, %v10842_v33  ;;  %v10844_v19 = vld [vmem:[%s21818_s7 + $0xbf0] sm:$0xff] }
 0x74d   :  { %16598 = vmatprep.subr.bf16.mxu0 %v16917_v12  ;;  %16718 = vmatprep.subr.bf16.mxu1 %v16917_v12 }
 0x750   :  { %16600 = vmatpush3.bf16.msra.mxu0 %v16599_v35  ;;  %16720 = vmatpush3.bf16.msra.mxu1 %v16719_v3  ;;  %v16650_v35 = vpack.c.bf16 %v10807_v42, %v10806_v56  ;;  %v16770_v3 = vpack.c.bf16 %v10887_v57, %v10886_v59  ;;  %v10862_v56 = vld [vmem:[%s21818_s7 + $0xc00] sm:$0xff]  ;;  %v10863_v42 = vld [vmem:[%s21818_s7 + $0xc08] sm:$0xff]  ;;  %v10864_v57 = vld [vmem:[%s21818_s7 + $0xc10] sm:$0xff] }
 0x751   :  { %16601 = vmatprep.subr.bf16.mxu0 %v16917_v12  ;;  %16721 = vmatprep.subr.bf16.mxu1 %v16917_v12  ;;  %v16734_v59 = vpack.c.bf16 %v10863_v42, %v10862_v56 }
 0x754   :  { %16603 = vmatpush3.bf16.msra.mxu0 %v16602_v58  ;;  %16723 = vmatpush3.bf16.msra.mxu1 %v16722_v7  ;;  %v16653_v58 = vpack.c.bf16 %v10809_v14, %v10808_v40  ;;  %v16773_v7 = vpack.c.bf16 %v10889_v50, %v10888_v28  ;;  %v10866_v40 = vld [vmem:[%s21818_s7 + $0xc20] sm:$0xff]  ;;  %v10867_v14 = vld [vmem:[%s21818_s7 + $0xc28] sm:$0xff] }
 0x755   :  { %16604 = vmatprep.subr.bf16.mxu0 %v16917_v12  ;;  %16724 = vmatprep.subr.bf16.mxu1 %v16917_v12  ;;  %v16740_v28 = vpack.c.bf16 %v10867_v14, %v10866_v40 }
 0x756   :  { %v7774_v21 = vpop.f32.mrb[70].mxu0  ;;  %v8216_v17 = vpop.f32.mrb[36].mxu1 }
 0x757   :  { %v21525_v29 = vadd.f32 %v7774_v21, %v21399_v2  ;;  %v21528_v48 = vadd.f32 %v8216_v17, %v21402_v32  ;;  %v14125_v11 = vpop.f32.mrb[71].mxu0  ;;  %v14300_v49 = vpop.f32.mrb[37].mxu1  ;;  %v10781_v2 = vld [vmem:[%s21818_s7 + $0xaf8] sm:$0xff]  ;;  %v10860_v32 = vld [vmem:[%s21819_s8 + $0xbf0] sm:$0xff]  ;;  %v16656_v21 = vpack.c.bf16 %v10811_v62, %v10810_v16  ;;  %v16776_v17 = vpack.c.bf16 %v10891_v6, %v10890_v37 }
 0x758   :  { %16606 = vmatpush3.bf16.msra.mxu0 %v16605_v1  ;;  %16726 = vmatpush3.bf16.msra.mxu1 %v16725_v55  ;;  %v16611_v46 = vpack.c.bf16 %v10781_v2, %v10780_v13  ;;  %v16731_v18 = vpack.c.bf16 %v10861_v41, %v10860_v32  ;;  %v10812_v11 = vld [vmem:[%s21818_s7 + $0xb70] sm:$0xff]  ;;  %v10893_v49 = vld [vmem:[%s21819_s8 + $0xc78] sm:$0xff]  ;;  %v10830_v13 = vld [vmem:[%s21818_s7 + $0xb80] sm:$0xff] }
 0x759   :  { %16607 = vmatprep.subr.bf16.mxu0 %v16917_v12  ;;  %16727 = vmatprep.subr.bf16.mxu1 %v16917_v12  ;;  %v10831_v2 = vld [vmem:[%s21818_s7 + $0xb88] sm:$0xff]  ;;  %v10832_v41 = vld [vmem:[%s21818_s7 + $0xb90] sm:$0xff]  ;;  %v10873_v37 = vld [vmem:[%s21818_s7 + $0xc58] sm:$0xff] }
 0x75a   :  { %v16686_v32 = vpack.c.bf16 %v10831_v2, %v10830_v13  ;;  %v10872_v62 = vld [vmem:[%s21818_s7 + $0xc50] sm:$0xff] }
 0x75b   :  { %v16749_v6 = vpack.c.bf16 %v10873_v37, %v10872_v62 }
 0x75c   :  { %16609 = vmatpush3.bf16.msra.mxu0 %v16608_v31  ;;  %16729 = vmatpush3.bf16.msra.mxu1 %v16728_v43 }
 0x75d   :  { %16610 = vmatprep.subr.bf16.mxu0 %v16917_v12  ;;  %16730 = vmatprep.subr.bf16.mxu1 %v16917_v12 }
 0x760   :  { %16612 = vmatpush3.bf16.msra.mxu0 %v16611_v46  ;;  %16732 = vmatpush3.bf16.msra.mxu1 %v16731_v18  ;;  %v10833_v46 = vld [vmem:[%s21818_s7 + $0xb98] sm:$0xff]  ;;  %v21681_v18 = vld [vmem:[#allocation3 + $0x30] sm:$0x3] }
 0x761   :  { %16637 = vmatprep.subr.bf16.mxu0 %v16917_v12  ;;  %16757 = vmatprep.subr.bf16.mxu1 %v16917_v12  ;;  %v16689_v51 = vpack.c.bf16 %v10833_v46, %v10832_v41 }
 0x763   :  { %14614 = vmatmul.mubr.f32.vlgmr.msra.gmra.mrb[84].mxu0 %v21320_v20  ;;  %14789 = vmatmul.mubr.f32.vlgmr.msra.gmra.mrb[50].mxu1 %v21572_v10  ;;  %v10882_v20 = vld [vmem:[%s21819_s8 + $0xc20] sm:$0xff] }
 0x764   :  { %16639 = vmatpush3.bf16.msra.mxu0 %v16638_v30  ;;  %16759 = vmatpush3.bf16.msra.mxu1 %v16758_v36  ;;  %v16764_v45 = vpack.c.bf16 %v10883_v39, %v10882_v20  ;;  %v10837_v30 = vld [vmem:[%s21818_s7 + $0xbb8] sm:$0xff] }
 0x765   :  { %16640 = vmatprep.subr.bf16.mxu0 %v16917_v12  ;;  %16760 = vmatprep.subr.bf16.mxu1 %v16917_v12 }
 0x766   :  { %14683 = vmatprep.mubr.msk.f32.mxu0 %vm16918_vm3, %v16919_v60  ;;  %14858 = vmatprep.mubr.msk.f32.mxu1 %vm16918_vm3, %v16919_v60 }
 0x768   :  { %16642 = vmatpush3.bf16.msra.mxu0 %v16641_v26  ;;  %16762 = vmatpush3.bf16.msra.mxu1 %v16761_v5  ;;  %v10841_v26 = vld [vmem:[%s21818_s7 + $0xbd8] sm:$0xff] }
 0x769   :  { %16643 = vmatprep.subr.bf16.mxu0 %v16917_v12  ;;  %16763 = vmatprep.subr.bf16.mxu1 %v16917_v12  ;;  %v16701_v5 = vpack.c.bf16 %v10841_v26, %v10840_v8 }
 0x76c   :  { %16645 = vmatpush3.bf16.msra.mxu0 %v16644_v61  ;;  %16765 = vmatpush3.bf16.msra.mxu1 %v16764_v45 }
 0x76d   :  { %16646 = vmatprep.subr.bf16.mxu0 %v16917_v12  ;;  %16766 = vmatprep.subr.bf16.mxu1 %v16917_v12 }
 0x770   :  { %16648 = vmatpush3.bf16.msra.mxu0 %v16647_v4  ;;  %16768 = vmatpush3.bf16.msra.mxu1 %v16767_v38  ;;  %v10845_v4 = vld [vmem:[%s21818_s7 + $0xbf8] sm:$0xff] }
 0x771   :  { %16649 = vmatprep.subr.bf16.mxu0 %v16917_v12  ;;  %16769 = vmatprep.subr.bf16.mxu1 %v16917_v12  ;;  %v16707_v38 = vpack.c.bf16 %v10845_v4, %v10844_v19 }
 0x774   :  { %16651 = vmatpush3.bf16.msra.mxu0 %v16650_v35  ;;  %16771 = vmatpush3.bf16.msra.mxu1 %v16770_v3  ;;  %v10865_v35 = vld [vmem:[%s21818_s7 + $0xc18] sm:$0xff] }
 0x775   :  { %16652 = vmatprep.subr.bf16.mxu0 %v16917_v12  ;;  %16772 = vmatprep.subr.bf16.mxu1 %v16917_v12  ;;  %v16737_v3 = vpack.c.bf16 %v10865_v35, %v10864_v57  ;;  %v10894_v35 = vld [vmem:[%s21820_s9] ss:$0 sm:$0xff] }
 0x776   :  { %v7951_v1 = vpop.f32.mrb[72].mxu0  ;;  %v8393_v55 = vpop.f32.mrb[38].mxu1 }
 0x777   :  { %v7955_v44 = vadd.f32 %v7951_v1, %v21525_v29  ;;  %v8397_v22 = vadd.f32 %v8393_v55, %v21528_v48  ;;  %v14195_v53 = vpop.f32.mrb[73].mxu0  ;;  %v14370_v9 = vpop.f32.mrb[39].mxu1  ;;  %v10813_v29 = vld [vmem:[%s21818_s7 + $0xb78] sm:$0xff]  ;;  %v10892_v48 = vld [vmem:[%s21819_s8 + $0xc70] sm:$0xff]  ;;  %v10874_v1 = vld [vmem:[%s21818_s7 + $0xc60] sm:$0xff] }
 0x778   :  { %16654 = vmatpush3.bf16.msra.mxu0 %v16653_v58  ;;  %16774 = vmatpush3.bf16.msra.mxu1 %v16773_v7  ;;  %v16659_v31 = vpack.c.bf16 %v10813_v29, %v10812_v11  ;;  %v16779_v43 = vpack.c.bf16 %v10893_v49, %v10892_v48  ;;  %v10870_v58 = vld [vmem:[%s21818_s7 + $0xc40] sm:$0xff]  ;;  %v10871_v7 = vld [vmem:[%s21818_s7 + $0xc48] sm:$0xff]  ;;  %v10876_v29 = vld [vmem:[%s21818_s7 + $0xc70] sm:$0xff] }
 0x779   :  { %16655 = vmatprep.subr.bf16.mxu0 %v16917_v12  ;;  %16775 = vmatprep.subr.bf16.mxu1 %v16917_v12  ;;  %v16746_v16 = vpack.c.bf16 %v10871_v7, %v10870_v58  ;;  %v10875_v55 = vld [vmem:[%s21818_s7 + $0xc68] sm:$0xff]  ;;  %v10877_v48 = vld [vmem:[%s21818_s7 + $0xc78] sm:$0xff] }
 0x77a   :  { %v16752_v11 = vpack.c.bf16 %v10875_v55, %v10874_v1  ;;  %v16755_v49 = vpack.c.bf16 %v10877_v48, %v10876_v29 }
 0x77c   :  { %16657 = vmatpush3.bf16.msra.mxu0 %v16656_v21  ;;  %16777 = vmatpush3.bf16.msra.mxu1 %v16776_v17 }
 0x77d   :  { %16658 = vmatprep.subr.bf16.mxu0 %v16917_v12  ;;  %16778 = vmatprep.subr.bf16.mxu1 %v16917_v12 }
 0x780   :  { %16660 = vmatpush3.bf16.msra.mxu0 %v16659_v31  ;;  %16780 = vmatpush3.bf16.msra.mxu1 %v16779_v43 }
 0x781   :  { %16685 = vmatprep.subr.bf16.mxu0 %v16917_v12 }
 0x783   :  { %14684 = vmatmul.mubr.f32.vlgmr.msra.gmra.mrb[86].mxu0 %v21446_v34  ;;  %14859 = vmatmul.mubr.f32.vlgmr.msra.gmra.mrb[52].mxu1 %v21681_v18  ;;  %v10836_v34 = vld [vmem:[%s21818_s7 + $0xbb0] sm:$0xff] }
 0x784   :  { %16687 = vmatpush3.bf16.msra.mxu0 %v16686_v32  ;;  %14753 = vmatprep.mubr.msk.f32.mxu0 %vm16918_vm3, %v16919_v60  ;;  %v16695_v36 = vpack.c.bf16 %v10837_v30, %v10836_v34 }
 0x785   :  { %16688 = vmatprep.subr.bf16.mxu0 %v16917_v12 }
 0x788   :  { %16690 = vmatpush3.bf16.msra.mxu0 %v16689_v51 }
 0x789   :  { %16691 = vmatprep.subr.bf16.mxu0 %v16917_v12 }
 0x78c   :  { %16693 = vmatpush3.bf16.msra.mxu0 %v16692_v54 }
 0x78d   :  { %16694 = vmatprep.subr.bf16.mxu0 %v16917_v12 }
 0x790   :  { %16696 = vmatpush3.bf16.msra.mxu0 %v16695_v36 }
 0x791   :  { %16697 = vmatprep.subr.bf16.mxu0 %v16917_v12 }
 0x794   :  { %16699 = vmatpush3.bf16.msra.mxu0 %v16698_v63 }
 0x795   :  { %16700 = vmatprep.subr.bf16.mxu0 %v16917_v12 }
 0x796   :  { %v8128_v20 = vpop.f32.mrb[74].mxu0  ;;  %v8570_v39 = vpop.f32.mrb[40].mxu1 }
 0x797   :  { %v8132_v61 = vadd.f32 %v8128_v20, %v7955_v44  ;;  %v8574_v45 = vadd.f32 %v8570_v39, %v8397_v22  ;;  %v14265_v52 = vpop.f32.mrb[75].mxu0  ;;  %v14440_v0 = vpop.f32.mrb[41].mxu1 }
 0x798   :  { %16702 = vmatpush3.bf16.msra.mxu0 %v16701_v5 }
 0x799   :  { %16703 = vmatprep.subr.bf16.mxu0 %v16917_v12 }
 0x79c   :  { %16705 = vmatpush3.bf16.msra.mxu0 %v16704_v24 }
 0x79d   :  { %16706 = vmatprep.subr.bf16.mxu0 %v16917_v12 }
 0x7a0   :  { %16708 = vmatpush3.bf16.msra.mxu0 %v16707_v38  ;;  %v10895_v38 = vld [vmem:[%s21821_s10] ss:$0 sm:$0xff]  ;;  %s16892_s10 = scalar_lea.vmem %s9667_s19, 32 }
 0x7a1   :  { %16733 = vmatprep.subr.bf16.mxu0 %v16917_v12  ;;  %p16893_p0 = scmp.ne.s32.totalorder %s9667_s19, %s16892_s10  ;;  %p16898_p2 = scmp.lt.s32.totalorder %s16892_s10, %s16892_s10 }
 0x7a3   :  { %14754 = vmatmul.mubr.f32.vlgmr.msra.gmra.mrb[88].mxu0 %v21572_v10  ;;  %v10868_v10 = vld [vmem:[%s21818_s7 + $0xc30] sm:$0xff]  ;;  %p16899_p3 = por %p16898_p2, %p16897_p1 }
 0x7a4   :  { %16735 = vmatpush3.bf16.msra.mxu0 %v16734_v59  ;;  %14823 = vmatprep.mubr.msk.f32.mxu0 %vm16918_vm3, %v16919_v60  ;;  %v10869_v60 = vld [vmem:[%s21818_s7 + $0xc38] sm:$0xff] }
 0x7a5   :  { %16736 = vmatprep.subr.bf16.mxu0 %v16917_v12  ;;  %v16743_v50 = vpack.c.bf16 %v10869_v60, %v10868_v10  ;;  %p16900_p4 = pnand %p16899_p3, %p16893_p0 }
 0x7a8   :  { %16738 = vmatpush3.bf16.msra.mxu0 %v16737_v3  ;;  %v9653_v3 = vld [vmem:[%s21822_s11] sm:$0x3] }
 0x7a9   :  { %16739 = vmatprep.subr.bf16.mxu0 %v16917_v12 }
 0x7ac   :  { %16741 = vmatpush3.bf16.msra.mxu0 %v16740_v28 }
 0x7ad   :  { %16742 = vmatprep.subr.bf16.mxu0 %v16917_v12 }
 0x7b0   :  { %16744 = vmatpush3.bf16.msra.mxu0 %v16743_v50 }
 0x7b1   :  { %16745 = vmatprep.subr.bf16.mxu0 %v16917_v12 }
 0x7b4   :  { %16747 = vmatpush3.bf16.msra.mxu0 %v16746_v16 }
 0x7b5   :  { %16748 = vmatprep.subr.bf16.mxu0 %v16917_v12 }
 0x7b6   :  { %v8305_v44 = vpop.f32.mrb[76].mxu0  ;;  %v8747_v22 = vpop.f32.mrb[42].mxu1 }
 0x7b7   :  { %v8309_v53 = vadd.f32 %v8305_v44, %v8132_v61  ;;  %v8751_v9 = vadd.f32 %v8747_v22, %v8574_v45  ;;  %v14335_v21 = vpop.f32.mrb[77].mxu0  ;;  %v14510_v17 = vpop.f32.mrb[43].mxu1 }
 0x7b8   :  { %16750 = vmatpush3.bf16.msra.mxu0 %v16749_v6 }
 0x7b9   :  { %16751 = vmatprep.subr.bf16.mxu0 %v16917_v12 }
 0x7bc   :  { %16753 = vmatpush3.bf16.msra.mxu0 %v16752_v11 }
 0x7bd   :  { %16754 = vmatprep.subr.bf16.mxu0 %v16917_v12 }
 0x7c0   :  { %16756 = vmatpush3.bf16.msra.mxu0 %v16755_v49 }
 0x7c3   :  { %14824 = vmatmul.mubr.f32.vlgmr.msra.gmra.mrb[90].mxu0 %v21681_v18 }
 0x7d6   :  { %v8482_v31 = vpop.f32.mrb[78].mxu0  ;;  %v8924_v43 = vpop.f32.mrb[44].mxu1 }
 0x7d7   :  { %v8486_v13 = vadd.f32 %v8482_v31, %v8309_v53  ;;  %v8928_v2 = vadd.f32 %v8924_v43, %v8751_v9  ;;  %v14405_v32 = vpop.f32.mrb[79].mxu0  ;;  %v14580_v41 = vpop.f32.mrb[45].mxu1 }
 0x7f6   :  { %v8659_v46 = vpop.f32.mrb[80].mxu0  ;;  %v9101_v51 = vpop.f32.mrb[46].mxu1 }
 0x7f7   :  { %v8663_v25 = vadd.f32 %v8659_v46, %v8486_v13  ;;  %v9105_v27 = vadd.f32 %v9101_v51, %v8928_v2  ;;  %v14475_v54 = vpop.f32.mrb[81].mxu0  ;;  %v14650_v34 = vpop.f32.mrb[47].mxu1 }
 0x816   :  { %v8836_v30 = vpop.f32.mrb[82].mxu0  ;;  %v9278_v36 = vpop.f32.mrb[48].mxu1 }
 0x817   :  { %v8840_v15 = vadd.f32 %v8836_v30, %v8663_v25  ;;  %v9282_v23 = vadd.f32 %v9278_v36, %v9105_v27  ;;  %v14545_v12 = vpop.f32.mrb[83].mxu0  ;;  %v14720_v63 = vpop.f32.mrb[49].mxu1 }
 0x836   :  { %v9013_v8 = vpop.f32.mrb[84].mxu0  ;;  %v9455_v18 = vpop.f32.mrb[50].mxu1 }
 0x837   :  { %v9017_v26 = vadd.f32 %v9013_v8, %v8840_v15  ;;  %v9459_v5 = vadd.f32 %v9455_v18, %v9282_v23  ;;  %v14615_v33 = vpop.f32.mrb[85].mxu0  ;;  %v14790_v47 = vpop.f32.mrb[51].mxu1 }
 0x856   :  { %v9190_v20 = vpop.f32.mrb[86].mxu0  ;;  %v9632_v39 = vpop.f32.mrb[52].mxu1 }
 0x857   :  { %v9194_v61 = vadd.f32 %v9190_v20, %v9017_v26  ;;  %v9636_v45 = vadd.f32 %v9632_v39, %v9459_v5  ;;  %v14685_v52 = vpop.f32.mrb[87].mxu0  ;;  %v14860_v0 = vpop.f32.mrb[53].mxu1 }
 0x859   :  { %v9652_v56 = vadd.f32 %v10895_v38, %v9636_v45 }
 0x85b   :  { %v9654_v42 = vmul.f32 1.442695, %v9652_v56 }
 0x85d   :  { %16890 = vpow2.f32 %v9654_v42 }
 0x867   :  { %v16891_v59 = vpop.eup %16890 }
 0x868   :  { %v9656_v10 = vmul.f32 %v16891_v59, %v9653_v3 }
 0x876   :  { %v9367_v24 = vpop.f32.mrb[88].mxu0 }
 0x877   :  { %v9371_v19 = vadd.f32 %v9367_v24, %v9194_v61  ;;  %v14755_v4 = vpop.f32.mrb[89].mxu0 }
 0x896   :  { %v9544_v57 = vpop.f32.mrb[90].mxu0 }
 0x897   :  { %v9548_v40 = vadd.f32 %v9544_v57, %v9371_v19  ;;  %v14825_v14 = vpop.f32.mrb[91].mxu0 }
 0x899   :  { %v9644_v28 = vadd.f32 %v10894_v35, %v9548_v40 }
 0x89b   :  { %v9657_v60 = vadd.f32 %v9656_v10, %v9644_v28 }
 0x89d   :  { %9659 = vst.msk [vmem:[#allocation4] sm:$0x3] %vm9658_vm13, %v9657_v60 }
 0x89e   :  { %16903 = shalt.err (!%p16900_p4)
}
 0x89f   :  { %s16904_s11 = scalar_lea.hbm %s21823_s12, 32 }
 0x8a0   :  { %p16905_p5 = scmp.ne.s32.totalorder %s21823_s12, %s16904_s11  ;;  %p16908_p6 = scmp.lt.u32.totalorder %s16904_s11, %s21823_s12 }
 0x8a2   :  { %p16910_p7 = pnand %p16908_p6, %p16905_p5 }
 0x8a4   :  { %16913 = shalt.err (!%p16910_p7)
}
 0x8a5   :  { %9669 = dma.vmem_to_hbm [thread:$0]  %s9667_s19, 32, %s21823_s12, [#allocation5]  }
 0x8a6   :  { %16914 = dma.done.wait [#allocation5], 32  }
 0x8a7   :  { %16915 = vsyncadd [#allocation5], 4294967264 }
 0x8a8   :  { %9673 = vsyncpa [#allocation5], 1 }

</bundles_post_ra>
